<compile_context>
chip_gen: v7x
topology: tpu7x:2x2x1
jax: 0.10.0
libtpu: 0.0.40
codegen_flags: <defaults>
</compile_context>

<pallas_src>
import jax
import jax.numpy as jnp
from jax.experimental import pallas as pl
from jax.experimental.pallas import tpu as pltpu


def _make_fused_kernel(B_blk, H, W, KH, KW, compute_dtype):
    """Fused kernel: in-VMEM wrap halo + im2col concat + ONE MXU dot."""
    ph, pw = KH // 2, KW // 2
    M = B_blk * H * W

    def kernel(x_ref, w_ref, shift_ref, o_ref):
        # x_ref:     (B_blk, H, W, Cin)      unpadded activations (input dtype)
        # w_ref:     (KH*KW*Cin, Cout_pad)   BN-scale-folded weights (compute_dtype)
        # shift_ref: (1, Cout_pad)           folded bias/BN shift (f32)
        # o_ref:     (B_blk*H*W, Cout_pad)   lane-dense output rows
        cin = x_ref.shape[-1]
        x = x_ref[...]
        # Torus halo built in VMEM (circular pad) -- no extra HBM pad pass.
        if pw:
            x = jnp.concatenate([x[:, :, W - pw:, :], x, x[:, :, :pw, :]], axis=2)
        if ph:
            x = jnp.concatenate([x[:, H - ph:, :, :], x, x[:, :ph, :, :]], axis=1)
        # im2col: KH*KW static-slice taps concatenated along channels so the
        # whole conv is a single MXU dot with K = KH*KW*Cin.
        taps = [x[:, kh:kh + H, kw:kw + W, :]
                for kh in range(KH) for kw in range(KW)]
        patches = taps[0] if len(taps) == 1 else jnp.concatenate(taps, axis=-1)
        patches = patches.reshape(M, KH * KW * cin).astype(compute_dtype)
        acc = jnp.dot(patches, w_ref[...], preferred_element_type=jnp.float32)
        o_ref[...] = (acc + shift_ref[...]).astype(o_ref.dtype)

    return kernel


def _make_fallback_kernel(B_blk, H, W, KH, KW, compute_dtype):
    """Conservative kernel (per-tap accumulated dots, wrapper-side wrap pad).

    Only used if the fused kernel fails to lower (older Mosaic without
    unaligned tpu.concatenate support).  Keeps M-blocking / bf16 output /
    lane-dense padded Cout, but re-adds one HBM pad pass.
    """
    M = B_blk * H * W

    def kernel(xp_ref, w_ref, shift_ref, o_ref):
        # xp_ref: (B_blk, H+2ph, W+2pw, Cin) wrap-padded activations
        # w_ref:  (KH*KW, Cin, Cout_pad)
        cin = xp_ref.shape[-1]
        cout = o_ref.shape[-1]
        x = xp_ref[...].astype(compute_dtype)
        acc = jnp.zeros((M, cout), jnp.float32)
        k = 0
        for kh in range(KH):
            for kw in range(KW):
                patch = x[:, kh:kh + H, kw:kw + W, :].reshape(M, cin)
                acc = acc + jnp.dot(patch, w_ref[k],
                                    preferred_element_type=jnp.float32)
                k += 1
        o_ref[...] = (acc + shift_ref[...]).astype(o_ref.dtype)

    return kernel


def _pick_batch_block(B, HW, row_bytes, target_rows=512, vmem_budget=8 << 20):
    """Images per grid step.

    Prefer the smallest divisor of B that (a) keeps >= 2 grid steps when the
    batch allows (v7x: two TensorCores, "parallel" grid axis) and (b) reaches
    ~target_rows MXU rows per step, while keeping the per-step working set
    (double-buffered input/output blocks + in-kernel im2col temporaries) well
    under the v7x scoped-VMEM default.
    """
    divisors = [d for d in range(1, B + 1) if B % d == 0]
    cands = [d for d in divisors if B // d >= 2] or [1]
    cands = [d for d in cands if d * HW * row_bytes <= vmem_budget] or [1]
    for d in cands:
        if d * HW >= target_rows:
            return d
    return cands[-1]


def torus_conv2d_nhwc(x_nhwc, w_oihw, bias, bn_params=None, eps=1e-5,
                      compute_dtype=jnp.bfloat16, out_dtype=None,
                      keep_padded_cout=False):
    """TorusConv2d forward, NHWC in / NHWC out (preferred entry point).

    Multi-layer callers should chain this entry point with bf16 activations
    and keep_padded_cout=True so no layout transposes, dtype up-casts or
    channel slices sit between layers.
    """
    B, H, W, Cin = x_nhwc.shape
    Cout, Cin_w, KH, KW = w_oihw.shape
    assert Cin_w == Cin
    if out_dtype is None:
        out_dtype = compute_dtype
    ph, pw = KH // 2, KW // 2
    HW = H * W

    # ---- fold conv bias + BatchNorm (inference running stats) --------------
    bias = bias.astype(jnp.float32)
    if bn_params is not None:
        gamma, beta, rmean, rvar = (p.astype(jnp.float32) for p in bn_params)
        scale = gamma * jax.lax.rsqrt(rvar + eps)
        shift = beta + scale * (bias - rmean)
    else:
        scale = jnp.ones((Cout,), jnp.float32)
        shift = bias

    # Lane-dense output: pad Cout to a multiple of 128 with zero weight
    # columns and a zero shift => padded channels are exactly 0, so the padded
    # layout can safely be kept between layers (keep_padded_cout=True).
    Cout_pad = ((Cout + 127) // 128) * 128
    w_folded = w_oihw.astype(jnp.float32) * scale[:, None, None, None]
    wk = jnp.transpose(w_folded, (2, 3, 1, 0)).reshape(KH * KW * Cin, Cout)
    wk = jnp.pad(wk, ((0, 0), (0, Cout_pad - Cout))).astype(compute_dtype)
    shift_p = jnp.pad(shift, (0, Cout_pad - Cout)).reshape(1, Cout_pad)
    shift_p = shift_p.astype(jnp.float32)

    # ---- pick the batch block (MXU rows vs. VMEM vs. v7x two-core grid) ----
    row_bytes = (2 * Cin * x_nhwc.dtype.itemsize               # input block (x2 buf)
                 + 2 * Cout_pad * jnp.dtype(out_dtype).itemsize  # output block (x2 buf)
                 + 4 * (2 * KH * KW * Cin + 2 * Cin)             # im2col/halo temps
                 + 4 * Cout_pad)                                 # f32 accumulator
    B_blk = _pick_batch_block(B, HW, row_bytes)
    grid = (B // B_blk,)

    def run(fused):
        if fused:
            kern = _make_fused_kernel(B_blk, H, W, KH, KW, compute_dtype)
            x_in, Hx, Wx, w_in = x_nhwc, H, W, wk
        else:
            kern = _make_fallback_kernel(B_blk, H, W, KH, KW, compute_dtype)
            x_in = jnp.pad(x_nhwc, ((0, 0), (ph, ph), (pw, pw), (0, 0)),
                           mode="wrap")
            Hx, Wx = H + 2 * ph, W + 2 * pw
            w_in = wk.reshape(KH * KW, Cin, Cout_pad)
        w_ndim = w_in.ndim
        return pl.pallas_call(
            kern,
            out_shape=jax.ShapeDtypeStruct((B * HW, Cout_pad), out_dtype),
            grid_spec=pltpu.PrefetchScalarGridSpec(
                num_scalar_prefetch=0,
                grid=grid,
                in_specs=[
                    # B_blk unpadded (or padded, fallback) images per step.
                    pl.BlockSpec((B_blk, Hx, Wx, Cin), lambda b: (b, 0, 0, 0)),
                    # Weights / shift: constant block index -> fetched once,
                    # VMEM-resident across all grid steps.
                    pl.BlockSpec(w_in.shape, lambda b: (0,) * w_ndim),
                    pl.BlockSpec((1, Cout_pad), lambda b: (0, 0)),
                ],
                # Flattened (B*H*W, Cout_pad) output: full-width lane-dense
                # stores, no in-kernel reshape at the store.
                out_specs=pl.BlockSpec((B_blk * HW, Cout_pad), lambda b: (b, 0)),
            ),
            compiler_params=pltpu.CompilerParams(
                dimension_semantics=("parallel",)),
        )(x_in, w_in, shift_p)

    try:
        out = run(fused=True)
    except Exception:
        # TODO(synk): drop this fallback once the minimum-supported Mosaic
        # always lowers unaligned tpu.concatenate; it re-adds one HBM pad pass.
        out = run(fused=False)

    out = out.reshape(B, H, W, Cout_pad)
    if not keep_padded_cout:
        out = out[..., :Cout]
    return out


def torus_conv2d(x_nchw, w_oihw, bias, bn_params=None, eps=1e-5,
                 compute_dtype=jnp.bfloat16, out_dtype=None):
    """PyTorch-parity wrapper: NCHW in / NCHW out (layout transposes included)."""
    x_nhwc = jnp.transpose(x_nchw, (0, 2, 3, 1))
    out = torus_conv2d_nhwc(x_nhwc, w_oihw, bias, bn_params=bn_params, eps=eps,
                            compute_dtype=compute_dtype, out_dtype=out_dtype)
    return jnp.transpose(out, (0, 3, 1, 2))


if __name__ == "__main__":
    key = jax.random.PRNGKey(0)
    B, Cin, H, W = 4, 8, 16, 16
    Cout, KH, KW = 32, 3, 3

    k1, k2, k3, k4, k5, k6, k7 = jax.random.split(key, 7)
    x = jax.random.normal(k1, (B, Cin, H, W), jnp.float32)
    w = 0.1 * jax.random.normal(k2, (Cout, Cin, KH, KW), jnp.float32)
    b = 0.1 * jax.random.normal(k3, (Cout,), jnp.float32)
    gamma = 1.0 + 0.1 * jax.random.normal(k4, (Cout,), jnp.float32)
    beta = 0.1 * jax.random.normal(k5, (Cout,), jnp.float32)
    rmean = 0.1 * jax.random.normal(k6, (Cout,), jnp.float32)
    rvar = jnp.abs(1.0 + 0.1 * jax.random.normal(k7, (Cout,), jnp.float32))
    bn = (gamma, beta, rmean, rvar)

    # Pure-JAX reference: circular pad + lax conv + BN (inference) affine.
    xp_ref = jnp.pad(x, ((0, 0), (0, 0), (1, 1), (1, 1)), mode="wrap")
    ref = jax.lax.conv_general_dilated(
        xp_ref, w, window_strides=(1, 1), padding="VALID",
        dimension_numbers=("NCHW", "OIHW", "NCHW"))
    ref = ref + b[None, :, None, None]
    sc = gamma / jnp.sqrt(rvar + 1e-5)
    ref = sc[None, :, None, None] * (ref - rmean[None, :, None, None]) \
        + beta[None, :, None, None]

    # Exact-precision path (f32 MXU inputs + f32 output): tight parity check.
    out_f32 = torus_conv2d(x, w, b, bn_params=bn, compute_dtype=jnp.float32)
    out_f32 = jax.block_until_ready(out_f32)
    assert out_f32.shape == (B, Cout, H, W), out_f32.shape
    assert out_f32.dtype == jnp.float32
    assert jnp.allclose(out_f32, ref, atol=1e-3, rtol=1e-3), \
        float(jnp.max(jnp.abs(out_f32 - ref)))

    # Default bf16-in / bf16-out path (chained-layer configuration): looser
    # check (difference is bf16 quantization of inputs/weights/output only).
    out_bf16 = torus_conv2d(x, w, b, bn_params=bn)
    out_bf16 = jax.block_until_ready(out_bf16)
    assert out_bf16.shape == (B, Cout, H, W), out_bf16.shape
    assert out_bf16.dtype == jnp.bfloat16
    assert jnp.allclose(out_bf16.astype(jnp.float32), ref, atol=5e-2, rtol=5e-2), \
        float(jnp.max(jnp.abs(out_bf16.astype(jnp.float32) - ref)))

    # NHWC + keep_padded_cout path (inter-layer layout, no channel slice):
    # padded channels must be exactly zero.
    x_nhwc = jnp.transpose(x, (0, 2, 3, 1))
    out_pad = torus_conv2d_nhwc(x_nhwc, w, b, bn_params=bn,
                                keep_padded_cout=True)
    out_pad = jax.block_until_ready(out_pad)
    assert out_pad.shape == (B, H, W, 128), out_pad.shape
    assert bool(jnp.all(out_pad[..., Cout:] == 0))
    ref_nhwc = jnp.transpose(ref, (0, 2, 3, 1))
    assert jnp.allclose(out_pad[..., :Cout].astype(jnp.float32), ref_nhwc,
                        atol=5e-2, rtol=5e-2)

    print("KERNEL_OK")
</pallas_src>

<mosaic_0001>
module attributes {stable_mosaic.version = 11 : i64} {
  func.func @kernel(%arg0: i32, %arg1: memref<2x16x16x8xf32, #tpu.memory_space<vmem>>, %arg2: memref<72x128xf32, #tpu.memory_space<vmem>>, %arg3: memref<1x128xf32, #tpu.memory_space<vmem>>, %arg4: memref<512x128xf32, #tpu.memory_space<vmem>>) attributes {dimension_semantics = [#tpu.dimension_semantics<parallel>], iteration_bounds = array<i64: 2>, scalar_prefetch = 0 : i64, scratch_operands = 0 : i64, tpu.core_type = #tpu.core_type<tc>, window_params = [{transform_indices = @transform_0, window_bounds = array<i64: 2, 16, 16, 8>}, {pipeline_mode = #tpu.pipeline_mode<synchronous>, transform_indices = @transform_1, window_bounds = array<i64: 72, 128>}, {pipeline_mode = #tpu.pipeline_mode<synchronous>, transform_indices = @transform_2, window_bounds = array<i64: 1, 128>}, {transform_indices = @transform_3, window_bounds = array<i64: 512, 128>}]} {
    %c0 = arith.constant 0 : index
    %c0_0 = arith.constant 0 : index
    %c0_1 = arith.constant 0 : index
    %c0_2 = arith.constant 0 : index
    %0 = vector.load %arg1[%c0, %c0_0, %c0_1, %c0_2] : memref<2x16x16x8xf32, #tpu.memory_space<vmem>>, vector<2x16x16x8xf32>
    %1 = vector.extract_strided_slice %0 {offsets = [0, 0, 15, 0], sizes = [2, 16, 1, 8], strides = [1, 1, 1, 1]} : vector<2x16x16x8xf32> to vector<2x16x1x8xf32>
    %2 = vector.extract_strided_slice %0 {offsets = [0, 0, 0, 0], sizes = [2, 16, 1, 8], strides = [1, 1, 1, 1]} : vector<2x16x16x8xf32> to vector<2x16x1x8xf32>
    %3 = tpu.concatenate %1, %0, %2 in 2 : vector<2x16x1x8xf32>, vector<2x16x16x8xf32>, vector<2x16x1x8xf32> -> vector<2x16x18x8xf32>
    %4 = vector.extract_strided_slice %3 {offsets = [0, 15, 0, 0], sizes = [2, 1, 18, 8], strides = [1, 1, 1, 1]} : vector<2x16x18x8xf32> to vector<2x1x18x8xf32>
    %5 = vector.extract_strided_slice %3 {offsets = [0, 0, 0, 0], sizes = [2, 1, 18, 8], strides = [1, 1, 1, 1]} : vector<2x16x18x8xf32> to vector<2x1x18x8xf32>
    %6 = tpu.concatenate %4, %3, %5 in 1 : vector<2x1x18x8xf32>, vector<2x16x18x8xf32>, vector<2x1x18x8xf32> -> vector<2x18x18x8xf32>
    %7 = vector.extract_strided_slice %6 {offsets = [0, 0, 0, 0], sizes = [2, 16, 16, 8], strides = [1, 1, 1, 1]} : vector<2x18x18x8xf32> to vector<2x16x16x8xf32>
    %8 = vector.extract_strided_slice %6 {offsets = [0, 0, 1, 0], sizes = [2, 16, 16, 8], strides = [1, 1, 1, 1]} : vector<2x18x18x8xf32> to vector<2x16x16x8xf32>
    %9 = vector.extract_strided_slice %6 {offsets = [0, 0, 2, 0], sizes = [2, 16, 16, 8], strides = [1, 1, 1, 1]} : vector<2x18x18x8xf32> to vector<2x16x16x8xf32>
    %10 = vector.extract_strided_slice %6 {offsets = [0, 1, 0, 0], sizes = [2, 16, 16, 8], strides = [1, 1, 1, 1]} : vector<2x18x18x8xf32> to vector<2x16x16x8xf32>
    %11 = vector.extract_strided_slice %6 {offsets = [0, 1, 1, 0], sizes = [2, 16, 16, 8], strides = [1, 1, 1, 1]} : vector<2x18x18x8xf32> to vector<2x16x16x8xf32>
    %12 = vector.extract_strided_slice %6 {offsets = [0, 1, 2, 0], sizes = [2, 16, 16, 8], strides = [1, 1, 1, 1]} : vector<2x18x18x8xf32> to vector<2x16x16x8xf32>
    %13 = vector.extract_strided_slice %6 {offsets = [0, 2, 0, 0], sizes = [2, 16, 16, 8], strides = [1, 1, 1, 1]} : vector<2x18x18x8xf32> to vector<2x16x16x8xf32>
    %14 = vector.extract_strided_slice %6 {offsets = [0, 2, 1, 0], sizes = [2, 16, 16, 8], strides = [1, 1, 1, 1]} : vector<2x18x18x8xf32> to vector<2x16x16x8xf32>
    %15 = vector.extract_strided_slice %6 {offsets = [0, 2, 2, 0], sizes = [2, 16, 16, 8], strides = [1, 1, 1, 1]} : vector<2x18x18x8xf32> to vector<2x16x16x8xf32>
    %16 = tpu.concatenate %7, %8, %9, %10, %11, %12, %13, %14, %15 in 3 : vector<2x16x16x8xf32>, vector<2x16x16x8xf32>, vector<2x16x16x8xf32>, vector<2x16x16x8xf32>, vector<2x16x16x8xf32>, vector<2x16x16x8xf32>, vector<2x16x16x8xf32>, vector<2x16x16x8xf32>, vector<2x16x16x8xf32> -> vector<2x16x16x72xf32>
    %17 = vector.shape_cast %16 : vector<2x16x16x72xf32> to vector<512x72xf32>
    %c0_3 = arith.constant 0 : index
    %c0_4 = arith.constant 0 : index
    %18 = vector.load %arg2[%c0_3, %c0_4] : memref<72x128xf32, #tpu.memory_space<vmem>>, vector<72x128xf32>
    %cst = arith.constant dense<0.000000e+00> : vector<512x128xf32>
    %19 = tpu.matmul %17, %18, %cst {dimension_numbers = #tpu.dot_dimension_numbers<[1], [0], [0], [1], [0, 0, 1, 1], [], []>} : vector<512x72xf32>, vector<72x128xf32>, vector<512x128xf32> -> vector<512x128xf32>
    %c0_5 = arith.constant 0 : index
    %c0_6 = arith.constant 0 : index
    %20 = vector.load %arg3[%c0_5, %c0_6] : memref<1x128xf32, #tpu.memory_space<vmem>>, vector<1x128xf32>
    %21 = vector.broadcast %20 : vector<1x128xf32> to vector<512x128xf32>
    %22 = arith.addf %19, %21 : vector<512x128xf32>
    %c0_7 = arith.constant 0 : index
    %c0_8 = arith.constant 0 : index
    %23 = vector.load %arg4[%c0_7, %c0_8] : memref<512x128xf32, #tpu.memory_space<vmem>>, vector<512x128xf32>
    tpu.vector_store %arg4[%c0_7, %c0_8], %22 {strides = array<i32>} : memref<512x128xf32, #tpu.memory_space<vmem>>, vector<512x128xf32>,
    return
  }
  func.func @transform_0(%arg0: i32) -> (i32, i32, i32, i32) {
    %c0_i32 = arith.constant 0 : i32
    %c0_i32_0 = arith.constant 0 : i32
    %c0_i32_1 = arith.constant 0 : i32
    %c0_i32_2 = arith.constant 0 : i32
    return %arg0, %c0_i32, %c0_i32_0, %c0_i32_1 : i32, i32, i32, i32
  }
  func.func @transform_1(%arg0: i32) -> (i32, i32) {
    %c0_i32 = arith.constant 0 : i32
    %c0_i32_0 = arith.constant 0 : i32
    %c0_i32_1 = arith.constant 0 : i32
    return %c0_i32, %c0_i32_0 : i32, i32
  }
  func.func @transform_2(%arg0: i32) -> (i32, i32) {
    %c0_i32 = arith.constant 0 : i32
    %c0_i32_0 = arith.constant 0 : i32
    %c0_i32_1 = arith.constant 0 : i32
    return %c0_i32, %c0_i32_0 : i32, i32
  }
  func.func @transform_3(%arg0: i32) -> (i32, i32) {
    %c0_i32 = arith.constant 0 : i32
    %c0_i32_0 = arith.constant 0 : i32
    return %arg0, %c0_i32 : i32, i32
  }
}

module attributes {stable_mosaic.version = 11 : i64} {
  func.func @kernel(%arg0: i32, %arg1: memref<2x18x18x8xf32, #tpu.memory_space<vmem>>, %arg2: memref<9x8x128xf32, #tpu.memory_space<vmem>>, %arg3: memref<1x128xf32, #tpu.memory_space<vmem>>, %arg4: memref<512x128xf32, #tpu.memory_space<vmem>>) attributes {dimension_semantics = [#tpu.dimension_semantics<parallel>], iteration_bounds = array<i64: 2>, scalar_prefetch = 0 : i64, scratch_operands = 0 : i64, tpu.core_type = #tpu.core_type<tc>, window_params = [{transform_indices = @transform_0, window_bounds = array<i64: 2, 18, 18, 8>}, {pipeline_mode = #tpu.pipeline_mode<synchronous>, transform_indices = @transform_1, window_bounds = array<i64: 9, 8, 128>}, {pipeline_mode = #tpu.pipeline_mode<synchronous>, transform_indices = @transform_2, window_bounds = array<i64: 1, 128>}, {transform_indices = @transform_3, window_bounds = array<i64: 512, 128>}]} {
    %c0 = arith.constant 0 : index
    %c0_0 = arith.constant 0 : index
    %c0_1 = arith.constant 0 : index
    %c0_2 = arith.constant 0 : index
    %0 = vector.load %arg1[%c0, %c0_0, %c0_1, %c0_2] : memref<2x18x18x8xf32, #tpu.memory_space<vmem>>, vector<2x18x18x8xf32>
    %cst = arith.constant 0.000000e+00 : f32
    %1 = vector.broadcast %cst : f32 to vector<512x128xf32>
    %2 = vector.extract_strided_slice %0 {offsets = [0, 0, 0, 0], sizes = [2, 16, 16, 8], strides = [1, 1, 1, 1]} : vector<2x18x18x8xf32> to vector<2x16x16x8xf32>
    %3 = vector.shape_cast %2 : vector<2x16x16x8xf32> to vector<512x8xf32>
    %c0_3 = arith.constant 0 : index
    %c0_4 = arith.constant 0 : index
    %c0_5 = arith.constant 0 : index
    %4 = vector.load %arg2[%c0_3, %c0_4, %c0_5] : memref<9x8x128xf32, #tpu.memory_space<vmem>>, vector<1x8x128xf32>
    %5 = vector.shape_cast %4 : vector<1x8x128xf32> to vector<8x128xf32>
    %cst_6 = arith.constant dense<0.000000e+00> : vector<512x128xf32>
    %6 = tpu.matmul %3, %5, %cst_6 {dimension_numbers = #tpu.dot_dimension_numbers<[1], [0], [0], [1], [0, 0, 1, 1], [], []>} : vector<512x8xf32>, vector<8x128xf32>, vector<512x128xf32> -> vector<512x128xf32>
    %7 = arith.addf %1, %6 : vector<512x128xf32>
    %8 = vector.extract_strided_slice %0 {offsets = [0, 0, 1, 0], sizes = [2, 16, 16, 8], strides = [1, 1, 1, 1]} : vector<2x18x18x8xf32> to vector<2x16x16x8xf32>
    %9 = vector.shape_cast %8 : vector<2x16x16x8xf32> to vector<512x8xf32>
    %c1 = arith.constant 1 : index
    %c0_7 = arith.constant 0 : index
    %c0_8 = arith.constant 0 : index
    %10 = vector.load %arg2[%c1, %c0_7, %c0_8] : memref<9x8x128xf32, #tpu.memory_space<vmem>>, vector<1x8x128xf32>
    %11 = vector.shape_cast %10 : vector<1x8x128xf32> to vector<8x128xf32>
    %cst_9 = arith.constant dense<0.000000e+00> : vector<512x128xf32>
    %12 = tpu.matmul %9, %11, %cst_9 {dimension_numbers = #tpu.dot_dimension_numbers<[1], [0], [0], [1], [0, 0, 1, 1], [], []>} : vector<512x8xf32>, vector<8x128xf32>, vector<512x128xf32> -> vector<512x128xf32>
    %13 = arith.addf %7, %12 : vector<512x128xf32>
    %14 = vector.extract_strided_slice %0 {offsets = [0, 0, 2, 0], sizes = [2, 16, 16, 8], strides = [1, 1, 1, 1]} : vector<2x18x18x8xf32> to vector<2x16x16x8xf32>
    %15 = vector.shape_cast %14 : vector<2x16x16x8xf32> to vector<512x8xf32>
    %c2 = arith.constant 2 : index
    %c0_10 = arith.constant 0 : index
    %c0_11 = arith.constant 0 : index
    %16 = vector.load %arg2[%c2, %c0_10, %c0_11] : memref<9x8x128xf32, #tpu.memory_space<vmem>>, vector<1x8x128xf32>
    %17 = vector.shape_cast %16 : vector<1x8x128xf32> to vector<8x128xf32>
    %cst_12 = arith.constant dense<0.000000e+00> : vector<512x128xf32>
    %18 = tpu.matmul %15, %17, %cst_12 {dimension_numbers = #tpu.dot_dimension_numbers<[1], [0], [0], [1], [0, 0, 1, 1], [], []>} : vector<512x8xf32>, vector<8x128xf32>, vector<512x128xf32> -> vector<512x128xf32>
    %19 = arith.addf %13, %18 : vector<512x128xf32>
    %20 = vector.extract_strided_slice %0 {offsets = [0, 1, 0, 0], sizes = [2, 16, 16, 8], strides = [1, 1, 1, 1]} : vector<2x18x18x8xf32> to vector<2x16x16x8xf32>
    %21 = vector.shape_cast %20 : vector<2x16x16x8xf32> to vector<512x8xf32>
    %c3 = arith.constant 3 : index
    %c0_13 = arith.constant 0 : index
    %c0_14 = arith.constant 0 : index
    %22 = vector.load %arg2[%c3, %c0_13, %c0_14] : memref<9x8x128xf32, #tpu.memory_space<vmem>>, vector<1x8x128xf32>
    %23 = vector.shape_cast %22 : vector<1x8x128xf32> to vector<8x128xf32>
    %cst_15 = arith.constant dense<0.000000e+00> : vector<512x128xf32>
    %24 = tpu.matmul %21, %23, %cst_15 {dimension_numbers = #tpu.dot_dimension_numbers<[1], [0], [0], [1], [0, 0, 1, 1], [], []>} : vector<512x8xf32>, vector<8x128xf32>, vector<512x128xf32> -> vector<512x128xf32>
    %25 = arith.addf %19, %24 : vector<512x128xf32>
    %26 = vector.extract_strided_slice %0 {offsets = [0, 1, 1, 0], sizes = [2, 16, 16, 8], strides = [1, 1, 1, 1]} : vector<2x18x18x8xf32> to vector<2x16x16x8xf32>
    %27 = vector.shape_cast %26 : vector<2x16x16x8xf32> to vector<512x8xf32>
    %c4 = arith.constant 4 : index
    %c0_16 = arith.constant 0 : index
    %c0_17 = arith.constant 0 : index
    %28 = vector.load %arg2[%c4, %c0_16, %c0_17] : memref<9x8x128xf32, #tpu.memory_space<vmem>>, vector<1x8x128xf32>
    %29 = vector.shape_cast %28 : vector<1x8x128xf32> to vector<8x128xf32>
    %cst_18 = arith.constant dense<0.000000e+00> : vector<512x128xf32>
    %30 = tpu.matmul %27, %29, %cst_18 {dimension_numbers = #tpu.dot_dimension_numbers<[1], [0], [0], [1], [0, 0, 1, 1], [], []>} : vector<512x8xf32>, vector<8x128xf32>, vector<512x128xf32> -> vector<512x128xf32>
    %31 = arith.addf %25, %30 : vector<512x128xf32>
    %32 = vector.extract_strided_slice %0 {offsets = [0, 1, 2, 0], sizes = [2, 16, 16, 8], strides = [1, 1, 1, 1]} : vector<2x18x18x8xf32> to vector<2x16x16x8xf32>
    %33 = vector.shape_cast %32 : vector<2x16x16x8xf32> to vector<512x8xf32>
    %c5 = arith.constant 5 : index
    %c0_19 = arith.constant 0 : index
    %c0_20 = arith.constant 0 : index
    %34 = vector.load %arg2[%c5, %c0_19, %c0_20] : memref<9x8x128xf32, #tpu.memory_space<vmem>>, vector<1x8x128xf32>
    %35 = vector.shape_cast %34 : vector<1x8x128xf32> to vector<8x128xf32>
    %cst_21 = arith.constant dense<0.000000e+00> : vector<512x128xf32>
    %36 = tpu.matmul %33, %35, %cst_21 {dimension_numbers = #tpu.dot_dimension_numbers<[1], [0], [0], [1], [0, 0, 1, 1], [], []>} : vector<512x8xf32>, vector<8x128xf32>, vector<512x128xf32> -> vector<512x128xf32>
    %37 = arith.addf %31, %36 : vector<512x128xf32>
    %38 = vector.extract_strided_slice %0 {offsets = [0, 2, 0, 0], sizes = [2, 16, 16, 8], strides = [1, 1, 1, 1]} : vector<2x18x18x8xf32> to vector<2x16x16x8xf32>
    %39 = vector.shape_cast %38 : vector<2x16x16x8xf32> to vector<512x8xf32>
    %c6 = arith.constant 6 : index
    %c0_22 = arith.constant 0 : index
    %c0_23 = arith.constant 0 : index
    %40 = vector.load %arg2[%c6, %c0_22, %c0_23] : memref<9x8x128xf32, #tpu.memory_space<vmem>>, vector<1x8x128xf32>
    %41 = vector.shape_cast %40 : vector<1x8x128xf32> to vector<8x128xf32>
    %cst_24 = arith.constant dense<0.000000e+00> : vector<512x128xf32>
    %42 = tpu.matmul %39, %41, %cst_24 {dimension_numbers = #tpu.dot_dimension_numbers<[1], [0], [0], [1], [0, 0, 1, 1], [], []>} : vector<512x8xf32>, vector<8x128xf32>, vector<512x128xf32> -> vector<512x128xf32>
    %43 = arith.addf %37, %42 : vector<512x128xf32>
    %44 = vector.extract_strided_slice %0 {offsets = [0, 2, 1, 0], sizes = [2, 16, 16, 8], strides = [1, 1, 1, 1]} : vector<2x18x18x8xf32> to vector<2x16x16x8xf32>
    %45 = vector.shape_cast %44 : vector<2x16x16x8xf32> to vector<512x8xf32>
    %c7 = arith.constant 7 : index
    %c0_25 = arith.constant 0 : index
    %c0_26 = arith.constant 0 : index
    %46 = vector.load %arg2[%c7, %c0_25, %c0_26] : memref<9x8x128xf32, #tpu.memory_space<vmem>>, vector<1x8x128xf32>
    %47 = vector.shape_cast %46 : vector<1x8x128xf32> to vector<8x128xf32>
    %cst_27 = arith.constant dense<0.000000e+00> : vector<512x128xf32>
    %48 = tpu.matmul %45, %47, %cst_27 {dimension_numbers = #tpu.dot_dimension_numbers<[1], [0], [0], [1], [0, 0, 1, 1], [], []>} : vector<512x8xf32>, vector<8x128xf32>, vector<512x128xf32> -> vector<512x128xf32>
    %49 = arith.addf %43, %48 : vector<512x128xf32>
    %50 = vector.extract_strided_slice %0 {offsets = [0, 2, 2, 0], sizes = [2, 16, 16, 8], strides = [1, 1, 1, 1]} : vector<2x18x18x8xf32> to vector<2x16x16x8xf32>
    %51 = vector.shape_cast %50 : vector<2x16x16x8xf32> to vector<512x8xf32>
    %c8 = arith.constant 8 : index
    %c0_28 = arith.constant 0 : index
    %c0_29 = arith.constant 0 : index
    %52 = vector.load %arg2[%c8, %c0_28, %c0_29] : memref<9x8x128xf32, #tpu.memory_space<vmem>>, vector<1x8x128xf32>
    %53 = vector.shape_cast %52 : vector<1x8x128xf32> to vector<8x128xf32>
    %cst_30 = arith.constant dense<0.000000e+00> : vector<512x128xf32>
    %54 = tpu.matmul %51, %53, %cst_30 {dimension_numbers = #tpu.dot_dimension_numbers<[1], [0], [0], [1], [0, 0, 1, 1], [], []>} : vector<512x8xf32>, vector<8x128xf32>, vector<512x128xf32> -> vector<512x128xf32>
    %55 = arith.addf %49, %54 : vector<512x128xf32>
    %c0_31 = arith.constant 0 : index
    %c0_32 = arith.constant 0 : index
    %56 = vector.load %arg3[%c0_31, %c0_32] : memref<1x128xf32, #tpu.memory_space<vmem>>, vector<1x128xf32>
    %57 = vector.broadcast %56 : vector<1x128xf32> to vector<512x128xf32>
    %58 = arith.addf %55, %57 : vector<512x128xf32>
    %c0_33 = arith.constant 0 : index
    %c0_34 = arith.constant 0 : index
    %59 = vector.load %arg4[%c0_33, %c0_34] : memref<512x128xf32, #tpu.memory_space<vmem>>, vector<512x128xf32>
    tpu.vector_store %arg4[%c0_33, %c0_34], %58 {strides = array<i32>} : memref<512x128xf32, #tpu.memory_space<vmem>>, vector<512x128xf32>,
    return
  }
  func.func @transform_0(%arg0: i32) -> (i32, i32, i32, i32) {
    %c0_i32 = arith.constant 0 : i32
    %c0_i32_0 = arith.constant 0 : i32
    %c0_i32_1 = arith.constant 0 : i32
    %c0_i32_2 = arith.constant 0 : i32
    return %arg0, %c0_i32, %c0_i32_0, %c0_i32_1 : i32, i32, i32, i32
  }
  func.func @transform_1(%arg0: i32) -> (i32, i32, i32) {
    %c0_i32 = arith.constant 0 : i32
    %c0_i32_0 = arith.constant 0 : i32
    %c0_i32_1 = arith.constant 0 : i32
    %c0_i32_2 = arith.constant 0 : i32
    return %c0_i32, %c0_i32_0, %c0_i32_1 : i32, i32, i32
  }
  func.func @transform_2(%arg0: i32) -> (i32, i32) {
    %c0_i32 = arith.constant 0 : i32
    %c0_i32_0 = arith.constant 0 : i32
    %c0_i32_1 = arith.constant 0 : i32
    return %c0_i32, %c0_i32_0 : i32, i32
  }
  func.func @transform_3(%arg0: i32) -> (i32, i32) {
    %c0_i32 = arith.constant 0 : i32
    %c0_i32_0 = arith.constant 0 : i32
    return %arg0, %c0_i32 : i32, i32
  }
}

</mosaic_0001>

<bundles_post_ra>
// kernel: tpu_custom_call.1
= control target key start
LH: loop header
LB: loop body
LE: loop exit
PB: predicated region body
PF: predicated region fallthrough
CT: control target
= control target key end

     0   :  { %8 = vsyncpa [#allocation3], 0  ;;  %s7776_s0 = inlined_call_operand.vmem [shape: f32[4,16,16,8], index: 0, kind: input, shape index: {}]   ;;  %s7777_s1 = inlined_call_operand.vmem [shape: f32[72,128], index: 1, kind: input, shape index: {}]   ;;  %s7778_s2 = inlined_call_operand.vmem [shape: f32[1,128], index: 2, kind: input, shape index: {}]   ;;  %s7779_s3 = inlined_call_operand.hbm [shape: f32[1024,128], index: 3, kind: output, shape index: {}]  }
   0x1   :  { %10 = vsyncpa [#allocation3 + $0x1], 0  ;;  %s4043_s12 = smov 0   ;;  %s4045_s13 = smov 0  }
   0x2   :  { %s4047_s14 = smov 0   ;;  %s4049_s15 = smov 0  }
   0x3 LB: > { %s4064_s16 = sadd.s32 4294967295, %s4011_s15   ;;  %s3608_s17 = sadd.s32 4294967294, %s4011_s15   ;;  %s4011_s15 = sphi %s4049_s15, %s9261_s15   ;;  %s4007_s14 = sphi %s4047_s14, %s9260_s14   ;;  %s4003_s13 = sphi %s4045_s13, %s9259_s13   ;;  %s3999_s12 = sphi %s4043_s12, %s9258_s12  }
   0x4   : > { %s4068_s18 = sadd.s32 1, %s4011_s15   ;;  %s91_s19 = sadd.s32 1, %s4007_s14 }
   0x5   : > { %s88_s20 = ssub.s32 %s4011_s15, %s4068_s18  ;;  %p101_p0 = scmp.ne.s32.totalorder %s4007_s14, %s4003_s13 }
   0x6   : > { %p89_p1 = scmp.eq.s32.totalorder %s88_s20, 0  ;;  %p102_p2 = scmp.eq.s32.totalorder %s4064_s16, 1 }
   0x7   : > { %p107_p3 = scmp.ne.s32.totalorder %s4003_s13, %s3999_s12  ;;  %p108_p4 = scmp.eq.s32.totalorder %s3608_s17, 1 }
   0x8   : > { %s4079_s21 = scalar_select %p89_p1, %s4007_s14, %s91_s19  }
   0x9   : > { %p4081_p5 = por %p102_p2, %p101_p0  ;;  %p4085_p6 = por %p108_p4, %p107_p3 }
   0xa   : > { %p3611_p7 = scmp.ge.s32.totalorder %s4011_s15, 1  ;;  %p142_p8 = scmp.lt.s32.totalorder %s4011_s15, 3 }
   0xc   : > { %p143_p9 = pnand %p3611_p7, %p142_p8 }
   0xe   : > { %146 = sbr.rel (%p143_p9) target bundleno = 1401 (0x579), region = 32 }
  0x15   : > { %s3613_s24 = sshll.u32 %s4064_s16, 1  ;;  %vm367_vm0 = vcmask 1040384   ;;  %vm560_vm1 = vcmask 1046528   ;;  %s4013_s29 = smov 8   ;;  %vm881_vm2 = vcmask 1045504   ;;  %vm2354_vm3 = vcmask 64512  }
  0x16   : > { %p168_p10 = scmp.lt.s32.totalorder %s3613_s24, 3  ;;  %s4014_s30 = smov 16   ;;  %vm2419_vm4 = vcmask 130048   ;;  %vm2484_vm5 = vcmask 195584   ;;  %vm2549_vm6 = vcmask 261120   ;;  %vm2614_vm7 = vcmask 326656  }
  0x17   : > { %s4015_s4 = smov 24   ;;  %s4016_s5 = smov 32   ;;  %vm2679_vm8 = vcmask 392192   ;;  %vm2744_vm9 = vcmask 457728   ;;  %vm2809_vm10 = vcmask 523264   ;;  %vm2890_vm11 = vcmask 588800  }
  0x18   : > { %s9263_s24 = smov (!%p168_p10, %s3613_s24), 3  ;;  %s4017_s6 = smov 40  }
  0x19   : > { %s3686_s25 = sshll.u32 %s9263_s24, 8  ;;  %s4018_s7 = smov 48  }
  0x1a   : > { %s4095_s28 = scalar_lea.vmem %s7776_s0, %s3686_s25  ;;  %s4019_s10 = smov 56  }
  0x1b   : > { %v205_v0 = vld [vmem:[%s4095_s28 + $0xf0] sm:$0xff]  ;;  %v206_v1 = vld [vmem:[%s4095_s28 + $0xf8] sm:$0xff]  ;;  %v175_v2 = vld [vmem:[%s4095_s28] sm:$0xff]  ;;  %s4020_s11 = smov 64   ;;  %s3687_s25 = sshll.u32 %s4064_s16, 13 }
  0x1c   : > { %v286_v3 = vrot.slane %v206_v1, 7  ;;  %v398_v4 = vrot.slane %v205_v0, 7  ;;  %v176_v5 = vld [vmem:[%s4095_s28 + $0x8] sm:$0xff]  ;;  %v368_v6 = vrot.slane %v175_v2, 7  ;;  %v177_v7 = vld [vmem:[%s4095_s28 + $0x10] sm:$0xff]  ;;  %v178_v8 = vld [vmem:[%s4095_s28 + $0x18] sm:$0xff] }
  0x1d   : > { %v271_v9 = vrot.slane %v176_v5, 7  ;;  %v272_v10 = vrot.slane %v178_v8, 7  ;;  %v370_v11 = vrot.slane %v177_v7, 7  ;;  %v179_v12 = vld [vmem:[%s4095_s28 + $0x20] sm:$0xff]  ;;  %v180_v13 = vld [vmem:[%s4095_s28 + $0x28] sm:$0xff]  ;;  %v181_v27 = vld [vmem:[%s4095_s28 + $0x30] sm:$0xff] }
  0x1e   : > { %v4106_v14 = vsel %vm367_vm0, %v398_v4, %v286_v3  ;;  %v4109_v15 = vsel %vm367_vm0, %v286_v3, %v398_v4  ;;  %v273_v16 = vrot.slane %v180_v13, 7  ;;  %v372_v17 = vrot.slane %v179_v12, 7  ;;  %v182_v28 = vld [vmem:[%s4095_s28 + $0x38] sm:$0xff]  ;;  %v183_v38 = vld [vmem:[%s4095_s28 + $0x40] sm:$0xff]  ;;  %v184_v39 = vld [vmem:[%s4095_s28 + $0x48] sm:$0xff] }
  0x1f   : > { %8134 = vst [vmem:[#allocation5_spill] sm:$0xff] %v4106_v14  ;;  %8135 = vst [vmem:[#allocation6_spill] sm:$0xff] %v4109_v15  ;;  %v561_v18 = vrot.slane %v4109_v15, 1  ;;  %v562_v19 = vrot.slane %v4106_v14, 1  ;;  %v4114_v20 = vsel %vm367_vm0, %v368_v6, %v271_v9  ;;  %v4117_v21 = vsel %vm367_vm0, %v271_v9, %v368_v6  ;;  %v185_v45 = vld [vmem:[%s4095_s28 + $0x50] sm:$0xff]  ;;  %v186_v46 = vld [vmem:[%s4095_s28 + $0x58] sm:$0xff] }
  0x20   : > { %8136 = vst [vmem:[#allocation7_spill] sm:$0xff] %v4114_v20  ;;  %8137 = vst [vmem:[#allocation8_spill] sm:$0xff] %v4117_v21  ;;  %v565_v22 = vrot.slane %v4117_v21, 1  ;;  %v566_v23 = vrot.slane %v4114_v20, 1  ;;  %v4122_v24 = vsel %vm367_vm0, %v370_v11, %v272_v10  ;;  %v4125_v25 = vsel %vm367_vm0, %v272_v10, %v370_v11  ;;  %v187_v58 = vld [vmem:[%s4095_s28 + $0x60] sm:$0xff]  ;;  %v188_v59 = vld [vmem:[%s4095_s28 + $0x68] sm:$0xff] }
  0x21   : > { %v4128_v26 = vsel %vm560_vm1, %v561_v18, %v562_v19  ;;  %v4138_v30 = vsel %vm560_vm1, %v562_v19, %v561_v18  ;;  %v569_v31 = vrot.slane %v4125_v25, 1  ;;  %v570_v32 = vrot.slane %v4122_v24, 1  ;;  %v189_v4 = vld [vmem:[%s4095_s28 + $0x70] sm:$0xff]  ;;  %v190_v5 = vld [vmem:[%s4095_s28 + $0x78] sm:$0xff]  ;;  %v191_v6 = vld [vmem:[%s4095_s28 + $0x80] sm:$0xff] }
  0x22   : > { %8138 = vst [vmem:[#allocation9_spill] sm:$0xff] %v4128_v26  ;;  %689 = vrot.lane.b32.xlu0 %v4128_v26, %s4013_s29  ;;  %v4135_v29 = vsel %vm560_vm1, %v565_v22, %v566_v23  ;;  %8140 = vst [vmem:[#allocation11_spill] sm:$0xff] %v4138_v30  ;;  %v4145_v33 = vsel %vm367_vm0, %v372_v17, %v273_v16  ;;  %v4148_v34 = vsel %vm367_vm0, %v273_v16, %v372_v17  ;;  %v192_v7 = vld [vmem:[%s4095_s28 + $0x88] sm:$0xff] }
  0x23   : > { %8139 = vst [vmem:[#allocation10_spill] sm:$0xff] %v4135_v29  ;;  %693 = vrot.lane.b32.xlu1 %v4135_v29, %s4013_s29  ;;  %v4151_v35 = vsel %vm560_vm1, %v566_v23, %v565_v22  ;;  %v274_v36 = vrot.slane %v182_v28, 7  ;;  %v374_v37 = vrot.slane %v181_v27, 7  ;;  %v573_v40 = vrot.slane %v4148_v34, 1  ;;  %v216_v26 = vld [vmem:[%s4095_s28 + $0x148] sm:$0xff] }
  0x24   : > { %8141 = vst [vmem:[#allocation12_spill] sm:$0xff] %v4151_v35  ;;  %v574_v41 = vrot.slane %v4145_v33, 1  ;;  %v4162_v42 = vsel %vm560_vm1, %v569_v31, %v570_v32  ;;  %v275_v43 = vrot.slane %v184_v39, 7  ;;  %v376_v44 = vrot.slane %v183_v38, 7  ;;  %v193_v38 = vld [vmem:[%s4095_s28 + $0x90] sm:$0xff] }
  0x25   : > { %8142 = vst [vmem:[#allocation13_spill] sm:$0xff] %v4162_v42  ;;  %v4167_v47 = vsel %vm560_vm1, %v570_v32, %v569_v31  ;;  %v4170_v48 = vsel %vm367_vm0, %v374_v37, %v274_v36  ;;  %v4173_v49 = vsel %vm367_vm0, %v274_v36, %v374_v37  ;;  %v276_v51 = vrot.slane %v186_v46, 7  ;;  %v237_v39 = vld [vmem:[%s4095_s28 + $0x1f0] sm:$0xff] }
  0x26   : > { %691 = vrot.lane.b32.xlu0 %v4138_v30, %s4013_s29  ;;  %8143 = vst [vmem:[#allocation14_spill] sm:$0xff] %v4167_v47  ;;  %v4178_v50 = vsel %vm560_vm1, %v573_v40, %v574_v41  ;;  %v378_v52 = vrot.slane %v185_v45, 7  ;;  %v577_v53 = vrot.slane %v4173_v49, 1  ;;  %v578_v54 = vrot.slane %v4170_v48, 1  ;;  %v215_v30 = vld [vmem:[%s4095_s28 + $0x140] sm:$0xff] }
  0x27   : > { %695 = vrot.lane.b32.xlu1 %v4151_v35, %s4013_s29  ;;  %8144 = vst [vmem:[#allocation15_spill] sm:$0xff] %v4178_v50  ;;  %v4185_v55 = vsel %vm367_vm0, %v376_v44, %v275_v43  ;;  %v4188_v56 = vsel %vm367_vm0, %v275_v43, %v376_v44  ;;  %v4191_v57 = vsel %vm560_vm1, %v574_v41, %v573_v40  ;;  %v277_v1 = vrot.slane %v188_v59, 7  ;;  %v238_v40 = vld [vmem:[%s4095_s28 + $0x1f8] sm:$0xff]  ;;  %v207_v43 = vld [vmem:[%s4095_s28 + $0x100] sm:$0xff]  ;;  %v208_v44 = vld [vmem:[%s4095_s28 + $0x108] sm:$0xff] }
  0x28   : > { %8145 = vst [vmem:[#allocation16_spill] sm:$0xff] %v4185_v55  ;;  %8146 = vst [vmem:[#allocation17_spill] sm:$0xff] %v4191_v57  ;;  %v581_v60 = vrot.slane %v4188_v56, 1  ;;  %v582_v61 = vrot.slane %v4185_v55, 1  ;;  %v4200_v62 = vsel %vm367_vm0, %v378_v52, %v276_v51  ;;  %v4205_v63 = vsel %vm560_vm1, %v577_v53, %v578_v54  ;;  %v194_v41 = vld [vmem:[%s4095_s28 + $0x98] sm:$0xff] }
  0x29   : > { %8147 = vst [vmem:[#allocation18_spill] sm:$0xff] %v4200_v62  ;;  %8148 = vst [vmem:[#allocation19_spill] sm:$0xff] %v4205_v63  ;;  %v4208_v0 = vsel %vm367_vm0, %v276_v51, %v378_v52  ;;  %v380_v2 = vrot.slane %v187_v58, 7  ;;  %v4211_v3 = vsel %vm560_vm1, %v578_v54, %v577_v53  ;;  %v586_v10 = vrot.slane %v4200_v62, 1  ;;  %v195_v53 = vld [vmem:[%s4095_s28 + $0xa0] sm:$0xff]  ;;  %v196_v54 = vld [vmem:[%s4095_s28 + $0xa8] sm:$0xff] }
  0x2a   : > { %697 = vrot.lane.b32.xlu0 %v4162_v42, %s4013_s29  ;;  %8149 = vst [vmem:[#allocation20_spill] sm:$0xff] %v4208_v0  ;;  %8150 = vst [vmem:[#allocation21_spill] sm:$0xff] %v4211_v3  ;;  %v4220_v8 = vsel %vm560_vm1, %v581_v60, %v582_v61  ;;  %v585_v9 = vrot.slane %v4208_v0, 1  ;;  %v278_v13 = vrot.slane %v190_v5, 7  ;;  %v382_v16 = vrot.slane %v189_v4, 7 }
  0x2b   : > { %699 = vrot.lane.b32.xlu1 %v4167_v47, %s4013_s29  ;;  %8151 = vst [vmem:[#allocation22_spill] sm:$0xff] %v4220_v8  ;;  %v4227_v11 = vsel %vm367_vm0, %v380_v2, %v277_v1  ;;  %v4230_v12 = vsel %vm367_vm0, %v277_v1, %v380_v2  ;;  %v4233_v17 = vsel %vm560_vm1, %v582_v61, %v581_v60  ;;  %v279_v18 = vrot.slane %v192_v7, 7  ;;  %v210_v7 = vld [vmem:[%s4095_s28 + $0x118] sm:$0xff] }
  0x2c   : > { %8152 = vst [vmem:[#allocation23_spill] sm:$0xff] %v4227_v11  ;;  %8153 = vst [vmem:[#allocation24_spill] sm:$0xff] %v4230_v12  ;;  %v384_v19 = vrot.slane %v191_v6, 7  ;;  %v589_v22 = vrot.slane %v4230_v12, 1  ;;  %v590_v23 = vrot.slane %v4227_v11, 1  ;;  %v4242_v27 = vsel %vm560_vm1, %v585_v9, %v586_v10  ;;  %v209_v6 = vld [vmem:[%s4095_s28 + $0x110] sm:$0xff] }
  0x2d   : > { %8154 = vst [vmem:[#allocation25_spill] sm:$0xff] %v4233_v17  ;;  %8155 = vst [vmem:[#allocation26_spill] sm:$0xff] %v4242_v27  ;;  %v4245_v28 = vsel %vm367_vm0, %v382_v16, %v278_v13  ;;  %v4248_v31 = vsel %vm367_vm0, %v278_v13, %v382_v16  ;;  %v4251_v32 = vsel %vm560_vm1, %v586_v10, %v585_v9  ;;  %v302_v60 = vrot.slane %v238_v40, 7 }
  0x2e   : > { %701 = vrot.lane.b32.xlu0 %v4178_v50, %s4013_s29  ;;  %8156 = vst [vmem:[#allocation27_spill] sm:$0xff] %v4245_v28  ;;  %8157 = vst [vmem:[#allocation28_spill] sm:$0xff] %v4248_v31  ;;  %v4254_v36 = vsel %vm367_vm0, %v384_v19, %v279_v18  ;;  %v4257_v37 = vsel %vm367_vm0, %v279_v18, %v384_v19  ;;  %v4268_v45 = vsel %vm560_vm1, %v589_v22, %v590_v23  ;;  %v211_v18 = vld [vmem:[%s4095_s28 + $0x120] sm:$0xff]  ;;  %v212_v19 = vld [vmem:[%s4095_s28 + $0x128] sm:$0xff] }
  0x2f   : > { %703 = vrot.lane.b32.xlu1 %v4191_v57, %s4013_s29  ;;  %8158 = vst [vmem:[#allocation29_spill] sm:$0xff] %v4251_v32  ;;  %8159 = vst [vmem:[#allocation30_spill] sm:$0xff] %v4254_v36  ;;  %v4271_v46 = vsel %vm560_vm1, %v590_v23, %v589_v22  ;;  %v593_v51 = vrot.slane %v4248_v31, 1  ;;  %v594_v52 = vrot.slane %v4245_v28, 1  ;;  %v597_v58 = vrot.slane %v4257_v37, 1  ;;  %v221_v57 = vld [vmem:[%s4095_s28 + $0x170] sm:$0xff] }
  0x30   : > { %8160 = vst [vmem:[#allocation31_spill] sm:$0xff] %v4257_v37  ;;  %8161 = vst [vmem:[#allocation32_spill] sm:$0xff] %v4268_v45  ;;  %v598_v59 = vrot.slane %v4254_v36, 1  ;;  %v430_v61 = vrot.slane %v237_v39, 7  ;;  %v280_v1 = vrot.slane %v194_v41, 7  ;;  %v386_v2 = vrot.slane %v193_v38, 7 }
  0x31   : > { %8162 = vst [vmem:[#allocation33_spill] sm:$0xff] %v4271_v46  ;;  %v287_v4 = vrot.slane %v208_v44, 7  ;;  %v400_v5 = vrot.slane %v207_v43, 7  ;;  %v281_v9 = vrot.slane %v196_v54, 7  ;;  %v388_v10 = vrot.slane %v195_v53, 7  ;;  %v197_v43 = vld [vmem:[%s4095_s28 + $0xb0] sm:$0xff] }
  0x32   : > { %705 = vrot.lane.b32.xlu0 %v4205_v63, %s4013_s29  ;;  %v4284_v13 = vsel %vm367_vm0, %v430_v61, %v302_v60  ;;  %v4287_v16 = vsel %vm367_vm0, %v302_v60, %v430_v61  ;;  %v4294_v22 = vsel %vm560_vm1, %v593_v51, %v594_v52  ;;  %v4297_v23 = vsel %vm560_vm1, %v594_v52, %v593_v51  ;;  %v198_v44 = vld [vmem:[%s4095_s28 + $0xb8] sm:$0xff]  ;;  %v229_v36 = vld [vmem:[%s4095_s28 + $0x1b0] sm:$0xff]  ;;  %v231_v37 = vld [vmem:[%s4095_s28 + $0x1c0] sm:$0xff] }
  0x33   : > { %707 = vrot.lane.b32.xlu1 %v4211_v3, %s4013_s29  ;;  %8163 = vst [vmem:[#allocation34_spill] sm:$0xff] %v4284_v13  ;;  %8164 = vst [vmem:[#allocation35_spill] sm:$0xff] %v4287_v16  ;;  %v4300_v38 = vsel %vm367_vm0, %v400_v5, %v287_v4  ;;  %v4303_v39 = vsel %vm367_vm0, %v287_v4, %v400_v5  ;;  %v4308_v40 = vsel %vm560_vm1, %v597_v58, %v598_v59  ;;  %v213_v4 = vld [vmem:[%s4095_s28 + $0x130] sm:$0xff]  ;;  %v214_v5 = vld [vmem:[%s4095_s28 + $0x138] sm:$0xff] }
  0x34   : > { %8165 = vst [vmem:[#allocation36_spill] sm:$0xff] %v4294_v22  ;;  %8166 = vst [vmem:[#allocation37_spill] sm:$0xff] %v4297_v23  ;;  %v4311_v41 = vsel %vm560_vm1, %v598_v59, %v597_v58  ;;  %v288_v51 = vrot.slane %v210_v7, 7  ;;  %v402_v52 = vrot.slane %v209_v6, 7  ;;  %v4316_v53 = vsel %vm367_vm0, %v386_v2, %v280_v1  ;;  %v202_v63 = vld [vmem:[%s4095_s28 + $0xd8] sm:$0xff]  ;;  %v236_v31 = vld [vmem:[%s4095_s28 + $0x1e8] sm:$0xff] }
  0x35   : > { %8167 = vst [vmem:[#allocation38_spill] sm:$0xff] %v4300_v38  ;;  %8168 = vst [vmem:[#allocation39_spill] sm:$0xff] %v4303_v39  ;;  %v4319_v54 = vsel %vm367_vm0, %v280_v1, %v386_v2  ;;  %v289_v60 = vrot.slane %v212_v19, 7  ;;  %v404_v61 = vrot.slane %v211_v18, 7  ;;  %v4324_v58 = vsel %vm367_vm0, %v388_v10, %v281_v9  ;;  %v199_v18 = vld [vmem:[%s4095_s28 + $0xc0] sm:$0xff]  ;;  %v200_v19 = vld [vmem:[%s4095_s28 + $0xc8] sm:$0xff] }
  0x36   : > { %709 = vrot.lane.b32.xlu0 %v4220_v8, %s4013_s29  ;;  %8169 = vst [vmem:[#allocation40_spill] sm:$0xff] %v4308_v40  ;;  %8170 = vst [vmem:[#allocation41_spill] sm:$0xff] %v4311_v41  ;;  %v4327_v59 = vsel %vm367_vm0, %v281_v9, %v388_v10  ;;  %v4330_v6 = vsel %vm367_vm0, %v402_v52, %v288_v51  ;;  %v4333_v7 = vsel %vm367_vm0, %v288_v51, %v402_v52 }
  0x37   : > { %711 = vrot.lane.b32.xlu1 %v4233_v17, %s4013_s29  ;;  %8171 = vst [vmem:[#allocation42_spill] sm:$0xff] %v4316_v53  ;;  %8172 = vst [vmem:[#allocation43_spill] sm:$0xff] %v4319_v54  ;;  %v282_v1 = vrot.slane %v198_v44, 7  ;;  %v390_v2 = vrot.slane %v197_v43, 7  ;;  %v4342_v9 = vsel %vm367_vm0, %v404_v61, %v289_v60  ;;  %v4345_v10 = vsel %vm367_vm0, %v289_v60, %v404_v61  ;;  %v217_v60 = vld [vmem:[%s4095_s28 + $0x150] sm:$0xff]  ;;  %v218_v61 = vld [vmem:[%s4095_s28 + $0x158] sm:$0xff] }
  0x38   : > { %8173 = vst [vmem:[#allocation44_spill] sm:$0xff] %v4324_v58  ;;  %8174 = vst [vmem:[#allocation45_spill] sm:$0xff] %v4327_v59  ;;  %v601_v51 = vrot.slane %v4319_v54, 1  ;;  %v602_v52 = vrot.slane %v4316_v53, 1  ;;  %v290_v44 = vrot.slane %v214_v5, 7  ;;  %v605_v43 = vrot.slane %v4327_v59, 1 }
  0x39   : > { %v392_v17 = vrot.slane %v199_v18, 7  ;;  %v219_v5 = vld [vmem:[%s4095_s28 + $0x160] sm:$0xff]  ;;  %v410_v3 = vrot.slane %v217_v60, 7  ;;  %v224_v60 = vld [vmem:[%s4095_s28 + $0x188] sm:$0xff]  ;;  %v225_v59 = vld [vmem:[%s4095_s28 + $0x190] sm:$0xff] }
  0x3a   : > { %713 = vrot.lane.b32.xlu0 %v4242_v27, %s4013_s29  ;;  %v283_v27 = vrot.slane %v200_v19, 7  ;;  %v226_v53 = vld [vmem:[%s4095_s28 + $0x198] sm:$0xff] }
  0x3b   : > { %715 = vrot.lane.b32.xlu1 %v4251_v32, %s4013_s29  ;;  %v408_v32 = vrot.slane %v215_v30, 7  ;;  %v4369_v30 = vsel %vm367_vm0, %v282_v1, %v390_v2 }
  0x3c   : > { %8176 = vst [vmem:[#allocation47_spill] sm:$0xff] %v4369_v30  ;;  %v609_v50 = vrot.slane %v4369_v30, 1 }
  0x3e   : > { %717 = vrot.lane.b32.xlu0 %v4268_v45, %s4013_s29  ;;  %v291_v45 = vrot.slane %v216_v26, 7  ;;  %v4366_v26 = vsel %vm367_vm0, %v390_v2, %v282_v1  ;;  %v4384_v1 = vsel %vm560_vm1, %v602_v52, %v601_v51 }
  0x3f   : > { %719 = vrot.lane.b32.xlu1 %v4271_v46, %s4013_s29  ;;  %v606_v46 = vrot.slane %v4324_v58, 1  ;;  %8175 = vst [vmem:[#allocation46_spill] sm:$0xff] %v4366_v26  ;;  %8179 = vst [vmem:[#allocation50_spill] sm:$0xff] %v4384_v1  ;;  %v610_v47 = vrot.slane %v4366_v26, 1  ;;  %v414_v26 = vrot.slane %v221_v57, 7  ;;  %v228_v57 = vld [vmem:[%s4095_s28 + $0x1a8] sm:$0xff] }
  0x40   : > { %v4372_v18 = vsel %vm367_vm0, %v408_v32, %v291_v45  ;;  %v4375_v19 = vsel %vm367_vm0, %v291_v45, %v408_v32  ;;  %v412_v45 = vrot.slane %v219_v5, 7  ;;  %v4408_v5 = vsel %vm367_vm0, %v283_v27, %v392_v17 }
  0x41   : > { %8177 = vst [vmem:[#allocation48_spill] sm:$0xff] %v4372_v18  ;;  %v4387_v2 = vsel %vm560_vm1, %v605_v43, %v606_v46  ;;  %8184 = vst [vmem:[#allocation55_spill] sm:$0xff] %v4408_v5  ;;  %v4420_v30 = vsel %vm560_vm1, %v606_v46, %v605_v43  ;;  %v4438_v46 = vsel %vm560_vm1, %v609_v50, %v610_v47 }
  0x42   : > { %721 = vrot.lane.b32.xlu0 %v4294_v22, %s4013_s29  ;;  %v406_v22 = vrot.slane %v213_v4, 7  ;;  %v220_v4 = vld [vmem:[%s4095_s28 + $0x168] sm:$0xff]  ;;  %8180 = vst [vmem:[#allocation51_spill] sm:$0xff] %v4387_v2  ;;  %8187 = vst [vmem:[#allocation58_spill] sm:$0xff] %v4420_v30 }
  0x43   : > { %723 = vrot.lane.b32.xlu1 %v4297_v23, %s4013_s29  ;;  %v293_v32 = vrot.slane %v220_v4, 7  ;;  %8190 = vst [vmem:[#allocation61_spill] sm:$0xff] %v4438_v46 }
  0x44   : > { %v4356_v23 = vsel %vm367_vm0, %v406_v22, %v290_v44  ;;  %v4359_v8 = vsel %vm367_vm0, %v290_v44, %v406_v22  ;;  %v4380_v22 = vsel %vm560_vm1, %v601_v51, %v602_v52  ;;  %v201_v44 = vld [vmem:[%s4095_s28 + $0xd0] sm:$0xff]  ;;  %v223_v52 = vld [vmem:[%s4095_s28 + $0x180] sm:$0xff] }
  0x45   : > { %8178 = vst [vmem:[#allocation49_spill] sm:$0xff] %v4380_v22  ;;  %v4411_v4 = vsel %vm367_vm0, %v412_v45, %v293_v32  ;;  %v4414_v35 = vsel %vm367_vm0, %v293_v32, %v412_v45  ;;  %v416_v58 = vrot.slane %v223_v52, 7  ;;  %v613_v32 = vrot.slane %v4408_v5, 1 }
  0x46   : > { %725 = vrot.lane.b32.xlu0 %v4308_v40, %s4013_s29  ;;  %v292_v40 = vrot.slane %v218_v61, 7  ;;  %v4405_v61 = vsel %vm367_vm0, %v392_v17, %v283_v27  ;;  %8185 = vst [vmem:[#allocation56_spill] sm:$0xff] %v4411_v4  ;;  %8186 = vst [vmem:[#allocation57_spill] sm:$0xff] %v4414_v35  ;;  %v203_v17 = vld [vmem:[%s4095_s28 + $0xe0] sm:$0xff]  ;;  %v295_v27 = vrot.slane %v224_v60, 7  ;;  %v296_v60 = vrot.slane %v226_v53, 7 }
  0x47   : > { %727 = vrot.lane.b32.xlu1 %v4311_v41, %s4013_s29  ;;  %v222_v41 = vld [vmem:[%s4095_s28 + $0x178] sm:$0xff]  ;;  %8183 = vst [vmem:[#allocation54_spill] sm:$0xff] %v4405_v61  ;;  %v614_v45 = vrot.slane %v4405_v61, 1  ;;  %v4452_v61 = vsel %vm560_vm1, %v610_v47, %v609_v50  ;;  %v297_v5 = vrot.slane %v228_v57, 7  ;;  %v232_v53 = vld [vmem:[%s4095_s28 + $0x1c8] sm:$0xff] }
  0x48   : > { %v4395_v42 = vsel %vm367_vm0, %v410_v3, %v292_v40  ;;  %v4398_v51 = vsel %vm367_vm0, %v292_v40, %v410_v3  ;;  %v284_v3 = vrot.slane %v202_v63, 7  ;;  %v394_v40 = vrot.slane %v201_v44, 7  ;;  %8194 = vst [vmem:[#allocation65_spill] sm:$0xff] %v4452_v61 }
  0x49   : > { %8181 = vst [vmem:[#allocation52_spill] sm:$0xff] %v4395_v42  ;;  %8182 = vst [vmem:[#allocation53_spill] sm:$0xff] %v4398_v51  ;;  %v294_v29 = vrot.slane %v222_v41, 7  ;;  %v227_v41 = vld [vmem:[%s4095_s28 + $0x1a0] sm:$0xff]  ;;  %v4441_v44 = vsel %vm367_vm0, %v416_v58, %v295_v27  ;;  %v4444_v52 = vsel %vm367_vm0, %v295_v27, %v416_v58  ;;  %v230_v58 = vld [vmem:[%s4095_s28 + $0x1b8] sm:$0xff]  ;;  %v4470_v47 = vsel %vm560_vm1, %v613_v32, %v614_v45 }
  0x4a   : > { %729 = vrot.lane.b32.xlu0 %v4380_v22, %s4013_s29  ;;  %v204_v22 = vld [vmem:[%s4095_s28 + $0xe8] sm:$0xff]  ;;  %8191 = vst [vmem:[#allocation62_spill] sm:$0xff] %v4441_v44  ;;  %8192 = vst [vmem:[#allocation63_spill] sm:$0xff] %v4444_v52  ;;  %v420_v54 = vrot.slane %v227_v41, 7  ;;  %v422_v41 = vrot.slane %v229_v36, 7  ;;  %v4486_v57 = vsel %vm560_vm1, %v614_v45, %v613_v32 }
  0x4b   : > { %731 = vrot.lane.b32.xlu1 %v4384_v1, %s4013_s29  ;;  %v4428_v1 = vsel %vm367_vm0, %v414_v26, %v294_v29  ;;  %v4431_v63 = vsel %vm367_vm0, %v294_v29, %v414_v26  ;;  %v285_v43 = vrot.slane %v204_v22, 7  ;;  %v4449_v29 = vsel %vm367_vm0, %v284_v3, %v394_v40  ;;  %8198 = vst [vmem:[#allocation69_spill] sm:$0xff] %v4470_v47 }
  0x4c   : > { %8188 = vst [vmem:[#allocation59_spill] sm:$0xff] %v4428_v1  ;;  %8189 = vst [vmem:[#allocation60_spill] sm:$0xff] %v4431_v63  ;;  %v396_v26 = vrot.slane %v203_v17, 7  ;;  %v4455_v22 = vsel %vm367_vm0, %v394_v40, %v284_v3  ;;  %v617_v50 = vrot.slane %v4449_v29, 1  ;;  %v298_v17 = vrot.slane %v230_v58, 7 }
  0x4d   : > { %8193 = vst [vmem:[#allocation64_spill] sm:$0xff] %v4449_v29  ;;  %8195 = vst [vmem:[#allocation66_spill] sm:$0xff] %v4455_v22  ;;  %v618_v3 = vrot.slane %v4455_v22, 1  ;;  %v424_v29 = vrot.slane %v231_v37, 7  ;;  %v235_v22 = vld [vmem:[%s4095_s28 + $0x1e0] sm:$0xff] }
  0x4e   : > { %733 = vrot.lane.b32.xlu0 %v4387_v2, %s4013_s29  ;;  %v418_v2 = vrot.slane %v225_v59, 7  ;;  %v4474_v59 = vsel %vm367_vm0, %v420_v54, %v297_v5  ;;  %v4483_v40 = vsel %vm367_vm0, %v285_v43, %v396_v26  ;;  %8202 = vst [vmem:[#allocation73_spill] sm:$0xff] %v4486_v57  ;;  %v4494_v28 = vsel %vm367_vm0, %v422_v41, %v298_v17 }
  0x4f   : > { %735 = vrot.lane.b32.xlu1 %v4420_v30, %s4013_s29  ;;  %8199 = vst [vmem:[#allocation70_spill] sm:$0xff] %v4474_v59  ;;  %8201 = vst [vmem:[#allocation72_spill] sm:$0xff] %v4483_v40  ;;  %v621_v36 = vrot.slane %v4483_v40, 1  ;;  %v4513_v45 = vsel %vm560_vm1, %v617_v50, %v618_v3 }
  0x50   : > { %v4460_v27 = vsel %vm367_vm0, %v418_v2, %v296_v60  ;;  %v4463_v30 = vsel %vm367_vm0, %v296_v60, %v418_v2  ;;  %v4477_v2 = vsel %vm367_vm0, %v297_v5, %v420_v54  ;;  %v4489_v60 = vsel %vm367_vm0, %v396_v26, %v285_v43  ;;  %v233_v54 = vld [vmem:[%s4095_s28 + $0x1d0] sm:$0xff]  ;;  %v234_v5 = vld [vmem:[%s4095_s28 + $0x1d8] sm:$0xff]  ;;  %8204 = vst [vmem:[#allocation75_spill] sm:$0xff] %v4494_v28 }
  0x51   : > { %8196 = vst [vmem:[#allocation67_spill] sm:$0xff] %v4460_v27  ;;  %8197 = vst [vmem:[#allocation68_spill] sm:$0xff] %v4463_v30  ;;  %v622_v43 = vrot.slane %v4489_v60, 1  ;;  %v300_v26 = vrot.slane %v234_v5, 7  ;;  %v426_v58 = vrot.slane %v233_v54, 7 }
  0x52   : > { %737 = vrot.lane.b32.xlu0 %v4438_v46, %s4013_s29  ;;  %8200 = vst [vmem:[#allocation71_spill] sm:$0xff] %v4477_v2  ;;  %8203 = vst [vmem:[#allocation74_spill] sm:$0xff] %v4489_v60  ;;  %v299_v46 = vrot.slane %v232_v53, 7  ;;  %v4517_v53 = vsel %vm560_vm1, %v618_v3, %v617_v50  ;;  %v626_v50 = vrot.slane %v4284_v13, 1 }
  0x53   : > { %739 = vrot.lane.b32.xlu1 %v4452_v61, %s4013_s29  ;;  %v4497_v61 = vsel %vm367_vm0, %v298_v17, %v422_v41  ;;  %8208 = vst [vmem:[#allocation79_spill] sm:$0xff] %v4513_v45  ;;  %8209 = vst [vmem:[#allocation80_spill] sm:$0xff] %v4517_v53  ;;  %v301_v17 = vrot.slane %v236_v31, 7  ;;  %v428_v41 = vrot.slane %v235_v22, 7  ;;  %v4536_v31 = vsel %vm560_vm1, %v621_v36, %v622_v43 }
  0x54   : > { %8205 = vst [vmem:[#allocation76_spill] sm:$0xff] %v4497_v61  ;;  %v4505_v32 = vsel %vm367_vm0, %v424_v29, %v299_v46  ;;  %v4508_v37 = vsel %vm367_vm0, %v299_v46, %v424_v29  ;;  %v4523_v46 = vsel %vm367_vm0, %v300_v26, %v426_v58  ;;  %8214 = vst [vmem:[#allocation85_spill] sm:$0xff] %v4536_v31  ;;  %v625_v22 = vrot.slane %v4287_v16, 1 }
  0x55   : > { %8206 = vst [vmem:[#allocation77_spill] sm:$0xff] %v4505_v32  ;;  %8207 = vst [vmem:[#allocation78_spill] sm:$0xff] %v4508_v37  ;;  %v4528_v29 = vsel %vm367_vm0, %v428_v41, %v301_v17  ;;  %v4531_v5 = vsel %vm367_vm0, %v301_v17, %v428_v41  ;;  %v4541_v3 = vsel %vm560_vm1, %v622_v43, %v621_v36  ;;  %v633_v43 = vrot.slane %v4333_v7, 1 }
  0x56   : > { %741 = vrot.lane.b32.xlu0 %v4470_v47, %s4013_s29  ;;  %v4520_v47 = vsel %vm367_vm0, %v426_v58, %v300_v26  ;;  %8211 = vst [vmem:[#allocation82_spill] sm:$0xff] %v4523_v46  ;;  %8212 = vst [vmem:[#allocation83_spill] sm:$0xff] %v4528_v29  ;;  %v4548_v54 = vsel %vm560_vm1, %v625_v22, %v626_v50  ;;  %v629_v26 = vrot.slane %v4303_v39, 1  ;;  %v630_v58 = vrot.slane %v4300_v38, 1 }
  0x57   : > { %743 = vrot.lane.b32.xlu1 %v4486_v57, %s4013_s29  ;;  %8210 = vst [vmem:[#allocation81_spill] sm:$0xff] %v4520_v47  ;;  %8213 = vst [vmem:[#allocation84_spill] sm:$0xff] %v4531_v5  ;;  %v4553_v17 = vsel %vm560_vm1, %v626_v50, %v625_v22  ;;  %v634_v41 = vrot.slane %v4330_v6, 1  ;;  %v637_v50 = vrot.slane %v4345_v10, 1 }
  0x58   : > { %8215 = vst [vmem:[#allocation86_spill] sm:$0xff] %v4541_v3  ;;  %8216 = vst [vmem:[#allocation87_spill] sm:$0xff] %v4548_v54  ;;  %v4560_v36 = vsel %vm560_vm1, %v629_v26, %v630_v58 }
  0x59   : > { %8217 = vst [vmem:[#allocation88_spill] sm:$0xff] %v4553_v17  ;;  %8218 = vst [vmem:[#allocation89_spill] sm:$0xff] %v4560_v36  ;;  %v4572_v22 = vsel %vm560_vm1, %v633_v43, %v634_v41 }
  0x5a   : > { %745 = vrot.lane.b32.xlu0 %v4513_v45, %s4013_s29  ;;  %8220 = vst [vmem:[#allocation91_spill] sm:$0xff] %v4572_v22 }
  0x5b   : > { %747 = vrot.lane.b32.xlu1 %v4517_v53, %s4013_s29 }
  0x5e   : > { %749 = vrot.lane.b32.xlu0 %v4536_v31, %s4013_s29 }
  0x5f   : > { %751 = vrot.lane.b32.xlu1 %v4541_v3, %s4013_s29  ;;  %v4565_v3 = vsel %vm560_vm1, %v630_v58, %v629_v26  ;;  %v641_v58 = vrot.slane %v4359_v8, 1 }
  0x60   : > { %8219 = vst [vmem:[#allocation90_spill] sm:$0xff] %v4565_v3 }
  0x62   : > { %753 = vrot.lane.b32.xlu0 %v4548_v54, %s4013_s29  ;;  %v4577_v54 = vsel %vm560_vm1, %v634_v41, %v633_v43  ;;  %v645_v41 = vrot.slane %v4375_v19, 1 }
  0x63   : > { %755 = vrot.lane.b32.xlu1 %v4553_v17, %s4013_s29  ;;  %v638_v17 = vrot.slane %v4342_v9, 1  ;;  %8221 = vst [vmem:[#allocation92_spill] sm:$0xff] %v4577_v54 }
  0x65   : > { %v4584_v26 = vsel %vm560_vm1, %v637_v50, %v638_v17 }
  0x66   : > { %757 = vrot.lane.b32.xlu0 %v4560_v36, %s4013_s29  ;;  %8222 = vst [vmem:[#allocation93_spill] sm:$0xff] %v4584_v26  ;;  %v4589_v36 = vsel %vm560_vm1, %v638_v17, %v637_v50  ;;  %v649_v50 = vrot.slane %v4398_v51, 1 }
  0x67   : > { %759 = vrot.lane.b32.xlu1 %v4565_v3, %s4013_s29  ;;  %v642_v3 = vrot.slane %v4356_v23, 1  ;;  %8223 = vst [vmem:[#allocation94_spill] sm:$0xff] %v4589_v36 }
  0x69   : > { %v4596_v43 = vsel %vm560_vm1, %v641_v58, %v642_v3 }
  0x6a   : > { %761 = vrot.lane.b32.xlu0 %v4572_v22, %s4013_s29  ;;  %8224 = vst [vmem:[#allocation95_spill] sm:$0xff] %v4596_v43  ;;  %v4601_v22 = vsel %vm560_vm1, %v642_v3, %v641_v58  ;;  %v653_v58 = vrot.slane %v4414_v35, 1 }
  0x6b   : > { %763 = vrot.lane.b32.xlu1 %v4577_v54, %s4013_s29  ;;  %v646_v54 = vrot.slane %v4372_v18, 1  ;;  %8225 = vst [vmem:[#allocation96_spill] sm:$0xff] %v4601_v22 }
  0x6d   : > { %v4608_v17 = vsel %vm560_vm1, %v645_v41, %v646_v54 }
  0x6e   : > { %765 = vrot.lane.b32.xlu0 %v4584_v26, %s4013_s29  ;;  %8226 = vst [vmem:[#allocation97_spill] sm:$0xff] %v4608_v17  ;;  %v4613_v26 = vsel %vm560_vm1, %v646_v54, %v645_v41  ;;  %v657_v41 = vrot.slane %v4431_v63, 1 }
  0x6f   : > { %767 = vrot.lane.b32.xlu1 %v4589_v36, %s4013_s29  ;;  %v650_v36 = vrot.slane %v4395_v42, 1  ;;  %8227 = vst [vmem:[#allocation98_spill] sm:$0xff] %v4613_v26 }
  0x71   : > { %v4620_v3 = vsel %vm560_vm1, %v649_v50, %v650_v36 }
  0x72   : > { %769 = vrot.lane.b32.xlu0 %v4596_v43, %s4013_s29  ;;  %8228 = vst [vmem:[#allocation99_spill] sm:$0xff] %v4620_v3  ;;  %v4625_v43 = vsel %vm560_vm1, %v650_v36, %v649_v50  ;;  %v661_v50 = vrot.slane %v4444_v52, 1 }
  0x73   : > { %771 = vrot.lane.b32.xlu1 %v4601_v22, %s4013_s29  ;;  %v654_v22 = vrot.slane %v4411_v4, 1  ;;  %8229 = vst [vmem:[#allocation100_spill] sm:$0xff] %v4625_v43 }
  0x75   : > { %v4632_v54 = vsel %vm560_vm1, %v653_v58, %v654_v22 }
  0x76   : > { %773 = vrot.lane.b32.xlu0 %v4608_v17, %s4013_s29  ;;  %8230 = vst [vmem:[#allocation101_spill] sm:$0xff] %v4632_v54  ;;  %v4637_v17 = vsel %vm560_vm1, %v654_v22, %v653_v58  ;;  %v665_v58 = vrot.slane %v4463_v30, 1 }
  0x77   : > { %775 = vrot.lane.b32.xlu1 %v4613_v26, %s4013_s29  ;;  %v658_v26 = vrot.slane %v4428_v1, 1  ;;  %8231 = vst [vmem:[#allocation102_spill] sm:$0xff] %v4637_v17 }
  0x79   : > { %v4644_v36 = vsel %vm560_vm1, %v657_v41, %v658_v26 }
  0x7a   : > { %777 = vrot.lane.b32.xlu0 %v4620_v3, %s4013_s29  ;;  %8232 = vst [vmem:[#allocation103_spill] sm:$0xff] %v4644_v36  ;;  %v4649_v3 = vsel %vm560_vm1, %v658_v26, %v657_v41  ;;  %v669_v41 = vrot.slane %v4477_v2, 1 }
  0x7b   : > { %779 = vrot.lane.b32.xlu1 %v4625_v43, %s4013_s29  ;;  %v662_v43 = vrot.slane %v4441_v44, 1  ;;  %8233 = vst [vmem:[#allocation104_spill] sm:$0xff] %v4649_v3 }
  0x7d   : > { %v4656_v22 = vsel %vm560_vm1, %v661_v50, %v662_v43 }
  0x7e   : > { %781 = vrot.lane.b32.xlu0 %v4632_v54, %s4013_s29  ;;  %8234 = vst [vmem:[#allocation105_spill] sm:$0xff] %v4656_v22  ;;  %v4661_v54 = vsel %vm560_vm1, %v662_v43, %v661_v50  ;;  %v673_v50 = vrot.slane %v4497_v61, 1 }
  0x7f   : > { %783 = vrot.lane.b32.xlu1 %v4637_v17, %s4013_s29  ;;  %v666_v17 = vrot.slane %v4460_v27, 1  ;;  %8235 = vst [vmem:[#allocation106_spill] sm:$0xff] %v4661_v54 }
  0x81   : > { %v4668_v26 = vsel %vm560_vm1, %v665_v58, %v666_v17 }
  0x82   : > { %785 = vrot.lane.b32.xlu0 %v4644_v36, %s4013_s29  ;;  %8236 = vst [vmem:[#allocation107_spill] sm:$0xff] %v4668_v26  ;;  %v4673_v36 = vsel %vm560_vm1, %v666_v17, %v665_v58  ;;  %v677_v58 = vrot.slane %v4508_v37, 1 }
  0x83   : > { %787 = vrot.lane.b32.xlu1 %v4649_v3, %s4013_s29  ;;  %v670_v3 = vrot.slane %v4474_v59, 1  ;;  %8237 = vst [vmem:[#allocation108_spill] sm:$0xff] %v4673_v36 }
  0x85   : > { %v4680_v43 = vsel %vm560_vm1, %v669_v41, %v670_v3 }
  0x86   : > { %789 = vrot.lane.b32.xlu0 %v4656_v22, %s4013_s29  ;;  %8238 = vst [vmem:[#allocation109_spill] sm:$0xff] %v4680_v43  ;;  %v4685_v22 = vsel %vm560_vm1, %v670_v3, %v669_v41  ;;  %v681_v41 = vrot.slane %v4523_v46, 1 }
  0x87   : > { %791 = vrot.lane.b32.xlu1 %v4661_v54, %s4013_s29  ;;  %v674_v54 = vrot.slane %v4494_v28, 1  ;;  %8239 = vst [vmem:[#allocation110_spill] sm:$0xff] %v4685_v22 }
  0x89   : > { %v4692_v17 = vsel %vm560_vm1, %v673_v50, %v674_v54 }
  0x8a   : > { %793 = vrot.lane.b32.xlu0 %v4668_v26, %s4013_s29  ;;  %8240 = vst [vmem:[#allocation111_spill] sm:$0xff] %v4692_v17  ;;  %v4697_v26 = vsel %vm560_vm1, %v674_v54, %v673_v50 }
  0x8b   : > { %795 = vrot.lane.b32.xlu1 %v4673_v36, %s4013_s29  ;;  %v678_v36 = vrot.slane %v4505_v32, 1  ;;  %8241 = vst [vmem:[#allocation112_spill] sm:$0xff] %v4697_v26 }
  0x8d   : > { %v4704_v3 = vsel %vm560_vm1, %v677_v58, %v678_v36  ;;  %v4711_v31 = vsel %vm560_vm1, %v678_v36, %v677_v58 }
  0x8e   : > { %797 = vrot.lane.b32.xlu0 %v4680_v43, %s4013_s29  ;;  %8242 = vst [vmem:[#allocation113_spill] sm:$0xff] %v4704_v3  ;;  %8244 = vst [vmem:[#allocation115_spill] sm:$0xff] %v4711_v31 }
  0x8f   : > { %799 = vrot.lane.b32.xlu1 %v4685_v22, %s4013_s29  ;;  %v682_v22 = vrot.slane %v4520_v47, 1 }
  0x91   : > { %v4720_v50 = vsel %vm560_vm1, %v681_v41, %v682_v22  ;;  %v4727_v36 = vsel %vm560_vm1, %v682_v22, %v681_v41 }
  0x92   : > { %801 = vrot.lane.b32.xlu0 %v4692_v17, %s4013_s29  ;;  %8246 = vst [vmem:[#allocation117_spill] sm:$0xff] %v4720_v50  ;;  %v686_v17 = vrot.slane %v4528_v29, 1  ;;  %8248 = vst [vmem:[#allocation119_spill] sm:$0xff] %v4727_v36 }
  0x93   : > { %803 = vrot.lane.b32.xlu1 %v4697_v26, %s4013_s29  ;;  %v685_v26 = vrot.slane %v4531_v5, 1 }
  0x94   : > { %v4708_v43 = vpop.permute.xlu0 %689 }
  0x95   : > { %8243 = vst [vmem:[#allocation114_spill] sm:$0xff] %v4708_v43  ;;  %v4713_v54 = vpop.permute.xlu1 %693  ;;  %v882_v43 = vrot.slane %v4109_v15, 2  ;;  %v4743_v22 = vsel %vm560_vm1, %v686_v17, %v685_v26 }
  0x96   : > { %8245 = vst [vmem:[#allocation116_spill] sm:$0xff] %v4713_v54  ;;  %805 = vrot.lane.b32.xlu0 %v4704_v3, %s4013_s29  ;;  %v4736_v54 = vsel %vm560_vm1, %v685_v26, %v686_v17  ;;  %8252 = vst [vmem:[#allocation123_spill] sm:$0xff] %v4743_v22 }
  0x97   : > { %807 = vrot.lane.b32.xlu1 %v4711_v31, %s4013_s29  ;;  %8250 = vst [vmem:[#allocation121_spill] sm:$0xff] %v4736_v54  ;;  %v883_v31 = vrot.slane %v4106_v14, 2 }
  0x98   : > { %v4724_v53 = vpop.permute.xlu0 %691 }
  0x99   : > { %8247 = vst [vmem:[#allocation118_spill] sm:$0xff] %v4724_v53  ;;  %v4729_v58 = vpop.permute.xlu1 %695  ;;  %v886_v53 = vrot.slane %v4117_v21, 2  ;;  %v4759_v26 = vsel %vm881_vm2, %v883_v31, %v882_v43 }
  0x9a   : > { %8249 = vst [vmem:[#allocation120_spill] sm:$0xff] %v4729_v58  ;;  %809 = vrot.lane.b32.xlu0 %v4720_v50, %s4013_s29  ;;  %v4752_v58 = vsel %vm881_vm2, %v882_v43, %v883_v31  ;;  %8256 = vst [vmem:[#allocation127_spill] sm:$0xff] %v4759_v26 }
  0x9b   : > { %811 = vrot.lane.b32.xlu1 %v4727_v36, %s4013_s29  ;;  %8254 = vst [vmem:[#allocation125_spill] sm:$0xff] %v4752_v58  ;;  %v887_v36 = vrot.slane %v4114_v20, 2 }
  0x9c   : > { %v4740_v3 = vpop.permute.xlu0 %697 }
  0x9d   : > { %8251 = vst [vmem:[#allocation122_spill] sm:$0xff] %v4740_v3  ;;  %v4745_v41 = vpop.permute.xlu1 %699  ;;  %v4775_v31 = vsel %vm881_vm2, %v887_v36, %v886_v53 }
  0x9e   : > { %8253 = vst [vmem:[#allocation124_spill] sm:$0xff] %v4745_v41  ;;  %813 = vrot.lane.b32.xlu0 %v4736_v54, %s4013_s29  ;;  %v4768_v41 = vsel %vm881_vm2, %v886_v53, %v887_v36  ;;  %v891_v54 = vrot.slane %v4122_v24, 2  ;;  %8260 = vst [vmem:[#allocation131_spill] sm:$0xff] %v4775_v31 }
  0x9f   : > { %815 = vrot.lane.b32.xlu1 %v4743_v22, %s4013_s29  ;;  %8258 = vst [vmem:[#allocation129_spill] sm:$0xff] %v4768_v41  ;;  %v890_v22 = vrot.slane %v4125_v25, 2 }
  0xa0   : > { %v4756_v3 = vpop.permute.xlu0 %701 }
  0xa1   : > { %8255 = vst [vmem:[#allocation126_spill] sm:$0xff] %v4756_v3  ;;  %v4761_v17 = vpop.permute.xlu1 %703  ;;  %v4791_v53 = vsel %vm881_vm2, %v891_v54, %v890_v22 }
  0xa2   : > { %8257 = vst [vmem:[#allocation128_spill] sm:$0xff] %v4761_v17  ;;  %1010 = vrot.lane.b32.xlu0 %v4752_v58, %s4014_s30  ;;  %v4784_v17 = vsel %vm881_vm2, %v890_v22, %v891_v54  ;;  %v895_v58 = vrot.slane %v4145_v33, 2  ;;  %8264 = vst [vmem:[#allocation135_spill] sm:$0xff] %v4791_v53 }
  0xa3   : > { %1012 = vrot.lane.b32.xlu1 %v4759_v26, %s4014_s30  ;;  %8262 = vst [vmem:[#allocation133_spill] sm:$0xff] %v4784_v17  ;;  %v894_v26 = vrot.slane %v4148_v34, 2 }
  0xa4   : > { %v4772_v3 = vpop.permute.xlu0 %705 }
  0xa5   : > { %8259 = vst [vmem:[#allocation130_spill] sm:$0xff] %v4772_v3  ;;  %v4777_v43 = vpop.permute.xlu1 %707  ;;  %v898_v3 = vrot.slane %v4173_v49, 2  ;;  %v4807_v54 = vsel %vm881_vm2, %v895_v58, %v894_v26 }
  0xa6   : > { %8261 = vst [vmem:[#allocation132_spill] sm:$0xff] %v4777_v43  ;;  %1014 = vrot.lane.b32.xlu0 %v4768_v41, %s4014_s30  ;;  %v4800_v43 = vsel %vm881_vm2, %v894_v26, %v895_v58  ;;  %8268 = vst [vmem:[#allocation139_spill] sm:$0xff] %v4807_v54 }
  0xa7   : > { %1016 = vrot.lane.b32.xlu1 %v4775_v31, %s4014_s30  ;;  %8266 = vst [vmem:[#allocation137_spill] sm:$0xff] %v4800_v43  ;;  %v899_v31 = vrot.slane %v4170_v48, 2 }
  0xa8   : > { %v4788_v50 = vpop.permute.xlu0 %709 }
  0xa9   : > { %8263 = vst [vmem:[#allocation134_spill] sm:$0xff] %v4788_v50  ;;  %v4793_v36 = vpop.permute.xlu1 %711  ;;  %v902_v50 = vrot.slane %v4188_v56, 2  ;;  %v4823_v58 = vsel %vm881_vm2, %v899_v31, %v898_v3 }
  0xaa   : > { %8265 = vst [vmem:[#allocation136_spill] sm:$0xff] %v4793_v36  ;;  %1018 = vrot.lane.b32.xlu0 %v4784_v17, %s4014_s30  ;;  %v4816_v36 = vsel %vm881_vm2, %v898_v3, %v899_v31  ;;  %8272 = vst [vmem:[#allocation143_spill] sm:$0xff] %v4823_v58 }
  0xab   : > { %1020 = vrot.lane.b32.xlu1 %v4791_v53, %s4014_s30  ;;  %8270 = vst [vmem:[#allocation141_spill] sm:$0xff] %v4816_v36  ;;  %v903_v53 = vrot.slane %v4185_v55, 2 }
  0xac   : > { %v4804_v41 = vpop.permute.xlu0 %713 }
  0xad   : > { %8267 = vst [vmem:[#allocation138_spill] sm:$0xff] %v4804_v41  ;;  %v4809_v22 = vpop.permute.xlu1 %715  ;;  %v906_v41 = vrot.slane %v4208_v0, 2  ;;  %v4839_v3 = vsel %vm881_vm2, %v903_v53, %v902_v50 }
  0xae   : > { %8269 = vst [vmem:[#allocation140_spill] sm:$0xff] %v4809_v22  ;;  %1022 = vrot.lane.b32.xlu0 %v4800_v43, %s4014_s30  ;;  %v4832_v22 = vsel %vm881_vm2, %v902_v50, %v903_v53  ;;  %8276 = vst [vmem:[#allocation147_spill] sm:$0xff] %v4839_v3 }
  0xaf   : > { %1024 = vrot.lane.b32.xlu1 %v4807_v54, %s4014_s30  ;;  %8274 = vst [vmem:[#allocation145_spill] sm:$0xff] %v4832_v22  ;;  %v907_v54 = vrot.slane %v4200_v62, 2 }
  0xb0   : > { %v4820_v17 = vpop.permute.xlu0 %717 }
  0xb1   : > { %8271 = vst [vmem:[#allocation142_spill] sm:$0xff] %v4820_v17  ;;  %v4825_v26 = vpop.permute.xlu1 %719  ;;  %v910_v17 = vrot.slane %v4230_v12, 2  ;;  %v4855_v50 = vsel %vm881_vm2, %v907_v54, %v906_v41 }
  0xb2   : > { %8273 = vst [vmem:[#allocation144_spill] sm:$0xff] %v4825_v26  ;;  %1026 = vrot.lane.b32.xlu0 %v4816_v36, %s4014_s30  ;;  %v4848_v26 = vsel %vm881_vm2, %v906_v41, %v907_v54  ;;  %8280 = vst [vmem:[#allocation151_spill] sm:$0xff] %v4855_v50 }
  0xb3   : > { %1028 = vrot.lane.b32.xlu1 %v4823_v58, %s4014_s30  ;;  %8278 = vst [vmem:[#allocation149_spill] sm:$0xff] %v4848_v26  ;;  %v911_v58 = vrot.slane %v4227_v11, 2 }
  0xb4   : > { %v4836_v43 = vpop.permute.xlu0 %721 }
  0xb5   : > { %8275 = vst [vmem:[#allocation146_spill] sm:$0xff] %v4836_v43  ;;  %v4841_v31 = vpop.permute.xlu1 %723  ;;  %v8283_v43 = vld [vmem:[#allocation28_spill] sm:$0xff]  ;;  %v4871_v41 = vsel %vm881_vm2, %v911_v58, %v910_v17 }
  0xb6   : > { %8277 = vst [vmem:[#allocation148_spill] sm:$0xff] %v4841_v31  ;;  %1030 = vrot.lane.b32.xlu0 %v4832_v22, %s4014_s30  ;;  %v4864_v31 = vsel %vm881_vm2, %v910_v17, %v911_v58  ;;  %v8284_v22 = vld [vmem:[#allocation27_spill] sm:$0xff]  ;;  %8286 = vst [vmem:[#allocation155_spill] sm:$0xff] %v4871_v41 }
  0xb7   : > { %1032 = vrot.lane.b32.xlu1 %v4839_v3, %s4014_s30  ;;  %8282 = vst [vmem:[#allocation153_spill] sm:$0xff] %v4864_v31  ;;  %v914_v3 = vrot.slane %v8283_v43, 2  ;;  %v915_v45 = vrot.slane %v8284_v22, 2 }
  0xb8   : > { %v4852_v36 = vpop.permute.xlu0 %725 }
  0xb9   : > { %8279 = vst [vmem:[#allocation150_spill] sm:$0xff] %v4852_v36  ;;  %v4857_v53 = vpop.permute.xlu1 %727  ;;  %v8289_v36 = vld [vmem:[#allocation31_spill] sm:$0xff]  ;;  %v4887_v17 = vsel %vm881_vm2, %v915_v45, %v914_v3 }
  0xba   : > { %8281 = vst [vmem:[#allocation152_spill] sm:$0xff] %v4857_v53  ;;  %1034 = vrot.lane.b32.xlu0 %v4848_v26, %s4014_s30  ;;  %v4880_v53 = vsel %vm881_vm2, %v914_v3, %v915_v45  ;;  %v8290_v26 = vld [vmem:[#allocation30_spill] sm:$0xff]  ;;  %8292 = vst [vmem:[#allocation159_spill] sm:$0xff] %v4887_v17 }
  0xbb   : > { %1036 = vrot.lane.b32.xlu1 %v4855_v50, %s4014_s30  ;;  %8288 = vst [vmem:[#allocation157_spill] sm:$0xff] %v4880_v53  ;;  %v918_v50 = vrot.slane %v8289_v36, 2  ;;  %v919_v14 = vrot.slane %v8290_v26, 2 }
  0xbc   : > { %v4868_v57 = vpop.permute.xlu0 %729 }
  0xbd   : > { %8285 = vst [vmem:[#allocation154_spill] sm:$0xff] %v4868_v57  ;;  %v4873_v54 = vpop.permute.xlu1 %731  ;;  %v8295_v57 = vld [vmem:[#allocation43_spill] sm:$0xff]  ;;  %v4903_v45 = vsel %vm881_vm2, %v919_v14, %v918_v50 }
  0xbe   : > { %8287 = vst [vmem:[#allocation156_spill] sm:$0xff] %v4873_v54  ;;  %1038 = vrot.lane.b32.xlu0 %v4864_v31, %s4014_s30  ;;  %v4896_v54 = vsel %vm881_vm2, %v918_v50, %v919_v14  ;;  %v8296_v31 = vld [vmem:[#allocation42_spill] sm:$0xff]  ;;  %8298 = vst [vmem:[#allocation163_spill] sm:$0xff] %v4903_v45 }
  0xbf   : > { %1040 = vrot.lane.b32.xlu1 %v4871_v41, %s4014_s30  ;;  %8294 = vst [vmem:[#allocation161_spill] sm:$0xff] %v4896_v54  ;;  %v922_v41 = vrot.slane %v8295_v57, 2  ;;  %v923_v26 = vrot.slane %v8296_v31, 2 }
  0xc0   : > { %v4884_v15 = vpop.permute.xlu0 %733 }
  0xc1   : > { %8291 = vst [vmem:[#allocation158_spill] sm:$0xff] %v4884_v15  ;;  %v4889_v58 = vpop.permute.xlu1 %735  ;;  %v8301_v15 = vld [vmem:[#allocation45_spill] sm:$0xff]  ;;  %v4919_v14 = vsel %vm881_vm2, %v923_v26, %v922_v41 }
  0xc2   : > { %8293 = vst [vmem:[#allocation160_spill] sm:$0xff] %v4889_v58  ;;  %1042 = vrot.lane.b32.xlu0 %v4880_v53, %s4014_s30  ;;  %v4912_v58 = vsel %vm881_vm2, %v922_v41, %v923_v26  ;;  %v8302_v53 = vld [vmem:[#allocation44_spill] sm:$0xff]  ;;  %8304 = vst [vmem:[#allocation167_spill] sm:$0xff] %v4919_v14 }
  0xc3   : > { %1044 = vrot.lane.b32.xlu1 %v4887_v17, %s4014_s30  ;;  %8300 = vst [vmem:[#allocation165_spill] sm:$0xff] %v4912_v58  ;;  %v926_v17 = vrot.slane %v8301_v15, 2  ;;  %v927_v31 = vrot.slane %v8302_v53, 2 }
  0xc4   : > { %v4900_v36 = vpop.permute.xlu0 %737 }
  0xc5   : > { %8297 = vst [vmem:[#allocation162_spill] sm:$0xff] %v4900_v36  ;;  %v4905_v3 = vpop.permute.xlu1 %739  ;;  %v8307_v36 = vld [vmem:[#allocation47_spill] sm:$0xff]  ;;  %v4935_v26 = vsel %vm881_vm2, %v927_v31, %v926_v17 }
  0xc6   : > { %8299 = vst [vmem:[#allocation164_spill] sm:$0xff] %v4905_v3  ;;  %1046 = vrot.lane.b32.xlu0 %v4896_v54, %s4014_s30  ;;  %v4928_v3 = vsel %vm881_vm2, %v926_v17, %v927_v31  ;;  %v8308_v54 = vld [vmem:[#allocation46_spill] sm:$0xff]  ;;  %8310 = vst [vmem:[#allocation171_spill] sm:$0xff] %v4935_v26 }
  0xc7   : > { %1048 = vrot.lane.b32.xlu1 %v4903_v45, %s4014_s30  ;;  %8306 = vst [vmem:[#allocation169_spill] sm:$0xff] %v4928_v3  ;;  %v930_v45 = vrot.slane %v8307_v36, 2  ;;  %v931_v53 = vrot.slane %v8308_v54, 2 }
  0xc8   : > { %v4916_v57 = vpop.permute.xlu0 %741 }
  0xc9   : > { %8303 = vst [vmem:[#allocation166_spill] sm:$0xff] %v4916_v57  ;;  %v4921_v50 = vpop.permute.xlu1 %743  ;;  %v8313_v57 = vld [vmem:[#allocation55_spill] sm:$0xff]  ;;  %v4951_v31 = vsel %vm881_vm2, %v931_v53, %v930_v45 }
  0xca   : > { %8305 = vst [vmem:[#allocation168_spill] sm:$0xff] %v4921_v50  ;;  %1050 = vrot.lane.b32.xlu0 %v4912_v58, %s4014_s30  ;;  %v4944_v50 = vsel %vm881_vm2, %v930_v45, %v931_v53  ;;  %v8314_v58 = vld [vmem:[#allocation54_spill] sm:$0xff]  ;;  %8316 = vst [vmem:[#allocation175_spill] sm:$0xff] %v4951_v31 }
  0xcb   : > { %1052 = vrot.lane.b32.xlu1 %v4919_v14, %s4014_s30  ;;  %8312 = vst [vmem:[#allocation173_spill] sm:$0xff] %v4944_v50  ;;  %v934_v14 = vrot.slane %v8313_v57, 2  ;;  %v935_v54 = vrot.slane %v8314_v58, 2 }
  0xcc   : > { %v4932_v15 = vpop.permute.xlu0 %745 }
  0xcd   : > { %8309 = vst [vmem:[#allocation170_spill] sm:$0xff] %v4932_v15  ;;  %v4937_v41 = vpop.permute.xlu1 %747  ;;  %v8319_v15 = vld [vmem:[#allocation64_spill] sm:$0xff]  ;;  %v4967_v53 = vsel %vm881_vm2, %v935_v54, %v934_v14 }
  0xce   : > { %8311 = vst [vmem:[#allocation172_spill] sm:$0xff] %v4937_v41  ;;  %1054 = vrot.lane.b32.xlu0 %v4928_v3, %s4014_s30  ;;  %v4960_v41 = vsel %vm881_vm2, %v934_v14, %v935_v54  ;;  %v8320_v3 = vld [vmem:[#allocation66_spill] sm:$0xff]  ;;  %8322 = vst [vmem:[#allocation179_spill] sm:$0xff] %v4967_v53 }
  0xcf   : > { %1056 = vrot.lane.b32.xlu1 %v4935_v26, %s4014_s30  ;;  %8318 = vst [vmem:[#allocation177_spill] sm:$0xff] %v4960_v41  ;;  %v938_v26 = vrot.slane %v8319_v15, 2  ;;  %v939_v58 = vrot.slane %v8320_v3, 2 }
  0xd0   : > { %v4948_v36 = vpop.permute.xlu0 %749 }
  0xd1   : > { %8315 = vst [vmem:[#allocation174_spill] sm:$0xff] %v4948_v36  ;;  %v4953_v17 = vpop.permute.xlu1 %751  ;;  %v942_v36 = vrot.slane %v4483_v40, 2  ;;  %v4983_v54 = vsel %vm881_vm2, %v939_v58, %v938_v26 }
  0xd2   : > { %8317 = vst [vmem:[#allocation176_spill] sm:$0xff] %v4953_v17  ;;  %1058 = vrot.lane.b32.xlu0 %v4944_v50, %s4014_s30  ;;  %v4976_v17 = vsel %vm881_vm2, %v938_v26, %v939_v58  ;;  %8326 = vst [vmem:[#allocation183_spill] sm:$0xff] %v4983_v54 }
  0xd3   : > { %1060 = vrot.lane.b32.xlu1 %v4951_v31, %s4014_s30  ;;  %8324 = vst [vmem:[#allocation181_spill] sm:$0xff] %v4976_v17  ;;  %v943_v31 = vrot.slane %v4489_v60, 2 }
  0xd4   : > { %v4964_v57 = vpop.permute.xlu0 %753 }
  0xd5   : > { %8321 = vst [vmem:[#allocation178_spill] sm:$0xff] %v4964_v57  ;;  %v4969_v45 = vpop.permute.xlu1 %755  ;;  %v946_v57 = vrot.slane %v4287_v16, 2  ;;  %v4999_v58 = vsel %vm881_vm2, %v943_v31, %v942_v36 }
  0xd6   : > { %8323 = vst [vmem:[#allocation180_spill] sm:$0xff] %v4969_v45  ;;  %1062 = vrot.lane.b32.xlu0 %v4960_v41, %s4014_s30  ;;  %v4992_v45 = vsel %vm881_vm2, %v942_v36, %v943_v31  ;;  %8330 = vst [vmem:[#allocation187_spill] sm:$0xff] %v4999_v58 }
  0xd7   : > { %1064 = vrot.lane.b32.xlu1 %v4967_v53, %s4014_s30  ;;  %8328 = vst [vmem:[#allocation185_spill] sm:$0xff] %v4992_v45  ;;  %v947_v53 = vrot.slane %v4284_v13, 2 }
  0xd8   : > { %v4980_v50 = vpop.permute.xlu0 %757 }
  0xd9   : > { %8325 = vst [vmem:[#allocation182_spill] sm:$0xff] %v4980_v50  ;;  %v4985_v14 = vpop.permute.xlu1 %759  ;;  %v950_v50 = vrot.slane %v4303_v39, 2  ;;  %v5015_v36 = vsel %vm881_vm2, %v947_v53, %v946_v57 }
  0xda   : > { %8327 = vst [vmem:[#allocation184_spill] sm:$0xff] %v4985_v14  ;;  %1066 = vrot.lane.b32.xlu0 %v4976_v17, %s4014_s30  ;;  %v5008_v14 = vsel %vm881_vm2, %v946_v57, %v947_v53  ;;  %8334 = vst [vmem:[#allocation191_spill] sm:$0xff] %v5015_v36 }
  0xdb   : > { %1068 = vrot.lane.b32.xlu1 %v4983_v54, %s4014_s30  ;;  %8332 = vst [vmem:[#allocation189_spill] sm:$0xff] %v5008_v14  ;;  %v951_v54 = vrot.slane %v4300_v38, 2 }
  0xdc   : > { %v4996_v41 = vpop.permute.xlu0 %761 }
  0xdd   : > { %8329 = vst [vmem:[#allocation186_spill] sm:$0xff] %v4996_v41  ;;  %v5001_v26 = vpop.permute.xlu1 %763  ;;  %v954_v41 = vrot.slane %v4333_v7, 2  ;;  %v5031_v57 = vsel %vm881_vm2, %v951_v54, %v950_v50 }
  0xde   : > { %8331 = vst [vmem:[#allocation188_spill] sm:$0xff] %v5001_v26  ;;  %1070 = vrot.lane.b32.xlu0 %v4992_v45, %s4014_s30  ;;  %v5024_v26 = vsel %vm881_vm2, %v950_v50, %v951_v54  ;;  %8338 = vst [vmem:[#allocation195_spill] sm:$0xff] %v5031_v57 }
  0xdf   : > { %1072 = vrot.lane.b32.xlu1 %v4999_v58, %s4014_s30  ;;  %8336 = vst [vmem:[#allocation193_spill] sm:$0xff] %v5024_v26  ;;  %v955_v58 = vrot.slane %v4330_v6, 2 }
  0xe0   : > { %v5012_v17 = vpop.permute.xlu0 %765 }
  0xe1   : > { %8333 = vst [vmem:[#allocation190_spill] sm:$0xff] %v5012_v17  ;;  %v5017_v31 = vpop.permute.xlu1 %767  ;;  %v958_v17 = vrot.slane %v4345_v10, 2  ;;  %v5047_v50 = vsel %vm881_vm2, %v955_v58, %v954_v41 }
  0xe2   : > { %8335 = vst [vmem:[#allocation192_spill] sm:$0xff] %v5017_v31  ;;  %1074 = vrot.lane.b32.xlu0 %v5008_v14, %s4014_s30  ;;  %v5040_v31 = vsel %vm881_vm2, %v954_v41, %v955_v58  ;;  %8342 = vst [vmem:[#allocation199_spill] sm:$0xff] %v5047_v50 }
  0xe3   : > { %1076 = vrot.lane.b32.xlu1 %v5015_v36, %s4014_s30  ;;  %8340 = vst [vmem:[#allocation197_spill] sm:$0xff] %v5040_v31  ;;  %v959_v36 = vrot.slane %v4342_v9, 2 }
  0xe4   : > { %v5028_v45 = vpop.permute.xlu0 %769 }
  0xe5   : > { %8337 = vst [vmem:[#allocation194_spill] sm:$0xff] %v5028_v45  ;;  %v5033_v53 = vpop.permute.xlu1 %771  ;;  %v962_v45 = vrot.slane %v4359_v8, 2  ;;  %v5063_v41 = vsel %vm881_vm2, %v959_v36, %v958_v17 }
  0xe6   : > { %8339 = vst [vmem:[#allocation196_spill] sm:$0xff] %v5033_v53  ;;  %1078 = vrot.lane.b32.xlu0 %v5024_v26, %s4014_s30  ;;  %v5056_v53 = vsel %vm881_vm2, %v958_v17, %v959_v36  ;;  %8346 = vst [vmem:[#allocation203_spill] sm:$0xff] %v5063_v41 }
  0xe7   : > { %1080 = vrot.lane.b32.xlu1 %v5031_v57, %s4014_s30  ;;  %8344 = vst [vmem:[#allocation201_spill] sm:$0xff] %v5056_v53  ;;  %v963_v57 = vrot.slane %v4356_v23, 2 }
  0xe8   : > { %v5044_v14 = vpop.permute.xlu0 %773 }
  0xe9   : > { %8341 = vst [vmem:[#allocation198_spill] sm:$0xff] %v5044_v14  ;;  %v5049_v54 = vpop.permute.xlu1 %775  ;;  %v966_v14 = vrot.slane %v4375_v19, 2  ;;  %v5079_v17 = vsel %vm881_vm2, %v963_v57, %v962_v45 }
  0xea   : > { %8343 = vst [vmem:[#allocation200_spill] sm:$0xff] %v5049_v54  ;;  %1082 = vrot.lane.b32.xlu0 %v5040_v31, %s4014_s30  ;;  %v5072_v54 = vsel %vm881_vm2, %v962_v45, %v963_v57  ;;  %8350 = vst [vmem:[#allocation207_spill] sm:$0xff] %v5079_v17 }
  0xeb   : > { %1084 = vrot.lane.b32.xlu1 %v5047_v50, %s4014_s30  ;;  %8348 = vst [vmem:[#allocation205_spill] sm:$0xff] %v5072_v54  ;;  %v967_v50 = vrot.slane %v4372_v18, 2 }
  0xec   : > { %v5060_v26 = vpop.permute.xlu0 %777 }
  0xed   : > { %8345 = vst [vmem:[#allocation202_spill] sm:$0xff] %v5060_v26  ;;  %v5065_v58 = vpop.permute.xlu1 %779  ;;  %v970_v26 = vrot.slane %v4398_v51, 2  ;;  %v5095_v45 = vsel %vm881_vm2, %v967_v50, %v966_v14 }
  0xee   : > { %8347 = vst [vmem:[#allocation204_spill] sm:$0xff] %v5065_v58  ;;  %1086 = vrot.lane.b32.xlu0 %v5056_v53, %s4014_s30  ;;  %v5088_v58 = vsel %vm881_vm2, %v966_v14, %v967_v50  ;;  %8354 = vst [vmem:[#allocation211_spill] sm:$0xff] %v5095_v45 }
  0xef   : > { %1088 = vrot.lane.b32.xlu1 %v5063_v41, %s4014_s30  ;;  %8352 = vst [vmem:[#allocation209_spill] sm:$0xff] %v5088_v58  ;;  %v971_v41 = vrot.slane %v4395_v42, 2 }
  0xf0   : > { %v5076_v31 = vpop.permute.xlu0 %781 }
  0xf1   : > { %8349 = vst [vmem:[#allocation206_spill] sm:$0xff] %v5076_v31  ;;  %v5081_v36 = vpop.permute.xlu1 %783  ;;  %v974_v31 = vrot.slane %v4414_v35, 2  ;;  %v5111_v14 = vsel %vm881_vm2, %v971_v41, %v970_v26 }
  0xf2   : > { %8351 = vst [vmem:[#allocation208_spill] sm:$0xff] %v5081_v36  ;;  %1090 = vrot.lane.b32.xlu0 %v5072_v54, %s4014_s30  ;;  %v5104_v36 = vsel %vm881_vm2, %v970_v26, %v971_v41  ;;  %8358 = vst [vmem:[#allocation215_spill] sm:$0xff] %v5111_v14 }
  0xf3   : > { %1092 = vrot.lane.b32.xlu1 %v5079_v17, %s4014_s30  ;;  %8356 = vst [vmem:[#allocation213_spill] sm:$0xff] %v5104_v36  ;;  %v975_v17 = vrot.slane %v4411_v4, 2 }
  0xf4   : > { %v5092_v53 = vpop.permute.xlu0 %785 }
  0xf5   : > { %8353 = vst [vmem:[#allocation210_spill] sm:$0xff] %v5092_v53  ;;  %v5097_v57 = vpop.permute.xlu1 %787  ;;  %v978_v53 = vrot.slane %v4431_v63, 2  ;;  %v5127_v26 = vsel %vm881_vm2, %v975_v17, %v974_v31 }
  0xf6   : > { %8355 = vst [vmem:[#allocation212_spill] sm:$0xff] %v5097_v57  ;;  %1094 = vrot.lane.b32.xlu0 %v5088_v58, %s4014_s30  ;;  %v5120_v57 = vsel %vm881_vm2, %v974_v31, %v975_v17  ;;  %8362 = vst [vmem:[#allocation219_spill] sm:$0xff] %v5127_v26 }
  0xf7   : > { %1096 = vrot.lane.b32.xlu1 %v5095_v45, %s4014_s30  ;;  %8360 = vst [vmem:[#allocation217_spill] sm:$0xff] %v5120_v57  ;;  %v979_v45 = vrot.slane %v4428_v1, 2 }
  0xf8   : > { %v5108_v54 = vpop.permute.xlu0 %789 }
  0xf9   : > { %8357 = vst [vmem:[#allocation214_spill] sm:$0xff] %v5108_v54  ;;  %v5113_v50 = vpop.permute.xlu1 %791  ;;  %v982_v54 = vrot.slane %v4444_v52, 2  ;;  %v5143_v31 = vsel %vm881_vm2, %v979_v45, %v978_v53 }
  0xfa   : > { %8359 = vst [vmem:[#allocation216_spill] sm:$0xff] %v5113_v50  ;;  %1098 = vrot.lane.b32.xlu0 %v5104_v36, %s4014_s30  ;;  %v5136_v50 = vsel %vm881_vm2, %v978_v53, %v979_v45  ;;  %8366 = vst [vmem:[#allocation223_spill] sm:$0xff] %v5143_v31 }
  0xfb   : > { %1100 = vrot.lane.b32.xlu1 %v5111_v14, %s4014_s30  ;;  %8364 = vst [vmem:[#allocation221_spill] sm:$0xff] %v5136_v50  ;;  %v983_v14 = vrot.slane %v4441_v44, 2 }
  0xfc   : > { %v5124_v58 = vpop.permute.xlu0 %793 }
  0xfd   : > { %8361 = vst [vmem:[#allocation218_spill] sm:$0xff] %v5124_v58  ;;  %v5129_v41 = vpop.permute.xlu1 %795  ;;  %v986_v58 = vrot.slane %v4463_v30, 2  ;;  %v5159_v53 = vsel %vm881_vm2, %v983_v14, %v982_v54 }
  0xfe   : > { %8363 = vst [vmem:[#allocation220_spill] sm:$0xff] %v5129_v41  ;;  %1102 = vrot.lane.b32.xlu0 %v5120_v57, %s4014_s30  ;;  %v5152_v41 = vsel %vm881_vm2, %v982_v54, %v983_v14  ;;  %8370 = vst [vmem:[#allocation227_spill] sm:$0xff] %v5159_v53 }
  0xff   : > { %1104 = vrot.lane.b32.xlu1 %v5127_v26, %s4014_s30  ;;  %8368 = vst [vmem:[#allocation225_spill] sm:$0xff] %v5152_v41  ;;  %v987_v26 = vrot.slane %v4460_v27, 2 }
 0x100   : > { %v5140_v36 = vpop.permute.xlu0 %797 }
 0x101   : > { %8365 = vst [vmem:[#allocation222_spill] sm:$0xff] %v5140_v36  ;;  %v5145_v17 = vpop.permute.xlu1 %799  ;;  %v990_v36 = vrot.slane %v4477_v2, 2  ;;  %v5175_v54 = vsel %vm881_vm2, %v987_v26, %v986_v58 }
 0x102   : > { %8367 = vst [vmem:[#allocation224_spill] sm:$0xff] %v5145_v17  ;;  %1106 = vrot.lane.b32.xlu0 %v5136_v50, %s4014_s30  ;;  %v5168_v17 = vsel %vm881_vm2, %v986_v58, %v987_v26  ;;  %8374 = vst [vmem:[#allocation231_spill] sm:$0xff] %v5175_v54 }
 0x103   : > { %1108 = vrot.lane.b32.xlu1 %v5143_v31, %s4014_s30  ;;  %8372 = vst [vmem:[#allocation229_spill] sm:$0xff] %v5168_v17  ;;  %v991_v31 = vrot.slane %v4474_v59, 2 }
 0x104   : > { %v5156_v57 = vpop.permute.xlu0 %801 }
 0x105   : > { %8369 = vst [vmem:[#allocation226_spill] sm:$0xff] %v5156_v57  ;;  %v5161_v45 = vpop.permute.xlu1 %803  ;;  %v994_v57 = vrot.slane %v4497_v61, 2  ;;  %v5191_v58 = vsel %vm881_vm2, %v991_v31, %v990_v36 }
 0x106   : > { %8371 = vst [vmem:[#allocation228_spill] sm:$0xff] %v5161_v45  ;;  %1110 = vrot.lane.b32.xlu0 %v5152_v41, %s4014_s30  ;;  %v5184_v45 = vsel %vm881_vm2, %v990_v36, %v991_v31  ;;  %8378 = vst [vmem:[#allocation235_spill] sm:$0xff] %v5191_v58 }
 0x107   : > { %1112 = vrot.lane.b32.xlu1 %v5159_v53, %s4014_s30  ;;  %8376 = vst [vmem:[#allocation233_spill] sm:$0xff] %v5184_v45  ;;  %v995_v53 = vrot.slane %v4494_v28, 2 }
 0x108   : > { %v5172_v50 = vpop.permute.xlu0 %805 }
 0x109   : > { %8373 = vst [vmem:[#allocation230_spill] sm:$0xff] %v5172_v50  ;;  %v5177_v14 = vpop.permute.xlu1 %807  ;;  %v998_v50 = vrot.slane %v4508_v37, 2  ;;  %v5207_v36 = vsel %vm881_vm2, %v995_v53, %v994_v57 }
 0x10a   : > { %8375 = vst [vmem:[#allocation232_spill] sm:$0xff] %v5177_v14  ;;  %1114 = vrot.lane.b32.xlu0 %v5168_v17, %s4014_s30  ;;  %v5200_v14 = vsel %vm881_vm2, %v994_v57, %v995_v53  ;;  %8382 = vst [vmem:[#allocation239_spill] sm:$0xff] %v5207_v36 }
 0x10b   : > { %1116 = vrot.lane.b32.xlu1 %v5175_v54, %s4014_s30  ;;  %8380 = vst [vmem:[#allocation237_spill] sm:$0xff] %v5200_v14  ;;  %v999_v54 = vrot.slane %v4505_v32, 2 }
 0x10c   : > { %v5188_v41 = vpop.permute.xlu0 %809 }
 0x10d   : > { %8377 = vst [vmem:[#allocation234_spill] sm:$0xff] %v5188_v41  ;;  %v5193_v26 = vpop.permute.xlu1 %811  ;;  %v1002_v41 = vrot.slane %v4523_v46, 2  ;;  %v5223_v57 = vsel %vm881_vm2, %v999_v54, %v998_v50 }
 0x10e   : > { %8379 = vst [vmem:[#allocation236_spill] sm:$0xff] %v5193_v26  ;;  %1118 = vrot.lane.b32.xlu0 %v5184_v45, %s4014_s30  ;;  %v5216_v26 = vsel %vm881_vm2, %v998_v50, %v999_v54  ;;  %8386 = vst [vmem:[#allocation243_spill] sm:$0xff] %v5223_v57 }
 0x10f   : > { %1120 = vrot.lane.b32.xlu1 %v5191_v58, %s4014_s30  ;;  %8384 = vst [vmem:[#allocation241_spill] sm:$0xff] %v5216_v26  ;;  %v1003_v58 = vrot.slane %v4520_v47, 2 }
 0x110   : > { %v5204_v17 = vpop.permute.xlu0 %813 }
 0x111   : > { %8381 = vst [vmem:[#allocation238_spill] sm:$0xff] %v5204_v17  ;;  %v5209_v31 = vpop.permute.xlu1 %815  ;;  %v1006_v17 = vrot.slane %v4531_v5, 2  ;;  %v5239_v50 = vsel %vm881_vm2, %v1003_v58, %v1002_v41 }
 0x112   : > { %8383 = vst [vmem:[#allocation240_spill] sm:$0xff] %v5209_v31  ;;  %1122 = vrot.lane.b32.xlu0 %v5200_v14, %s4014_s30  ;;  %v5232_v31 = vsel %vm881_vm2, %v1002_v41, %v1003_v58  ;;  %8390 = vst [vmem:[#allocation247_spill] sm:$0xff] %v5239_v50 }
 0x113   : > { %1124 = vrot.lane.b32.xlu1 %v5207_v36, %s4014_s30  ;;  %8388 = vst [vmem:[#allocation245_spill] sm:$0xff] %v5232_v31  ;;  %v1007_v36 = vrot.slane %v4528_v29, 2 }
 0x114   : > { %v5220_v45 = vpop.permute.xlu0 %1010 }
 0x115   : > { %8385 = vst [vmem:[#allocation242_spill] sm:$0xff] %v5220_v45  ;;  %v5225_v53 = vpop.permute.xlu1 %1012 }
 0x116   : > { %8387 = vst [vmem:[#allocation244_spill] sm:$0xff] %v5225_v53  ;;  %1126 = vrot.lane.b32.xlu0 %v5216_v26, %s4014_s30  ;;  %v5248_v53 = vsel %vm881_vm2, %v1006_v17, %v1007_v36 }
 0x117   : > { %1128 = vrot.lane.b32.xlu1 %v5223_v57, %s4014_s30  ;;  %8392 = vst [vmem:[#allocation249_spill] sm:$0xff] %v5248_v53  ;;  %v5253_v57 = vsel %vm881_vm2, %v1007_v36, %v1006_v17 }
 0x118   : > { %v5236_v14 = vpop.permute.xlu0 %1014  ;;  %8394 = vst [vmem:[#allocation251_spill] sm:$0xff] %v5253_v57 }
 0x119   : > { %8389 = vst [vmem:[#allocation246_spill] sm:$0xff] %v5236_v14  ;;  %v5241_v54 = vpop.permute.xlu1 %1016 }
 0x11a   : > { %8391 = vst [vmem:[#allocation248_spill] sm:$0xff] %v5241_v54  ;;  %1130 = vrot.lane.b32.xlu0 %v5232_v31, %s4014_s30 }
 0x11b   : > { %1132 = vrot.lane.b32.xlu1 %v5239_v50, %s4014_s30 }
 0x11c   : > { %v5250_v45 = vpop.permute.xlu0 %1018 }
 0x11d   : > { %8393 = vst [vmem:[#allocation250_spill] sm:$0xff] %v5250_v45  ;;  %v5255_v14 = vpop.permute.xlu1 %1020  ;;  %v8415_v45 = vld [vmem:[#allocation30_spill] sm:$0xff] }
 0x11e   : > { %8395 = vst [vmem:[#allocation252_spill] sm:$0xff] %v5255_v14  ;;  %1134 = vrot.lane.b32.xlu0 %v5248_v53, %s4014_s30 }
 0x11f   : > { %1136 = vrot.lane.b32.xlu1 %v5253_v57, %s4014_s30  ;;  %s7723_s30 = scalar_lea.hbm %s7779_s3, %s3687_s25 }
 0x120   : > { %v5261_v41 = vpop.permute.xlu0 %1022 }
 0x121   : > { %8396 = vst [vmem:[#allocation253_spill] sm:$0xff] %v5261_v41  ;;  %v5263_v58 = vpop.permute.xlu1 %1024 }
 0x122   : > { %8397 = vst [vmem:[#allocation254_spill] sm:$0xff] %v5263_v58  ;;  %1202 = vrot.lane.b32.xlu0 %v4117_v21, %s4015_s4 }
 0x123   : > { %1204 = vrot.lane.b32.xlu1 %v4114_v20, %s4015_s4  ;;  %v8419_v20 = vld [vmem:[#allocation42_spill] sm:$0xff] }
 0x124   : > { %v5269_v17 = vpop.permute.xlu0 %1026 }
 0x125   : > { %8398 = vst [vmem:[#allocation255_spill] sm:$0xff] %v5269_v17  ;;  %v5271_v36 = vpop.permute.xlu1 %1028 }
 0x126   : > { %8399 = vst [vmem:[#allocation256_spill] sm:$0xff] %v5271_v36  ;;  %1206 = vrot.lane.b32.xlu0 %v4125_v25, %s4015_s4 }
 0x127   : > { %1208 = vrot.lane.b32.xlu1 %v4122_v24, %s4015_s4 }
 0x128   : > { %v5277_v41 = vpop.permute.xlu0 %1030 }
 0x129   : > { %8400 = vst [vmem:[#allocation257_spill] sm:$0xff] %v5277_v41  ;;  %v5279_v58 = vpop.permute.xlu1 %1032 }
 0x12a   : > { %8401 = vst [vmem:[#allocation258_spill] sm:$0xff] %v5279_v58  ;;  %1210 = vrot.lane.b32.xlu0 %v4148_v34, %s4015_s4 }
 0x12b   : > { %1212 = vrot.lane.b32.xlu1 %v4145_v33, %s4015_s4 }
 0x12c   : > { %v5285_v14 = vpop.permute.xlu0 %1034 }
 0x12d   : > { %8402 = vst [vmem:[#allocation259_spill] sm:$0xff] %v5285_v14  ;;  %v5287_v17 = vpop.permute.xlu1 %1036 }
 0x12e   : > { %8403 = vst [vmem:[#allocation260_spill] sm:$0xff] %v5287_v17  ;;  %1214 = vrot.lane.b32.xlu0 %v4173_v49, %s4015_s4 }
 0x12f   : > { %1216 = vrot.lane.b32.xlu1 %v4170_v48, %s4015_s4 }
 0x130   : > { %v5293_v36 = vpop.permute.xlu0 %1038 }
 0x131   : > { %8404 = vst [vmem:[#allocation261_spill] sm:$0xff] %v5293_v36  ;;  %v5295_v41 = vpop.permute.xlu1 %1040 }
 0x132   : > { %8405 = vst [vmem:[#allocation262_spill] sm:$0xff] %v5295_v41  ;;  %1218 = vrot.lane.b32.xlu0 %v4188_v56, %s4015_s4 }
 0x133   : > { %1220 = vrot.lane.b32.xlu1 %v4185_v55, %s4015_s4 }
 0x134   : > { %v5301_v58 = vpop.permute.xlu0 %1042 }
 0x135   : > { %8406 = vst [vmem:[#allocation263_spill] sm:$0xff] %v5301_v58  ;;  %v5303_v14 = vpop.permute.xlu1 %1044 }
 0x136   : > { %8407 = vst [vmem:[#allocation264_spill] sm:$0xff] %v5303_v14  ;;  %1222 = vrot.lane.b32.xlu0 %v4208_v0, %s4015_s4 }
 0x137   : > { %1224 = vrot.lane.b32.xlu1 %v4200_v62, %s4015_s4 }
 0x138   : > { %v5309_v17 = vpop.permute.xlu0 %1046 }
 0x139   : > { %8408 = vst [vmem:[#allocation265_spill] sm:$0xff] %v5309_v17  ;;  %v5311_v36 = vpop.permute.xlu1 %1048 }
 0x13a   : > { %8409 = vst [vmem:[#allocation266_spill] sm:$0xff] %v5311_v36  ;;  %1226 = vrot.lane.b32.xlu0 %v4230_v12, %s4015_s4  ;;  %v8414_v36 = vld [vmem:[#allocation31_spill] sm:$0xff] }
 0x13b   : > { %1228 = vrot.lane.b32.xlu1 %v4227_v11, %s4015_s4 }
 0x13c   : > { %v5317_v41 = vpop.permute.xlu0 %1050 }
 0x13d   : > { %8410 = vst [vmem:[#allocation267_spill] sm:$0xff] %v5317_v41  ;;  %v5319_v58 = vpop.permute.xlu1 %1052 }
 0x13e   : > { %8411 = vst [vmem:[#allocation268_spill] sm:$0xff] %v5319_v58  ;;  %1230 = vrot.lane.b32.xlu0 %v8283_v43, %s4015_s4  ;;  %v8418_v58 = vld [vmem:[#allocation43_spill] sm:$0xff] }
 0x13f   : > { %1232 = vrot.lane.b32.xlu1 %v8284_v22, %s4015_s4 }
 0x140   : > { %v5325_v14 = vpop.permute.xlu0 %1054 }
 0x141   : > { %8412 = vst [vmem:[#allocation269_spill] sm:$0xff] %v5325_v14  ;;  %v5327_v17 = vpop.permute.xlu1 %1056 }
 0x142   : > { %8413 = vst [vmem:[#allocation270_spill] sm:$0xff] %v5327_v17  ;;  %1234 = vrot.lane.b32.xlu0 %v8414_v36, %s4015_s4  ;;  %v8422_v17 = vld [vmem:[#allocation45_spill] sm:$0xff]  ;;  %v8423_v36 = vld [vmem:[#allocation44_spill] sm:$0xff] }
 0x143   : > { %1236 = vrot.lane.b32.xlu1 %v8415_v45, %s4015_s4 }
 0x144   : > { %v5333_v54 = vpop.permute.xlu0 %1058 }
 0x145   : > { %8416 = vst [vmem:[#allocation271_spill] sm:$0xff] %v5333_v54  ;;  %v5335_v41 = vpop.permute.xlu1 %1060 }
 0x146   : > { %8417 = vst [vmem:[#allocation272_spill] sm:$0xff] %v5335_v41  ;;  %1238 = vrot.lane.b32.xlu0 %v8418_v58, %s4015_s4  ;;  %v8426_v41 = vld [vmem:[#allocation47_spill] sm:$0xff]  ;;  %v8427_v58 = vld [vmem:[#allocation46_spill] sm:$0xff] }
 0x147   : > { %1240 = vrot.lane.b32.xlu1 %v8419_v20, %s4015_s4 }
 0x148   : > { %v5341_v21 = vpop.permute.xlu0 %1062 }
 0x149   : > { %8420 = vst [vmem:[#allocation273_spill] sm:$0xff] %v5341_v21  ;;  %v5343_v14 = vpop.permute.xlu1 %1064 }
 0x14a   : > { %8421 = vst [vmem:[#allocation274_spill] sm:$0xff] %v5343_v14  ;;  %1242 = vrot.lane.b32.xlu0 %v8422_v17, %s4015_s4  ;;  %v8430_v14 = vld [vmem:[#allocation55_spill] sm:$0xff]  ;;  %v8431_v17 = vld [vmem:[#allocation54_spill] sm:$0xff] }
 0x14b   : > { %1244 = vrot.lane.b32.xlu1 %v8423_v36, %s4015_s4 }
 0x14c   : > { %v5349_v45 = vpop.permute.xlu0 %1066 }
 0x14d   : > { %8424 = vst [vmem:[#allocation275_spill] sm:$0xff] %v5349_v45  ;;  %v5351_v54 = vpop.permute.xlu1 %1068 }
 0x14e   : > { %8425 = vst [vmem:[#allocation276_spill] sm:$0xff] %v5351_v54  ;;  %1246 = vrot.lane.b32.xlu0 %v8426_v41, %s4015_s4 }
 0x14f   : > { %1248 = vrot.lane.b32.xlu1 %v8427_v58, %s4015_s4 }
 0x150   : > { %v5357_v20 = vpop.permute.xlu0 %1070 }
 0x151   : > { %8428 = vst [vmem:[#allocation277_spill] sm:$0xff] %v5357_v20  ;;  %v5359_v21 = vpop.permute.xlu1 %1072 }
 0x152   : > { %8429 = vst [vmem:[#allocation278_spill] sm:$0xff] %v5359_v21  ;;  %1250 = vrot.lane.b32.xlu0 %v8430_v14, %s4015_s4 }
 0x153   : > { %1252 = vrot.lane.b32.xlu1 %v8431_v17, %s4015_s4 }
 0x154   : > { %v5365_v36 = vpop.permute.xlu0 %1074 }
 0x155   : > { %8432 = vst [vmem:[#allocation279_spill] sm:$0xff] %v5365_v36  ;;  %v5367_v45 = vpop.permute.xlu1 %1076  ;;  %v8555_v36 = vld [vmem:[#allocation98_spill] sm:$0xff] }
 0x156   : > { %8433 = vst [vmem:[#allocation280_spill] sm:$0xff] %v5367_v45  ;;  %1254 = vrot.lane.b32.xlu0 %v8319_v15, %s4015_s4  ;;  %v8438_v45 = vld [vmem:[#allocation6_spill] sm:$0xff]  ;;  %v8439_v15 = vld [vmem:[#allocation5_spill] sm:$0xff] }
 0x157   : > { %1256 = vrot.lane.b32.xlu1 %v8320_v3, %s4015_s4 }
 0x158   : > { %v5373_v54 = vpop.permute.xlu0 %1078 }
 0x159   : > { %8434 = vst [vmem:[#allocation281_spill] sm:$0xff] %v5373_v54  ;;  %v5375_v20 = vpop.permute.xlu1 %1080 }
 0x15a   : > { %8435 = vst [vmem:[#allocation282_spill] sm:$0xff] %v5375_v20  ;;  %1258 = vrot.lane.b32.xlu0 %v4483_v40, %s4015_s4 }
 0x15b   : > { %1260 = vrot.lane.b32.xlu1 %v4489_v60, %s4015_s4 }
 0x15c   : > { %v5381_v21 = vpop.permute.xlu0 %1082 }
 0x15d   : > { %8436 = vst [vmem:[#allocation283_spill] sm:$0xff] %v5381_v21  ;;  %v5383_v17 = vpop.permute.xlu1 %1084 }
 0x15e   : > { %8437 = vst [vmem:[#allocation284_spill] sm:$0xff] %v5383_v17  ;;  %1262 = vrot.lane.b32.xlu0 %v8438_v45, %s4015_s4  ;;  %v8567_v45 = vld [vmem:[#allocation104_spill] sm:$0xff] }
 0x15f   : > { %1264 = vrot.lane.b32.xlu1 %v8439_v15, %s4015_s4 }
 0x160   : > { %v5389_v3 = vpop.permute.xlu0 %1086 }
 0x161   : > { %8440 = vst [vmem:[#allocation285_spill] sm:$0xff] %v5389_v3  ;;  %v5391_v54 = vpop.permute.xlu1 %1088 }
 0x162   : > { %8441 = vst [vmem:[#allocation286_spill] sm:$0xff] %v5391_v54  ;;  %1266 = vrot.lane.b32.xlu0 %v4303_v39, %s4015_s4 }
 0x163   : > { %1268 = vrot.lane.b32.xlu1 %v4300_v38, %s4015_s4  ;;  %v8499_v38 = vld [vmem:[#allocation33_spill] sm:$0xff] }
 0x164   : > { %v5397_v60 = vpop.permute.xlu0 %1090 }
 0x165   : > { %8442 = vst [vmem:[#allocation287_spill] sm:$0xff] %v5397_v60  ;;  %v5399_v40 = vpop.permute.xlu1 %1092 }
 0x166   : > { %8443 = vst [vmem:[#allocation288_spill] sm:$0xff] %v5399_v40  ;;  %1270 = vrot.lane.b32.xlu0 %v4333_v7, %s4015_s4 }
 0x167   : > { %1272 = vrot.lane.b32.xlu1 %v4330_v6, %s4015_s4 }
 0x168   : > { %v5405_v17 = vpop.permute.xlu0 %1094 }
 0x169   : > { %8444 = vst [vmem:[#allocation289_spill] sm:$0xff] %v5405_v17  ;;  %v5407_v3 = vpop.permute.xlu1 %1096 }
 0x16a   : > { %8445 = vst [vmem:[#allocation290_spill] sm:$0xff] %v5407_v3  ;;  %1274 = vrot.lane.b32.xlu0 %v4345_v10, %s4015_s4 }
 0x16b   : > { %1276 = vrot.lane.b32.xlu1 %v4342_v9, %s4015_s4 }
 0x16c   : > { %v5413_v54 = vpop.permute.xlu0 %1098 }
 0x16d   : > { %8446 = vst [vmem:[#allocation291_spill] sm:$0xff] %v5413_v54  ;;  %v5415_v60 = vpop.permute.xlu1 %1100 }
 0x16e   : > { %8447 = vst [vmem:[#allocation292_spill] sm:$0xff] %v5415_v60  ;;  %1278 = vrot.lane.b32.xlu0 %v4359_v8, %s4015_s4 }
 0x16f   : > { %1280 = vrot.lane.b32.xlu1 %v4356_v23, %s4015_s4 }
 0x170   : > { %v5421_v40 = vpop.permute.xlu0 %1102 }
 0x171   : > { %8448 = vst [vmem:[#allocation293_spill] sm:$0xff] %v5421_v40  ;;  %v5423_v17 = vpop.permute.xlu1 %1104 }
 0x172   : > { %8449 = vst [vmem:[#allocation294_spill] sm:$0xff] %v5423_v17  ;;  %1282 = vrot.lane.b32.xlu0 %v4375_v19, %s4015_s4 }
 0x173   : > { %1284 = vrot.lane.b32.xlu1 %v4372_v18, %s4015_s4 }
 0x174   : > { %v5429_v3 = vpop.permute.xlu0 %1106 }
 0x175   : > { %8450 = vst [vmem:[#allocation295_spill] sm:$0xff] %v5429_v3  ;;  %v5431_v54 = vpop.permute.xlu1 %1108 }
 0x176   : > { %8451 = vst [vmem:[#allocation296_spill] sm:$0xff] %v5431_v54  ;;  %1286 = vrot.lane.b32.xlu0 %v4398_v51, %s4015_s4  ;;  %v8679_v51 = vld [vmem:[#allocation207_spill] sm:$0xff] }
 0x177   : > { %1288 = vrot.lane.b32.xlu1 %v4395_v42, %s4015_s4 }
 0x178   : > { %v5437_v60 = vpop.permute.xlu0 %1110 }
 0x179   : > { %8452 = vst [vmem:[#allocation297_spill] sm:$0xff] %v5437_v60  ;;  %v5439_v40 = vpop.permute.xlu1 %1112 }
 0x17a   : > { %8453 = vst [vmem:[#allocation298_spill] sm:$0xff] %v5439_v40  ;;  %1290 = vrot.lane.b32.xlu0 %v4414_v35, %s4015_s4  ;;  %v8619_v35 = vld [vmem:[#allocation147_spill] sm:$0xff] }
 0x17b   : > { %1292 = vrot.lane.b32.xlu1 %v4411_v4, %s4015_s4 }
 0x17c   : > { %v5445_v17 = vpop.permute.xlu0 %1114 }
 0x17d   : > { %8454 = vst [vmem:[#allocation299_spill] sm:$0xff] %v5445_v17  ;;  %v5447_v3 = vpop.permute.xlu1 %1116 }
 0x17e   : > { %8455 = vst [vmem:[#allocation300_spill] sm:$0xff] %v5447_v3  ;;  %1294 = vrot.lane.b32.xlu0 %v4431_v63, %s4015_s4 }
 0x17f   : > { %1296 = vrot.lane.b32.xlu1 %v4428_v1, %s4015_s4  ;;  %v8559_v1 = vld [vmem:[#allocation100_spill] sm:$0xff] }
 0x180   : > { %v5453_v54 = vpop.permute.xlu0 %1118 }
 0x181   : > { %8456 = vst [vmem:[#allocation301_spill] sm:$0xff] %v5453_v54  ;;  %v5455_v60 = vpop.permute.xlu1 %1120 }
 0x182   : > { %8457 = vst [vmem:[#allocation302_spill] sm:$0xff] %v5455_v60  ;;  %1298 = vrot.lane.b32.xlu0 %v4444_v52, %s4015_s4 }
 0x183   : > { %1300 = vrot.lane.b32.xlu1 %v4441_v44, %s4015_s4  ;;  %v8503_v44 = vld [vmem:[#allocation37_spill] sm:$0xff] }
 0x184   : > { %v5461_v40 = vpop.permute.xlu0 %1122 }
 0x185   : > { %8458 = vst [vmem:[#allocation303_spill] sm:$0xff] %v5461_v40  ;;  %v5463_v17 = vpop.permute.xlu1 %1124 }
 0x186   : > { %8459 = vst [vmem:[#allocation304_spill] sm:$0xff] %v5463_v17  ;;  %1302 = vrot.lane.b32.xlu0 %v4463_v30, %s4015_s4  ;;  %v8495_v30 = vld [vmem:[#allocation29_spill] sm:$0xff] }
 0x187   : > { %1304 = vrot.lane.b32.xlu1 %v4460_v27, %s4015_s4  ;;  %v8491_v27 = vld [vmem:[#allocation25_spill] sm:$0xff] }
 0x188   : > { %v5469_v3 = vpop.permute.xlu0 %1126 }
 0x189   : > { %8460 = vst [vmem:[#allocation305_spill] sm:$0xff] %v5469_v3  ;;  %v5471_v54 = vpop.permute.xlu1 %1128 }
 0x18a   : > { %8461 = vst [vmem:[#allocation306_spill] sm:$0xff] %v5471_v54  ;;  %1306 = vrot.lane.b32.xlu0 %v4477_v2, %s4015_s4  ;;  %v8482_v2 = vld [vmem:[#allocation15_spill] sm:$0xff] }
 0x18b   : > { %1308 = vrot.lane.b32.xlu1 %v4474_v59, %s4015_s4  ;;  %v8479_v59 = vld [vmem:[#allocation14_spill] sm:$0xff] }
 0x18c   : > { %v5477_v60 = vpop.permute.xlu0 %1130 }
 0x18d   : > { %8462 = vst [vmem:[#allocation307_spill] sm:$0xff] %v5477_v60  ;;  %v5479_v40 = vpop.permute.xlu1 %1132 }
 0x18e   : > { %8463 = vst [vmem:[#allocation308_spill] sm:$0xff] %v5479_v40  ;;  %1310 = vrot.lane.b32.xlu0 %v4497_v61, %s4015_s4  ;;  %v8478_v61 = vld [vmem:[#allocation13_spill] sm:$0xff] }
 0x18f   : > { %1312 = vrot.lane.b32.xlu1 %v4494_v28, %s4015_s4 }
 0x190   : > { %v5485_v17 = vpop.permute.xlu0 %1134 }
 0x191   : > { %8464 = vst [vmem:[#allocation309_spill] sm:$0xff] %v5485_v17  ;;  %v5487_v3 = vpop.permute.xlu1 %1136 }
 0x192   : > { %8465 = vst [vmem:[#allocation310_spill] sm:$0xff] %v5487_v3  ;;  %1314 = vrot.lane.b32.xlu0 %v4508_v37, %s4015_s4 }
 0x193   : > { %1316 = vrot.lane.b32.xlu1 %v4505_v32, %s4015_s4 }
 0x194   : > { %v5493_v54 = vpop.permute.xlu0 %1202 }
 0x195   : > { %8466 = vst [vmem:[#allocation311_spill] sm:$0xff] %v5493_v54  ;;  %v5495_v60 = vpop.permute.xlu1 %1204  ;;  %v8563_v54 = vld [vmem:[#allocation102_spill] sm:$0xff] }
 0x196   : > { %8467 = vst [vmem:[#allocation312_spill] sm:$0xff] %v5495_v60  ;;  %1318 = vrot.lane.b32.xlu0 %v4523_v46, %s4015_s4 }
 0x197   : > { %1320 = vrot.lane.b32.xlu1 %v4520_v47, %s4015_s4 }
 0x198   : > { %v5501_v40 = vpop.permute.xlu0 %1206 }
 0x199   : > { %8468 = vst [vmem:[#allocation313_spill] sm:$0xff] %v5501_v40  ;;  %v5503_v17 = vpop.permute.xlu1 %1208  ;;  %v8507_v40 = vld [vmem:[#allocation41_spill] sm:$0xff] }
 0x19a   : > { %8469 = vst [vmem:[#allocation314_spill] sm:$0xff] %v5503_v17  ;;  %1322 = vrot.lane.b32.xlu0 %v4531_v5, %s4015_s4  ;;  %v8474_v5 = vld [vmem:[#allocation10_spill] sm:$0xff] }
 0x19b   : > { %1324 = vrot.lane.b32.xlu1 %v4528_v29, %s4015_s4  ;;  %v8475_v29 = vld [vmem:[#allocation12_spill] sm:$0xff] }
 0x19c   : > { %v5509_v3 = vpop.permute.xlu0 %1210 }
 0x19d   : > { %8470 = vst [vmem:[#allocation315_spill] sm:$0xff] %v5509_v3  ;;  %v5511_v32 = vpop.permute.xlu1 %1212 }
 0x19e   : > { %8471 = vst [vmem:[#allocation316_spill] sm:$0xff] %v5511_v32  ;;  %1326 = vrot.lane.b32.xlu0 %v4287_v16, %s4015_s4  ;;  %v8487_v32 = vld [vmem:[#allocation21_spill] sm:$0xff] }
 0x19f   : > { %1328 = vrot.lane.b32.xlu1 %v4284_v13, %s4015_s4  ;;  %v8511_v13 = vld [vmem:[#allocation50_spill] sm:$0xff] }
 0x1a0   : > { %v5517_v47 = vpop.permute.xlu0 %1214 }
 0x1a1   : > { %8472 = vst [vmem:[#allocation317_spill] sm:$0xff] %v5517_v47  ;;  %v5519_v46 = vpop.permute.xlu1 %1216 }
 0x1a2   : > { %8473 = vst [vmem:[#allocation318_spill] sm:$0xff] %v5519_v46  ;;  %1394 = vrot.lane.b32.xlu0 %v8474_v5, %s4016_s5  ;;  %v8483_v5 = vld [vmem:[#allocation17_spill] sm:$0xff] }
 0x1a3   : > { %1396 = vrot.lane.b32.xlu1 %v8475_v29, %s4016_s5 }
 0x1a4   : > { %v5525_v37 = vpop.permute.xlu0 %1218 }
 0x1a5   : > { %8476 = vst [vmem:[#allocation319_spill] sm:$0xff] %v5525_v37  ;;  %v5527_v28 = vpop.permute.xlu1 %1220 }
 0x1a6   : > { %8477 = vst [vmem:[#allocation320_spill] sm:$0xff] %v5527_v28  ;;  %1398 = vrot.lane.b32.xlu0 %v8478_v61, %s4016_s5  ;;  %v8486_v28 = vld [vmem:[#allocation19_spill] sm:$0xff] }
 0x1a7   : > { %1400 = vrot.lane.b32.xlu1 %v8479_v59, %s4016_s5 }
 0x1a8   : > { %v5533_v47 = vpop.permute.xlu0 %1222 }
 0x1a9   : > { %8480 = vst [vmem:[#allocation13_spill] sm:$0xff] %v5533_v47  ;;  %v5535_v46 = vpop.permute.xlu1 %1224 }
 0x1aa   : > { %8481 = vst [vmem:[#allocation14_spill] sm:$0xff] %v5535_v46  ;;  %1402 = vrot.lane.b32.xlu0 %v8482_v2, %s4016_s5  ;;  %v8490_v46 = vld [vmem:[#allocation22_spill] sm:$0xff] }
 0x1ab   : > { %1404 = vrot.lane.b32.xlu1 %v8483_v5, %s4016_s5 }
 0x1ac   : > { %v5541_v29 = vpop.permute.xlu0 %1226 }
 0x1ad   : > { %8484 = vst [vmem:[#allocation15_spill] sm:$0xff] %v5541_v29  ;;  %v5543_v37 = vpop.permute.xlu1 %1228 }
 0x1ae   : > { %8485 = vst [vmem:[#allocation17_spill] sm:$0xff] %v5543_v37  ;;  %1406 = vrot.lane.b32.xlu0 %v8486_v28, %s4016_s5  ;;  %v8494_v37 = vld [vmem:[#allocation26_spill] sm:$0xff] }
 0x1af   : > { %1408 = vrot.lane.b32.xlu1 %v8487_v32, %s4016_s5 }
 0x1b0   : > { %v5549_v21 = vpop.permute.xlu0 %1230 }
 0x1b1   : > { %8488 = vst [vmem:[#allocation19_spill] sm:$0xff] %v5549_v21  ;;  %v5551_v47 = vpop.permute.xlu1 %1232 }
 0x1b2   : > { %8489 = vst [vmem:[#allocation21_spill] sm:$0xff] %v5551_v47  ;;  %1410 = vrot.lane.b32.xlu0 %v8490_v46, %s4016_s5  ;;  %v8498_v47 = vld [vmem:[#allocation32_spill] sm:$0xff] }
 0x1b3   : > { %1412 = vrot.lane.b32.xlu1 %v8491_v27, %s4016_s5  ;;  %v8687_v27 = vld [vmem:[#allocation215_spill] sm:$0xff] }
 0x1b4   : > { %v5557_v3 = vpop.permute.xlu0 %1234 }
 0x1b5   : > { %8492 = vst [vmem:[#allocation22_spill] sm:$0xff] %v5557_v3  ;;  %v5559_v29 = vpop.permute.xlu1 %1236 }
 0x1b6   : > { %8493 = vst [vmem:[#allocation321_spill] sm:$0xff] %v5559_v29  ;;  %1414 = vrot.lane.b32.xlu0 %v8494_v37, %s4016_s5  ;;  %v8502_v29 = vld [vmem:[#allocation36_spill] sm:$0xff]  ;;  %v8627_v37 = vld [vmem:[#allocation155_spill] sm:$0xff] }
 0x1b7   : > { %1416 = vrot.lane.b32.xlu1 %v8495_v30, %s4016_s5  ;;  %v8623_v30 = vld [vmem:[#allocation151_spill] sm:$0xff] }
 0x1b8   : > { %v5565_v20 = vpop.permute.xlu0 %1238 }
 0x1b9   : > { %8496 = vst [vmem:[#allocation322_spill] sm:$0xff] %v5565_v20  ;;  %v5567_v21 = vpop.permute.xlu1 %1240 }
 0x1ba   : > { %8497 = vst [vmem:[#allocation323_spill] sm:$0xff] %v5567_v21  ;;  %1418 = vrot.lane.b32.xlu0 %v8498_v47, %s4016_s5  ;;  %v8506_v21 = vld [vmem:[#allocation40_spill] sm:$0xff]  ;;  %v8615_v47 = vld [vmem:[#allocation143_spill] sm:$0xff] }
 0x1bb   : > { %1420 = vrot.lane.b32.xlu1 %v8499_v38, %s4016_s5 }
 0x1bc   : > { %v5573_v17 = vpop.permute.xlu0 %1242 }
 0x1bd   : > { %8500 = vst [vmem:[#allocation324_spill] sm:$0xff] %v5573_v17  ;;  %v5575_v3 = vpop.permute.xlu1 %1244 }
 0x1be   : > { %8501 = vst [vmem:[#allocation325_spill] sm:$0xff] %v5575_v3  ;;  %1422 = vrot.lane.b32.xlu0 %v8502_v29, %s4016_s5  ;;  %v8510_v3 = vld [vmem:[#allocation49_spill] sm:$0xff] }
 0x1bf   : > { %1424 = vrot.lane.b32.xlu1 %v8503_v44, %s4016_s5 }
 0x1c0   : > { %v5581_v39 = vpop.permute.xlu0 %1246 }
 0x1c1   : > { %8504 = vst [vmem:[#allocation326_spill] sm:$0xff] %v5581_v39  ;;  %v5583_v20 = vpop.permute.xlu1 %1248 }
 0x1c2   : > { %8505 = vst [vmem:[#allocation327_spill] sm:$0xff] %v5583_v20  ;;  %1426 = vrot.lane.b32.xlu0 %v8506_v21, %s4016_s5  ;;  %v8514_v20 = vld [vmem:[#allocation51_spill] sm:$0xff]  ;;  %v8515_v21 = vld [vmem:[#allocation58_spill] sm:$0xff] }
 0x1c3   : > { %1428 = vrot.lane.b32.xlu1 %v8507_v40, %s4016_s5 }
 0x1c4   : > { %v5589_v52 = vpop.permute.xlu0 %1250 }
 0x1c5   : > { %8508 = vst [vmem:[#allocation328_spill] sm:$0xff] %v5589_v52  ;;  %v5591_v17 = vpop.permute.xlu1 %1252 }
 0x1c6   : > { %8509 = vst [vmem:[#allocation329_spill] sm:$0xff] %v5591_v17  ;;  %1430 = vrot.lane.b32.xlu0 %v8510_v3, %s4016_s5  ;;  %v8518_v17 = vld [vmem:[#allocation61_spill] sm:$0xff] }
 0x1c7   : > { %1432 = vrot.lane.b32.xlu1 %v8511_v13, %s4016_s5  ;;  %v8519_v3 = vld [vmem:[#allocation65_spill] sm:$0xff] }
 0x1c8   : > { %v5597_v44 = vpop.permute.xlu0 %1254 }
 0x1c9   : > { %8512 = vst [vmem:[#allocation330_spill] sm:$0xff] %v5597_v44  ;;  %v5599_v39 = vpop.permute.xlu1 %1256 }
 0x1ca   : > { %8513 = vst [vmem:[#allocation331_spill] sm:$0xff] %v5599_v39  ;;  %1434 = vrot.lane.b32.xlu0 %v8514_v20, %s4016_s5  ;;  %v8522_v39 = vld [vmem:[#allocation69_spill] sm:$0xff] }
 0x1cb   : > { %1436 = vrot.lane.b32.xlu1 %v8515_v21, %s4016_s5  ;;  %v8523_v20 = vld [vmem:[#allocation73_spill] sm:$0xff] }
 0x1cc   : > { %v5605_v40 = vpop.permute.xlu0 %1258 }
 0x1cd   : > { %8516 = vst [vmem:[#allocation332_spill] sm:$0xff] %v5605_v40  ;;  %v5607_v52 = vpop.permute.xlu1 %1260 }
 0x1ce   : > { %8517 = vst [vmem:[#allocation333_spill] sm:$0xff] %v5607_v52  ;;  %1438 = vrot.lane.b32.xlu0 %v8518_v17, %s4016_s5  ;;  %v8526_v52 = vld [vmem:[#allocation79_spill] sm:$0xff]  ;;  %v8527_v17 = vld [vmem:[#allocation80_spill] sm:$0xff] }
 0x1cf   : > { %1440 = vrot.lane.b32.xlu1 %v8519_v3, %s4016_s5 }
 0x1d0   : > { %v5613_v13 = vpop.permute.xlu0 %1262 }
 0x1d1   : > { %8520 = vst [vmem:[#allocation334_spill] sm:$0xff] %v5613_v13  ;;  %v5615_v44 = vpop.permute.xlu1 %1264 }
 0x1d2   : > { %8521 = vst [vmem:[#allocation335_spill] sm:$0xff] %v5615_v44  ;;  %1442 = vrot.lane.b32.xlu0 %v8522_v39, %s4016_s5  ;;  %v8530_v44 = vld [vmem:[#allocation85_spill] sm:$0xff]  ;;  %v8531_v39 = vld [vmem:[#allocation86_spill] sm:$0xff] }
 0x1d3   : > { %1444 = vrot.lane.b32.xlu1 %v8523_v20, %s4016_s5 }
 0x1d4   : > { %v5621_v21 = vpop.permute.xlu0 %1266 }
 0x1d5   : > { %8524 = vst [vmem:[#allocation336_spill] sm:$0xff] %v5621_v21  ;;  %v5623_v40 = vpop.permute.xlu1 %1268  ;;  %v8551_v21 = vld [vmem:[#allocation96_spill] sm:$0xff] }
 0x1d6   : > { %8525 = vst [vmem:[#allocation337_spill] sm:$0xff] %v5623_v40  ;;  %1446 = vrot.lane.b32.xlu0 %v8526_v52, %s4016_s5  ;;  %v8534_v40 = vld [vmem:[#allocation9_spill] sm:$0xff]  ;;  %v8535_v52 = vld [vmem:[#allocation11_spill] sm:$0xff] }
 0x1d7   : > { %1448 = vrot.lane.b32.xlu1 %v8527_v17, %s4016_s5 }
 0x1d8   : > { %v5629_v3 = vpop.permute.xlu0 %1270 }
 0x1d9   : > { %8528 = vst [vmem:[#allocation338_spill] sm:$0xff] %v5629_v3  ;;  %v5631_v13 = vpop.permute.xlu1 %1272 }
 0x1da   : > { %8529 = vst [vmem:[#allocation339_spill] sm:$0xff] %v5631_v13  ;;  %1450 = vrot.lane.b32.xlu0 %v8530_v44, %s4016_s5  ;;  %v8538_v13 = vld [vmem:[#allocation89_spill] sm:$0xff]  ;;  %v8539_v44 = vld [vmem:[#allocation90_spill] sm:$0xff] }
 0x1db   : > { %1452 = vrot.lane.b32.xlu1 %v8531_v39, %s4016_s5 }
 0x1dc   : > { %v5637_v20 = vpop.permute.xlu0 %1274 }
 0x1dd   : > { %8532 = vst [vmem:[#allocation340_spill] sm:$0xff] %v5637_v20  ;;  %v5639_v60 = vpop.permute.xlu1 %1276 }
 0x1de   : > { %8533 = vst [vmem:[#allocation341_spill] sm:$0xff] %v5639_v60  ;;  %1454 = vrot.lane.b32.xlu0 %v8534_v40, %s4016_s5  ;;  %v8542_v60 = vld [vmem:[#allocation91_spill] sm:$0xff]  ;;  %v8543_v40 = vld [vmem:[#allocation92_spill] sm:$0xff] }
 0x1df   : > { %1456 = vrot.lane.b32.xlu1 %v8535_v52, %s4016_s5 }
 0x1e0   : > { %v5645_v17 = vpop.permute.xlu0 %1278 }
 0x1e1   : > { %8536 = vst [vmem:[#allocation342_spill] sm:$0xff] %v5645_v17  ;;  %v5647_v3 = vpop.permute.xlu1 %1280 }
 0x1e2   : > { %8537 = vst [vmem:[#allocation343_spill] sm:$0xff] %v5647_v3  ;;  %1458 = vrot.lane.b32.xlu0 %v8538_v13, %s4016_s5  ;;  %v8546_v3 = vld [vmem:[#allocation93_spill] sm:$0xff]  ;;  %v8547_v13 = vld [vmem:[#allocation94_spill] sm:$0xff] }
 0x1e3   : > { %1460 = vrot.lane.b32.xlu1 %v8539_v44, %s4016_s5 }
 0x1e4   : > { %v5653_v39 = vpop.permute.xlu0 %1282 }
 0x1e5   : > { %8540 = vst [vmem:[#allocation344_spill] sm:$0xff] %v5653_v39  ;;  %v5655_v20 = vpop.permute.xlu1 %1284 }
 0x1e6   : > { %8541 = vst [vmem:[#allocation345_spill] sm:$0xff] %v5655_v20  ;;  %1462 = vrot.lane.b32.xlu0 %v8542_v60, %s4016_s5  ;;  %v8550_v20 = vld [vmem:[#allocation95_spill] sm:$0xff] }
 0x1e7   : > { %1464 = vrot.lane.b32.xlu1 %v8543_v40, %s4016_s5 }
 0x1e8   : > { %v5661_v52 = vpop.permute.xlu0 %1286 }
 0x1e9   : > { %8544 = vst [vmem:[#allocation91_spill] sm:$0xff] %v5661_v52  ;;  %v5663_v17 = vpop.permute.xlu1 %1288 }
 0x1ea   : > { %8545 = vst [vmem:[#allocation92_spill] sm:$0xff] %v5663_v17  ;;  %1466 = vrot.lane.b32.xlu0 %v8546_v3, %s4016_s5  ;;  %v8554_v17 = vld [vmem:[#allocation97_spill] sm:$0xff] }
 0x1eb   : > { %1468 = vrot.lane.b32.xlu1 %v8547_v13, %s4016_s5 }
 0x1ec   : > { %v5669_v44 = vpop.permute.xlu0 %1290 }
 0x1ed   : > { %8548 = vst [vmem:[#allocation93_spill] sm:$0xff] %v5669_v44  ;;  %v5671_v39 = vpop.permute.xlu1 %1292 }
 0x1ee   : > { %8549 = vst [vmem:[#allocation94_spill] sm:$0xff] %v5671_v39  ;;  %1470 = vrot.lane.b32.xlu0 %v8550_v20, %s4016_s5  ;;  %v8558_v39 = vld [vmem:[#allocation99_spill] sm:$0xff] }
 0x1ef   : > { %1472 = vrot.lane.b32.xlu1 %v8551_v21, %s4016_s5 }
 0x1f0   : > { %v5677_v29 = vpop.permute.xlu0 %1294 }
 0x1f1   : > { %8552 = vst [vmem:[#allocation95_spill] sm:$0xff] %v5677_v29  ;;  %v5679_v52 = vpop.permute.xlu1 %1296 }
 0x1f2   : > { %8553 = vst [vmem:[#allocation96_spill] sm:$0xff] %v5679_v52  ;;  %1474 = vrot.lane.b32.xlu0 %v8554_v17, %s4016_s5  ;;  %v8562_v52 = vld [vmem:[#allocation101_spill] sm:$0xff] }
 0x1f3   : > { %1476 = vrot.lane.b32.xlu1 %v8555_v36, %s4016_s5 }
 0x1f4   : > { %v5685_v15 = vpop.permute.xlu0 %1298 }
 0x1f5   : > { %8556 = vst [vmem:[#allocation346_spill] sm:$0xff] %v5685_v15  ;;  %v5687_v44 = vpop.permute.xlu1 %1300 }
 0x1f6   : > { %8557 = vst [vmem:[#allocation347_spill] sm:$0xff] %v5687_v44  ;;  %1478 = vrot.lane.b32.xlu0 %v8558_v39, %s4016_s5  ;;  %v8566_v44 = vld [vmem:[#allocation103_spill] sm:$0xff] }
 0x1f7   : > { %1480 = vrot.lane.b32.xlu1 %v8559_v1, %s4016_s5 }
 0x1f8   : > { %v5693_v16 = vpop.permute.xlu0 %1302 }
 0x1f9   : > { %8560 = vst [vmem:[#allocation348_spill] sm:$0xff] %v5693_v16  ;;  %v5695_v29 = vpop.permute.xlu1 %1304 }
 0x1fa   : > { %8561 = vst [vmem:[#allocation349_spill] sm:$0xff] %v5695_v29  ;;  %1482 = vrot.lane.b32.xlu0 %v8562_v52, %s4016_s5  ;;  %v8570_v29 = vld [vmem:[#allocation105_spill] sm:$0xff]  ;;  %v8571_v52 = vld [vmem:[#allocation106_spill] sm:$0xff] }
 0x1fb   : > { %1484 = vrot.lane.b32.xlu1 %v8563_v54, %s4016_s5 }
 0x1fc   : > { %v5701_v63 = vpop.permute.xlu0 %1306 }
 0x1fd   : > { %8564 = vst [vmem:[#allocation350_spill] sm:$0xff] %v5701_v63  ;;  %v5703_v15 = vpop.permute.xlu1 %1308 }
 0x1fe   : > { %8565 = vst [vmem:[#allocation351_spill] sm:$0xff] %v5703_v15  ;;  %1486 = vrot.lane.b32.xlu0 %v8566_v44, %s4016_s5  ;;  %v8574_v15 = vld [vmem:[#allocation107_spill] sm:$0xff]  ;;  %v8575_v44 = vld [vmem:[#allocation108_spill] sm:$0xff] }
 0x1ff   : > { %1488 = vrot.lane.b32.xlu1 %v8567_v45, %s4016_s5 }
 0x200   : > { %v5709_v38 = vpop.permute.xlu0 %1310 }
 0x201   : > { %8568 = vst [vmem:[#allocation352_spill] sm:$0xff] %v5709_v38  ;;  %v5711_v16 = vpop.permute.xlu1 %1312 }
 0x202   : > { %8569 = vst [vmem:[#allocation353_spill] sm:$0xff] %v5711_v16  ;;  %1490 = vrot.lane.b32.xlu0 %v8570_v29, %s4016_s5  ;;  %v8578_v16 = vld [vmem:[#allocation109_spill] sm:$0xff]  ;;  %v8579_v29 = vld [vmem:[#allocation110_spill] sm:$0xff] }
 0x203   : > { %1492 = vrot.lane.b32.xlu1 %v8571_v52, %s4016_s5 }
 0x204   : > { %v5717_v54 = vpop.permute.xlu0 %1314 }
 0x205   : > { %8572 = vst [vmem:[#allocation354_spill] sm:$0xff] %v5717_v54  ;;  %v5719_v63 = vpop.permute.xlu1 %1316 }
 0x206   : > { %8573 = vst [vmem:[#allocation355_spill] sm:$0xff] %v5719_v63  ;;  %1494 = vrot.lane.b32.xlu0 %v8574_v15, %s4016_s5  ;;  %v8582_v63 = vld [vmem:[#allocation111_spill] sm:$0xff]  ;;  %v8583_v15 = vld [vmem:[#allocation112_spill] sm:$0xff] }
 0x207   : > { %1496 = vrot.lane.b32.xlu1 %v8575_v44, %s4016_s5 }
 0x208   : > { %v5725_v45 = vpop.permute.xlu0 %1318 }
 0x209   : > { %8576 = vst [vmem:[#allocation356_spill] sm:$0xff] %v5725_v45  ;;  %v5727_v38 = vpop.permute.xlu1 %1320 }
 0x20a   : > { %8577 = vst [vmem:[#allocation357_spill] sm:$0xff] %v5727_v38  ;;  %1498 = vrot.lane.b32.xlu0 %v8578_v16, %s4016_s5  ;;  %v8586_v38 = vld [vmem:[#allocation113_spill] sm:$0xff]  ;;  %v8587_v16 = vld [vmem:[#allocation115_spill] sm:$0xff] }
 0x20b   : > { %1500 = vrot.lane.b32.xlu1 %v8579_v29, %s4016_s5 }
 0x20c   : > { %v5733_v52 = vpop.permute.xlu0 %1322 }
 0x20d   : > { %8580 = vst [vmem:[#allocation358_spill] sm:$0xff] %v5733_v52  ;;  %v5735_v54 = vpop.permute.xlu1 %1324 }
 0x20e   : > { %8581 = vst [vmem:[#allocation359_spill] sm:$0xff] %v5735_v54  ;;  %1502 = vrot.lane.b32.xlu0 %v8582_v63, %s4016_s5  ;;  %v8590_v54 = vld [vmem:[#allocation117_spill] sm:$0xff]  ;;  %v8591_v63 = vld [vmem:[#allocation119_spill] sm:$0xff] }
 0x20f   : > { %1504 = vrot.lane.b32.xlu1 %v8583_v15, %s4016_s5 }
 0x210   : > { %v5741_v44 = vpop.permute.xlu0 %1326 }
 0x211   : > { %8584 = vst [vmem:[#allocation360_spill] sm:$0xff] %v5741_v44  ;;  %v5743_v45 = vpop.permute.xlu1 %1328 }
 0x212   : > { %8585 = vst [vmem:[#allocation361_spill] sm:$0xff] %v5743_v45  ;;  %1506 = vrot.lane.b32.xlu0 %v8586_v38, %s4016_s5  ;;  %v8594_v45 = vld [vmem:[#allocation121_spill] sm:$0xff]  ;;  %v8595_v38 = vld [vmem:[#allocation123_spill] sm:$0xff] }
 0x213   : > { %1508 = vrot.lane.b32.xlu1 %v8587_v16, %s4016_s5 }
 0x214   : > { %v5749_v29 = vpop.permute.xlu0 %1394 }
 0x215   : > { %8588 = vst [vmem:[#allocation362_spill] sm:$0xff] %v5749_v29  ;;  %v5751_v52 = vpop.permute.xlu1 %1396 }
 0x216   : > { %8589 = vst [vmem:[#allocation363_spill] sm:$0xff] %v5751_v52  ;;  %1510 = vrot.lane.b32.xlu0 %v8590_v54, %s4016_s5  ;;  %v8598_v52 = vld [vmem:[#allocation87_spill] sm:$0xff]  ;;  %v8599_v54 = vld [vmem:[#allocation88_spill] sm:$0xff] }
 0x217   : > { %1512 = vrot.lane.b32.xlu1 %v8591_v63, %s4016_s5 }
 0x218   : > { %v5757_v15 = vpop.permute.xlu0 %1398 }
 0x219   : > { %8592 = vst [vmem:[#allocation364_spill] sm:$0xff] %v5757_v15  ;;  %v5759_v44 = vpop.permute.xlu1 %1400 }
 0x21a   : > { %8593 = vst [vmem:[#allocation365_spill] sm:$0xff] %v5759_v44  ;;  %1514 = vrot.lane.b32.xlu0 %v8594_v45, %s4016_s5  ;;  %v8602_v45 = vld [vmem:[#allocation129_spill] sm:$0xff] }
 0x21b   : > { %1516 = vrot.lane.b32.xlu1 %v8595_v38, %s4016_s5  ;;  %v8603_v38 = vld [vmem:[#allocation131_spill] sm:$0xff]  ;;  %v8610_v44 = vld [vmem:[#allocation137_spill] sm:$0xff] }
 0x21c   : > { %v5765_v16 = vpop.permute.xlu0 %1402 }
 0x21d   : > { %8596 = vst [vmem:[#allocation366_spill] sm:$0xff] %v5765_v16  ;;  %v5767_v29 = vpop.permute.xlu1 %1404 }
 0x21e   : > { %8597 = vst [vmem:[#allocation367_spill] sm:$0xff] %v5767_v29  ;;  %1518 = vrot.lane.b32.xlu0 %v8598_v52, %s4016_s5  ;;  %v8606_v52 = vld [vmem:[#allocation133_spill] sm:$0xff] }
 0x21f   : > { %1520 = vrot.lane.b32.xlu1 %v8599_v54, %s4016_s5  ;;  %v8607_v54 = vld [vmem:[#allocation135_spill] sm:$0xff]  ;;  %s4021_s5 = smov [#allocation2]  }
 0x220   : > { %v5773_v63 = vpop.permute.xlu0 %1406 }
 0x221   : > { %8600 = vst [vmem:[#allocation368_spill] sm:$0xff] %v5773_v63  ;;  %v5775_v15 = vpop.permute.xlu1 %1408 }
 0x222   : > { %8601 = vst [vmem:[#allocation369_spill] sm:$0xff] %v5775_v15  ;;  %1586 = vrot.lane.b32.xlu0 %v8602_v45, %s4017_s6  ;;  %v8611_v45 = vld [vmem:[#allocation139_spill] sm:$0xff] }
 0x223   : > { %1588 = vrot.lane.b32.xlu1 %v8603_v38, %s4017_s6 }
 0x224   : > { %v5781_v16 = vpop.permute.xlu0 %1410 }
 0x225   : > { %8604 = vst [vmem:[#allocation370_spill] sm:$0xff] %v5781_v16  ;;  %v5783_v29 = vpop.permute.xlu1 %1412 }
 0x226   : > { %8605 = vst [vmem:[#allocation371_spill] sm:$0xff] %v5783_v29  ;;  %1590 = vrot.lane.b32.xlu0 %v8606_v52, %s4017_s6  ;;  %v8614_v29 = vld [vmem:[#allocation141_spill] sm:$0xff] }
 0x227   : > { %1592 = vrot.lane.b32.xlu1 %v8607_v54, %s4017_s6 }
 0x228   : > { %v5789_v63 = vpop.permute.xlu0 %1414 }
 0x229   : > { %8608 = vst [vmem:[#allocation133_spill] sm:$0xff] %v5789_v63  ;;  %v5791_v15 = vpop.permute.xlu1 %1416 }
 0x22a   : > { %8609 = vst [vmem:[#allocation135_spill] sm:$0xff] %v5791_v15  ;;  %1594 = vrot.lane.b32.xlu0 %v8610_v44, %s4017_s6  ;;  %v8618_v15 = vld [vmem:[#allocation145_spill] sm:$0xff] }
 0x22b   : > { %1596 = vrot.lane.b32.xlu1 %v8611_v45, %s4017_s6 }
 0x22c   : > { %v5797_v38 = vpop.permute.xlu0 %1418 }
 0x22d   : > { %8612 = vst [vmem:[#allocation137_spill] sm:$0xff] %v5797_v38  ;;  %v5799_v16 = vpop.permute.xlu1 %1420 }
 0x22e   : > { %8613 = vst [vmem:[#allocation139_spill] sm:$0xff] %v5799_v16  ;;  %1598 = vrot.lane.b32.xlu0 %v8614_v29, %s4017_s6  ;;  %v8622_v16 = vld [vmem:[#allocation149_spill] sm:$0xff] }
 0x22f   : > { %1600 = vrot.lane.b32.xlu1 %v8615_v47, %s4017_s6 }
 0x230   : > { %v5805_v4 = vpop.permute.xlu0 %1422 }
 0x231   : > { %8616 = vst [vmem:[#allocation141_spill] sm:$0xff] %v5805_v4  ;;  %v5807_v63 = vpop.permute.xlu1 %1424 }
 0x232   : > { %8617 = vst [vmem:[#allocation143_spill] sm:$0xff] %v5807_v63  ;;  %1602 = vrot.lane.b32.xlu0 %v8618_v15, %s4017_s6  ;;  %v8626_v63 = vld [vmem:[#allocation153_spill] sm:$0xff]  ;;  %v8683_v15 = vld [vmem:[#allocation211_spill] sm:$0xff] }
 0x233   : > { %1604 = vrot.lane.b32.xlu1 %v8619_v35, %s4017_s6 }
 0x234   : > { %v5813_v1 = vpop.permute.xlu0 %1426 }
 0x235   : > { %8620 = vst [vmem:[#allocation372_spill] sm:$0xff] %v5813_v1  ;;  %v5815_v38 = vpop.permute.xlu1 %1428 }
 0x236   : > { %8621 = vst [vmem:[#allocation373_spill] sm:$0xff] %v5815_v38  ;;  %1606 = vrot.lane.b32.xlu0 %v8622_v16, %s4017_s6  ;;  %v8630_v38 = vld [vmem:[#allocation157_spill] sm:$0xff]  ;;  %v8631_v16 = vld [vmem:[#allocation159_spill] sm:$0xff] }
 0x237   : > { %1608 = vrot.lane.b32.xlu1 %v8623_v30, %s4017_s6 }
 0x238   : > { %v5821_v39 = vpop.permute.xlu0 %1430 }
 0x239   : > { %8624 = vst [vmem:[#allocation374_spill] sm:$0xff] %v5821_v39  ;;  %v5823_v4 = vpop.permute.xlu1 %1432 }
 0x23a   : > { %8625 = vst [vmem:[#allocation375_spill] sm:$0xff] %v5823_v4  ;;  %1610 = vrot.lane.b32.xlu0 %v8626_v63, %s4017_s6  ;;  %v8634_v4 = vld [vmem:[#allocation161_spill] sm:$0xff]  ;;  %v8635_v63 = vld [vmem:[#allocation163_spill] sm:$0xff] }
 0x23b   : > { %1612 = vrot.lane.b32.xlu1 %v8627_v37, %s4017_s6 }
 0x23c   : > { %v5829_v42 = vpop.permute.xlu0 %1434 }
 0x23d   : > { %8628 = vst [vmem:[#allocation376_spill] sm:$0xff] %v5829_v42  ;;  %v5831_v1 = vpop.permute.xlu1 %1436 }
 0x23e   : > { %8629 = vst [vmem:[#allocation377_spill] sm:$0xff] %v5831_v1  ;;  %1614 = vrot.lane.b32.xlu0 %v8630_v38, %s4017_s6  ;;  %v8638_v1 = vld [vmem:[#allocation165_spill] sm:$0xff]  ;;  %v8639_v38 = vld [vmem:[#allocation167_spill] sm:$0xff] }
 0x23f   : > { %1616 = vrot.lane.b32.xlu1 %v8631_v16, %s4017_s6 }
 0x240   : > { %v5837_v30 = vpop.permute.xlu0 %1438 }
 0x241   : > { %8632 = vst [vmem:[#allocation378_spill] sm:$0xff] %v5837_v30  ;;  %v5839_v39 = vpop.permute.xlu1 %1440 }
 0x242   : > { %8633 = vst [vmem:[#allocation379_spill] sm:$0xff] %v5839_v39  ;;  %1618 = vrot.lane.b32.xlu0 %v8634_v4, %s4017_s6  ;;  %v8642_v39 = vld [vmem:[#allocation169_spill] sm:$0xff]  ;;  %v8643_v4 = vld [vmem:[#allocation171_spill] sm:$0xff] }
 0x243   : > { %1620 = vrot.lane.b32.xlu1 %v8635_v63, %s4017_s6 }
 0x244   : > { %v5845_v37 = vpop.permute.xlu0 %1442 }
 0x245   : > { %8636 = vst [vmem:[#allocation380_spill] sm:$0xff] %v5845_v37  ;;  %v5847_v42 = vpop.permute.xlu1 %1444 }
 0x246   : > { %8637 = vst [vmem:[#allocation381_spill] sm:$0xff] %v5847_v42  ;;  %1622 = vrot.lane.b32.xlu0 %v8638_v1, %s4017_s6  ;;  %v8646_v42 = vld [vmem:[#allocation173_spill] sm:$0xff]  ;;  %v8647_v1 = vld [vmem:[#allocation175_spill] sm:$0xff] }
 0x247   : > { %1624 = vrot.lane.b32.xlu1 %v8639_v38, %s4017_s6 }
 0x248   : > { %v5853_v16 = vpop.permute.xlu0 %1446 }
 0x249   : > { %8640 = vst [vmem:[#allocation382_spill] sm:$0xff] %v5853_v16  ;;  %v5855_v30 = vpop.permute.xlu1 %1448 }
 0x24a   : > { %8641 = vst [vmem:[#allocation383_spill] sm:$0xff] %v5855_v30  ;;  %1626 = vrot.lane.b32.xlu0 %v8642_v39, %s4017_s6  ;;  %v8650_v30 = vld [vmem:[#allocation177_spill] sm:$0xff]  ;;  %v8651_v39 = vld [vmem:[#allocation179_spill] sm:$0xff] }
 0x24b   : > { %1628 = vrot.lane.b32.xlu1 %v8643_v4, %s4017_s6 }
 0x24c   : > { %v5861_v63 = vpop.permute.xlu0 %1450 }
 0x24d   : > { %8644 = vst [vmem:[#allocation384_spill] sm:$0xff] %v5861_v63  ;;  %v5863_v37 = vpop.permute.xlu1 %1452 }
 0x24e   : > { %8645 = vst [vmem:[#allocation385_spill] sm:$0xff] %v5863_v37  ;;  %1630 = vrot.lane.b32.xlu0 %v8646_v42, %s4017_s6  ;;  %v8654_v37 = vld [vmem:[#allocation181_spill] sm:$0xff]  ;;  %v8655_v42 = vld [vmem:[#allocation183_spill] sm:$0xff] }
 0x24f   : > { %1632 = vrot.lane.b32.xlu1 %v8647_v1, %s4017_s6 }
 0x250   : > { %v5869_v38 = vpop.permute.xlu0 %1454 }
 0x251   : > { %8648 = vst [vmem:[#allocation386_spill] sm:$0xff] %v5869_v38  ;;  %v5871_v16 = vpop.permute.xlu1 %1456 }
 0x252   : > { %8649 = vst [vmem:[#allocation387_spill] sm:$0xff] %v5871_v16  ;;  %1634 = vrot.lane.b32.xlu0 %v8650_v30, %s4017_s6  ;;  %v8658_v16 = vld [vmem:[#allocation185_spill] sm:$0xff]  ;;  %v8659_v30 = vld [vmem:[#allocation187_spill] sm:$0xff] }
 0x253   : > { %1636 = vrot.lane.b32.xlu1 %v8651_v39, %s4017_s6 }
 0x254   : > { %v5877_v4 = vpop.permute.xlu0 %1458 }
 0x255   : > { %8652 = vst [vmem:[#allocation388_spill] sm:$0xff] %v5877_v4  ;;  %v5879_v63 = vpop.permute.xlu1 %1460 }
 0x256   : > { %8653 = vst [vmem:[#allocation389_spill] sm:$0xff] %v5879_v63  ;;  %1638 = vrot.lane.b32.xlu0 %v8654_v37, %s4017_s6  ;;  %v8662_v63 = vld [vmem:[#allocation125_spill] sm:$0xff]  ;;  %v8663_v37 = vld [vmem:[#allocation127_spill] sm:$0xff] }
 0x257   : > { %1640 = vrot.lane.b32.xlu1 %v8655_v42, %s4017_s6 }
 0x258   : > { %v5885_v1 = vpop.permute.xlu0 %1462 }
 0x259   : > { %8656 = vst [vmem:[#allocation390_spill] sm:$0xff] %v5885_v1  ;;  %v5887_v38 = vpop.permute.xlu1 %1464 }
 0x25a   : > { %8657 = vst [vmem:[#allocation391_spill] sm:$0xff] %v5887_v38  ;;  %1642 = vrot.lane.b32.xlu0 %v8658_v16, %s4017_s6  ;;  %v8666_v38 = vld [vmem:[#allocation193_spill] sm:$0xff]  ;;  %v8667_v16 = vld [vmem:[#allocation195_spill] sm:$0xff] }
 0x25b   : > { %1644 = vrot.lane.b32.xlu1 %v8659_v30, %s4017_s6 }
 0x25c   : > { %v5893_v39 = vpop.permute.xlu0 %1466 }
 0x25d   : > { %8660 = vst [vmem:[#allocation392_spill] sm:$0xff] %v5893_v39  ;;  %v5895_v4 = vpop.permute.xlu1 %1468 }
 0x25e   : > { %8661 = vst [vmem:[#allocation393_spill] sm:$0xff] %v5895_v4  ;;  %1646 = vrot.lane.b32.xlu0 %v8662_v63, %s4017_s6  ;;  %v8670_v4 = vld [vmem:[#allocation197_spill] sm:$0xff]  ;;  %v8671_v63 = vld [vmem:[#allocation199_spill] sm:$0xff] }
 0x25f   : > { %1648 = vrot.lane.b32.xlu1 %v8663_v37, %s4017_s6 }
 0x260   : > { %v5901_v42 = vpop.permute.xlu0 %1470 }
 0x261   : > { %8664 = vst [vmem:[#allocation394_spill] sm:$0xff] %v5901_v42  ;;  %v5903_v1 = vpop.permute.xlu1 %1472 }
 0x262   : > { %8665 = vst [vmem:[#allocation395_spill] sm:$0xff] %v5903_v1  ;;  %1650 = vrot.lane.b32.xlu0 %v8666_v38, %s4017_s6  ;;  %v8674_v1 = vld [vmem:[#allocation201_spill] sm:$0xff]  ;;  %v8675_v38 = vld [vmem:[#allocation203_spill] sm:$0xff] }
 0x263   : > { %1652 = vrot.lane.b32.xlu1 %v8667_v16, %s4017_s6 }
 0x264   : > { %v5909_v30 = vpop.permute.xlu0 %1474 }
 0x265   : > { %8668 = vst [vmem:[#allocation396_spill] sm:$0xff] %v5909_v30  ;;  %v5911_v39 = vpop.permute.xlu1 %1476 }
 0x266   : > { %8669 = vst [vmem:[#allocation397_spill] sm:$0xff] %v5911_v39  ;;  %1654 = vrot.lane.b32.xlu0 %v8670_v4, %s4017_s6  ;;  %v8678_v39 = vld [vmem:[#allocation205_spill] sm:$0xff] }
 0x267   : > { %1656 = vrot.lane.b32.xlu1 %v8671_v63, %s4017_s6 }
 0x268   : > { %v5917_v37 = vpop.permute.xlu0 %1478 }
 0x269   : > { %8672 = vst [vmem:[#allocation197_spill] sm:$0xff] %v5917_v37  ;;  %v5919_v42 = vpop.permute.xlu1 %1480 }
 0x26a   : > { %8673 = vst [vmem:[#allocation199_spill] sm:$0xff] %v5919_v42  ;;  %1658 = vrot.lane.b32.xlu0 %v8674_v1, %s4017_s6  ;;  %v8682_v42 = vld [vmem:[#allocation209_spill] sm:$0xff] }
 0x26b   : > { %1660 = vrot.lane.b32.xlu1 %v8675_v38, %s4017_s6 }
 0x26c   : > { %v5925_v16 = vpop.permute.xlu0 %1482 }
 0x26d   : > { %8676 = vst [vmem:[#allocation201_spill] sm:$0xff] %v5925_v16  ;;  %v5927_v30 = vpop.permute.xlu1 %1484 }
 0x26e   : > { %8677 = vst [vmem:[#allocation203_spill] sm:$0xff] %v5927_v30  ;;  %1662 = vrot.lane.b32.xlu0 %v8678_v39, %s4017_s6  ;;  %v8686_v30 = vld [vmem:[#allocation213_spill] sm:$0xff] }
 0x26f   : > { %1664 = vrot.lane.b32.xlu1 %v8679_v51, %s4017_s6 }
 0x270   : > { %v5933_v35 = vpop.permute.xlu0 %1486 }
 0x271   : > { %8680 = vst [vmem:[#allocation205_spill] sm:$0xff] %v5933_v35  ;;  %v5935_v37 = vpop.permute.xlu1 %1488 }
 0x272   : > { %8681 = vst [vmem:[#allocation207_spill] sm:$0xff] %v5935_v37  ;;  %1666 = vrot.lane.b32.xlu0 %v8682_v42, %s4017_s6  ;;  %v8690_v37 = vld [vmem:[#allocation217_spill] sm:$0xff]  ;;  %v8691_v42 = vld [vmem:[#allocation219_spill] sm:$0xff] }
 0x273   : > { %1668 = vrot.lane.b32.xlu1 %v8683_v15, %s4017_s6 }
 0x274   : > { %v5941_v36 = vpop.permute.xlu0 %1490 }
 0x275   : > { %8684 = vst [vmem:[#allocation398_spill] sm:$0xff] %v5941_v36  ;;  %v5943_v16 = vpop.permute.xlu1 %1492 }
 0x276   : > { %8685 = vst [vmem:[#allocation399_spill] sm:$0xff] %v5943_v16  ;;  %1670 = vrot.lane.b32.xlu0 %v8686_v30, %s4017_s6  ;;  %v8694_v16 = vld [vmem:[#allocation221_spill] sm:$0xff]  ;;  %v8695_v30 = vld [vmem:[#allocation223_spill] sm:$0xff] }
 0x277   : > { %1672 = vrot.lane.b32.xlu1 %v8687_v27, %s4017_s6 }
 0x278   : > { %v5949_v17 = vpop.permute.xlu0 %1494 }
 0x279   : > { %8688 = vst [vmem:[#allocation400_spill] sm:$0xff] %v5949_v17  ;;  %v5951_v35 = vpop.permute.xlu1 %1496 }
 0x27a   : > { %8689 = vst [vmem:[#allocation401_spill] sm:$0xff] %v5951_v35  ;;  %1674 = vrot.lane.b32.xlu0 %v8690_v37, %s4017_s6  ;;  %v8698_v35 = vld [vmem:[#allocation225_spill] sm:$0xff]  ;;  %v8699_v37 = vld [vmem:[#allocation227_spill] sm:$0xff] }
 0x27b   : > { %1676 = vrot.lane.b32.xlu1 %v8691_v42, %s4017_s6 }
 0x27c   : > { %v5957_v15 = vpop.permute.xlu0 %1498 }
 0x27d   : > { %8692 = vst [vmem:[#allocation402_spill] sm:$0xff] %v5957_v15  ;;  %v5959_v36 = vpop.permute.xlu1 %1500 }
 0x27e   : > { %8693 = vst [vmem:[#allocation403_spill] sm:$0xff] %v5959_v36  ;;  %1678 = vrot.lane.b32.xlu0 %v8694_v16, %s4017_s6  ;;  %v8702_v36 = vld [vmem:[#allocation229_spill] sm:$0xff]  ;;  %v8703_v16 = vld [vmem:[#allocation231_spill] sm:$0xff] }
 0x27f   : > { %1680 = vrot.lane.b32.xlu1 %v8695_v30, %s4017_s6 }
 0x280   : > { %v5965_v27 = vpop.permute.xlu0 %1502 }
 0x281   : > { %8696 = vst [vmem:[#allocation404_spill] sm:$0xff] %v5965_v27  ;;  %v5967_v17 = vpop.permute.xlu1 %1504 }
 0x282   : > { %8697 = vst [vmem:[#allocation405_spill] sm:$0xff] %v5967_v17  ;;  %1682 = vrot.lane.b32.xlu0 %v8698_v35, %s4017_s6  ;;  %v8706_v17 = vld [vmem:[#allocation233_spill] sm:$0xff]  ;;  %v8707_v35 = vld [vmem:[#allocation235_spill] sm:$0xff] }
 0x283   : > { %1684 = vrot.lane.b32.xlu1 %v8699_v37, %s4017_s6 }
 0x284   : > { %v5973_v42 = vpop.permute.xlu0 %1506 }
 0x285   : > { %8700 = vst [vmem:[#allocation406_spill] sm:$0xff] %v5973_v42  ;;  %v5975_v15 = vpop.permute.xlu1 %1508 }
 0x286   : > { %8701 = vst [vmem:[#allocation407_spill] sm:$0xff] %v5975_v15  ;;  %1686 = vrot.lane.b32.xlu0 %v8702_v36, %s4017_s6  ;;  %v8710_v15 = vld [vmem:[#allocation237_spill] sm:$0xff]  ;;  %v8711_v36 = vld [vmem:[#allocation239_spill] sm:$0xff] }
 0x287   : > { %1688 = vrot.lane.b32.xlu1 %v8703_v16, %s4017_s6 }
 0x288   : > { %v5981_v30 = vpop.permute.xlu0 %1510 }
 0x289   : > { %8704 = vst [vmem:[#allocation408_spill] sm:$0xff] %v5981_v30  ;;  %v5983_v27 = vpop.permute.xlu1 %1512 }
 0x28a   : > { %8705 = vst [vmem:[#allocation409_spill] sm:$0xff] %v5983_v27  ;;  %1690 = vrot.lane.b32.xlu0 %v8706_v17, %s4017_s6  ;;  %v8714_v27 = vld [vmem:[#allocation243_spill] sm:$0xff] }
 0x28b   : > { %1692 = vrot.lane.b32.xlu1 %v8707_v35, %s4017_s6 }
 0x28c   : > { %v5989_v37 = vpop.permute.xlu0 %1514 }
 0x28d   : > { %8708 = vst [vmem:[#allocation233_spill] sm:$0xff] %v5989_v37  ;;  %v5991_v42 = vpop.permute.xlu1 %1516 }
 0x28e   : > { %8709 = vst [vmem:[#allocation410_spill] sm:$0xff] %v5991_v42  ;;  %1694 = vrot.lane.b32.xlu0 %v8710_v15, %s4017_s6 }
 0x28f   : > { %1696 = vrot.lane.b32.xlu1 %v8711_v36, %s4017_s6 }
 0x290   : > { %v5997_v16 = vpop.permute.xlu0 %1518 }
 0x291   : > { %8712 = vst [vmem:[#allocation411_spill] sm:$0xff] %v5997_v16  ;;  %v5999_v30 = vpop.permute.xlu1 %1520 }
 0x292   : > { %8713 = vst [vmem:[#allocation412_spill] sm:$0xff] %v5999_v30  ;;  %1698 = vrot.lane.b32.xlu0 %v5216_v26, %s4017_s6  ;;  %v8715_v26 = vld [vmem:[#allocation189_spill] sm:$0xff] }
 0x293   : > { %1700 = vrot.lane.b32.xlu1 %v8714_v27, %s4017_s6 }
 0x294   : > { %v6005_v35 = vpop.permute.xlu0 %1586 }
 0x295   : > { %v6007_v37 = vpop.permute.xlu1 %1588 }
 0x296   : > { %1702 = vrot.lane.b32.xlu0 %v5232_v31, %s4017_s6  ;;  %v8716_v31 = vld [vmem:[#allocation191_spill] sm:$0xff] }
 0x297   : > { %1704 = vrot.lane.b32.xlu1 %v5239_v50, %s4017_s6 }
 0x298   : > { %v6013_v42 = vpop.permute.xlu0 %1590 }
 0x299   : > { %v6015_v16 = vpop.permute.xlu1 %1592 }
 0x29a   : > { %1706 = vrot.lane.b32.xlu0 %v5248_v53, %s4017_s6 }
 0x29b   : > { %1708 = vrot.lane.b32.xlu1 %v5253_v57, %s4017_s6 }
 0x29c   : > { %v6021_v30 = vpop.permute.xlu0 %1594 }
 0x29d   : > { %v6023_v27 = vpop.permute.xlu1 %1596 }
 0x29e   : > { %1710 = vrot.lane.b32.xlu0 %v8715_v26, %s4017_s6 }
 0x29f   : > { %1712 = vrot.lane.b32.xlu1 %v8716_v31, %s4017_s6  ;;  %s3953_s6 = sshll.u32 %s4021_s5, 4  ;;  %s3954_s6 = int_to_ptr.vmem [resolvable:$false] %s3953_s6 }
 0x2a0   : > { %v6029_v50 = vpop.permute.xlu0 %1598  ;;  %s3955_s8 = scalar_lea.vmem %s3954_s6, 16384 }
 0x2a1   : > { %v6031_v36 = vpop.permute.xlu1 %1600 }
 0x2a2   : > { %1778 = vrot.lane.b32.xlu0 %v4125_v25, %s4018_s7 }
 0x2a3   : > { %1780 = vrot.lane.b32.xlu1 %v4122_v24, %s4018_s7 }
 0x2a4   : > { %v6037_v57 = vpop.permute.xlu0 %1602 }
 0x2a5   : > { %8717 = vst [vmem:[#allocation413_spill] sm:$0xff] %v6037_v57  ;;  %v6039_v53 = vpop.permute.xlu1 %1604 }
 0x2a6   : > { %8718 = vst [vmem:[#allocation414_spill] sm:$0xff] %v6039_v53  ;;  %1782 = vrot.lane.b32.xlu0 %v4148_v34, %s4018_s7 }
 0x2a7   : > { %1784 = vrot.lane.b32.xlu1 %v4145_v33, %s4018_s7 }
 0x2a8   : > { %v6045_v31 = vpop.permute.xlu0 %1606 }
 0x2a9   : > { %8719 = vst [vmem:[#allocation415_spill] sm:$0xff] %v6045_v31  ;;  %v6047_v26 = vpop.permute.xlu1 %1608 }
 0x2aa   : > { %8720 = vst [vmem:[#allocation416_spill] sm:$0xff] %v6047_v26  ;;  %1786 = vrot.lane.b32.xlu0 %v4173_v49, %s4018_s7 }
 0x2ab   : > { %1788 = vrot.lane.b32.xlu1 %v4170_v48, %s4018_s7 }
 0x2ac   : > { %v6053_v15 = vpop.permute.xlu0 %1610 }
 0x2ad   : > { %8721 = vst [vmem:[#allocation417_spill] sm:$0xff] %v6053_v15  ;;  %v6055_v57 = vpop.permute.xlu1 %1612 }
 0x2ae   : > { %8722 = vst [vmem:[#allocation418_spill] sm:$0xff] %v6055_v57  ;;  %1790 = vrot.lane.b32.xlu0 %v4188_v56, %s4018_s7 }
 0x2af   : > { %1792 = vrot.lane.b32.xlu1 %v4185_v55, %s4018_s7  ;;  %v8827_v55 = vld [vmem:[#allocation34_spill] sm:$0xff] }
 0x2b0   : > { %v6061_v53 = vpop.permute.xlu0 %1614 }
 0x2b1   : > { %8723 = vst [vmem:[#allocation419_spill] sm:$0xff] %v6061_v53  ;;  %v6063_v31 = vpop.permute.xlu1 %1616 }
 0x2b2   : > { %8724 = vst [vmem:[#allocation420_spill] sm:$0xff] %v6063_v31  ;;  %1794 = vrot.lane.b32.xlu0 %v4208_v0, %s4018_s7  ;;  %v8814_v0 = vld [vmem:[#allocation178_spill] sm:$0xff] }
 0x2b3   : > { %1796 = vrot.lane.b32.xlu1 %v4200_v62, %s4018_s7 }
 0x2b4   : > { %v6069_v26 = vpop.permute.xlu0 %1618 }
 0x2b5   : > { %8725 = vst [vmem:[#allocation421_spill] sm:$0xff] %v6069_v26  ;;  %v6071_v15 = vpop.permute.xlu1 %1620 }
 0x2b6   : > { %8726 = vst [vmem:[#allocation422_spill] sm:$0xff] %v6071_v15  ;;  %1798 = vrot.lane.b32.xlu0 %v4230_v12, %s4018_s7  ;;  %v8731_v15 = vld [vmem:[#allocation31_spill] sm:$0xff]  ;;  %v2877_v12 = vld [vmem:[%s7777_s1 + $0x18] sm:$0xff] }
 0x2b7   : > { %1800 = vrot.lane.b32.xlu1 %v4227_v11, %s4018_s7  ;;  %v2874_v11 = vld [vmem:[%s7777_s1] sm:$0xff] }
 0x2b8   : > { %v6077_v57 = vpop.permute.xlu0 %1622 }
 0x2b9   : > { %8727 = vst [vmem:[#allocation423_spill] sm:$0xff] %v6077_v57  ;;  %v6079_v53 = vpop.permute.xlu1 %1624  ;;  %v8732_v57 = vld [vmem:[#allocation30_spill] sm:$0xff] }
 0x2ba   : > { %8728 = vst [vmem:[#allocation424_spill] sm:$0xff] %v6079_v53  ;;  %1802 = vrot.lane.b32.xlu0 %v8283_v43, %s4018_s7  ;;  %v2875_v53 = vld [vmem:[%s7777_s1 + $0x8] sm:$0xff] }
 0x2bb   : > { %1804 = vrot.lane.b32.xlu1 %v8284_v22, %s4018_s7  ;;  %v3875_v43 = vpack.c.bf16 %v2875_v53, %v2874_v11  ;;  %v8736_v11 = vld [vmem:[#allocation42_spill] sm:$0xff] }
 0x2bc   : > { %v6085_v31 = vpop.permute.xlu0 %1626 }
 0x2bd   : > { %8729 = vst [vmem:[#allocation425_spill] sm:$0xff] %v6085_v31  ;;  %v6087_v26 = vpop.permute.xlu1 %1628  ;;  %3876 = vmatprep.subr.bf16.mxu0 %v3875_v43  ;;  %3891 = vmatprep.subr.bf16.mxu1 %v3875_v43 }
 0x2be   : > { %8730 = vst [vmem:[#allocation426_spill] sm:$0xff] %v6087_v26  ;;  %1806 = vrot.lane.b32.xlu0 %v8731_v15, %s4018_s7  ;;  %v8735_v26 = vld [vmem:[#allocation43_spill] sm:$0xff]  ;;  %3878 = vmatpush3.bf16.msra.mxu0 %v3875_v43 }
 0x2bf   : > { %1808 = vrot.lane.b32.xlu1 %v8732_v57, %s4018_s7  ;;  %v2876_v15 = vld [vmem:[%s7777_s1 + $0x10] sm:$0xff]  ;;  %3896 = vmatpush3.bf16.msra.mxu1 %v3875_v43  ;;  %v2878_v57 = vld [vmem:[%s7777_s1 + $0x20] sm:$0xff] }
 0x2c0   : > { %v6099_v22 = vpop.permute.xlu0 %1630  ;;  %v3879_v53 = vpack.c.bf16 %v2877_v12, %v2876_v15  ;;  %v8740_v15 = vld [vmem:[#allocation44_spill] sm:$0xff] }
 0x2c1   : > { %8733 = vst [vmem:[#allocation427_spill] sm:$0xff] %v6099_v22  ;;  %v6101_v31 = vpop.permute.xlu1 %1632 }
 0x2c2   : > { %8734 = vst [vmem:[#allocation428_spill] sm:$0xff] %v6101_v31  ;;  %1810 = vrot.lane.b32.xlu0 %v8735_v26, %s4018_s7  ;;  %3880 = vmatprep.subr.bf16.mxu0 %v3879_v53  ;;  %v8739_v26 = vld [vmem:[#allocation45_spill] sm:$0xff] }
 0x2c3   : > { %1812 = vrot.lane.b32.xlu1 %v8736_v11, %s4018_s7  ;;  %3892 = vmatprep.subr.bf16.mxu1 %v3879_v53  ;;  %v2879_v11 = vld [vmem:[%s7777_s1 + $0x28] sm:$0xff] }
 0x2c4   : > { %v6113_v31 = vpop.permute.xlu0 %1634  ;;  %3882 = vmatpush3.bf16.msra.mxu0 %v3879_v53  ;;  %v3883_v12 = vpack.c.bf16 %v2879_v11, %v2878_v57  ;;  %3897 = vmatpush3.bf16.msra.mxu1 %v3879_v53 }
 0x2c5   : > { %8737 = vst [vmem:[#allocation429_spill] sm:$0xff] %v6113_v31  ;;  %v6115_v22 = vpop.permute.xlu1 %1636  ;;  %v2880_v31 = vld [vmem:[%s7777_s1 + $0x30] sm:$0xff] }
 0x2c6   : > { %8738 = vst [vmem:[#allocation430_spill] sm:$0xff] %v6115_v22  ;;  %1814 = vrot.lane.b32.xlu0 %v8739_v26, %s4018_s7  ;;  %3884 = vmatprep.subr.bf16.mxu0 %v3883_v12  ;;  %v8779_v26 = vld [vmem:[#allocation99_spill] sm:$0xff] }
 0x2c7   : > { %1816 = vrot.lane.b32.xlu1 %v8740_v15, %s4018_s7  ;;  %3893 = vmatprep.subr.bf16.mxu1 %v3883_v12  ;;  %v2881_v15 = vld [vmem:[%s7777_s1 + $0x38] sm:$0xff] }
 0x2c8   : > { %v6127_v43 = vpop.permute.xlu0 %1638  ;;  %3886 = vmatpush3.bf16.msra.mxu0 %v3883_v12  ;;  %v3887_v57 = vpack.c.bf16 %v2881_v15, %v2880_v31  ;;  %3898 = vmatpush3.bf16.msra.mxu1 %v3883_v12 }
 0x2c9   : > { %8741 = vst [vmem:[#allocation431_spill] sm:$0xff] %v6127_v43  ;;  %v6129_v22 = vpop.permute.xlu1 %1640 }
 0x2ca   : > { %8742 = vst [vmem:[#allocation432_spill] sm:$0xff] %v6129_v22  ;;  %1818 = vrot.lane.b32.xlu0 %v8426_v41, %s4018_s7  ;;  %3888 = vmatprep.subr.bf16.mxu0 %v3887_v57  ;;  %v2882_v22 = vld [vmem:[%s7777_s1 + $0x40] sm:$0xff] }
 0x2cb   : > { %1820 = vrot.lane.b32.xlu1 %v8427_v58, %s4018_s7  ;;  %3894 = vmatprep.subr.bf16.mxu1 %v3887_v57  ;;  %v8775_v58 = vld [vmem:[#allocation211_spill] sm:$0xff] }
 0x2cc   : > { %v6141_v11 = vpop.permute.xlu0 %1642  ;;  %3890 = vmatpush3.bf16.msra.mxu0 %v3887_v57  ;;  %3899 = vmatpush3.bf16.msra.mxu1 %v3887_v57 }
 0x2cd   : > { %8743 = vst [vmem:[#allocation433_spill] sm:$0xff] %v6141_v11  ;;  %v6143_v53 = vpop.permute.xlu1 %1644  ;;  %3777 = vmatprep.subr.mxu0 %v2882_v22  ;;  %3895 = vmatprep.subr.mxu1 %v2882_v22 }
 0x2ce   : > { %8744 = vst [vmem:[#allocation434_spill] sm:$0xff] %v6143_v53  ;;  %1822 = vrot.lane.b32.xlu0 %v8430_v14, %s4018_s7 }
 0x2cf   : > { %1842 = vrot.lane.b32.xlu1 %v4333_v7, %s4018_s7 }
 0x2d0   : > { %v6152_v31 = vpop.permute.xlu0 %1646  ;;  %3778 = vmatpush3.msra.mxu0 %v2882_v22  ;;  %3900 = vmatpush3.msra.mxu1 %v2882_v22 }
 0x2d1   : > { %8745 = vst [vmem:[#allocation435_spill] sm:$0xff] %v6152_v31  ;;  %v6154_v15 = vpop.permute.xlu1 %1648 }
 0x2d2   : > { %8746 = vst [vmem:[#allocation436_spill] sm:$0xff] %v6154_v15  ;;  %1844 = vrot.lane.b32.xlu0 %v4330_v6, %s4018_s7 }
 0x2d3   : > { %1970 = vrot.lane.b32.xlu1 %v8478_v61, %s4019_s10 }
 0x2d4   : > { %v6160_v12 = vpop.permute.xlu0 %1650 }
 0x2d5   : > { %v6162_v53 = vpop.permute.xlu1 %1652 }
 0x2d6   : > { %2034 = vrot.lane.b32.xlu0 %v8542_v60, %s4019_s10 }
 0x2d7   : > { %1972 = vrot.lane.b32.xlu1 %v8479_v59, %s4019_s10 }
 0x2d8   : > { %v6168_v57 = vpop.permute.xlu0 %1654 }
 0x2d9   : > { %v6170_v15 = vpop.permute.xlu1 %1656 }
 0x2da   : > { %2036 = vrot.lane.b32.xlu0 %v8543_v40, %s4019_s10 }
 0x2db   : > { %2162 = vrot.lane.b32.xlu1 %v8606_v52, %s4020_s11 }
 0x2dc   : > { %v6176_v61 = vpop.permute.xlu0 %1658 }
 0x2dd   : > { %v6178_v22 = vpop.permute.xlu1 %1660 }
 0x2de   : > { %2226 = vrot.lane.b32.xlu0 %v8670_v4, %s4020_s11 }
 0x2df   : > { %2164 = vrot.lane.b32.xlu1 %v8607_v54, %s4020_s11 }
 0x2e0   : > { %v6184_v59 = vpop.permute.xlu0 %1662 }
 0x2e1   : > { %v6186_v60 = vpop.permute.xlu1 %1664 }
 0x2e2   : > { %2228 = vrot.lane.b32.xlu0 %v8671_v63, %s4020_s11 }
 0x2e3   : > { %1846 = vrot.lane.b32.xlu1 %v4345_v10, %s4018_s7 }
 0x2e4   : > { %v6192_v52 = vpop.permute.xlu0 %1666 }
 0x2e5   : > { %v6194_v40 = vpop.permute.xlu1 %1668 }
 0x2e6   : > { %1848 = vrot.lane.b32.xlu0 %v4342_v9, %s4018_s7 }
 0x2e7   : > { %1974 = vrot.lane.b32.xlu1 %v8482_v2, %s4019_s10 }
 0x2e8   : > { %v6200_v4 = vpop.permute.xlu0 %1670 }
 0x2e9   : > { %8747 = vst [vmem:[#allocation437_spill] sm:$0xff] %v6200_v4  ;;  %v6202_v54 = vpop.permute.xlu1 %1672  ;;  %v8820_v4 = vld [vmem:[#allocation279_spill] sm:$0xff] }
 0x2ea   : > { %8748 = vst [vmem:[#allocation438_spill] sm:$0xff] %v6202_v54  ;;  %2038 = vrot.lane.b32.xlu0 %v8546_v3, %s4019_s10 }
 0x2eb   : > { %1976 = vrot.lane.b32.xlu1 %v8483_v5, %s4019_s10 }
 0x2ec   : > { %v6208_v63 = vpop.permute.xlu0 %1674 }
 0x2ed   : > { %8749 = vst [vmem:[#allocation439_spill] sm:$0xff] %v6208_v63  ;;  %v6210_v31 = vpop.permute.xlu1 %1676  ;;  %v8810_v63 = vld [vmem:[#allocation6_spill] sm:$0xff] }
 0x2ee   : > { %8750 = vst [vmem:[#allocation440_spill] sm:$0xff] %v6210_v31  ;;  %2040 = vrot.lane.b32.xlu0 %v8547_v13, %s4019_s10 }
 0x2ef   : > { %2166 = vrot.lane.b32.xlu1 %v8610_v44, %s4020_s11 }
 0x2f0   : > { %v6216_v2 = vpop.permute.xlu0 %1678 }
 0x2f1   : > { %8751 = vst [vmem:[#allocation441_spill] sm:$0xff] %v6216_v2  ;;  %v6218_v11 = vpop.permute.xlu1 %1680  ;;  %v8791_v2 = vld [vmem:[#allocation215_spill] sm:$0xff] }
 0x2f2   : > { %8752 = vst [vmem:[#allocation442_spill] sm:$0xff] %v6218_v11  ;;  %2230 = vrot.lane.b32.xlu0 %v8674_v1, %s4020_s11 }
 0x2f3   : > { %2168 = vrot.lane.b32.xlu1 %v8611_v45, %s4020_s11 }
 0x2f4   : > { %v6224_v5 = vpop.permute.xlu0 %1682 }
 0x2f5   : > { %8753 = vst [vmem:[#allocation443_spill] sm:$0xff] %v6224_v5  ;;  %v6226_v3 = vpop.permute.xlu1 %1684  ;;  %v8787_v5 = vld [vmem:[#allocation213_spill] sm:$0xff] }
 0x2f6   : > { %8754 = vst [vmem:[#allocation444_spill] sm:$0xff] %v6226_v3  ;;  %2232 = vrot.lane.b32.xlu0 %v8675_v38, %s4020_s11 }
 0x2f7   : > { %1850 = vrot.lane.b32.xlu1 %v4359_v8, %s4018_s7 }
 0x2f8   : > { %v6232_v13 = vpop.permute.xlu0 %1686 }
 0x2f9   : > { %8755 = vst [vmem:[#allocation445_spill] sm:$0xff] %v6232_v13  ;;  %v6234_v44 = vpop.permute.xlu1 %1688  ;;  %v8784_v13 = vld [vmem:[#allocation149_spill] sm:$0xff] }
 0x2fa   : > { %8756 = vst [vmem:[#allocation446_spill] sm:$0xff] %v6234_v44  ;;  %1852 = vrot.lane.b32.xlu0 %v4356_v23, %s4018_s7  ;;  %v8783_v44 = vld [vmem:[#allocation100_spill] sm:$0xff] }
 0x2fb   : > { %1978 = vrot.lane.b32.xlu1 %v8486_v28, %s4019_s10 }
 0x2fc   : > { %v6240_v1 = vpop.permute.xlu0 %1690 }
 0x2fd   : > { %8757 = vst [vmem:[#allocation447_spill] sm:$0xff] %v6240_v1  ;;  %v6242_v45 = vpop.permute.xlu1 %1692 }
 0x2fe   : > { %8758 = vst [vmem:[#allocation448_spill] sm:$0xff] %v6242_v45  ;;  %2042 = vrot.lane.b32.xlu0 %v8550_v20, %s4019_s10 }
 0x2ff   : > { %1980 = vrot.lane.b32.xlu1 %v8487_v32, %s4019_s10 }
 0x300   : > { %v6248_v38 = vpop.permute.xlu0 %1694 }
 0x301   : > { %8759 = vst [vmem:[#allocation449_spill] sm:$0xff] %v6248_v38  ;;  %v6250_v43 = vpop.permute.xlu1 %1696 }
 0x302   : > { %8760 = vst [vmem:[#allocation450_spill] sm:$0xff] %v6250_v43  ;;  %2044 = vrot.lane.b32.xlu0 %v8551_v21, %s4019_s10  ;;  %v8777_v43 = vld [vmem:[#allocation52_spill] sm:$0xff] }
 0x303   : > { %2170 = vrot.lane.b32.xlu1 %v8614_v29, %s4020_s11 }
 0x304   : > { %v6256_v28 = vpop.permute.xlu0 %1698 }
 0x305   : > { %8761 = vst [vmem:[#allocation451_spill] sm:$0xff] %v6256_v28  ;;  %v6258_v14 = vpop.permute.xlu1 %1700 }
 0x306   : > { %8762 = vst [vmem:[#allocation452_spill] sm:$0xff] %v6258_v14  ;;  %2234 = vrot.lane.b32.xlu0 %v8678_v39, %s4020_s11  ;;  %v8772_v14 = vld [vmem:[#allocation145_spill] sm:$0xff] }
 0x307   : > { %2172 = vrot.lane.b32.xlu1 %v8615_v47, %s4020_s11 }
 0x308   : > { %v6264_v20 = vpop.permute.xlu0 %1702 }
 0x309   : > { %8763 = vst [vmem:[#allocation453_spill] sm:$0xff] %v6264_v20  ;;  %v6266_v32 = vpop.permute.xlu1 %1704 }
 0x30a   : > { %8764 = vst [vmem:[#allocation454_spill] sm:$0xff] %v6266_v32  ;;  %2236 = vrot.lane.b32.xlu0 %v8679_v51, %s4020_s11  ;;  %v8769_v32 = vld [vmem:[#allocation97_spill] sm:$0xff] }
 0x30b   : > { %1854 = vrot.lane.b32.xlu1 %v4375_v19, %s4018_s7  ;;  %v8770_v51 = vld [vmem:[#allocation25_spill] sm:$0xff] }
 0x30c   : > { %v6272_v21 = vpop.permute.xlu0 %1706 }
 0x30d   : > { %8765 = vst [vmem:[#allocation455_spill] sm:$0xff] %v6272_v21  ;;  %v6274_v29 = vpop.permute.xlu1 %1708 }
 0x30e   : > { %8766 = vst [vmem:[#allocation456_spill] sm:$0xff] %v6274_v29  ;;  %1856 = vrot.lane.b32.xlu0 %v4372_v18, %s4018_s7  ;;  %v8771_v29 = vld [vmem:[#allocation98_spill] sm:$0xff]  ;;  %v8821_v18 = vld [vmem:[#allocation36_spill] sm:$0xff] }
 0x30f   : > { %1982 = vrot.lane.b32.xlu1 %v8490_v46, %s4019_s10 }
 0x310   : > { %v6280_v39 = vpop.permute.xlu0 %1710 }
 0x311   : > { %8767 = vst [vmem:[#allocation457_spill] sm:$0xff] %v6280_v39  ;;  %v6282_v47 = vpop.permute.xlu1 %1712 }
 0x312   : > { %8768 = vst [vmem:[#allocation458_spill] sm:$0xff] %v6282_v47  ;;  %2046 = vrot.lane.b32.xlu0 %v8769_v32, %s4019_s10  ;;  %v8773_v47 = vld [vmem:[#allocation209_spill] sm:$0xff]  ;;  %v8774_v32 = vld [vmem:[#allocation147_spill] sm:$0xff] }
 0x313   : > { %1984 = vrot.lane.b32.xlu1 %v8770_v51, %s4019_s10 }
 0x314   : > { %v6288_v20 = vpop.permute.xlu0 %1778 }
 0x315   : > { %v6290_v21 = vpop.permute.xlu1 %1780 }
 0x316   : > { %2048 = vrot.lane.b32.xlu0 %v8771_v29, %s4019_s10  ;;  %v8776_v29 = vld [vmem:[#allocation53_spill] sm:$0xff] }
 0x317   : > { %2174 = vrot.lane.b32.xlu1 %v8772_v14, %s4020_s11 }
 0x318   : > { %v6296_v46 = vpop.permute.xlu0 %1782 }
 0x319   : > { %v6298_v39 = vpop.permute.xlu1 %1784 }
 0x31a   : > { %2238 = vrot.lane.b32.xlu0 %v8773_v47, %s4020_s11  ;;  %v8778_v47 = vld [vmem:[#allocation26_spill] sm:$0xff] }
 0x31b   : > { %2176 = vrot.lane.b32.xlu1 %v8774_v32, %s4020_s11 }
 0x31c   : > { %v6304_v51 = vpop.permute.xlu0 %1786 }
 0x31d   : > { %v6306_v28 = vpop.permute.xlu1 %1788 }
 0x31e   : > { %2240 = vrot.lane.b32.xlu0 %v8775_v58, %s4020_s11  ;;  %v8780_v58 = vld [vmem:[#allocation29_spill] sm:$0xff] }
 0x31f   : > { %1858 = vrot.lane.b32.xlu1 %v8776_v29, %s4018_s7 }
 0x320   : > { %v6312_v14 = vpop.permute.xlu0 %1790 }
 0x321   : > { %v6314_v41 = vpop.permute.xlu1 %1792 }
 0x322   : > { %1860 = vrot.lane.b32.xlu0 %v8777_v43, %s4018_s7 }
 0x323   : > { %1986 = vrot.lane.b32.xlu1 %v8778_v47, %s4019_s10 }
 0x324   : > { %v6320_v32 = vpop.permute.xlu0 %1794 }
 0x325   : > { %v6322_v38 = vpop.permute.xlu1 %1796 }
 0x326   : > { %2050 = vrot.lane.b32.xlu0 %v8779_v26, %s4019_s10  ;;  %v8788_v26 = vld [vmem:[#allocation151_spill] sm:$0xff] }
 0x327   : > { %1988 = vrot.lane.b32.xlu1 %v8780_v58, %s4019_s10 }
 0x328   : > { %v6328_v45 = vpop.permute.xlu0 %1798 }
 0x329   : > { %8781 = vst [vmem:[#allocation97_spill] sm:$0xff] %v6328_v45  ;;  %v6330_v1 = vpop.permute.xlu1 %1800  ;;  %v8826_v45 = vld [vmem:[#allocation180_spill] sm:$0xff] }
 0x32a   : > { %8782 = vst [vmem:[#allocation25_spill] sm:$0xff] %v6330_v1  ;;  %2052 = vrot.lane.b32.xlu0 %v8783_v44, %s4019_s10  ;;  %v8792_v44 = vld [vmem:[#allocation57_spill] sm:$0xff]  ;;  %v8816_v1 = vld [vmem:[#allocation362_spill] sm:$0xff] }
 0x32b   : > { %2178 = vrot.lane.b32.xlu1 %v8784_v13, %s4020_s11 }
 0x32c   : > { %v6336_v47 = vpop.permute.xlu0 %1802 }
 0x32d   : > { %8785 = vst [vmem:[#allocation98_spill] sm:$0xff] %v6336_v47  ;;  %v6338_v3 = vpop.permute.xlu1 %1804  ;;  %v8813_v47 = vld [vmem:[#allocation311_spill] sm:$0xff] }
 0x32e   : > { %8786 = vst [vmem:[#allocation145_spill] sm:$0xff] %v6338_v3  ;;  %2242 = vrot.lane.b32.xlu0 %v8787_v5, %s4020_s11  ;;  %v8795_v3 = vld [vmem:[#allocation56_spill] sm:$0xff] }
 0x32f   : > { %2180 = vrot.lane.b32.xlu1 %v8788_v26, %s4020_s11  ;;  %v8796_v5 = vld [vmem:[#allocation32_spill] sm:$0xff] }
 0x330   : > { %v6344_v58 = vpop.permute.xlu0 %1806 }
 0x331   : > { %8789 = vst [vmem:[#allocation209_spill] sm:$0xff] %v6344_v58  ;;  %v6346_v11 = vpop.permute.xlu1 %1808 }
 0x332   : > { %8790 = vst [vmem:[#allocation147_spill] sm:$0xff] %v6346_v11  ;;  %2244 = vrot.lane.b32.xlu0 %v8791_v2, %s4020_s11  ;;  %v8799_v11 = vld [vmem:[#allocation101_spill] sm:$0xff] }
 0x333   : > { %1862 = vrot.lane.b32.xlu1 %v8792_v44, %s4018_s7  ;;  %v8800_v2 = vld [vmem:[#allocation33_spill] sm:$0xff] }
 0x334   : > { %v6352_v13 = vpop.permute.xlu0 %1810 }
 0x335   : > { %8793 = vst [vmem:[#allocation211_spill] sm:$0xff] %v6352_v13  ;;  %v6354_v31 = vpop.permute.xlu1 %1812 }
 0x336   : > { %8794 = vst [vmem:[#allocation26_spill] sm:$0xff] %v6354_v31  ;;  %1864 = vrot.lane.b32.xlu0 %v8795_v3, %s4018_s7  ;;  %v8803_v31 = vld [vmem:[#allocation102_spill] sm:$0xff]  ;;  %v8804_v3 = vld [vmem:[#allocation153_spill] sm:$0xff] }
 0x337   : > { %1990 = vrot.lane.b32.xlu1 %v8796_v5, %s4019_s10 }
 0x338   : > { %v6360_v26 = vpop.permute.xlu0 %1814 }
 0x339   : > { %8797 = vst [vmem:[#allocation99_spill] sm:$0xff] %v6360_v26  ;;  %v6362_v58 = vpop.permute.xlu1 %1816 }
 0x33a   : > { %8798 = vst [vmem:[#allocation29_spill] sm:$0xff] %v6362_v58  ;;  %2054 = vrot.lane.b32.xlu0 %v8799_v11, %s4019_s10  ;;  %v8806_v58 = vld [vmem:[#allocation217_spill] sm:$0xff]  ;;  %v8807_v11 = vld [vmem:[#allocation155_spill] sm:$0xff] }
 0x33b   : > { %1992 = vrot.lane.b32.xlu1 %v8800_v2, %s4019_s10 }
 0x33c   : > { %v6368_v44 = vpop.permute.xlu0 %1818 }
 0x33d   : > { %8801 = vst [vmem:[#allocation100_spill] sm:$0xff] %v6368_v44  ;;  %v6370_v13 = vpop.permute.xlu1 %1820 }
 0x33e   : > { %8802 = vst [vmem:[#allocation149_spill] sm:$0xff] %v6370_v13  ;;  %2056 = vrot.lane.b32.xlu0 %v8803_v31, %s4019_s10  ;;  %v8808_v13 = vld [vmem:[#allocation219_spill] sm:$0xff]  ;;  %v8809_v31 = vld [vmem:[#allocation114_spill] sm:$0xff] }
 0x33f   : > { %2182 = vrot.lane.b32.xlu1 %v8804_v3, %s4020_s11  ;;  %v2355_v3 = vsel %vm2354_vm3, %v8810_v63, %v8809_v31  ;;  %v8817_v63 = vld [vmem:[#allocation59_spill] sm:$0xff] }
 0x340   : > { %v6376_v5 = vpop.permute.xlu0 %1822 }
 0x341   : > { %8805 = vst [vmem:[#allocation213_spill] sm:$0xff] %v6376_v5  ;;  %v1843_v26 = vpop.permute.xlu1 %1842  ;;  %v8811_v5 = vld [vmem:[#allocation60_spill] sm:$0xff] }
 0x342   : > { %2246 = vrot.lane.b32.xlu0 %v8806_v58, %s4020_s11  ;;  %v8812_v58 = vld [vmem:[#allocation242_spill] sm:$0xff] }
 0x343   : > { %2184 = vrot.lane.b32.xlu1 %v8807_v11, %s4020_s11  ;;  %v2420_v43 = vsel %vm2419_vm4, %v2355_v3, %v8812_v58  ;;  %v8819_v3 = vld [vmem:[#allocation5_spill] sm:$0xff] }
 0x344   : > { %v1845_v2 = vpop.permute.xlu0 %1844  ;;  %v2485_v62 = vsel %vm2484_vm5, %v2420_v43, %v8813_v47 }
 0x345   : > { %v1971_v44 = vpop.permute.xlu1 %1970  ;;  %v2550_v31 = vsel %vm2549_vm6, %v2485_v62, %v8816_v1  ;;  %v8823_v1 = vld [vmem:[#allocation336_spill] sm:$0xff] }
 0x346   : > { %2248 = vrot.lane.b32.xlu0 %v8808_v13, %s4020_s11  ;;  %v8815_v13 = vld [vmem:[#allocation35_spill] sm:$0xff]  ;;  %v2615_v47 = vsel %vm2614_vm7, %v2550_v31, %v6005_v35 }
 0x347   : > { %1866 = vrot.lane.b32.xlu1 %v8811_v5, %s4018_s7  ;;  %v2387_v54 = vsel %vm2354_vm3, %v8815_v13, %v8814_v0  ;;  %v8818_v5 = vld [vmem:[#allocation118_spill] sm:$0xff]  ;;  %v8822_v0 = vld [vmem:[#allocation244_spill] sm:$0xff] }
 0x348   : > { %v2035_v11 = vpop.permute.xlu0 %2034  ;;  %v2356_v58 = vsel %vm2354_vm3, %v8819_v3, %v8818_v5  ;;  %v2452_v43 = vsel %vm2419_vm4, %v2387_v54, %v8820_v4  ;;  %v8824_v3 = vld [vmem:[#allocation312_spill] sm:$0xff] }
 0x349   : > { %v1973_v29 = vpop.permute.xlu1 %1972  ;;  %v2421_v62 = vsel %vm2419_vm4, %v2356_v58, %v8822_v0  ;;  %v2517_v13 = vsel %vm2484_vm5, %v2452_v43, %v8823_v1  ;;  %v8825_v54 = vld [vmem:[#allocation388_spill] sm:$0xff]  ;;  %v2388_v58 = vsel %vm2354_vm3, %v8827_v55, %v8826_v45  ;;  %v8828_v0 = vld [vmem:[#allocation363_spill] sm:$0xff]  ;;  %v8831_v45 = vld [vmem:[#allocation37_spill] sm:$0xff] }
 0x34a   : > { %1868 = vrot.lane.b32.xlu0 %v8817_v63, %s4018_s7  ;;  %v2680_v63 = vsel %vm2679_vm8, %v2615_v47, %v6288_v20  ;;  %v2486_v4 = vsel %vm2484_vm5, %v2421_v62, %v8824_v3  ;;  %v2582_v35 = vsel %vm2549_vm6, %v2517_v13, %v8825_v54  ;;  %v8829_v47 = vld [vmem:[#allocation103_spill] sm:$0xff]  ;;  %v8830_v62 = vld [vmem:[#allocation280_spill] sm:$0xff]  ;;  %v8832_v1 = vld [vmem:[#allocation337_spill] sm:$0xff] }
 0x34b   : > { %1994 = vrot.lane.b32.xlu1 %v8821_v18, %s4019_s10  ;;  %v2745_v18 = vsel %vm2744_vm9, %v2680_v63, %v1971_v44  ;;  %v2551_v43 = vsel %vm2549_vm6, %v2486_v4, %v8828_v0  ;;  %v2647_v20 = vsel %vm2614_vm7, %v2582_v35, %v6160_v12  ;;  %v2453_v13 = vsel %vm2419_vm4, %v2388_v58, %v8830_v62  ;;  %v8836_v62 = vld [vmem:[#allocation221_spill] sm:$0xff] }
 0x34c   : > { %v2037_v5 = vpop.permute.xlu0 %2036  ;;  %v2616_v63 = vsel %vm2614_vm7, %v2551_v43, %v6007_v37  ;;  %v2712_v44 = vsel %vm2679_vm8, %v2647_v20, %v1843_v26  ;;  %v2518_v12 = vsel %vm2484_vm5, %v2453_v13, %v8832_v1  ;;  %v8834_v20 = vld [vmem:[#allocation104_spill] sm:$0xff]  ;;  %v8837_v13 = vld [vmem:[#allocation159_spill] sm:$0xff] }
 0x34d   : > { %v2163_v31 = vpop.permute.xlu1 %2162  ;;  %v2681_v4 = vsel %vm2679_vm8, %v2616_v63, %v6290_v21  ;;  %v2777_v54 = vsel %vm2744_vm9, %v2712_v44, %v2035_v11  ;;  %v8835_v11 = vld [vmem:[#allocation157_spill] sm:$0xff]  ;;  %v8838_v44 = vld [vmem:[#allocation223_spill] sm:$0xff]  ;;  %v8840_v1 = vld [vmem:[#allocation8_spill] sm:$0xff] }
 0x34e   : > { %2058 = vrot.lane.b32.xlu0 %v8829_v47, %s4019_s10  ;;  %v2810_v3 = vsel %vm2809_vm10, %v2745_v18, %v2163_v31  ;;  %v8833_v18 = vld [vmem:[#allocation389_spill] sm:$0xff]  ;;  %v2746_v37 = vsel %vm2744_vm9, %v2681_v4, %v1973_v29  ;;  %v8842_v4 = vld [vmem:[#allocation246_spill] sm:$0xff] }
 0x34f   : > { %1996 = vrot.lane.b32.xlu1 %v8831_v45, %s4019_s10  ;;  %3779 = vmatprep.mubr.msk.f32.mxu0 %vm2890_vm11, %v2810_v3  ;;  %v2583_v31 = vsel %vm2549_vm6, %v2518_v12, %v8833_v18  ;;  %v8839_v45 = vld [vmem:[#allocation116_spill] sm:$0xff]  ;;  %v8841_v12 = vld [vmem:[#allocation63_spill] sm:$0xff]  ;;  %v8843_v18 = vld [vmem:[#allocation313_spill] sm:$0xff] }
 0x350   : > { %v2227_v35 = vpop.permute.xlu0 %2226  ;;  %v2648_v0 = vsel %vm2614_vm7, %v2583_v31, %v6162_v53 }
 0x351   : > { %v2165_v26 = vpop.permute.xlu1 %2164  ;;  %v2842_v58 = vsel %vm2809_vm10, %v2777_v54, %v2227_v35  ;;  %v2713_v21 = vsel %vm2679_vm8, %v2648_v0, %v1845_v2 }
 0x352   : > { %v2811_v43 = vsel %vm2809_vm10, %v2746_v37, %v2165_v26  ;;  %2060 = vrot.lane.b32.xlu0 %v8834_v20, %s4019_s10  ;;  %3827 = vmatprep.mubr.msk.f32.mxu1 %vm2890_vm11, %v2842_v58  ;;  %v2778_v29 = vsel %vm2744_vm9, %v2713_v21, %v2037_v5  ;;  %v2357_v5 = vsel %vm2354_vm3, %v8840_v1, %v8839_v45  ;;  %v8844_v26 = vld [vmem:[#allocation182_spill] sm:$0xff]  ;;  %v8845_v58 = vld [vmem:[#allocation39_spill] sm:$0xff]  ;;  %v8852_v45 = vld [vmem:[#allocation248_spill] sm:$0xff] }
 0x353   : > { %2186 = vrot.lane.b32.xlu1 %v8835_v11, %s4020_s11  ;;  %3780 = vmatmul.mubr.msk.f32.vlgmr.msra.gmra.mrb[0].mxu0 %vm2890_vm11, %v2811_v43  ;;  %v2422_v54 = vsel %vm2419_vm4, %v2357_v5, %v8842_v4  ;;  %v2389_v0 = vsel %vm2354_vm3, %v8845_v58, %v8844_v26  ;;  %v8846_v43 = vld [vmem:[#allocation364_spill] sm:$0xff]  ;;  %v8847_v21 = vld [vmem:[#allocation62_spill] sm:$0xff] }
 0x354   : > { %v2229_v47 = vpop.permute.xlu0 %2228  ;;  %v2487_v31 = vsel %vm2484_vm5, %v2422_v54, %v8843_v18  ;;  %v8848_v11 = vld [vmem:[#allocation120_spill] sm:$0xff]  ;;  %v8853_v4 = vld [vmem:[#allocation338_spill] sm:$0xff] }
 0x355   : > { %v2843_v3 = vsel %vm2809_vm10, %v2778_v29, %v2229_v47  ;;  %v1847_v53 = vpop.permute.xlu1 %1846  ;;  %v2552_v20 = vsel %vm2549_vm6, %v2487_v31, %v8846_v43  ;;  %v8849_v29 = vld [vmem:[#allocation7_spill] sm:$0xff]  ;;  %v8854_v26 = vld [vmem:[#allocation314_spill] sm:$0xff] }
 0x356   : > { %2250 = vrot.lane.b32.xlu0 %v8836_v62, %s4020_s11  ;;  %3828 = vmatmul.mubr.msk.f32.vlgmr.msra.gmra.mrb[0].mxu1 %vm2890_vm11, %v2843_v3  ;;  %v2358_v47 = vsel %vm2354_vm3, %v8849_v29, %v8848_v11  ;;  %v8850_v3 = vld [vmem:[#allocation281_spill] sm:$0xff] }
 0x357   : > { %2188 = vrot.lane.b32.xlu1 %v8837_v13, %s4020_s11  ;;  %v2454_v62 = vsel %vm2419_vm4, %v2389_v0, %v8850_v3  ;;  %v2617_v13 = vsel %vm2614_vm7, %v2552_v20, %v6013_v42  ;;  %v2423_v5 = vsel %vm2419_vm4, %v2358_v47, %v8852_v45  ;;  %v8855_v0 = vld [vmem:[#allocation390_spill] sm:$0xff]  ;;  %v8856_v3 = vld [vmem:[#allocation184_spill] sm:$0xff]  ;;  %v8858_v45 = vld [vmem:[#allocation365_spill] sm:$0xff] }
 0x358   : > { %v1849_v2 = vpop.permute.xlu0 %1848  ;;  %v2519_v54 = vsel %vm2484_vm5, %v2454_v62, %v8853_v4  ;;  %v2682_v18 = vsel %vm2679_vm8, %v2617_v13, %v6296_v46  ;;  %v2488_v43 = vsel %vm2484_vm5, %v2423_v5, %v8854_v26  ;;  %v8859_v5 = vld [vmem:[#allocation105_spill] sm:$0xff]  ;;  %v8860_v4 = vld [vmem:[#allocation282_spill] sm:$0xff] }
 0x359   : > { %v1975_v63 = vpop.permute.xlu1 %1974  ;;  %v2584_v11 = vsel %vm2549_vm6, %v2519_v54, %v8855_v0  ;;  %v2553_v62 = vsel %vm2549_vm6, %v2488_v43, %v8858_v45  ;;  %v8861_v26 = vld [vmem:[#allocation41_spill] sm:$0xff]  ;;  %v8862_v43 = vld [vmem:[#allocation339_spill] sm:$0xff] }
 0x35a   : > { %2252 = vrot.lane.b32.xlu0 %v8838_v44, %s4020_s11  ;;  %v8851_v44 = vld [vmem:[#allocation40_spill] sm:$0xff]  ;;  %v2747_v42 = vsel %vm2744_vm9, %v2682_v18, %v1975_v63  ;;  %v2649_v46 = vsel %vm2614_vm7, %v2584_v11, %v6168_v57  ;;  %v2618_v63 = vsel %vm2614_vm7, %v2553_v62, %v6015_v16 }
 0x35b   : > { %1870 = vrot.lane.b32.xlu1 %v8841_v12, %s4018_s7  ;;  %v2714_v18 = vsel %vm2679_vm8, %v2649_v46, %v1847_v53  ;;  %v2683_v0 = vsel %vm2679_vm8, %v2618_v63, %v6298_v39  ;;  %v8864_v46 = vld [vmem:[#allocation106_spill] sm:$0xff] }
 0x35c   : > { %v2039_v35 = vpop.permute.xlu0 %2038 }
 0x35d   : > { %v1977_v37 = vpop.permute.xlu1 %1976  ;;  %v2779_v11 = vsel %vm2744_vm9, %v2714_v18, %v2039_v35  ;;  %v8865_v35 = vld [vmem:[#allocation161_spill] sm:$0xff]  ;;  %v8868_v18 = vld [vmem:[#allocation227_spill] sm:$0xff] }
 0x35e   : > { %1872 = vrot.lane.b32.xlu0 %v8847_v21, %s4018_s7  ;;  %v2748_v16 = vsel %vm2744_vm9, %v2683_v0, %v1977_v37 }
 0x35f   : > { %1998 = vrot.lane.b32.xlu1 %v8851_v44, %s4019_s10  ;;  %v8857_v44 = vld [vmem:[#allocation38_spill] sm:$0xff] }
 0x360   : > { %v2041_v31 = vpop.permute.xlu0 %2040  ;;  %v2390_v47 = vsel %vm2354_vm3, %v8857_v44, %v8856_v3 }
 0x361   : > { %v2167_v20 = vpop.permute.xlu1 %2166  ;;  %v2455_v54 = vsel %vm2419_vm4, %v2390_v47, %v8860_v4  ;;  %v8866_v4 = vld [vmem:[#allocation225_spill] sm:$0xff] }
 0x362   : > { %v2812_v13 = vsel %vm2809_vm10, %v2747_v42, %v2167_v20  ;;  %2062 = vrot.lane.b32.xlu0 %v8859_v5, %s4019_s10  ;;  %v2520_v57 = vsel %vm2484_vm5, %v2455_v54, %v8862_v43  ;;  %v8863_v20 = vld [vmem:[#allocation391_spill] sm:$0xff]  ;;  %v8870_v43 = vld [vmem:[#allocation68_spill] sm:$0xff] }
 0x363   : > { %2000 = vrot.lane.b32.xlu1 %v8861_v26, %s4019_s10  ;;  %3782 = vmatprep.mubr.msk.f32.mxu0 %vm2890_vm11, %v2812_v13  ;;  %v2585_v3 = vsel %vm2549_vm6, %v2520_v57, %v8863_v20  ;;  %v8867_v54 = vld [vmem:[#allocation163_spill] sm:$0xff]  ;;  %v8869_v26 = vld [vmem:[#allocation122_spill] sm:$0xff] }
 0x364   : > { %v2231_v42 = vpop.permute.xlu0 %2230  ;;  %v2650_v45 = vsel %vm2614_vm7, %v2585_v3, %v6170_v15  ;;  %v8871_v57 = vld [vmem:[#allocation250_spill] sm:$0xff] }
 0x365   : > { %v2844_v53 = vsel %vm2809_vm10, %v2779_v11, %v2231_v42  ;;  %v2169_v47 = vpop.permute.xlu1 %2168  ;;  %v2715_v39 = vsel %vm2679_vm8, %v2650_v45, %v1849_v2  ;;  %v8872_v42 = vld [vmem:[#allocation315_spill] sm:$0xff] }
 0x366   : > { %v2813_v62 = vsel %vm2809_vm10, %v2748_v16, %v2169_v47  ;;  %2064 = vrot.lane.b32.xlu0 %v8864_v46, %s4019_s10  ;;  %3830 = vmatprep.mubr.msk.f32.mxu1 %vm2890_vm11, %v2844_v53  ;;  %v2780_v37 = vsel %vm2744_vm9, %v2715_v39, %v2041_v31  ;;  %v2359_v31 = vsel %vm2354_vm3, %v4125_v25, %v8869_v26  ;;  %v8873_v16 = vld [vmem:[#allocation186_spill] sm:$0xff]  ;;  %v8875_v25 = vld [vmem:[#allocation67_spill] sm:$0xff] }
 0x367   : > { %2190 = vrot.lane.b32.xlu1 %v8865_v35, %s4020_s11  ;;  %3783 = vmatmul.mubr.msk.f32.gmra.mrb[2].mxu0 %vm2890_vm11, %v2813_v62  ;;  %v2424_v0 = vsel %vm2419_vm4, %v2359_v31, %v8871_v57  ;;  %v2391_v53 = vsel %vm2354_vm3, %v4333_v7, %v8873_v16  ;;  %v8874_v47 = vld [vmem:[#allocation366_spill] sm:$0xff]  ;;  %v8876_v62 = vld [vmem:[#allocation124_spill] sm:$0xff]  ;;  %v8877_v39 = vld [vmem:[#allocation283_spill] sm:$0xff] }
 0x368   : > { %v2233_v13 = vpop.permute.xlu0 %2232  ;;  %v2489_v20 = vsel %vm2484_vm5, %v2424_v0, %v8872_v42  ;;  %v2360_v46 = vsel %vm2354_vm3, %v4122_v24, %v8876_v62  ;;  %v2456_v35 = vsel %vm2419_vm4, %v2391_v53, %v8877_v39  ;;  %v8879_v7 = vld [vmem:[#allocation252_spill] sm:$0xff]  ;;  %v8884_v53 = vld [vmem:[#allocation367_spill] sm:$0xff] }
 0x369   : > { %v2845_v5 = vsel %vm2809_vm10, %v2780_v37, %v2233_v13  ;;  %v1851_v15 = vpop.permute.xlu1 %1850  ;;  %v2554_v45 = vsel %vm2549_vm6, %v2489_v20, %v8874_v47  ;;  %v8878_v13 = vld [vmem:[#allocation49_spill] sm:$0xff]  ;;  %v8881_v24 = vld [vmem:[#allocation316_spill] sm:$0xff]  ;;  %v8885_v62 = vld [vmem:[#allocation107_spill] sm:$0xff] }
 0x36a   : > { %2254 = vrot.lane.b32.xlu0 %v8866_v4, %s4020_s11  ;;  %3831 = vmatmul.mubr.msk.f32.gmra.mrb[2].mxu1 %vm2890_vm11, %v2845_v5  ;;  %v2619_v37 = vsel %vm2614_vm7, %v2554_v45, %v6021_v30  ;;  %v2425_v5 = vsel %vm2419_vm4, %v2360_v46, %v8879_v7  ;;  %v8880_v4 = vld [vmem:[#allocation340_spill] sm:$0xff] }
 0x36b   : > { %2192 = vrot.lane.b32.xlu1 %v8867_v54, %s4020_s11  ;;  %v2521_v54 = vsel %vm2484_vm5, %v2456_v35, %v8880_v4  ;;  %v2490_v31 = vsel %vm2484_vm5, %v2425_v5, %v8881_v24  ;;  %v8882_v57 = vld [vmem:[#allocation392_spill] sm:$0xff]  ;;  %v8889_v4 = vld [vmem:[#allocation393_spill] sm:$0xff] }
 0x36c   : > { %v1853_v2 = vpop.permute.xlu0 %1852  ;;  %v2586_v0 = vsel %vm2549_vm6, %v2521_v54, %v8882_v57  ;;  %v8883_v20 = vld [vmem:[#allocation188_spill] sm:$0xff]  ;;  %v2555_v47 = vsel %vm2549_vm6, %v2490_v31, %v8884_v53  ;;  %v8894_v53 = vld [vmem:[#allocation231_spill] sm:$0xff] }
 0x36d   : > { %v1979_v63 = vpop.permute.xlu1 %1978  ;;  %v2392_v16 = vsel %vm2354_vm3, %v4330_v6, %v8883_v20  ;;  %v8886_v46 = vld [vmem:[#allocation284_spill] sm:$0xff]  ;;  %v8887_v6 = vld [vmem:[#allocation50_spill] sm:$0xff]  ;;  %v8893_v20 = vld [vmem:[#allocation167_spill] sm:$0xff] }
 0x36e   : > { %2256 = vrot.lane.b32.xlu0 %v8868_v18, %s4020_s11  ;;  %v2684_v18 = vsel %vm2679_vm8, %v2619_v37, %v6304_v51  ;;  %v2651_v51 = vsel %vm2614_vm7, %v2586_v0, %v6176_v61  ;;  %v2457_v39 = vsel %vm2419_vm4, %v2392_v16, %v8886_v46  ;;  %v8888_v37 = vld [vmem:[#allocation341_spill] sm:$0xff]  ;;  %v8890_v57 = vld [vmem:[#allocation108_spill] sm:$0xff] }
 0x36f   : > { %1874 = vrot.lane.b32.xlu1 %v8870_v43, %s4018_s7  ;;  %v2749_v30 = vsel %vm2744_vm9, %v2684_v18, %v1979_v63  ;;  %v2620_v63 = vsel %vm2614_vm7, %v2555_v47, %v6023_v27  ;;  %v2716_v35 = vsel %vm2679_vm8, %v2651_v51, %v1851_v15  ;;  %v2522_v61 = vsel %vm2484_vm5, %v2457_v39, %v8888_v37  ;;  %v8895_v47 = vld [vmem:[#allocation126_spill] sm:$0xff]  ;;  %v8896_v51 = vld [vmem:[#allocation71_spill] sm:$0xff]  ;;  %v8898_v39 = vld [vmem:[#allocation317_spill] sm:$0xff] }
 0x370   : > { %v2043_v11 = vpop.permute.xlu0 %2042  ;;  %v2587_v54 = vsel %vm2549_vm6, %v2522_v61, %v8889_v4  ;;  %v8900_v61 = vld [vmem:[#allocation368_spill] sm:$0xff]  ;;  %v8903_v4 = vld [vmem:[#allocation285_spill] sm:$0xff] }
 0x371   : > { %v1981_v3 = vpop.permute.xlu1 %1980  ;;  %v2781_v7 = vsel %vm2744_vm9, %v2716_v35, %v2043_v11  ;;  %v2652_v24 = vsel %vm2614_vm7, %v2587_v54, %v6178_v22  ;;  %v8891_v11 = vld [vmem:[#allocation165_spill] sm:$0xff] }
 0x372   : > { %1876 = vrot.lane.b32.xlu0 %v8875_v25, %s4018_s7 }
 0x373   : > { %2002 = vrot.lane.b32.xlu1 %v8878_v13, %s4019_s10  ;;  %v2685_v13 = vsel %vm2679_vm8, %v2620_v63, %v6306_v28  ;;  %v2717_v28 = vsel %vm2679_vm8, %v2652_v24, %v1853_v2  ;;  %v8906_v24 = vld [vmem:[#allocation342_spill] sm:$0xff] }
 0x374   : > { %v2045_v26 = vpop.permute.xlu0 %2044  ;;  %v2750_v27 = vsel %vm2744_vm9, %v2685_v13, %v1981_v3 }
 0x375   : > { %v2171_v42 = vpop.permute.xlu1 %2170  ;;  %v2782_v3 = vsel %vm2744_vm9, %v2717_v28, %v2045_v26  ;;  %v2361_v26 = vsel %vm2354_vm3, %v4148_v34, %v8895_v47  ;;  %v8901_v34 = vld [vmem:[#allocation70_spill] sm:$0xff] }
 0x376   : > { %v2814_v45 = vsel %vm2809_vm10, %v2749_v30, %v2171_v42  ;;  %2066 = vrot.lane.b32.xlu0 %v8885_v62, %s4019_s10  ;;  %v8892_v42 = vld [vmem:[#allocation229_spill] sm:$0xff] }
 0x377   : > { %2004 = vrot.lane.b32.xlu1 %v8887_v6, %s4019_s10  ;;  %3785 = vmatprep.mubr.msk.f32.mxu0 %vm2890_vm11, %v2814_v45  ;;  %v8897_v45 = vld [vmem:[#allocation253_spill] sm:$0xff]  ;;  %v8899_v6 = vld [vmem:[#allocation190_spill] sm:$0xff] }
 0x378   : > { %v2235_v5 = vpop.permute.xlu0 %2234  ;;  %v2426_v62 = vsel %vm2419_vm4, %v2361_v26, %v8897_v45  ;;  %v2393_v37 = vsel %vm2354_vm3, %v4345_v10, %v8899_v6  ;;  %v8905_v10 = vld [vmem:[#allocation254_spill] sm:$0xff]  ;;  %v8911_v45 = vld [vmem:[#allocation109_spill] sm:$0xff]  ;;  %v8914_v6 = vld [vmem:[#allocation343_spill] sm:$0xff] }
 0x379   : > { %v2846_v15 = vsel %vm2809_vm10, %v2781_v7, %v2235_v5  ;;  %v2173_v18 = vpop.permute.xlu1 %2172  ;;  %v2491_v63 = vsel %vm2484_vm5, %v2426_v62, %v8898_v39  ;;  %v8902_v7 = vld [vmem:[#allocation128_spill] sm:$0xff]  ;;  %v2458_v54 = vsel %vm2419_vm4, %v2393_v37, %v8903_v4  ;;  %v8912_v62 = vld [vmem:[#allocation286_spill] sm:$0xff] }
 0x37a   : > { %v2815_v31 = vsel %vm2809_vm10, %v2750_v27, %v2173_v18  ;;  %2068 = vrot.lane.b32.xlu0 %v8890_v57, %s4019_s10  ;;  %3833 = vmatprep.mubr.msk.f32.mxu1 %vm2890_vm11, %v2846_v15  ;;  %v2556_v13 = vsel %vm2549_vm6, %v2491_v63, %v8900_v61  ;;  %v2362_v5 = vsel %vm2354_vm3, %v4145_v33, %v8902_v7  ;;  %v8904_v15 = vld [vmem:[#allocation51_spill] sm:$0xff]  ;;  %v8907_v33 = vld [vmem:[#allocation318_spill] sm:$0xff] }
 0x37b   : > { %2194 = vrot.lane.b32.xlu1 %v8891_v11, %s4020_s11  ;;  %3786 = vmatmul.mubr.msk.f32.gmra.mrb[4].mxu0 %vm2890_vm11, %v2815_v31  ;;  %v2621_v27 = vsel %vm2614_vm7, %v2556_v13, %v6029_v50  ;;  %v2427_v18 = vsel %vm2419_vm4, %v2362_v5, %v8905_v10  ;;  %v2523_v31 = vsel %vm2484_vm5, %v2458_v54, %v8906_v24  ;;  %v8915_v7 = vld [vmem:[#allocation395_spill] sm:$0xff] }
 0x37c   : > { %v2237_v0 = vpop.permute.xlu0 %2236  ;;  %v2686_v57 = vsel %vm2679_vm8, %v2621_v27, %v6312_v14  ;;  %v2492_v11 = vsel %vm2484_vm5, %v2427_v18, %v8907_v33  ;;  %v8918_v24 = vld [vmem:[#allocation171_spill] sm:$0xff]  ;;  %v8920_v33 = vld [vmem:[#allocation130_spill] sm:$0xff] }
 0x37d   : > { %v2847_v30 = vsel %vm2809_vm10, %v2782_v3, %v2237_v0  ;;  %v1855_v22 = vpop.permute.xlu1 %1854  ;;  %v8908_v3 = vld [vmem:[#allocation394_spill] sm:$0xff] }
 0x37e   : > { %2258 = vrot.lane.b32.xlu0 %v8892_v42, %s4020_s11  ;;  %3834 = vmatmul.mubr.msk.f32.gmra.mrb[4].mxu1 %vm2890_vm11, %v2847_v30  ;;  %v2588_v0 = vsel %vm2549_vm6, %v2523_v31, %v8908_v3  ;;  %v8909_v42 = vld [vmem:[#allocation192_spill] sm:$0xff]  ;;  %v8922_v3 = vld [vmem:[#allocation255_spill] sm:$0xff] }
 0x37f   : > { %2196 = vrot.lane.b32.xlu1 %v8893_v20, %s4020_s11  ;;  %v2394_v20 = vsel %vm2354_vm3, %v4342_v9, %v8909_v42  ;;  %v2653_v14 = vsel %vm2614_vm7, %v2588_v0, %v6184_v59  ;;  %v8913_v9 = vld [vmem:[#allocation58_spill] sm:$0xff] }
 0x380   : > { %v1857_v2 = vpop.permute.xlu0 %1856  ;;  %v2459_v39 = vsel %vm2419_vm4, %v2394_v20, %v8912_v62  ;;  %v2718_v63 = vsel %vm2679_vm8, %v2653_v14, %v1855_v22  ;;  %v8924_v20 = vld [vmem:[#allocation194_spill] sm:$0xff]  ;;  %v8928_v62 = vld [vmem:[#allocation287_spill] sm:$0xff] }
 0x381   : > { %v1983_v16 = vpop.permute.xlu1 %1982  ;;  %v2524_v59 = vsel %vm2484_vm5, %v2459_v39, %v8914_v6 }
 0x382   : > { %2260 = vrot.lane.b32.xlu0 %v8894_v53, %s4020_s11  ;;  %v2751_v50 = vsel %vm2744_vm9, %v2686_v57, %v1983_v16  ;;  %v8910_v53 = vld [vmem:[#allocation369_spill] sm:$0xff]  ;;  %v2589_v5 = vsel %vm2549_vm6, %v2524_v59, %v8915_v7  ;;  %v8919_v57 = vld [vmem:[#allocation235_spill] sm:$0xff]  ;;  %v8932_v59 = vld [vmem:[#allocation344_spill] sm:$0xff] }
 0x383   : > { %1878 = vrot.lane.b32.xlu1 %v8896_v51, %s4018_s7  ;;  %v2557_v47 = vsel %vm2549_vm6, %v2492_v11, %v8910_v53  ;;  %v2654_v54 = vsel %vm2614_vm7, %v2589_v5, %v6186_v60  ;;  %v8921_v11 = vld [vmem:[#allocation76_spill] sm:$0xff]  ;;  %v2395_v53 = vsel %vm2354_vm3, %v4359_v8, %v8924_v20 }
 0x384   : > { %v2047_v46 = vpop.permute.xlu0 %2046  ;;  %v2622_v16 = vsel %vm2614_vm7, %v2557_v47, %v6031_v36  ;;  %v8925_v47 = vld [vmem:[#allocation370_spill] sm:$0xff]  ;;  %v2460_v39 = vsel %vm2419_vm4, %v2395_v53, %v8928_v62  ;;  %v8931_v8 = vld [vmem:[#allocation256_spill] sm:$0xff] }
 0x385   : > { %v1985_v35 = vpop.permute.xlu1 %1984  ;;  %v2687_v37 = vsel %vm2679_vm8, %v2622_v16, %v6314_v41  ;;  %v2783_v61 = vsel %vm2744_vm9, %v2718_v63, %v2047_v46  ;;  %v2719_v41 = vsel %vm2679_vm8, %v2654_v54, %v1857_v2  ;;  %v8917_v46 = vld [vmem:[#allocation169_spill] sm:$0xff]  ;;  %v8934_v5 = vld [vmem:[#allocation396_spill] sm:$0xff] }
 0x386   : > { %1880 = vrot.lane.b32.xlu0 %v8901_v34, %s4018_s7  ;;  %v2752_v36 = vsel %vm2744_vm9, %v2687_v37, %v1985_v35  ;;  %v8929_v16 = vld [vmem:[#allocation413_spill] sm:$0xff]  ;;  %v2525_v37 = vsel %vm2484_vm5, %v2460_v39, %v8932_v59  ;;  %v8935_v54 = vld [vmem:[#allocation196_spill] sm:$0xff]  ;;  %v8949_v59 = vld [vmem:[#allocation78_spill] sm:$0xff] }
 0x387   : > { %2006 = vrot.lane.b32.xlu1 %v8904_v15, %s4019_s10  ;;  %v8916_v15 = vld [vmem:[#allocation110_spill] sm:$0xff]  ;;  %v8945_v39 = vld [vmem:[#allocation237_spill] sm:$0xff] }
 0x388   : > { %v2049_v28 = vpop.permute.xlu0 %2048 }
 0x389   : > { %v2175_v30 = vpop.permute.xlu1 %2174  ;;  %v2784_v35 = vsel %vm2744_vm9, %v2719_v41, %v2049_v28  ;;  %v2363_v28 = vsel %vm2354_vm3, %v4173_v49, %v8920_v33  ;;  %v8926_v49 = vld [vmem:[#allocation75_spill] sm:$0xff]  ;;  %v8941_v33 = vld [vmem:[#allocation345_spill] sm:$0xff] }
 0x38a   : > { %v2816_v26 = vsel %vm2809_vm10, %v2751_v50, %v2175_v30  ;;  %2070 = vrot.lane.b32.xlu0 %v8911_v45, %s4019_s10  ;;  %v8923_v50 = vld [vmem:[#allocation319_spill] sm:$0xff] }
 0x38b   : > { %2008 = vrot.lane.b32.xlu1 %v8913_v9, %s4019_s10  ;;  %3788 = vmatprep.mubr.msk.f32.mxu0 %vm2890_vm11, %v2816_v26  ;;  %v8927_v26 = vld [vmem:[#allocation132_spill] sm:$0xff]  ;;  %v8930_v9 = vld [vmem:[#allocation61_spill] sm:$0xff] }
 0x38c   : > { %v2239_v13 = vpop.permute.xlu0 %2238  ;;  %v2364_v45 = vsel %vm2354_vm3, %v4170_v48, %v8927_v26  ;;  %v8933_v48 = vld [vmem:[#allocation320_spill] sm:$0xff] }
 0x38d   : > { %v2848_v22 = vsel %vm2809_vm10, %v2783_v61, %v2239_v13  ;;  %v2177_v4 = vpop.permute.xlu1 %2176  ;;  %v2429_v6 = vsel %vm2419_vm4, %v2364_v45, %v8931_v8  ;;  %v8943_v26 = vld [vmem:[#allocation112_spill] sm:$0xff]  ;;  %v8948_v8 = vld [vmem:[#allocation134_spill] sm:$0xff] }
 0x38e   : > { %v2817_v27 = vsel %vm2809_vm10, %v2752_v36, %v2177_v4  ;;  %2072 = vrot.lane.b32.xlu0 %v8916_v15, %s4019_s10  ;;  %3836 = vmatprep.mubr.msk.f32.mxu1 %vm2890_vm11, %v2848_v22  ;;  %v2494_v7 = vsel %vm2484_vm5, %v2429_v6, %v8933_v48  ;;  %v2590_v36 = vsel %vm2549_vm6, %v2525_v37, %v8934_v5  ;;  %v8936_v15 = vld [vmem:[#allocation371_spill] sm:$0xff]  ;;  %v8950_v37 = vld [vmem:[#allocation257_spill] sm:$0xff] }
 0x38f   : > { %2198 = vrot.lane.b32.xlu1 %v8917_v46, %s4020_s11  ;;  %3789 = vmatmul.mubr.msk.f32.gmra.mrb[6].mxu0 %vm2890_vm11, %v2817_v27  ;;  %v2396_v27 = vsel %vm2354_vm3, %v4356_v23, %v8935_v54  ;;  %v2559_v41 = vsel %vm2549_vm6, %v2494_v7, %v8936_v15  ;;  %v8940_v23 = vld [vmem:[#allocation65_spill] sm:$0xff]  ;;  %v2365_v6 = vsel %vm2354_vm3, %v4188_v56, %v8948_v8  ;;  %v8954_v56 = vld [vmem:[#allocation54_spill] sm:$0xff]  ;;  %v8956_v15 = vld [vmem:[#allocation16_spill] sm:$0xff] }
 0x390   : > { %v2241_v10 = vpop.permute.xlu0 %2240  ;;  %v8951_v48 = vld [vmem:[#allocation13_spill] sm:$0xff] }
 0x391   : > { %v2849_v18 = vsel %vm2809_vm10, %v2784_v35, %v2241_v10  ;;  %v1859_v60 = vpop.permute.xlu1 %1858  ;;  %v8937_v35 = vld [vmem:[#allocation111_spill] sm:$0xff]  ;;  %v8938_v10 = vld [vmem:[#allocation288_spill] sm:$0xff]  ;;  %v8972_v8 = vld [vmem:[#allocation113_spill] sm:$0xff] }
 0x392   : > { %2262 = vrot.lane.b32.xlu0 %v8706_v17, %s4020_s11  ;;  %3837 = vmatmul.mubr.msk.f32.gmra.mrb[6].mxu1 %vm2890_vm11, %v2849_v18  ;;  %v2428_v17 = vsel %vm2419_vm4, %v2363_v28, %v8922_v3  ;;  %v2461_v18 = vsel %vm2419_vm4, %v2396_v27, %v8938_v10  ;;  %v8955_v27 = vld [vmem:[#allocation136_spill] sm:$0xff] }
 0x393   : > { %2200 = vrot.lane.b32.xlu1 %v8918_v24, %s4020_s11  ;;  %v2493_v30 = vsel %vm2484_vm5, %v2428_v17, %v8923_v50  ;;  %v8939_v24 = vld [vmem:[#allocation414_spill] sm:$0xff]  ;;  %v8942_v50 = vld [vmem:[#allocation397_spill] sm:$0xff] }
 0x394   : > { %v1861_v2 = vpop.permute.xlu0 %1860  ;;  %v2558_v14 = vsel %vm2549_vm6, %v2493_v30, %v8925_v47 }
 0x395   : > { %v1987_v31 = vpop.permute.xlu1 %1986  ;;  %v2623_v63 = vsel %vm2614_vm7, %v2558_v14, %v8929_v16  ;;  %v8946_v16 = vld [vmem:[#allocation175_spill] sm:$0xff] }
 0x396   : > { %2264 = vrot.lane.b32.xlu0 %v8919_v57, %s4020_s11  ;;  %v2688_v61 = vsel %vm2679_vm8, %v2623_v63, %v6320_v32  ;;  %v2655_v32 = vsel %vm2614_vm7, %v2590_v36, %v6192_v52  ;;  %v2526_v52 = vsel %vm2484_vm5, %v2461_v18, %v8941_v33  ;;  %v8952_v36 = vld [vmem:[#allocation198_spill] sm:$0xff]  ;;  %v8959_v18 = vld [vmem:[#allocation77_spill] sm:$0xff] }
 0x397   : > { %1882 = vrot.lane.b32.xlu1 %v8921_v11, %s4018_s7  ;;  %v2753_v22 = vsel %vm2744_vm9, %v2688_v61, %v1987_v31  ;;  %v2624_v31 = vsel %vm2614_vm7, %v2559_v41, %v8939_v24  ;;  %v2720_v57 = vsel %vm2679_vm8, %v2655_v32, %v1859_v60  ;;  %v2591_v30 = vsel %vm2549_vm6, %v2526_v52, %v8942_v50  ;;  %v8957_v32 = vld [vmem:[#allocation289_spill] sm:$0xff] }
 0x398   : > { %v2051_v0 = vpop.permute.xlu0 %2050  ;;  %v2689_v28 = vsel %vm2679_vm8, %v2624_v31, %v6322_v38  ;;  %v2656_v47 = vsel %vm2614_vm7, %v2591_v30, %v6194_v40  ;;  %v2430_v61 = vsel %vm2419_vm4, %v2365_v6, %v8950_v37  ;;  %v2366_v41 = vsel %vm2354_vm3, %v8956_v15, %v8955_v27  ;;  %v8961_v31 = vld [vmem:[#allocation91_spill] sm:$0xff]  ;;  %v8973_v6 = vld [vmem:[#allocation92_spill] sm:$0xff]  ;;  %v8976_v15 = vld [vmem:[#allocation438_spill] sm:$0xff] }
 0x399   : > { %v1989_v42 = vpop.permute.xlu1 %1988  ;;  %v2785_v3 = vsel %vm2744_vm9, %v2720_v57, %v2051_v0  ;;  %v2721_v38 = vsel %vm2679_vm8, %v2656_v47, %v1861_v2  ;;  %v8944_v0 = vld [vmem:[#allocation173_spill] sm:$0xff]  ;;  %v2495_v7 = vsel %vm2484_vm5, %v2430_v61, %v8951_v48 }
 0x39a   : > { %1884 = vrot.lane.b32.xlu0 %v8926_v49, %s4018_s7  ;;  %v2754_v20 = vsel %vm2744_vm9, %v2689_v28, %v1989_v42  ;;  %v8963_v28 = vld [vmem:[#allocation14_spill] sm:$0xff]  ;;  %v8974_v61 = vld [vmem:[#allocation25_spill] sm:$0xff] }
 0x39b   : > { %2010 = vrot.lane.b32.xlu1 %v8930_v9, %s4019_s10  ;;  %v8947_v9 = vld [vmem:[#allocation239_spill] sm:$0xff] }
 0x39c   : > { %v2053_v13 = vpop.permute.xlu0 %2052 }
 0x39d   : > { %v2179_v4 = vpop.permute.xlu1 %2178  ;;  %v2786_v42 = vsel %vm2744_vm9, %v2721_v38, %v2053_v13  ;;  %v8968_v38 = vld [vmem:[#allocation437_spill] sm:$0xff] }
 0x39e   : > { %v2818_v46 = vsel %vm2809_vm10, %v2753_v22, %v2179_v4  ;;  %2074 = vrot.lane.b32.xlu0 %v8937_v35, %s4019_s10  ;;  %v2397_v22 = vsel %vm2354_vm3, %v4375_v19, %v8952_v36  ;;  %v8953_v4 = vld [vmem:[#allocation133_spill] sm:$0xff]  ;;  %v8958_v35 = vld [vmem:[#allocation415_spill] sm:$0xff]  ;;  %v8960_v19 = vld [vmem:[#allocation258_spill] sm:$0xff] }
 0x39f   : > { %2012 = vrot.lane.b32.xlu1 %v8940_v23, %s4019_s10  ;;  %3791 = vmatprep.mubr.msk.f32.mxu0 %vm2890_vm11, %v2818_v46  ;;  %v2560_v54 = vsel %vm2549_vm6, %v2495_v7, %v8953_v4  ;;  %v2462_v46 = vsel %vm2419_vm4, %v2397_v22, %v8957_v32  ;;  %v2431_v24 = vsel %vm2419_vm4, %v2366_v41, %v8960_v19  ;;  %v8962_v23 = vld [vmem:[#allocation97_spill] sm:$0xff]  ;;  %v8975_v22 = vld [vmem:[#allocation199_spill] sm:$0xff] }
 0x3a0   : > { %v2243_v17 = vpop.permute.xlu0 %2242  ;;  %v2625_v10 = vsel %vm2614_vm7, %v2560_v54, %v8958_v35  ;;  %v2527_v57 = vsel %vm2484_vm5, %v2462_v46, %v8961_v31  ;;  %v8977_v46 = vld [vmem:[#allocation73_spill] sm:$0xff]  ;;  %v8978_v35 = vld [vmem:[#allocation115_spill] sm:$0xff] }
 0x3a1   : > { %v2850_v60 = vsel %vm2809_vm10, %v2785_v3, %v2243_v17  ;;  %v2181_v53 = vpop.permute.xlu1 %2180  ;;  %v2690_v33 = vsel %vm2679_vm8, %v2625_v10, %v8962_v23  ;;  %v2496_v3 = vsel %vm2484_vm5, %v2431_v24, %v8963_v28  ;;  %v8964_v17 = vld [vmem:[#allocation197_spill] sm:$0xff]  ;;  %v8982_v28 = vld [vmem:[#allocation138_spill] sm:$0xff] }
 0x3a2   : > { %v2819_v14 = vsel %vm2809_vm10, %v2754_v20, %v2181_v53  ;;  %2076 = vrot.lane.b32.xlu0 %v8943_v26, %s4019_s10  ;;  %3839 = vmatprep.mubr.msk.f32.mxu1 %vm2890_vm11, %v2850_v60  ;;  %v2592_v50 = vsel %vm2549_vm6, %v2527_v57, %v8964_v17  ;;  %v8965_v60 = vld [vmem:[#allocation200_spill] sm:$0xff]  ;;  %v8979_v31 = vld [vmem:[#allocation177_spill] sm:$0xff]  ;;  %v8984_v17 = vld [vmem:[#allocation243_spill] sm:$0xff] }
 0x3a3   : > { %2202 = vrot.lane.b32.xlu1 %v8944_v0, %s4020_s11  ;;  %3792 = vmatmul.mubr.msk.f32.gmra.mrb[8].mxu0 %vm2890_vm11, %v2819_v14  ;;  %v8966_v53 = vld [vmem:[#allocation48_spill] sm:$0xff]  ;;  %v8967_v14 = vld [vmem:[#allocation135_spill] sm:$0xff]  ;;  %v2657_v0 = vsel %vm2614_vm7, %v2592_v50, %v8968_v38  ;;  %v8980_v57 = vld [vmem:[#allocation241_spill] sm:$0xff] }
 0x3a4   : > { %v2245_v45 = vpop.permute.xlu0 %2244  ;;  %v2398_v47 = vsel %vm2354_vm3, %v8966_v53, %v8965_v60  ;;  %v2561_v26 = vsel %vm2549_vm6, %v2496_v3, %v8967_v14  ;;  %v8983_v3 = vld [vmem:[#allocation20_spill] sm:$0xff]  ;;  %v8985_v50 = vld [vmem:[#allocation259_spill] sm:$0xff]  ;;  %v8987_v14 = vld [vmem:[#allocation202_spill] sm:$0xff] }
 0x3a5   : > { %v2851_v62 = vsel %vm2809_vm10, %v2786_v42, %v2245_v45  ;;  %v1863_v40 = vpop.permute.xlu1 %1862  ;;  %v8969_v45 = vld [vmem:[#allocation69_spill] sm:$0xff]  ;;  %v8986_v60 = vld [vmem:[#allocation15_spill] sm:$0xff] }
 0x3a6   : > { %2266 = vrot.lane.b32.xlu0 %v8945_v39, %s4020_s11  ;;  %3840 = vmatmul.mubr.msk.f32.gmra.mrb[8].mxu1 %vm2890_vm11, %v2851_v62  ;;  %v8970_v62 = vld [vmem:[#allocation290_spill] sm:$0xff] }
 0x3a7   : > { %2204 = vrot.lane.b32.xlu1 %v8946_v16, %s4020_s11  ;;  %v2463_v39 = vsel %vm2419_vm4, %v2398_v47, %v8970_v62  ;;  %v8971_v16 = vld [vmem:[#allocation416_spill] sm:$0xff] }
 0x3a8   : > { %v1865_v2 = vpop.permute.xlu0 %1864  ;;  %v2528_v37 = vsel %vm2484_vm5, %v2463_v39, %v8973_v6  ;;  %v8991_v62 = vld [vmem:[#allocation140_spill] sm:$0xff]  ;;  %v8992_v39 = vld [vmem:[#allocation18_spill] sm:$0xff] }
 0x3a9   : > { %v1991_v63 = vpop.permute.xlu1 %1990  ;;  %v2593_v4 = vsel %vm2549_vm6, %v2528_v37, %v8975_v22  ;;  %v8995_v37 = vld [vmem:[#allocation82_spill] sm:$0xff] }
 0x3aa   : > { %2268 = vrot.lane.b32.xlu0 %v8947_v9, %s4020_s11  ;;  %v2755_v30 = vsel %vm2744_vm9, %v2690_v33, %v1991_v63  ;;  %v2626_v63 = vsel %vm2614_vm7, %v2561_v26, %v8971_v16  ;;  %v2722_v9 = vsel %vm2679_vm8, %v2657_v0, %v1863_v40  ;;  %v2658_v41 = vsel %vm2614_vm7, %v2593_v4, %v8976_v15  ;;  %v8981_v33 = vld [vmem:[#allocation179_spill] sm:$0xff]  ;;  %v8988_v26 = vld [vmem:[#allocation53_spill] sm:$0xff]  ;;  %v8998_v22 = vld [vmem:[#allocation98_spill] sm:$0xff] }
 0x3ab   : > { %1886 = vrot.lane.b32.xlu1 %v8949_v59, %s4018_s7  ;;  %v2691_v48 = vsel %vm2679_vm8, %v2626_v63, %v8974_v61  ;;  %v2399_v38 = vsel %vm2354_vm3, %v8988_v26, %v8987_v14  ;;  %v8989_v0 = vld [vmem:[#allocation137_spill] sm:$0xff]  ;;  %v2368_v16 = vsel %vm2354_vm3, %v8992_v39, %v8991_v62  ;;  %v8993_v63 = vld [vmem:[#allocation291_spill] sm:$0xff]  ;;  %v8996_v61 = vld [vmem:[#allocation260_spill] sm:$0xff] }
 0x3ac   : > { %v2055_v13 = vpop.permute.xlu0 %2054  ;;  %v9000_v15 = vld [vmem:[#allocation201_spill] sm:$0xff] }
 0x3ad   : > { %v1993_v5 = vpop.permute.xlu1 %1992  ;;  %v2787_v7 = vsel %vm2744_vm9, %v2722_v9, %v2055_v13  ;;  %v2723_v13 = vsel %vm2679_vm8, %v2658_v41, %v1865_v2  ;;  %v2464_v9 = vsel %vm2419_vm4, %v2399_v38, %v8993_v63  ;;  %v9010_v14 = vld [vmem:[#allocation145_spill] sm:$0xff]  ;;  %v9012_v63 = vld [vmem:[#allocation440_spill] sm:$0xff] }
 0x3ae   : > { %1824 = vrot.lane.b32.xlu0 %v8954_v56, %s4018_s7  ;;  %v2756_v54 = vsel %vm2744_vm9, %v2691_v48, %v1993_v5  ;;  %v2433_v48 = vsel %vm2419_vm4, %v2368_v16, %v8996_v61  ;;  %v9014_v61 = vld [vmem:[#allocation117_spill] sm:$0xff] }
 0x3af   : > { %1888 = vrot.lane.b32.xlu1 %v8959_v18, %s4018_s7 }
 0x3b0   : > { %v2057_v52 = vpop.permute.xlu0 %2056 }
 0x3b1   : > { %v2183_v20 = vpop.permute.xlu1 %2182  ;;  %v2788_v5 = vsel %vm2744_vm9, %v2723_v13, %v2057_v52  ;;  %v2367_v52 = vsel %vm2354_vm3, %v8983_v3, %v8982_v28  ;;  %v9001_v13 = vld [vmem:[#allocation204_spill] sm:$0xff]  ;;  %v9005_v28 = vld [vmem:[#allocation66_spill] sm:$0xff] }
 0x3b2   : > { %v2820_v42 = vsel %vm2809_vm10, %v2755_v30, %v2183_v20  ;;  %2014 = vrot.lane.b32.xlu0 %v8969_v45, %s4019_s10  ;;  %v2432_v30 = vsel %vm2419_vm4, %v2367_v52, %v8985_v50  ;;  %v8990_v45 = vld [vmem:[#allocation64_spill] sm:$0xff] }
 0x3b3   : > { %2078 = vrot.lane.b32.xlu1 %v8972_v8, %s4019_s10  ;;  %3794 = vmatprep.mubr.msk.f32.mxu0 %vm2890_vm11, %v2820_v42  ;;  %v2497_v53 = vsel %vm2484_vm5, %v2432_v30, %v8986_v60  ;;  %v8994_v8 = vld [vmem:[#allocation417_spill] sm:$0xff]  ;;  %v9006_v3 = vld [vmem:[#allocation292_spill] sm:$0xff]  ;;  %v9009_v60 = vld [vmem:[#allocation94_spill] sm:$0xff] }
 0x3b4   : > { %v2247_v36 = vpop.permute.xlu0 %2246  ;;  %v2562_v42 = vsel %vm2549_vm6, %v2497_v53, %v8989_v0  ;;  %v9008_v30 = vld [vmem:[#allocation81_spill] sm:$0xff] }
 0x3b5   : > { %v2852_v40 = vsel %vm2809_vm10, %v2787_v7, %v2247_v36  ;;  %v2185_v27 = vpop.permute.xlu1 %2184  ;;  %v2627_v6 = vsel %vm2614_vm7, %v2562_v42, %v8994_v8  ;;  %v8997_v7 = vld [vmem:[#allocation93_spill] sm:$0xff]  ;;  %v9011_v42 = vld [vmem:[#allocation203_spill] sm:$0xff] }
 0x3b6   : > { %v2821_v32 = vsel %vm2809_vm10, %v2756_v54, %v2185_v27  ;;  %2016 = vrot.lane.b32.xlu0 %v8977_v46, %s4019_s10  ;;  %3842 = vmatprep.mubr.msk.f32.mxu1 %vm2890_vm11, %v2852_v40  ;;  %v2529_v36 = vsel %vm2484_vm5, %v2464_v9, %v8997_v7  ;;  %v2692_v4 = vsel %vm2679_vm8, %v2627_v6, %v8998_v22  ;;  %v8999_v40 = vld [vmem:[#allocation17_spill] sm:$0xff]  ;;  %v9013_v6 = vld [vmem:[#allocation79_spill] sm:$0xff]  ;;  %v9015_v22 = vld [vmem:[#allocation80_spill] sm:$0xff] }
 0x3b7   : > { %2080 = vrot.lane.b32.xlu1 %v8978_v35, %s4019_s10  ;;  %3795 = vmatmul.mubr.msk.f32.gmra.mrb[10].mxu0 %vm2890_vm11, %v2821_v32  ;;  %v2498_v27 = vsel %vm2484_vm5, %v2433_v48, %v8999_v40  ;;  %v2594_v41 = vsel %vm2549_vm6, %v2529_v36, %v9000_v15  ;;  %v9002_v35 = vld [vmem:[#allocation52_spill] sm:$0xff]  ;;  %v9018_v15 = vld [vmem:[#allocation142_spill] sm:$0xff] }
 0x3b8   : > { %v2249_v10 = vpop.permute.xlu0 %2248 }
 0x3b9   : > { %v2853_v19 = vsel %vm2809_vm10, %v2788_v5, %v2249_v10  ;;  %v1867_v24 = vpop.permute.xlu1 %1866  ;;  %v2400_v5 = vsel %vm2354_vm3, %v9002_v35, %v9001_v13  ;;  %v9003_v10 = vld [vmem:[#allocation139_spill] sm:$0xff] }
 0x3ba   : > { %2206 = vrot.lane.b32.xlu0 %v8979_v31, %s4020_s11  ;;  %3843 = vmatmul.mubr.msk.f32.gmra.mrb[10].mxu1 %vm2890_vm11, %v2853_v19  ;;  %v2563_v19 = vsel %vm2549_vm6, %v2498_v27, %v9003_v10  ;;  %v9004_v31 = vld [vmem:[#allocation439_spill] sm:$0xff]  ;;  %v2465_v52 = vsel %vm2419_vm4, %v2400_v5, %v9006_v3  ;;  %v9017_v27 = vld [vmem:[#allocation181_spill] sm:$0xff] }
 0x3bb   : > { %2270 = vrot.lane.b32.xlu1 %v8980_v57, %s4020_s11  ;;  %v2659_v57 = vsel %vm2614_vm7, %v2594_v41, %v9004_v31  ;;  %v2530_v53 = vsel %vm2484_vm5, %v2465_v52, %v9009_v60  ;;  %v9019_v41 = vld [vmem:[#allocation24_spill] sm:$0xff]  ;;  %v9022_v5 = vld [vmem:[#allocation19_spill] sm:$0xff]  ;;  %v9023_v31 = vld [vmem:[#allocation206_spill] sm:$0xff] }
 0x3bc   : > { %v1869_v2 = vpop.permute.xlu0 %1868  ;;  %v2724_v50 = vsel %vm2679_vm8, %v2659_v57, %v1867_v24  ;;  %v2595_v62 = vsel %vm2549_vm6, %v2530_v53, %v9011_v42  ;;  %v9024_v57 = vld [vmem:[#allocation57_spill] sm:$0xff]  ;;  %v9032_v42 = vld [vmem:[#allocation262_spill] sm:$0xff] }
 0x3bd   : > { %v1995_v23 = vpop.permute.xlu1 %1994  ;;  %v2660_v9 = vsel %vm2614_vm7, %v2595_v62, %v9012_v63  ;;  %v9025_v3 = vld [vmem:[#allocation141_spill] sm:$0xff] }
 0x3be   : > { %2208 = vrot.lane.b32.xlu0 %v8981_v33, %s4020_s11  ;;  %v2757_v32 = vsel %vm2744_vm9, %v2692_v4, %v1995_v23  ;;  %v9007_v23 = vld [vmem:[#allocation418_spill] sm:$0xff]  ;;  %v9016_v4 = vld [vmem:[#allocation119_spill] sm:$0xff]  ;;  %v9029_v53 = vld [vmem:[#allocation293_spill] sm:$0xff] }
 0x3bf   : > { %2272 = vrot.lane.b32.xlu1 %v8984_v17, %s4020_s11  ;;  %v2628_v17 = vsel %vm2614_vm7, %v2563_v19, %v9007_v23  ;;  %v9026_v23 = vld [vmem:[#allocation183_spill] sm:$0xff] }
 0x3c0   : > { %v2059_v20 = vpop.permute.xlu0 %2058  ;;  %v2693_v26 = vsel %vm2679_vm8, %v2628_v17, %v9010_v14  ;;  %v9027_v17 = vld [vmem:[#allocation144_spill] sm:$0xff] }
 0x3c1   : > { %v1997_v47 = vpop.permute.xlu1 %1996  ;;  %v2789_v38 = vsel %vm2744_vm9, %v2724_v50, %v2059_v20  ;;  %v2725_v20 = vsel %vm2679_vm8, %v2660_v9, %v1869_v2  ;;  %v9028_v50 = vld [vmem:[#allocation23_spill] sm:$0xff] }
 0x3c2   : > { %1826 = vrot.lane.b32.xlu0 %v8990_v45, %s4018_s7  ;;  %v2758_v39 = vsel %vm2744_vm9, %v2693_v26, %v1997_v47  ;;  %v2370_v60 = vsel %vm2354_vm3, %v9028_v50, %v9027_v17  ;;  %v9030_v26 = vld [vmem:[#allocation419_spill] sm:$0xff] }
 0x3c3   : > { %1890 = vrot.lane.b32.xlu1 %v8995_v37, %s4018_s7  ;;  %v2435_v62 = vsel %vm2419_vm4, %v2370_v60, %v9032_v42  ;;  %v9047_v60 = vld [vmem:[#allocation207_spill] sm:$0xff] }
 0x3c4   : > { %v2061_v54 = vpop.permute.xlu0 %2060 }
 0x3c5   : > { %v2187_v46 = vpop.permute.xlu1 %2186  ;;  %v2790_v47 = vsel %vm2744_vm9, %v2725_v20, %v2061_v54  ;;  %v2369_v54 = vsel %vm2354_vm3, %v9019_v41, %v9018_v15  ;;  %v9036_v20 = vld [vmem:[#allocation205_spill] sm:$0xff] }
 0x3c6   : > { %v2822_v33 = vsel %vm2809_vm10, %v2757_v32, %v2187_v46  ;;  %1828 = vrot.lane.b32.xlu0 %v9005_v28, %s4018_s7  ;;  %v9020_v32 = vld [vmem:[#allocation245_spill] sm:$0xff] }
 0x3c7   : > { %1892 = vrot.lane.b32.xlu1 %v9008_v30, %s4018_s7  ;;  %3797 = vmatprep.mubr.msk.f32.mxu0 %vm2890_vm11, %v2822_v33  ;;  %v9021_v46 = vld [vmem:[#allocation261_spill] sm:$0xff]  ;;  %v2401_v33 = vsel %vm2354_vm3, %v9024_v57, %v9023_v31  ;;  %v9044_v57 = vld [vmem:[#allocation84_spill] sm:$0xff] }
 0x3c8   : > { %v2251_v0 = vpop.permute.xlu0 %2250  ;;  %v2434_v13 = vsel %vm2419_vm4, %v2369_v54, %v9021_v46  ;;  %v2466_v14 = vsel %vm2419_vm4, %v2401_v33, %v9029_v53  ;;  %v9040_v41 = vld [vmem:[#allocation441_spill] sm:$0xff]  ;;  %v9041_v46 = vld [vmem:[#allocation72_spill] sm:$0xff] }
 0x3c9   : > { %v2854_v24 = vsel %vm2809_vm10, %v2789_v38, %v2251_v0  ;;  %v2189_v16 = vpop.permute.xlu1 %2188  ;;  %v2499_v10 = vsel %vm2484_vm5, %v2434_v13, %v9022_v5  ;;  %v9031_v0 = vld [vmem:[#allocation247_spill] sm:$0xff]  ;;  %v9042_v13 = vld [vmem:[#allocation294_spill] sm:$0xff]  ;;  %v9045_v33 = vld [vmem:[#allocation96_spill] sm:$0xff] }
 0x3ca   : > { %v2823_v8 = vsel %vm2809_vm10, %v2758_v39, %v2189_v16  ;;  %2018 = vrot.lane.b32.xlu0 %v9013_v6, %s4019_s10  ;;  %3845 = vmatprep.mubr.msk.f32.mxu1 %vm2890_vm11, %v2854_v24  ;;  %v2564_v52 = vsel %vm2549_vm6, %v2499_v10, %v9025_v3  ;;  %v9033_v39 = vld [vmem:[#allocation95_spill] sm:$0xff]  ;;  %v9034_v16 = vld [vmem:[#allocation209_spill] sm:$0xff] }
 0x3cb   : > { %2082 = vrot.lane.b32.xlu1 %v9014_v61, %s4019_s10  ;;  %3798 = vmatmul.mubr.msk.f32.gmra.mrb[12].mxu0 %vm2890_vm11, %v2823_v8  ;;  %v2629_v38 = vsel %vm2614_vm7, %v2564_v52, %v9030_v26  ;;  %v2531_v24 = vsel %vm2484_vm5, %v2466_v14, %v9033_v39  ;;  %v9035_v8 = vld [vmem:[#allocation21_spill] sm:$0xff]  ;;  %v9046_v52 = vld [vmem:[#allocation147_spill] sm:$0xff] }
 0x3cc   : > { %v2253_v48 = vpop.permute.xlu0 %2252  ;;  %v2694_v63 = vsel %vm2679_vm8, %v2629_v38, %v9034_v16  ;;  %v2500_v6 = vsel %vm2484_vm5, %v2435_v62, %v9035_v8  ;;  %v2596_v61 = vsel %vm2549_vm6, %v2531_v24, %v9036_v20  ;;  %v9048_v38 = vld [vmem:[#allocation442_spill] sm:$0xff]  ;;  %v9050_v39 = vld [vmem:[#allocation83_spill] sm:$0xff]  ;;  %v9051_v8 = vld [vmem:[#allocation85_spill] sm:$0xff] }
 0x3cd   : > { %v2855_v7 = vsel %vm2809_vm10, %v2790_v47, %v2253_v48  ;;  %v1871_v36 = vpop.permute.xlu1 %1870  ;;  %v2661_v54 = vsel %vm2614_vm7, %v2596_v61, %v9040_v41  ;;  %v9049_v62 = vld [vmem:[#allocation74_spill] sm:$0xff] }
 0x3ce   : > { %2020 = vrot.lane.b32.xlu0 %v9015_v22, %s4019_s10  ;;  %3846 = vmatmul.mubr.msk.f32.gmra.mrb[12].mxu1 %vm2890_vm11, %v2855_v7  ;;  %v9037_v7 = vld [vmem:[#allocation208_spill] sm:$0xff]  ;;  %v2726_v31 = vsel %vm2679_vm8, %v2661_v54, %v1871_v36  ;;  %v9053_v61 = vld [vmem:[#allocation86_spill] sm:$0xff] }
 0x3cf   : > { %2084 = vrot.lane.b32.xlu1 %v9016_v4, %s4019_s10  ;;  %v9038_v22 = vld [vmem:[#allocation56_spill] sm:$0xff] }
 0x3d0   : > { %v1873_v2 = vpop.permute.xlu0 %1872  ;;  %v2402_v4 = vsel %vm2354_vm3, %v9038_v22, %v9037_v7  ;;  %v9056_v7 = vld [vmem:[#allocation123_spill] sm:$0xff] }
 0x3d1   : > { %v1999_v40 = vpop.permute.xlu1 %1998  ;;  %v2467_v5 = vsel %vm2419_vm4, %v2402_v4, %v9042_v13  ;;  %v9057_v22 = vld [vmem:[#allocation263_spill] sm:$0xff]  ;;  %v9060_v13 = vld [vmem:[#allocation60_spill] sm:$0xff] }
 0x3d2   : > { %2210 = vrot.lane.b32.xlu0 %v9017_v27, %s4020_s11  ;;  %v2759_v47 = vsel %vm2744_vm9, %v2694_v63, %v1999_v40  ;;  %v9039_v27 = vld [vmem:[#allocation143_spill] sm:$0xff]  ;;  %v9043_v40 = vld [vmem:[#allocation420_spill] sm:$0xff]  ;;  %v2532_v3 = vsel %vm2484_vm5, %v2467_v5, %v9045_v33 }
 0x3d3   : > { %2274 = vrot.lane.b32.xlu1 %v9020_v32, %s4020_s11  ;;  %v2565_v15 = vsel %vm2549_vm6, %v2500_v6, %v9039_v27  ;;  %v2597_v53 = vsel %vm2549_vm6, %v2532_v3, %v9047_v60  ;;  %v9052_v6 = vld [vmem:[#allocation121_spill] sm:$0xff]  ;;  %v9063_v33 = vld [vmem:[#allocation148_spill] sm:$0xff]  ;;  %v9064_v3 = vld [vmem:[#allocation27_spill] sm:$0xff] }
 0x3d4   : > { %v2063_v35 = vpop.permute.xlu0 %2062  ;;  %v2630_v10 = vsel %vm2614_vm7, %v2565_v15, %v9043_v40  ;;  %v9058_v15 = vld [vmem:[#allocation22_spill] sm:$0xff]  ;;  %v9061_v40 = vld [vmem:[#allocation372_spill] sm:$0xff] }
 0x3d5   : > { %v2001_v19 = vpop.permute.xlu1 %2000  ;;  %v2791_v17 = vsel %vm2744_vm9, %v2726_v31, %v2063_v35  ;;  %v9062_v31 = vld [vmem:[#allocation185_spill] sm:$0xff] }
 0x3d6   : > { %2212 = vrot.lane.b32.xlu0 %v9026_v23, %s4020_s11  ;;  %v2695_v23 = vsel %vm2679_vm8, %v2630_v10, %v9046_v52  ;;  %v2372_v52 = vsel %vm2354_vm3, %v9064_v3, %v9063_v33  ;;  %v9081_v33 = vld [vmem:[#allocation347_spill] sm:$0xff] }
 0x3d7   : > { %2276 = vrot.lane.b32.xlu1 %v9031_v0, %s4020_s11  ;;  %v2760_v14 = vsel %vm2744_vm9, %v2695_v23, %v2001_v19  ;;  %v2662_v0 = vsel %vm2614_vm7, %v2597_v53, %v9048_v38  ;;  %v9065_v23 = vld [vmem:[#allocation295_spill] sm:$0xff]  ;;  %v9067_v53 = vld [vmem:[#allocation249_spill] sm:$0xff] }
 0x3d8   : > { %v2065_v9 = vpop.permute.xlu0 %2064  ;;  %v2727_v35 = vsel %vm2679_vm8, %v2662_v0, %v1873_v2  ;;  %v9070_v0 = vld [vmem:[#allocation211_spill] sm:$0xff] }
 0x3d9   : > { %v2191_v48 = vpop.permute.xlu1 %2190  ;;  %v2792_v19 = vsel %vm2744_vm9, %v2727_v35, %v2065_v9 }
 0x3da   : > { %v2824_v32 = vsel %vm2809_vm10, %v2759_v47, %v2191_v48  ;;  %1830 = vrot.lane.b32.xlu0 %v9041_v46, %s4018_s7  ;;  %v9054_v47 = vld [vmem:[#allocation146_spill] sm:$0xff]  ;;  %v9055_v48 = vld [vmem:[#allocation28_spill] sm:$0xff] }
 0x3db   : > { %1894 = vrot.lane.b32.xlu1 %v9044_v57, %s4018_s7  ;;  %3800 = vmatprep.mubr.msk.f32.mxu0 %vm2890_vm11, %v2824_v32  ;;  %v2371_v9 = vsel %vm2354_vm3, %v9055_v48, %v9054_v47  ;;  %v9059_v32 = vld [vmem:[#allocation210_spill] sm:$0xff]  ;;  %v9073_v47 = vld [vmem:[#allocation212_spill] sm:$0xff]  ;;  %v9074_v48 = vld [vmem:[#allocation59_spill] sm:$0xff] }
 0x3dc   : > { %v2255_v50 = vpop.permute.xlu0 %2254  ;;  %v2436_v4 = vsel %vm2419_vm4, %v2371_v9, %v9057_v22  ;;  %v2403_v5 = vsel %vm2354_vm3, %v9060_v13, %v9059_v32  ;;  %v2404_v9 = vsel %vm2354_vm3, %v9074_v48, %v9073_v47  ;;  %v9077_v32 = vld [vmem:[#allocation187_spill] sm:$0xff]  ;;  %v9078_v13 = vld [vmem:[#allocation296_spill] sm:$0xff]  ;;  %v9088_v47 = vld [vmem:[#allocation9_spill] sm:$0xff] }
 0x3dd   : > { %v2856_v36 = vsel %vm2809_vm10, %v2791_v17, %v2255_v50  ;;  %v2193_v26 = vpop.permute.xlu1 %2192  ;;  %v2501_v41 = vsel %vm2484_vm5, %v2436_v4, %v9058_v15  ;;  %v2468_v17 = vsel %vm2419_vm4, %v2403_v5, %v9065_v23  ;;  %v9066_v50 = vld [vmem:[#allocation421_spill] sm:$0xff]  ;;  %v9076_v4 = vld [vmem:[#allocation443_spill] sm:$0xff]  ;;  %v2469_v5 = vsel %vm2419_vm4, %v2404_v9, %v9078_v13  ;;  %v9089_v48 = vld [vmem:[#allocation150_spill] sm:$0xff] }
 0x3de   : > { %v2825_v42 = vsel %vm2809_vm10, %v2760_v14, %v2193_v26  ;;  %1832 = vrot.lane.b32.xlu0 %v9049_v62, %s4018_s7  ;;  %3848 = vmatprep.mubr.msk.f32.mxu1 %vm2890_vm11, %v2856_v36  ;;  %v2566_v10 = vsel %vm2549_vm6, %v2501_v41, %v9061_v40  ;;  %v9068_v14 = vld [vmem:[#allocation264_spill] sm:$0xff]  ;;  %v9069_v26 = vld [vmem:[#allocation346_spill] sm:$0xff]  ;;  %v2534_v3 = vsel %vm2484_vm5, %v2469_v5, %v9081_v33  ;;  %v9090_v9 = vld [vmem:[#allocation31_spill] sm:$0xff] }
 0x3df   : > { %1896 = vrot.lane.b32.xlu1 %v9050_v39, %s4018_s7  ;;  %3801 = vmatmul.mubr.msk.f32.gmra.mrb[14].mxu0 %vm2890_vm11, %v2825_v42  ;;  %v2631_v60 = vsel %vm2614_vm7, %v2566_v10, %v9066_v50  ;;  %v2437_v36 = vsel %vm2419_vm4, %v2372_v52, %v9068_v14  ;;  %v2533_v38 = vsel %vm2484_vm5, %v2468_v17, %v9069_v26  ;;  %v9082_v52 = vld [vmem:[#allocation26_spill] sm:$0xff]  ;;  %v9084_v26 = vld [vmem:[#allocation444_spill] sm:$0xff] }
 0x3e0   : > { %v2257_v24 = vpop.permute.xlu0 %2256  ;;  %v2696_v42 = vsel %vm2679_vm8, %v2631_v60, %v9070_v0  ;;  %v9083_v60 = vld [vmem:[#allocation399_spill] sm:$0xff]  ;;  %v9094_v13 = vld [vmem:[#allocation214_spill] sm:$0xff] }
 0x3e1   : > { %v2857_v16 = vsel %vm2809_vm10, %v2792_v19, %v2257_v24  ;;  %v1875_v63 = vpop.permute.xlu1 %1874  ;;  %v9071_v19 = vld [vmem:[#allocation321_spill] sm:$0xff]  ;;  %v2405_v5 = vsel %vm2354_vm3, %v8841_v12, %v9094_v13  ;;  %v9098_v33 = vld [vmem:[#allocation30_spill] sm:$0xff] }
 0x3e2   : > { %2022 = vrot.lane.b32.xlu0 %v9051_v8, %s4019_s10  ;;  %3849 = vmatmul.mubr.msk.f32.gmra.mrb[14].mxu1 %vm2890_vm11, %v2857_v16  ;;  %v2502_v24 = vsel %vm2484_vm5, %v2437_v36, %v9071_v19  ;;  %v9072_v16 = vld [vmem:[#allocation398_spill] sm:$0xff]  ;;  %v9086_v19 = vld [vmem:[#allocation35_spill] sm:$0xff] }
 0x3e3   : > { %2086 = vrot.lane.b32.xlu1 %v9052_v6, %s4019_s10  ;;  %v2598_v8 = vsel %vm2549_vm6, %v2533_v38, %v9072_v16  ;;  %v9102_v12 = vld [vmem:[#allocation266_spill] sm:$0xff] }
 0x3e4   : > { %v1877_v2 = vpop.permute.xlu0 %1876  ;;  %v2663_v15 = vsel %vm2614_vm7, %v2598_v8, %v9076_v4 }
 0x3e5   : > { %v2003_v20 = vpop.permute.xlu1 %2002  ;;  %v2728_v10 = vsel %vm2679_vm8, %v2663_v15, %v1875_v63 }
 0x3e6   : > { %2024 = vrot.lane.b32.xlu0 %v9053_v61, %s4019_s10  ;;  %v2761_v6 = vsel %vm2744_vm9, %v2696_v42, %v2003_v20  ;;  %v9079_v20 = vld [vmem:[#allocation422_spill] sm:$0xff] }
 0x3e7   : > { %2088 = vrot.lane.b32.xlu1 %v9056_v7, %s4019_s10  ;;  %v9075_v7 = vld [vmem:[#allocation373_spill] sm:$0xff]  ;;  %v9085_v42 = vld [vmem:[#allocation6_spill] sm:$0xff] }
 0x3e8   : > { %v2067_v27 = vpop.permute.xlu0 %2066  ;;  %v2567_v22 = vsel %vm2549_vm6, %v2502_v24, %v9075_v7  ;;  %v9091_v7 = vld [vmem:[#allocation87_spill] sm:$0xff] }
 0x3e9   : > { %v2005_v54 = vpop.permute.xlu1 %2004  ;;  %v2632_v40 = vsel %vm2614_vm7, %v2567_v22, %v9079_v20  ;;  %v2793_v17 = vsel %vm2744_vm9, %v2728_v10, %v2067_v27  ;;  %v9092_v22 = vld [vmem:[#allocation265_spill] sm:$0xff]  ;;  %v9095_v20 = vld [vmem:[#allocation374_spill] sm:$0xff]  ;;  %v9096_v10 = vld [vmem:[#allocation11_spill] sm:$0xff] }
 0x3ea   : > { %2214 = vrot.lane.b32.xlu0 %v9062_v31, %s4020_s11  ;;  %v9080_v31 = vld [vmem:[#allocation251_spill] sm:$0xff]  ;;  %v2697_v23 = vsel %vm2679_vm8, %v2632_v40, %v9082_v52  ;;  %v9099_v52 = vld [vmem:[#allocation297_spill] sm:$0xff] }
 0x3eb   : > { %2278 = vrot.lane.b32.xlu1 %v9067_v53, %s4020_s11  ;;  %v2599_v53 = vsel %vm2549_vm6, %v2534_v3, %v9083_v60  ;;  %v2762_v14 = vsel %vm2744_vm9, %v2697_v23, %v2005_v54  ;;  %v2470_v23 = vsel %vm2419_vm4, %v2405_v5, %v9099_v52  ;;  %v9101_v60 = vld [vmem:[#allocation88_spill] sm:$0xff]  ;;  %v9114_v5 = vld [vmem:[#allocation349_spill] sm:$0xff] }
 0x3ec   : > { %v2069_v35 = vpop.permute.xlu0 %2068  ;;  %v2664_v38 = vsel %vm2614_vm7, %v2599_v53, %v9084_v26 }
 0x3ed   : > { %v2195_v61 = vpop.permute.xlu1 %2194  ;;  %v2729_v27 = vsel %vm2679_vm8, %v2664_v38, %v1877_v2 }
 0x3ee   : > { %v2826_v41 = vsel %vm2809_vm10, %v2761_v6, %v2195_v61  ;;  %2216 = vrot.lane.b32.xlu0 %v9077_v32, %s4020_s11  ;;  %v2794_v54 = vsel %vm2744_vm9, %v2729_v27, %v2069_v35  ;;  %v9087_v6 = vld [vmem:[#allocation5_spill] sm:$0xff]  ;;  %v2373_v35 = vsel %vm2354_vm3, %v9090_v9, %v9089_v48  ;;  %v9106_v27 = vld [vmem:[#allocation400_spill] sm:$0xff] }
 0x3ef   : > { %2280 = vrot.lane.b32.xlu1 %v9080_v31, %s4020_s11  ;;  %3803 = vmatprep.mubr.msk.f32.mxu0 %vm2890_vm11, %v2826_v41  ;;  %v2438_v4 = vsel %vm2419_vm4, %v2373_v35, %v9092_v22  ;;  %v9093_v41 = vld [vmem:[#allocation322_spill] sm:$0xff]  ;;  %v9097_v31 = vld [vmem:[#allocation152_spill] sm:$0xff]  ;;  %v9109_v9 = vld [vmem:[#allocation445_spill] sm:$0xff] }
 0x3f0   : > { %v2259_v50 = vpop.permute.xlu0 %2258  ;;  %v2503_v32 = vsel %vm2484_vm5, %v2438_v4, %v9093_v41  ;;  %v2374_v3 = vsel %vm2354_vm3, %v9098_v33, %v9097_v31  ;;  %v9110_v22 = vld [vmem:[#allocation125_spill] sm:$0xff]  ;;  %v9111_v4 = vld [vmem:[#allocation298_spill] sm:$0xff] }
 0x3f1   : > { %v2858_v63 = vsel %vm2809_vm10, %v2793_v17, %v2259_v50  ;;  %v2197_v36 = vpop.permute.xlu1 %2196  ;;  %v2568_v40 = vsel %vm2549_vm6, %v2503_v32, %v9095_v20  ;;  %v9100_v17 = vld [vmem:[#allocation423_spill] sm:$0xff]  ;;  %v2439_v53 = vsel %vm2419_vm4, %v2374_v3, %v9102_v12  ;;  %v9116_v3 = vld [vmem:[#allocation401_spill] sm:$0xff] }
 0x3f2   : > { %v2827_v0 = vsel %vm2809_vm10, %v2762_v14, %v2197_v36  ;;  %1834 = vrot.lane.b32.xlu0 %v9085_v42, %s4018_s7  ;;  %3851 = vmatprep.mubr.msk.f32.mxu1 %vm2890_vm11, %v2858_v63  ;;  %v2633_v50 = vsel %vm2614_vm7, %v2568_v40, %v9100_v17  ;;  %v9103_v14 = vld [vmem:[#allocation348_spill] sm:$0xff]  ;;  %v9104_v36 = vld [vmem:[#allocation99_spill] sm:$0xff]  ;;  %v9115_v40 = vld [vmem:[#allocation29_spill] sm:$0xff] }
 0x3f3   : > { %1898 = vrot.lane.b32.xlu1 %v9086_v19, %s4018_s7  ;;  %3804 = vmatmul.mubr.msk.f32.gmra.mrb[16].mxu0 %vm2890_vm11, %v2827_v0  ;;  %v2535_v63 = vsel %vm2484_vm5, %v2470_v23, %v9103_v14  ;;  %v2698_v26 = vsel %vm2679_vm8, %v2633_v50, %v9104_v36  ;;  %v9105_v0 = vld [vmem:[#allocation323_spill] sm:$0xff]  ;;  %v9117_v50 = vld [vmem:[#allocation446_spill] sm:$0xff] }
 0x3f4   : > { %v2261_v24 = vpop.permute.xlu0 %2260  ;;  %v2504_v42 = vsel %vm2484_vm5, %v2439_v53, %v9105_v0  ;;  %v2600_v19 = vsel %vm2549_vm6, %v2535_v63, %v9106_v27  ;;  %v9118_v53 = vld [vmem:[#allocation127_spill] sm:$0xff] }
 0x3f5   : > { %v2859_v16 = vsel %vm2809_vm10, %v2794_v54, %v2261_v24  ;;  %v1879_v8 = vpop.permute.xlu1 %1878  ;;  %v2665_v35 = vsel %vm2614_vm7, %v2600_v19, %v9109_v9  ;;  %v9119_v14 = vld [vmem:[#allocation191_spill] sm:$0xff]  ;;  %v9126_v9 = vld [vmem:[#allocation10_spill] sm:$0xff] }
 0x3f6   : > { %1836 = vrot.lane.b32.xlu0 %v9087_v6, %s4018_s7  ;;  %3852 = vmatmul.mubr.msk.f32.gmra.mrb[16].mxu1 %vm2890_vm11, %v2859_v16  ;;  %v9107_v16 = vld [vmem:[#allocation216_spill] sm:$0xff]  ;;  %v2730_v13 = vsel %vm2679_vm8, %v2665_v35, %v1879_v8  ;;  %v9121_v27 = vld [vmem:[#allocation43_spill] sm:$0xff] }
 0x3f7   : > { %1900 = vrot.lane.b32.xlu1 %v8827_v55, %s4018_s7  ;;  %v2406_v6 = vsel %vm2354_vm3, %v8847_v21, %v9107_v16  ;;  %v9113_v21 = vld [vmem:[#allocation189_spill] sm:$0xff]  ;;  %v9122_v19 = vld [vmem:[#allocation267_spill] sm:$0xff]  ;;  %v9127_v35 = vld [vmem:[#allocation156_spill] sm:$0xff] }
 0x3f8   : > { %v1881_v2 = vpop.permute.xlu0 %1880  ;;  %v2471_v41 = vsel %vm2419_vm4, %v2406_v6, %v9111_v4  ;;  %v9124_v6 = vld [vmem:[#allocation218_spill] sm:$0xff] }
 0x3f9   : > { %v2007_v61 = vpop.permute.xlu1 %2006  ;;  %v2536_v20 = vsel %vm2484_vm5, %v2471_v41, %v9114_v5  ;;  %v9130_v41 = vld [vmem:[#allocation425_spill] sm:$0xff] }
 0x3fa   : > { %2026 = vrot.lane.b32.xlu0 %v9088_v47, %s4019_s10  ;;  %v2763_v54 = vsel %vm2744_vm9, %v2698_v26, %v2007_v61  ;;  %v9108_v47 = vld [vmem:[#allocation375_spill] sm:$0xff]  ;;  %v9112_v61 = vld [vmem:[#allocation424_spill] sm:$0xff]  ;;  %v2601_v52 = vsel %vm2549_vm6, %v2536_v20, %v9116_v3  ;;  %v9136_v3 = vld [vmem:[#allocation402_spill] sm:$0xff] }
 0x3fb   : > { %2090 = vrot.lane.b32.xlu1 %v9091_v7, %s4019_s10  ;;  %v2569_v48 = vsel %vm2549_vm6, %v2504_v42, %v9108_v47  ;;  %v9120_v42 = vld [vmem:[#allocation154_spill] sm:$0xff]  ;;  %v2407_v47 = vsel %vm2354_vm3, %v8870_v43, %v9124_v6  ;;  %v9132_v43 = vld [vmem:[#allocation268_spill] sm:$0xff] }
 0x3fc   : > { %v2071_v15 = vpop.permute.xlu0 %2070  ;;  %v2634_v32 = vsel %vm2614_vm7, %v2569_v48, %v9112_v61  ;;  %v9134_v20 = vld [vmem:[#allocation100_spill] sm:$0xff] }
 0x3fd   : > { %v2009_v55 = vpop.permute.xlu1 %2008  ;;  %v2795_v31 = vsel %vm2744_vm9, %v2730_v13, %v2071_v15 }
 0x3fe   : > { %2028 = vrot.lane.b32.xlu0 %v9096_v10, %s4019_s10  ;;  %v2699_v10 = vsel %vm2679_vm8, %v2634_v32, %v9115_v40  ;;  %v9131_v32 = vld [vmem:[#allocation89_spill] sm:$0xff] }
 0x3ff   : > { %2092 = vrot.lane.b32.xlu1 %v9101_v60, %s4019_s10  ;;  %v2764_v23 = vsel %vm2744_vm9, %v2699_v10, %v2009_v55  ;;  %v2666_v60 = vsel %vm2614_vm7, %v2601_v52, %v9117_v50 }
 0x400   : > { %v2073_v38 = vpop.permute.xlu0 %2072  ;;  %v2731_v15 = vsel %vm2679_vm8, %v2666_v60, %v1881_v2  ;;  %v9138_v60 = vld [vmem:[#allocation377_spill] sm:$0xff] }
 0x401   : > { %v2199_v24 = vpop.permute.xlu1 %2198  ;;  %v2796_v55 = vsel %vm2744_vm9, %v2731_v15, %v2073_v38  ;;  %v2375_v38 = vsel %vm2354_vm3, %v9121_v27, %v9120_v42 }
 0x402   : > { %v2828_v7 = vsel %vm2809_vm10, %v2763_v54, %v2199_v24  ;;  %2218 = vrot.lane.b32.xlu0 %v9110_v22, %s4020_s11  ;;  %v9123_v24 = vld [vmem:[#allocation324_spill] sm:$0xff]  ;;  %v9129_v22 = vld [vmem:[#allocation299_spill] sm:$0xff] }
 0x403   : > { %2282 = vrot.lane.b32.xlu1 %v9113_v21, %s4020_s11  ;;  %3806 = vmatprep.mubr.msk.f32.mxu0 %vm2890_vm11, %v2828_v7  ;;  %v2472_v4 = vsel %vm2419_vm4, %v2407_v47, %v9129_v22  ;;  %v9133_v21 = vld [vmem:[#allocation350_spill] sm:$0xff]  ;;  %v9146_v47 = vld [vmem:[#allocation403_spill] sm:$0xff]  ;;  %v9148_v22 = vld [vmem:[#allocation129_spill] sm:$0xff] }
 0x404   : > { %v2263_v33 = vpop.permute.xlu0 %2262  ;;  %v2537_v5 = vsel %vm2484_vm5, %v2472_v4, %v9133_v21  ;;  %v9149_v4 = vld [vmem:[#allocation193_spill] sm:$0xff] }
 0x405   : > { %v2860_v8 = vsel %vm2809_vm10, %v2795_v31, %v2263_v33  ;;  %v2201_v17 = vpop.permute.xlu1 %2200  ;;  %v9135_v31 = vld [vmem:[#allocation325_spill] sm:$0xff]  ;;  %v2602_v52 = vsel %vm2549_vm6, %v2537_v5, %v9136_v3 }
 0x406   : > { %v2829_v12 = vsel %vm2809_vm10, %v2764_v23, %v2201_v17  ;;  %2220 = vrot.lane.b32.xlu0 %v9118_v53, %s4020_s11  ;;  %3854 = vmatprep.mubr.msk.f32.mxu1 %vm2890_vm11, %v2860_v8  ;;  %v9137_v17 = vld [vmem:[#allocation220_spill] sm:$0xff]  ;;  %v9139_v53 = vld [vmem:[#allocation447_spill] sm:$0xff] }
 0x407   : > { %2284 = vrot.lane.b32.xlu1 %v9119_v14, %s4020_s11  ;;  %3807 = vmatmul.mubr.msk.f32.gmra.mrb[18].mxu0 %vm2890_vm11, %v2829_v12  ;;  %v2408_v50 = vsel %vm2354_vm3, %v8875_v25, %v9137_v17  ;;  %v2667_v15 = vsel %vm2614_vm7, %v2602_v52, %v9139_v53  ;;  %v9143_v25 = vld [vmem:[#allocation90_spill] sm:$0xff] }
 0x408   : > { %v2265_v63 = vpop.permute.xlu0 %2264  ;;  %v9154_v52 = vld [vmem:[#allocation222_spill] sm:$0xff] }
 0x409   : > { %v2861_v36 = vsel %vm2809_vm10, %v2796_v55, %v2265_v63  ;;  %v1883_v26 = vpop.permute.xlu1 %1882  ;;  %v9140_v55 = vld [vmem:[#allocation12_spill] sm:$0xff] }
 0x40a   : > { %1838 = vrot.lane.b32.xlu0 %v8840_v1, %s4018_s7  ;;  %3855 = vmatmul.mubr.msk.f32.gmra.mrb[18].mxu1 %vm2890_vm11, %v2861_v36  ;;  %v2440_v1 = vsel %vm2419_vm4, %v2375_v38, %v9122_v19  ;;  %v9141_v63 = vld [vmem:[#allocation300_spill] sm:$0xff]  ;;  %v2732_v27 = vsel %vm2679_vm8, %v2667_v15, %v1883_v26  ;;  %v9144_v38 = vld [vmem:[#allocation351_spill] sm:$0xff]  ;;  %v9157_v15 = vld [vmem:[#allocation326_spill] sm:$0xff] }
 0x40b   : > { %1902 = vrot.lane.b32.xlu1 %v8845_v58, %s4018_s7  ;;  %v2505_v16 = vsel %vm2484_vm5, %v2440_v1, %v9123_v24  ;;  %v2473_v36 = vsel %vm2419_vm4, %v2408_v50, %v9141_v63  ;;  %v9145_v1 = vld [vmem:[#allocation149_spill] sm:$0xff] }
 0x40c   : > { %v1885_v2 = vpop.permute.xlu0 %1884  ;;  %v2538_v19 = vsel %vm2484_vm5, %v2473_v36, %v9144_v38  ;;  %v9158_v36 = vld [vmem:[#allocation160_spill] sm:$0xff] }
 0x40d   : > { %v2011_v0 = vpop.permute.xlu1 %2010 }
 0x40e   : > { %1840 = vrot.lane.b32.xlu0 %v8849_v29, %s4018_s7  ;;  %v9125_v29 = vld [vmem:[#allocation376_spill] sm:$0xff] }
 0x40f   : > { %1904 = vrot.lane.b32.xlu1 %v8857_v44, %s4018_s7  ;;  %v2570_v48 = vsel %vm2549_vm6, %v2505_v16, %v9125_v29  ;;  %v9128_v44 = vld [vmem:[#allocation42_spill] sm:$0xff]  ;;  %v2603_v29 = vsel %vm2549_vm6, %v2538_v19, %v9146_v47  ;;  %s164_s7 = sand.u32 1, %s4003_s13  }
 0x410   : > { %v2075_v54 = vpop.permute.xlu0 %2074  ;;  %v2376_v7 = vsel %vm2354_vm3, %v9128_v44, %v9127_v35  ;;  %v2635_v61 = vsel %vm2614_vm7, %v2570_v48, %v9130_v41  ;;  %v9147_v35 = vld [vmem:[#allocation448_spill] sm:$0xff]  ;;  %s3612_s17 = sshll.u32 %s164_s7, 9  ;;  %s7734_s16 = scalar_lea.sflag [#allocation3], %s164_s7 }
 0x411   : > { %v2013_v58 = vpop.permute.xlu1 %2012  ;;  %v2441_v13 = vsel %vm2419_vm4, %v2376_v7, %v9132_v43  ;;  %v2700_v40 = vsel %vm2679_vm8, %v2635_v61, %v9134_v20  ;;  %v2797_v16 = vsel %vm2744_vm9, %v2732_v27, %v2075_v54  ;;  %v2668_v44 = vsel %vm2614_vm7, %v2603_v29, %v9147_v35  ;;  %v9150_v43 = vld [vmem:[#allocation131_spill] sm:$0xff]  ;;  %v7290_v20 = vld [vmem:[%s7778_s2] ss:$0 sm:$0xff]  ;;  %s7313_s24 = scalar_lea.vmem [#allocation2], %s3612_s17  ;;  %v9165_v35 = vld [vmem:[#allocation270_spill] sm:$0xff] }
 0x412   : > { %2030 = vrot.lane.b32.xlu0 %v9126_v9, %s4019_s10  ;;  %v2506_v33 = vsel %vm2484_vm5, %v2441_v13, %v9135_v31  ;;  %v2765_v23 = vsel %vm2744_vm9, %v2700_v40, %v2011_v0  ;;  %v9142_v0 = vld [vmem:[#allocation426_spill] sm:$0xff]  ;;  %v2733_v54 = vsel %vm2679_vm8, %v2668_v44, %v1885_v2  ;;  %v9151_v13 = vld [vmem:[#allocation195_spill] sm:$0xff]  ;;  %v9153_v31 = vld [vmem:[#allocation45_spill] sm:$0xff]  ;;  %s3546_s26 = sshll.u32 %s7313_s24, 4  ;;  %s7727_s26 = int_to_ptr.vmem [resolvable:$true] %s3546_s26 }
 0x413   : > { %2094 = vrot.lane.b32.xlu1 %v9131_v32, %s4019_s10  ;;  %v2571_v12 = vsel %vm2549_vm6, %v2506_v33, %v9138_v60  ;;  %v9164_v29 = vld [vmem:[#allocation427_spill] sm:$0xff]  ;;  %s3949_s4 = scalar_lea.vmem %s7727_s26, 8192  ;;  %p3956_p0 = scmp.lt.s32.totalorder %s7727_s26, %s3954_s6 }
 0x414   : > { %v2077_v10 = vpop.permute.xlu0 %2076  ;;  %v2636_v42 = vsel %vm2614_vm7, %v2571_v12, %v9142_v0  ;;  %v9156_v12 = vld [vmem:[#allocation301_spill] sm:$0xff]  ;;  %v9159_v0 = vld [vmem:[#allocation44_spill] sm:$0xff]  ;;  %p3950_p11 = scmp.ne.s32.totalorder %s7727_s26, %s3949_s4  ;;  %p3957_p1 = scmp.lt.s32.totalorder %s3955_s8, %s3949_s4 }
 0x415   : > { %v2203_v8 = vpop.permute.xlu1 %2202  ;;  %v2701_v24 = vsel %vm2679_vm8, %v2636_v42, %v9145_v1  ;;  %v2378_v42 = vsel %vm2354_vm3, %v9159_v0, %v9158_v36 }
 0x416   : > { %v2830_v14 = vsel %vm2809_vm10, %v2765_v23, %v2203_v8  ;;  %2032 = vrot.lane.b32.xlu0 %v9140_v55, %s4019_s10  ;;  %v2766_v48 = vsel %vm2744_vm9, %v2701_v24, %v2013_v58  ;;  %v2798_v58 = vsel %vm2744_vm9, %v2733_v54, %v2077_v10  ;;  %v9152_v10 = vld [vmem:[#allocation158_spill] sm:$0xff]  ;;  %v2409_v23 = vsel %vm2354_vm3, %v8896_v51, %v9154_v52  ;;  %v9155_v8 = vld [vmem:[#allocation269_spill] sm:$0xff]  ;;  %v9160_v51 = vld [vmem:[#allocation352_spill] sm:$0xff]  ;;  %p3951_p12 = pnand %p3950_p11, %p4081_p5  ;;  %p3958_p2 = por %p3957_p1, %p3956_p0 }
 0x417   : > { %2096 = vrot.lane.b32.xlu1 %v9143_v25, %s4019_s10  ;;  %3809 = vmatprep.mubr.msk.f32.mxu0 %vm2890_vm11, %v2830_v14  ;;  %v2377_v33 = vsel %vm2354_vm3, %v9153_v31, %v9152_v10  ;;  %v2474_v53 = vsel %vm2419_vm4, %v2409_v23, %v9156_v12  ;;  %v9161_v25 = vld [vmem:[#allocation378_spill] sm:$0xff]  ;;  %v9162_v24 = vld [vmem:[#allocation224_spill] sm:$0xff]  ;;  %v2443_v44 = vsel %vm2419_vm4, %v2378_v42, %v9165_v35  ;;  %v9167_v54 = vld [vmem:[#allocation213_spill] sm:$0xff] }
 0x418   : > { %v2267_v6 = vpop.permute.xlu0 %2266  ;;  %v2442_v17 = vsel %vm2419_vm4, %v2377_v33, %v9155_v8  ;;  %v2539_v27 = vsel %vm2484_vm5, %v2474_v53, %v9160_v51  ;;  %v9170_v33 = vld [vmem:[#allocation353_spill] sm:$0xff]  ;;  %v9171_v52 = vld [vmem:[#allocation379_spill] sm:$0xff]  ;;  %p3952_p13 = pneg %p3951_p12 }
 0x419   : > { %v2862_v26 = vsel %vm2809_vm10, %v2797_v16, %v2267_v6  ;;  %v2205_v9 = vpop.permute.xlu1 %2204  ;;  %v2507_v14 = vsel %vm2484_vm5, %v2442_v17, %v9157_v15  ;;  %v2410_v16 = vsel %vm2354_vm3, %v8901_v34, %v9162_v24  ;;  %v9163_v6 = vld [vmem:[#allocation404_spill] sm:$0xff]  ;;  %v9174_v15 = vld [vmem:[#allocation450_spill] sm:$0xff] }
 0x41a   : > { %v2831_v7 = vsel %vm2809_vm10, %v2766_v48, %v2205_v9  ;;  %2222 = vrot.lane.b32.xlu0 %v9148_v22, %s4020_s11  ;;  %3857 = vmatprep.mubr.msk.f32.mxu1 %vm2890_vm11, %v2862_v26  ;;  %v2572_v38 = vsel %vm2549_vm6, %v2507_v14, %v9161_v25  ;;  %v2604_v47 = vsel %vm2549_vm6, %v2539_v27, %v9163_v6  ;;  %p3959_p3 = pnand %p3958_p2, %p3952_p13 }
 0x41b   : > { %2286 = vrot.lane.b32.xlu1 %v9149_v4, %s4020_s11  ;;  %3810 = vmatmul.mubr.msk.f32.gmra.mrb[20].mxu0 %vm2890_vm11, %v2831_v7  ;;  %v2637_v48 = vsel %vm2614_vm7, %v2572_v38, %v9164_v29  ;;  %v9166_v7 = vld [vmem:[#allocation449_spill] sm:$0xff] }
 0x41c   : > { %v2269_v41 = vpop.permute.xlu0 %2268  ;;  %v2669_v22 = vsel %vm2614_vm7, %v2604_v47, %v9166_v7  ;;  %v2702_v34 = vsel %vm2679_vm8, %v2637_v48, %v9167_v54  ;;  %v9175_v48 = vld [vmem:[#allocation162_spill] sm:$0xff]  ;;  %v9178_v54 = vld [vmem:[#allocation271_spill] sm:$0xff] }
 0x41d   : > { %v2863_v61 = vsel %vm2809_vm10, %v2798_v58, %v2269_v41  ;;  %v1887_v32 = vpop.permute.xlu1 %1886  ;;  %v9168_v58 = vld [vmem:[#allocation302_spill] sm:$0xff] }
 0x41e   : > { %2224 = vrot.lane.b32.xlu0 %v9150_v43, %s4020_s11  ;;  %3858 = vmatmul.mubr.msk.f32.gmra.mrb[20].mxu1 %vm2890_vm11, %v2863_v61  ;;  %v2475_v41 = vsel %vm2419_vm4, %v2410_v16, %v9168_v58  ;;  %v9169_v61 = vld [vmem:[#allocation327_spill] sm:$0xff]  ;;  %v9177_v7 = vld [vmem:[#allocation226_spill] sm:$0xff] }
 0x41f   : > { %2288 = vrot.lane.b32.xlu1 %v9151_v13, %s4020_s11  ;;  %v2508_v43 = vsel %vm2484_vm5, %v2443_v44, %v9169_v61  ;;  %v2734_v13 = vsel %vm2679_vm8, %v2669_v22, %v1887_v32  ;;  %v9173_v32 = vld [vmem:[#allocation428_spill] sm:$0xff]  ;;  %v2411_v22 = vsel %vm2354_vm3, %v8921_v11, %v9177_v7  ;;  %v9179_v58 = vld [vmem:[#allocation303_spill] sm:$0xff] }
 0x420   : > { %v1825_v2 = vpop.permute.xlu0 %1824  ;;  %v2573_v23 = vsel %vm2549_vm6, %v2508_v43, %v9171_v52  ;;  %v9180_v61 = vld [vmem:[#allocation328_spill] sm:$0xff] }
 0x421   : > { %v1889_v21 = vpop.permute.xlu1 %1888  ;;  %v9183_v52 = vld [vmem:[#allocation164_spill] sm:$0xff] }
 0x424   : > { %v2015_v5 = vpop.permute.xlu0 %2014 }
 0x425   : > { %v2079_v40 = vpop.permute.xlu1 %2078  ;;  %v2767_v10 = vsel %vm2744_vm9, %v2702_v34, %v2015_v5  ;;  %v2638_v5 = vsel %vm2614_vm7, %v2573_v23, %v9173_v32  ;;  %v9184_v23 = vld [vmem:[#allocation46_spill] sm:$0xff]  ;;  %v9187_v32 = vld [vmem:[#allocation228_spill] sm:$0xff] }
 0x426   : > { %v3781_v3 = vpop.f32.mrb[0].mxu0  ;;  %v2799_v8 = vsel %vm2744_vm9, %v2734_v13, %v2079_v40 }
 0x427   : > { %v3155_v50 = vadd.f32 %v3781_v3, %v7290_v20  ;;  %v3149_v60 = vpop.f32.mrb[1].mxu0  ;;  %v2540_v3 = vsel %vm2484_vm5, %v2475_v41, %v9170_v33  ;;  %v2476_v41 = vsel %vm2419_vm4, %v2411_v22, %v9179_v58  ;;  %v9182_v33 = vld [vmem:[#allocation380_spill] sm:$0xff] }
 0x428   : > { %v3150_v55 = vadd.f32 %v7290_v20, %v3149_v60  ;;  %v2017_v63 = vpop.permute.xlu0 %2016  ;;  %v9172_v60 = vld [vmem:[#allocation405_spill] sm:$0xff] }
 0x429   : > { %3469 = vst [vmem:[%s7313_s24 + $0x8] sm:$0xff] %v3155_v50  ;;  %v2081_v19 = vpop.permute.xlu1 %2080  ;;  %v3829_v1 = vpop.f32.mrb[0].mxu1  ;;  %v2605_v12 = vsel %vm2549_vm6, %v2540_v3, %v9172_v60  ;;  %v9186_v60 = vld [vmem:[#allocation429_spill] sm:$0xff] }
 0x42a   : > { %3468 = vst [vmem:[%s7313_s24] sm:$0xff] %v3150_v55  ;;  %v3315_v26 = vadd.f32 %v3829_v1, %v7290_v20  ;;  %v3309_v9 = vpop.f32.mrb[1].mxu1  ;;  %v2670_v14 = vsel %vm2614_vm7, %v2605_v12, %v9174_v15  ;;  %v2703_v55 = vsel %vm2679_vm8, %v2638_v5, %v1825_v2  ;;  %v2412_v5 = vsel %vm2354_vm3, %v8926_v49, %v9187_v32  ;;  %v9192_v49 = vld [vmem:[#allocation355_spill] sm:$0xff] }
 0x42b   : > { %v3310_v4 = vadd.f32 %v7290_v20, %v3309_v9  ;;  %v2735_v40 = vsel %vm2679_vm8, %v2670_v14, %v1889_v21  ;;  %v2768_v36 = vsel %vm2744_vm9, %v2703_v55, %v2017_v63  ;;  %v9189_v14 = vld [vmem:[#allocation451_spill] sm:$0xff] }
 0x42c   : > { %3501 = vst [vmem:[%s7313_s24 + $0x108] sm:$0xff] %v3315_v26  ;;  %v2207_v31 = vpop.permute.xlu0 %2206  ;;  %v2800_v42 = vsel %vm2744_vm9, %v2735_v40, %v2081_v19  ;;  %v9176_v26 = vld [vmem:[#allocation47_spill] sm:$0xff] }
 0x42d   : > { %3500 = vst [vmem:[%s7313_s24 + $0x100] sm:$0xff] %v3310_v4  ;;  %v2832_v17 = vsel %vm2809_vm10, %v2767_v10, %v2207_v31  ;;  %v2271_v50 = vpop.permute.xlu1 %2270  ;;  %v2379_v9 = vsel %vm2354_vm3, %v9176_v26, %v9175_v48  ;;  %v9181_v10 = vld [vmem:[#allocation354_spill] sm:$0xff]  ;;  %v9194_v26 = vld [vmem:[#allocation407_spill] sm:$0xff] }
 0x42e   : > { %v2864_v53 = vsel %vm2809_vm10, %v2799_v8, %v2271_v50  ;;  %3812 = vmatprep.mubr.msk.f32.mxu0 %vm2890_vm11, %v2832_v17  ;;  %v2444_v34 = vsel %vm2419_vm4, %v2379_v9, %v9178_v54  ;;  %v2541_v31 = vsel %vm2484_vm5, %v2476_v41, %v9181_v10  ;;  %v2380_v8 = vsel %vm2354_vm3, %v9184_v23, %v9183_v52  ;;  %v9185_v17 = vld [vmem:[#allocation406_spill] sm:$0xff] }
 0x42f   : > { %3860 = vmatprep.mubr.msk.f32.mxu1 %vm2890_vm11, %v2864_v53  ;;  %v2509_v43 = vsel %vm2484_vm5, %v2444_v34, %v9180_v61  ;;  %v2606_v50 = vsel %vm2549_vm6, %v2541_v31, %v9185_v17  ;;  %v9188_v53 = vld [vmem:[#allocation272_spill] sm:$0xff] }
 0x430   : > { %v2209_v0 = vpop.permute.xlu0 %2208  ;;  %v2574_v3 = vsel %vm2549_vm6, %v2509_v43, %v9182_v33  ;;  %v2445_v15 = vsel %vm2419_vm4, %v2380_v8, %v9188_v53  ;;  %v2671_v55 = vsel %vm2614_vm7, %v2606_v50, %v9189_v14 }
 0x431   : > { %v2833_v51 = vsel %vm2809_vm10, %v2768_v36, %v2209_v0  ;;  %v2273_v27 = vpop.permute.xlu1 %2272  ;;  %v2639_v12 = vsel %vm2614_vm7, %v2574_v3, %v9186_v60  ;;  %v9190_v36 = vld [vmem:[#allocation304_spill] sm:$0xff]  ;;  %v9197_v60 = vld [vmem:[#allocation166_spill] sm:$0xff] }
 0x432   : > { %v2865_v25 = vsel %vm2809_vm10, %v2800_v42, %v2273_v27  ;;  %3813 = vmatmul.mubr.msk.f32.gmra.mrb[22].mxu0 %vm2890_vm11, %v2833_v51  ;;  %v2477_v0 = vsel %vm2419_vm4, %v2412_v5, %v9190_v36  ;;  %v9191_v42 = vld [vmem:[#allocation329_spill] sm:$0xff]  ;;  %v9199_v5 = vld [vmem:[#allocation230_spill] sm:$0xff] }
 0x433   : > { %3861 = vmatmul.mubr.msk.f32.gmra.mrb[22].mxu1 %vm2890_vm11, %v2865_v25  ;;  %v2510_v51 = vsel %vm2484_vm5, %v2445_v15, %v9191_v42  ;;  %v2413_v53 = vsel %vm2354_vm3, %v8949_v59, %v9199_v5  ;;  %v9200_v15 = vld [vmem:[#allocation273_spill] sm:$0xff]  ;;  %v9202_v36 = vld [vmem:[#allocation330_spill] sm:$0xff] }
 0x434   : > { %v1827_v2 = vpop.permute.xlu0 %1826 }
 0x435   : > { %v1891_v38 = vpop.permute.xlu1 %1890  ;;  %v2704_v40 = vsel %vm2679_vm8, %v2639_v12, %v1827_v2  ;;  %v9198_v12 = vld [vmem:[#allocation55_spill] sm:$0xff] }
 0x436   : > { %v2736_v27 = vsel %vm2679_vm8, %v2671_v55, %v1891_v38  ;;  %v2381_v32 = vsel %vm2354_vm3, %v9198_v12, %v9197_v60  ;;  %v9201_v55 = vld [vmem:[#allocation305_spill] sm:$0xff] }
 0x437   : > { %v2446_v14 = vsel %vm2419_vm4, %v2381_v32, %v9200_v15 }
 0x438   : > { %v1829_v1 = vpop.permute.xlu0 %1828 }
 0x439   : > { %v1893_v21 = vpop.permute.xlu1 %1892 }
 0x43a   : > { %v3784_v24 = vpop.f32.mrb[2].mxu0 }
 0x43b   : > { %v3165_v63 = vadd.f32 %v3784_v24, %v7290_v20  ;;  %v3159_v16 = vpop.f32.mrb[3].mxu0 }
 0x43c   : > { %v3160_v19 = vadd.f32 %v7290_v20, %v3159_v16  ;;  %v2019_v6 = vpop.permute.xlu0 %2018  ;;  %v9193_v16 = vld [vmem:[#allocation381_spill] sm:$0xff] }
 0x43d   : > { %3471 = vst [vmem:[%s7313_s24 + $0x18] sm:$0xff] %v3165_v63  ;;  %v2083_v47 = vpop.permute.xlu1 %2082  ;;  %v3832_v29 = vpop.f32.mrb[2].mxu1  ;;  %v2769_v25 = vsel %vm2744_vm9, %v2704_v40, %v2019_v6  ;;  %v2542_v63 = vsel %vm2484_vm5, %v2477_v0, %v9192_v49  ;;  %v2478_v40 = vsel %vm2419_vm4, %v2413_v53, %v9201_v55  ;;  %v2511_v0 = vsel %vm2484_vm5, %v2446_v14, %v9202_v36 }
 0x43e   : > { %3470 = vst [vmem:[%s7313_s24 + $0x10] sm:$0xff] %v3160_v19  ;;  %v3325_v35 = vadd.f32 %v3832_v29, %v7290_v20  ;;  %v3319_v44 = vpop.f32.mrb[3].mxu1  ;;  %v2575_v19 = vsel %vm2549_vm6, %v2510_v51, %v9193_v16  ;;  %v2801_v29 = vsel %vm2744_vm9, %v2736_v27, %v2083_v47  ;;  %v2607_v9 = vsel %vm2549_vm6, %v2542_v63, %v9194_v26  ;;  %v9203_v51 = vld [vmem:[#allocation356_spill] sm:$0xff] }
 0x43f   : > { %v3320_v4 = vadd.f32 %v7290_v20, %v3319_v44  ;;  %v9196_v44 = vld [vmem:[#allocation452_spill] sm:$0xff]  ;;  %v2543_v27 = vsel %vm2484_vm5, %v2478_v40, %v9203_v51 }
 0x440   : > { %3503 = vst [vmem:[%s7313_s24 + $0x118] sm:$0xff] %v3325_v35  ;;  %v2021_v13 = vpop.permute.xlu0 %2020  ;;  %v9195_v35 = vld [vmem:[#allocation430_spill] sm:$0xff]  ;;  %v2672_v7 = vsel %vm2614_vm7, %v2607_v9, %v9196_v44  ;;  %v9205_v63 = vld [vmem:[#allocation168_spill] sm:$0xff] }
 0x441   : > { %3502 = vst [vmem:[%s7313_s24 + $0x110] sm:$0xff] %v3320_v4  ;;  %v2085_v11 = vpop.permute.xlu1 %2084  ;;  %v2640_v38 = vsel %vm2614_vm7, %v2575_v19, %v9195_v35  ;;  %v2737_v47 = vsel %vm2679_vm8, %v2672_v7, %v1893_v21  ;;  %v2382_v59 = vsel %vm2354_vm3, %v8954_v56, %v9205_v63  ;;  %v9206_v16 = vld [vmem:[#allocation408_spill] sm:$0xff]  ;;  %v9209_v9 = vld [vmem:[#allocation274_spill] sm:$0xff] }
 0x442   : > { %v2705_v22 = vsel %vm2679_vm8, %v2640_v38, %v1829_v1  ;;  %v2802_v4 = vsel %vm2744_vm9, %v2737_v47, %v2085_v11  ;;  %v2608_v19 = vsel %vm2549_vm6, %v2543_v27, %v9206_v16  ;;  %v2447_v35 = vsel %vm2419_vm4, %v2382_v59, %v9209_v9  ;;  %v9210_v38 = vld [vmem:[#allocation453_spill] sm:$0xff]  ;;  %v9211_v7 = vld [vmem:[#allocation306_spill] sm:$0xff] }
 0x443   : > { %v2770_v54 = vsel %vm2744_vm9, %v2705_v22, %v2021_v13  ;;  %v9212_v22 = vld [vmem:[#allocation331_spill] sm:$0xff]  ;;  %v9218_v59 = vld [vmem:[#allocation170_spill] sm:$0xff] }
 0x444   : > { %v2211_v24 = vpop.permute.xlu0 %2210  ;;  %v2512_v47 = vsel %vm2484_vm5, %v2447_v35, %v9212_v22  ;;  %v2383_v16 = vsel %vm2354_vm3, %v8990_v45, %v9218_v59  ;;  %v9222_v35 = vld [vmem:[#allocation332_spill] sm:$0xff] }
 0x445   : > { %v2834_v2 = vsel %vm2809_vm10, %v2769_v25, %v2211_v24  ;;  %v2275_v48 = vpop.permute.xlu1 %2274  ;;  %v9204_v25 = vld [vmem:[#allocation382_spill] sm:$0xff] }
 0x446   : > { %v2866_v6 = vsel %vm2809_vm10, %v2801_v29, %v2275_v48  ;;  %3815 = vmatprep.mubr.msk.f32.mxu0 %vm2890_vm11, %v2834_v2  ;;  %v2576_v24 = vsel %vm2549_vm6, %v2511_v0, %v9204_v25  ;;  %v9207_v29 = vld [vmem:[#allocation431_spill] sm:$0xff]  ;;  %v9208_v48 = vld [vmem:[#allocation232_spill] sm:$0xff] }
 0x447   : > { %3863 = vmatprep.mubr.msk.f32.mxu1 %vm2890_vm11, %v2866_v6  ;;  %v2641_v2 = vsel %vm2614_vm7, %v2576_v24, %v9207_v29  ;;  %v2414_v26 = vsel %vm2354_vm3, %v8959_v18, %v9208_v48  ;;  %v2673_v6 = vsel %vm2614_vm7, %v2608_v19, %v9210_v38  ;;  %v9213_v18 = vld [vmem:[#allocation357_spill] sm:$0xff]  ;;  %v9219_v19 = vld [vmem:[#allocation234_spill] sm:$0xff] }
 0x448   : > { %v2213_v34 = vpop.permute.xlu0 %2212  ;;  %v2479_v56 = vsel %vm2419_vm4, %v2414_v26, %v9211_v7  ;;  %v2415_v29 = vsel %vm2354_vm3, %v8995_v37, %v9219_v19  ;;  %v9221_v26 = vld [vmem:[#allocation307_spill] sm:$0xff] }
 0x449   : > { %v2835_v58 = vsel %vm2809_vm10, %v2770_v54, %v2213_v34  ;;  %v2277_v41 = vpop.permute.xlu1 %2276  ;;  %v2480_v9 = vsel %vm2419_vm4, %v2415_v29, %v9221_v26 }
 0x44a   : > { %v2867_v61 = vsel %vm2809_vm10, %v2802_v4, %v2277_v41  ;;  %3816 = vmatmul.mubr.msk.f32.gmra.mrb[24].mxu0 %vm2890_vm11, %v2835_v58  ;;  %v2544_v58 = vsel %vm2484_vm5, %v2479_v56, %v9213_v18  ;;  %v9214_v41 = vld [vmem:[#allocation383_spill] sm:$0xff]  ;;  %v9224_v56 = vld [vmem:[#allocation384_spill] sm:$0xff] }
 0x44b   : > { %3864 = vmatmul.mubr.msk.f32.gmra.mrb[24].mxu1 %vm2890_vm11, %v2867_v61  ;;  %v2577_v61 = vsel %vm2549_vm6, %v2512_v47, %v9214_v41  ;;  %v9225_v47 = vld [vmem:[#allocation172_spill] sm:$0xff] }
 0x44c   : > { %v1831_v1 = vpop.permute.xlu0 %1830  ;;  %v2384_v37 = vsel %vm2354_vm3, %v9005_v28, %v9225_v47 }
 0x44d   : > { %v1895_v21 = vpop.permute.xlu1 %1894  ;;  %v2706_v44 = vsel %vm2679_vm8, %v2641_v2, %v1831_v1  ;;  %v9220_v2 = vld [vmem:[#allocation275_spill] sm:$0xff] }
 0x44e   : > { %v3787_v43 = vpop.f32.mrb[4].mxu0  ;;  %v2738_v54 = vsel %vm2679_vm8, %v2673_v6, %v1895_v21  ;;  %v2448_v48 = vsel %vm2419_vm4, %v2383_v16, %v9220_v2 }
 0x44f   : > { %v3175_v13 = vadd.f32 %v3787_v43, %v7290_v20  ;;  %v3169_v10 = vpop.f32.mrb[5].mxu0  ;;  %v2513_v38 = vsel %vm2484_vm5, %v2448_v48, %v9222_v35 }
 0x450   : > { %v3170_v31 = vadd.f32 %v7290_v20, %v3169_v10  ;;  %v1833_v33 = vpop.permute.xlu0 %1832  ;;  %v9215_v10 = vld [vmem:[#allocation409_spill] sm:$0xff]  ;;  %v2578_v45 = vsel %vm2549_vm6, %v2513_v38, %v9224_v56  ;;  %v9238_v56 = vld [vmem:[#allocation174_spill] sm:$0xff] }
 0x451   : > { %3473 = vst [vmem:[%s7313_s24 + $0x28] sm:$0xff] %v3175_v13  ;;  %v1897_v3 = vpop.permute.xlu1 %1896  ;;  %v3835_v11 = vpop.f32.mrb[4].mxu1 }
 0x452   : > { %3472 = vst [vmem:[%s7313_s24 + $0x20] sm:$0xff] %v3170_v31  ;;  %v3335_v52 = vadd.f32 %v3835_v11, %v7290_v20  ;;  %v3329_v23 = vpop.f32.mrb[5].mxu1  ;;  %v2609_v31 = vsel %vm2549_vm6, %v2544_v58, %v9215_v10  ;;  %v9216_v11 = vld [vmem:[#allocation432_spill] sm:$0xff] }
 0x453   : > { %v3330_v8 = vadd.f32 %v7290_v20, %v3329_v23  ;;  %v2642_v21 = vsel %vm2614_vm7, %v2577_v61, %v9216_v11  ;;  %v9217_v23 = vld [vmem:[#allocation454_spill] sm:$0xff]  ;;  %v9228_v58 = vld [vmem:[#allocation236_spill] sm:$0xff]  ;;  %v9232_v11 = vld [vmem:[#allocation333_spill] sm:$0xff] }
 0x454   : > { %3505 = vst [vmem:[%s7313_s24 + $0x128] sm:$0xff] %v3335_v52  ;;  %v2023_v17 = vpop.permute.xlu0 %2022  ;;  %v2416_v41 = vsel %vm2354_vm3, %v9008_v30, %v9228_v58  ;;  %v9229_v61 = vld [vmem:[#allocation276_spill] sm:$0xff]  ;;  %v9233_v30 = vld [vmem:[#allocation359_spill] sm:$0xff] }
 0x455   : > { %3504 = vst [vmem:[%s7313_s24 + $0x120] sm:$0xff] %v3330_v8  ;;  %v2087_v50 = vpop.permute.xlu1 %2086  ;;  %v2771_v34 = vsel %vm2744_vm9, %v2706_v44, %v2023_v17  ;;  %v2674_v8 = vsel %vm2614_vm7, %v2609_v31, %v9217_v23  ;;  %v2707_v17 = vsel %vm2679_vm8, %v2642_v21, %v1833_v33  ;;  %v9223_v44 = vld [vmem:[#allocation358_spill] sm:$0xff]  ;;  %v9231_v31 = vld [vmem:[#allocation308_spill] sm:$0xff] }
 0x456   : > { %v2803_v43 = vsel %vm2744_vm9, %v2738_v54, %v2087_v50  ;;  %v2739_v50 = vsel %vm2679_vm8, %v2674_v8, %v1897_v3  ;;  %v2545_v7 = vsel %vm2484_vm5, %v2480_v9, %v9223_v44  ;;  %v9226_v54 = vld [vmem:[#allocation233_spill] sm:$0xff]  ;;  %v2481_v28 = vsel %vm2419_vm4, %v2416_v41, %v9231_v31  ;;  %v9246_v31 = vld [vmem:[#allocation240_spill] sm:$0xff] }
 0x458   : > { %v2025_v42 = vpop.permute.xlu0 %2024 }
 0x459   : > { %v2089_v49 = vpop.permute.xlu1 %2088  ;;  %v2772_v60 = vsel %vm2744_vm9, %v2707_v17, %v2025_v42  ;;  %v2546_v17 = vsel %vm2484_vm5, %v2481_v28, %v9233_v30  ;;  %v2418_v28 = vsel %vm2354_vm3, %v9050_v39, %v9246_v31 }
 0x45a   : > { %v2804_v32 = vsel %vm2744_vm9, %v2739_v50, %v2089_v49  ;;  %v9234_v50 = vld [vmem:[#allocation385_spill] sm:$0xff] }
 0x45c   : > { %v2215_v4 = vpop.permute.xlu0 %2214 }
 0x45d   : > { %v2836_v1 = vsel %vm2809_vm10, %v2771_v34, %v2215_v4  ;;  %v2279_v13 = vpop.permute.xlu1 %2278  ;;  %v2610_v34 = vsel %vm2549_vm6, %v2545_v7, %v9226_v54  ;;  %v9227_v4 = vld [vmem:[#allocation433_spill] sm:$0xff] }
 0x45e   : > { %v2868_v52 = vsel %vm2809_vm10, %v2803_v43, %v2279_v13  ;;  %3818 = vmatprep.mubr.msk.f32.mxu0 %vm2890_vm11, %v2836_v1  ;;  %v2643_v18 = vsel %vm2614_vm7, %v2578_v45, %v9227_v4  ;;  %v2449_v43 = vsel %vm2419_vm4, %v2384_v37, %v9229_v61  ;;  %v9230_v1 = vld [vmem:[#allocation455_spill] sm:$0xff]  ;;  %v2385_v45 = vsel %vm2354_vm3, %v9041_v46, %v9238_v56  ;;  %v9240_v37 = vld [vmem:[#allocation277_spill] sm:$0xff]  ;;  %v9243_v61 = vld [vmem:[#allocation176_spill] sm:$0xff] }
 0x45f   : > { %3866 = vmatprep.mubr.msk.f32.mxu1 %vm2890_vm11, %v2868_v52  ;;  %v2675_v13 = vsel %vm2614_vm7, %v2610_v34, %v9230_v1  ;;  %v2514_v21 = vsel %vm2484_vm5, %v2449_v43, %v9232_v11  ;;  %v2450_v54 = vsel %vm2419_vm4, %v2385_v45, %v9240_v37  ;;  %v9241_v34 = vld [vmem:[#allocation309_spill] sm:$0xff]  ;;  %v2386_v43 = vsel %vm2354_vm3, %v9049_v62, %v9243_v61  ;;  %v9244_v1 = vld [vmem:[#allocation360_spill] sm:$0xff]  ;;  %v9247_v11 = vld [vmem:[#allocation278_spill] sm:$0xff] }
 0x460   : > { %v2217_v12 = vpop.permute.xlu0 %2216 }
 0x461   : > { %v2837_v5 = vsel %vm2809_vm10, %v2772_v60, %v2217_v12  ;;  %v2281_v53 = vpop.permute.xlu1 %2280  ;;  %v2579_v60 = vsel %vm2549_vm6, %v2514_v21, %v9234_v50  ;;  %v2451_v21 = vsel %vm2419_vm4, %v2386_v43, %v9247_v11 }
 0x462   : > { %v2869_v15 = vsel %vm2809_vm10, %v2804_v32, %v2281_v53  ;;  %v3790_v14 = vpop.f32.mrb[6].mxu0  ;;  %3819 = vmatmul.mubr.msk.f32.gmra.mrb[26].mxu0 %vm2890_vm11, %v2837_v5  ;;  %v9235_v53 = vld [vmem:[#allocation410_spill] sm:$0xff] }
 0x463   : > { %v3185_v33 = vadd.f32 %v3790_v14, %v7290_v20  ;;  %v3179_v55 = vpop.f32.mrb[7].mxu0  ;;  %3867 = vmatmul.mubr.msk.f32.gmra.mrb[26].mxu1 %vm2890_vm11, %v2869_v15  ;;  %v2611_v15 = vsel %vm2549_vm6, %v2546_v17, %v9235_v53  ;;  %v9236_v14 = vld [vmem:[#allocation434_spill] sm:$0xff]  ;;  %v9252_v53 = vld [vmem:[#allocation335_spill] sm:$0xff] }
 0x464   : > { %v3180_v3 = vadd.f32 %v7290_v20, %v3179_v55  ;;  %v1835_v40 = vpop.permute.xlu0 %1834  ;;  %v9250_v17 = vld [vmem:[#allocation310_spill] sm:$0xff] }
 0x465   : > { %3475 = vst [vmem:[%s7313_s24 + $0x38] sm:$0xff] %v3185_v33  ;;  %v1899_v36 = vpop.permute.xlu1 %1898  ;;  %v3838_v0 = vpop.f32.mrb[6].mxu1  ;;  %v2708_v10 = vsel %vm2679_vm8, %v2643_v18, %v1835_v40  ;;  %v2644_v33 = vsel %vm2614_vm7, %v2579_v60, %v9236_v14  ;;  %v9237_v40 = vld [vmem:[#allocation456_spill] sm:$0xff]  ;;  %v9242_v18 = vld [vmem:[#allocation334_spill] sm:$0xff]  ;;  %v2483_v50 = vsel %vm2419_vm4, %v2418_v28, %v9250_v17  ;;  %v9251_v60 = vld [vmem:[#allocation457_spill] sm:$0xff] }
 0x466   : > { %3474 = vst [vmem:[%s7313_s24 + $0x30] sm:$0xff] %v3180_v3  ;;  %v3345_v42 = vadd.f32 %v3838_v0, %v7290_v20  ;;  %v3339_v51 = vpop.f32.mrb[7].mxu1  ;;  %v2740_v52 = vsel %vm2679_vm8, %v2675_v13, %v1899_v36  ;;  %v2676_v36 = vsel %vm2614_vm7, %v2611_v15, %v9237_v40  ;;  %v2515_v58 = vsel %vm2484_vm5, %v2450_v54, %v9242_v18  ;;  %v9245_v13 = vld [vmem:[#allocation386_spill] sm:$0xff]  ;;  %v9253_v40 = vld [vmem:[#allocation361_spill] sm:$0xff] }
 0x467   : > { %v3340_v27 = vadd.f32 %v7290_v20, %v3339_v51  ;;  %v2516_v15 = vsel %vm2484_vm5, %v2451_v21, %v9252_v53 }
 0x468   : > { %3507 = vst [vmem:[%s7313_s24 + $0x138] sm:$0xff] %v3345_v42  ;;  %v1837_v25 = vpop.permute.xlu0 %1836 }
 0x469   : > { %3506 = vst [vmem:[%s7313_s24 + $0x130] sm:$0xff] %v3340_v27  ;;  %v1901_v24 = vpop.permute.xlu1 %1900  ;;  %v2709_v0 = vsel %vm2679_vm8, %v2644_v33, %v1837_v25 }
 0x46a   : > { %v2741_v27 = vsel %vm2679_vm8, %v2676_v36, %v1901_v24  ;;  %v2548_v36 = vsel %vm2484_vm5, %v2483_v50, %v9253_v40 }
 0x46c   : > { %v2027_v49 = vpop.permute.xlu0 %2026 }
 0x46d   : > { %v2091_v63 = vpop.permute.xlu1 %2090  ;;  %v2773_v23 = vsel %vm2744_vm9, %v2708_v10, %v2027_v49 }
 0x46e   : > { %v2805_v12 = vsel %vm2744_vm9, %v2740_v52, %v2091_v63  ;;  %v9248_v52 = vld [vmem:[#allocation411_spill] sm:$0xff] }
 0x470   : > { %v2029_v6 = vpop.permute.xlu0 %2028 }
 0x471   : > { %v2093_v22 = vpop.permute.xlu1 %2092  ;;  %v2774_v49 = vsel %vm2744_vm9, %v2709_v0, %v2029_v6  ;;  %v9254_v0 = vld [vmem:[#allocation387_spill] sm:$0xff] }
 0x472   : > { %v2806_v16 = vsel %vm2744_vm9, %v2741_v27, %v2093_v22  ;;  %v9239_v22 = vld [vmem:[#allocation238_spill] sm:$0xff] }
 0x473   : > { %v2417_v47 = vsel %vm2354_vm3, %v9044_v57, %v9239_v22  ;;  %v2580_v57 = vsel %vm2549_vm6, %v2515_v58, %v9245_v13 }
 0x474   : > { %v2219_v8 = vpop.permute.xlu0 %2218  ;;  %v2482_v4 = vsel %vm2419_vm4, %v2417_v47, %v9241_v34 }
 0x475   : > { %v2838_v32 = vsel %vm2809_vm10, %v2773_v23, %v2219_v8  ;;  %v2283_v5 = vpop.permute.xlu1 %2282  ;;  %v2547_v46 = vsel %vm2484_vm5, %v2482_v4, %v9244_v1  ;;  %v9249_v8 = vld [vmem:[#allocation435_spill] sm:$0xff] }
 0x476   : > { %v2870_v55 = vsel %vm2809_vm10, %v2805_v12, %v2283_v5  ;;  %v3793_v3 = vpop.f32.mrb[8].mxu0  ;;  %3821 = vmatprep.mubr.msk.f32.mxu0 %vm2890_vm11, %v2838_v32  ;;  %v2612_v23 = vsel %vm2549_vm6, %v2547_v46, %v9248_v52  ;;  %v2645_v62 = vsel %vm2614_vm7, %v2580_v57, %v9249_v8 }
 0x477   : > { %v3195_v42 = vadd.f32 %v3793_v3, %v7290_v20  ;;  %v3189_v51 = vpop.f32.mrb[9].mxu0  ;;  %3869 = vmatprep.mubr.msk.f32.mxu1 %vm2890_vm11, %v2870_v55  ;;  %v2677_v12 = vsel %vm2614_vm7, %v2612_v23, %v9251_v60 }
 0x478   : > { %v3190_v63 = vadd.f32 %v7290_v20, %v3189_v51  ;;  %v2221_v59 = vpop.permute.xlu0 %2220 }
 0x479   : > { %3477 = vst [vmem:[%s7313_s24 + $0x48] sm:$0xff] %v3195_v42  ;;  %v2839_v19 = vsel %vm2809_vm10, %v2774_v49, %v2221_v59  ;;  %v2285_v25 = vpop.permute.xlu1 %2284  ;;  %v3841_v29 = vpop.f32.mrb[8].mxu1  ;;  %v2581_v42 = vsel %vm2549_vm6, %v2516_v15, %v9254_v0  ;;  %v9255_v59 = vld [vmem:[#allocation412_spill] sm:$0xff] }
 0x47a   : > { %3476 = vst [vmem:[%s7313_s24 + $0x40] sm:$0xff] %v3190_v63  ;;  %v2871_v2 = vsel %vm2809_vm10, %v2806_v16, %v2285_v25  ;;  %v3355_v48 = vadd.f32 %v3841_v29, %v7290_v20  ;;  %3822 = vmatmul.mubr.msk.f32.gmra.mrb[28].mxu0 %vm2890_vm11, %v2839_v19  ;;  %v3349_v24 = vpop.f32.mrb[9].mxu1  ;;  %v2613_v16 = vsel %vm2549_vm6, %v2548_v36, %v9255_v59  ;;  %v9256_v19 = vld [vmem:[#allocation436_spill] sm:$0xff] }
 0x47b   : > { %v3350_v26 = vadd.f32 %v7290_v20, %v3349_v24  ;;  %3870 = vmatmul.mubr.msk.f32.gmra.mrb[28].mxu1 %vm2890_vm11, %v2871_v2  ;;  %v2646_v25 = vsel %vm2614_vm7, %v2581_v42, %v9256_v19  ;;  %v9257_v24 = vld [vmem:[#allocation458_spill] sm:$0xff] }
 0x47c   : > { %3509 = vst [vmem:[%s7313_s24 + $0x148] sm:$0xff] %v3355_v48  ;;  %v1839_v9 = vpop.permute.xlu0 %1838 }
 0x47d   : > { %3508 = vst [vmem:[%s7313_s24 + $0x140] sm:$0xff] %v3350_v26  ;;  %v1903_v35 = vpop.permute.xlu1 %1902  ;;  %v2710_v32 = vsel %vm2679_vm8, %v2645_v62, %v1839_v9  ;;  %v2678_v26 = vsel %vm2614_vm7, %v2613_v16, %v9257_v24 }
 0x47e   : > { %v2742_v14 = vsel %vm2679_vm8, %v2677_v12, %v1903_v35 }
 0x480   : > { %v1841_v38 = vpop.permute.xlu0 %1840 }
 0x481   : > { %v1905_v6 = vpop.permute.xlu1 %1904  ;;  %v2711_v9 = vsel %vm2679_vm8, %v2646_v25, %v1841_v38 }
 0x484   : > { %v2031_v44 = vpop.permute.xlu0 %2030 }
 0x485   : > { %v2095_v7 = vpop.permute.xlu1 %2094  ;;  %v2775_v33 = vsel %vm2744_vm9, %v2710_v32, %v2031_v44  ;;  %v2743_v44 = vsel %vm2679_vm8, %v2678_v26, %v1905_v6 }
 0x486   : > { %v2807_v51 = vsel %vm2744_vm9, %v2742_v14, %v2095_v7 }
 0x488   : > { %v2033_v41 = vpop.permute.xlu0 %2032 }
 0x489   : > { %v2097_v10 = vpop.permute.xlu1 %2096  ;;  %v2776_v7 = vsel %vm2744_vm9, %v2711_v9, %v2033_v41 }
 0x48a   : > { %v3796_v30 = vpop.f32.mrb[10].mxu0  ;;  %v2808_v45 = vsel %vm2744_vm9, %v2743_v44, %v2097_v10 }
 0x48b   : > { %v3205_v39 = vadd.f32 %v3796_v30, %v7290_v20  ;;  %v3199_v5 = vpop.f32.mrb[11].mxu0 }
 0x48c   : > { %v3200_v55 = vadd.f32 %v7290_v20, %v3199_v5  ;;  %v2223_v3 = vpop.permute.xlu0 %2222 }
 0x48d   : > { %3479 = vst [vmem:[%s7313_s24 + $0x58] sm:$0xff] %v3205_v39  ;;  %v2840_v27 = vsel %vm2809_vm10, %v2775_v33, %v2223_v3  ;;  %v2287_v49 = vpop.permute.xlu1 %2286  ;;  %v3844_v63 = vpop.f32.mrb[10].mxu1 }
 0x48e   : > { %3478 = vst [vmem:[%s7313_s24 + $0x50] sm:$0xff] %v3200_v55  ;;  %v2872_v29 = vsel %vm2809_vm10, %v2807_v51, %v2287_v49  ;;  %v3365_v2 = vadd.f32 %v3844_v63, %v7290_v20  ;;  %3824 = vmatprep.mubr.msk.f32.mxu0 %vm2890_vm11, %v2840_v27  ;;  %v3359_v48 = vpop.f32.mrb[11].mxu1 }
 0x48f   : > { %v3360_v35 = vadd.f32 %v7290_v20, %v3359_v48  ;;  %3872 = vmatprep.mubr.msk.f32.mxu1 %vm2890_vm11, %v2872_v29 }
 0x490   : > { %3511 = vst [vmem:[%s7313_s24 + $0x158] sm:$0xff] %v3365_v2  ;;  %v2225_v56 = vpop.permute.xlu0 %2224 }
 0x491   : > { %3510 = vst [vmem:[%s7313_s24 + $0x150] sm:$0xff] %v3360_v35  ;;  %v2841_v22 = vsel %vm2809_vm10, %v2776_v7, %v2225_v56  ;;  %v2289_v38 = vpop.permute.xlu1 %2288 }
 0x492   : > { %v2873_v47 = vsel %vm2809_vm10, %v2808_v45, %v2289_v38  ;;  %3825 = vmatmul.mubr.msk.f32.gmra.mrb[30].mxu0 %vm2890_vm11, %v2841_v22 }
 0x493   : > { %3873 = vmatmul.mubr.msk.f32.gmra.mrb[30].mxu1 %vm2890_vm11, %v2873_v47 }
 0x49e   : > { %v3799_v6 = vpop.f32.mrb[12].mxu0 }
 0x49f   : > { %v3215_v37 = vadd.f32 %v3799_v6, %v7290_v20  ;;  %v3209_v54 = vpop.f32.mrb[13].mxu0 }
 0x4a0   : > { %v3210_v34 = vadd.f32 %v7290_v20, %v3209_v54 }
 0x4a1   : > { %3481 = vst [vmem:[%s7313_s24 + $0x68] sm:$0xff] %v3215_v37  ;;  %v3847_v4 = vpop.f32.mrb[12].mxu1 }
 0x4a2   : > { %3480 = vst [vmem:[%s7313_s24 + $0x60] sm:$0xff] %v3210_v34  ;;  %v3375_v18 = vadd.f32 %v3847_v4, %v7290_v20  ;;  %v3369_v58 = vpop.f32.mrb[13].mxu1 }
 0x4a3   : > { %v3370_v41 = vadd.f32 %v7290_v20, %v3369_v58 }
 0x4a4   : > { %3513 = vst [vmem:[%s7313_s24 + $0x168] sm:$0xff] %v3375_v18 }
 0x4a5   : > { %3512 = vst [vmem:[%s7313_s24 + $0x160] sm:$0xff] %v3370_v41 }
 0x4b2   : > { %v3802_v61 = vpop.f32.mrb[14].mxu0 }
 0x4b3   : > { %v3225_v43 = vadd.f32 %v3802_v61, %v7290_v20  ;;  %v3219_v1 = vpop.f32.mrb[15].mxu0 }
 0x4b4   : > { %v3220_v46 = vadd.f32 %v7290_v20, %v3219_v1 }
 0x4b5   : > { %3483 = vst [vmem:[%s7313_s24 + $0x78] sm:$0xff] %v3225_v43  ;;  %v3850_v13 = vpop.f32.mrb[14].mxu1 }
 0x4b6   : > { %3482 = vst [vmem:[%s7313_s24 + $0x70] sm:$0xff] %v3220_v46  ;;  %v3385_v57 = vadd.f32 %v3850_v13, %v7290_v20  ;;  %v3379_v10 = vpop.f32.mrb[15].mxu1 }
 0x4b7   : > { %v3380_v31 = vadd.f32 %v7290_v20, %v3379_v10 }
 0x4b8   : > { %3515 = vst [vmem:[%s7313_s24 + $0x178] sm:$0xff] %v3385_v57 }
 0x4b9   : > { %3514 = vst [vmem:[%s7313_s24 + $0x170] sm:$0xff] %v3380_v31 }
 0x4c6   : > { %v3805_v28 = vpop.f32.mrb[16].mxu0 }
 0x4c7   : > { %v3235_v11 = vadd.f32 %v3805_v28, %v7290_v20  ;;  %v3229_v21 = vpop.f32.mrb[17].mxu0 }
 0x4c8   : > { %v3230_v52 = vadd.f32 %v7290_v20, %v3229_v21 }
 0x4c9   : > { %3485 = vst [vmem:[%s7313_s24 + $0x88] sm:$0xff] %v3235_v11  ;;  %v3853_v23 = vpop.f32.mrb[16].mxu1 }
 0x4ca   : > { %3484 = vst [vmem:[%s7313_s24 + $0x80] sm:$0xff] %v3230_v52  ;;  %v3395_v8 = vadd.f32 %v3853_v23, %v7290_v20  ;;  %v3389_v62 = vpop.f32.mrb[17].mxu1 }
 0x4cb   : > { %v3390_v30 = vadd.f32 %v7290_v20, %v3389_v62 }
 0x4cc   : > { %3517 = vst [vmem:[%s7313_s24 + $0x188] sm:$0xff] %v3395_v8 }
 0x4cd   : > { %3516 = vst [vmem:[%s7313_s24 + $0x180] sm:$0xff] %v3390_v30 }
 0x4da   : > { %v3808_v17 = vpop.f32.mrb[18].mxu0 }
 0x4db   : > { %v3245_v50 = vadd.f32 %v3808_v17, %v7290_v20  ;;  %v3239_v60 = vpop.f32.mrb[19].mxu0 }
 0x4dc   : > { %v3240_v12 = vadd.f32 %v7290_v20, %v3239_v60 }
 0x4dd   : > { %3487 = vst [vmem:[%s7313_s24 + $0x98] sm:$0xff] %v3245_v50  ;;  %v3856_v32 = vpop.f32.mrb[18].mxu1 }
 0x4de   : > { %3486 = vst [vmem:[%s7313_s24 + $0x90] sm:$0xff] %v3240_v12  ;;  %v3405_v39 = vadd.f32 %v3856_v32, %v7290_v20  ;;  %v3399_v5 = vpop.f32.mrb[19].mxu1 }
 0x4df   : > { %v3400_v53 = vadd.f32 %v7290_v20, %v3399_v5 }
 0x4e0   : > { %3519 = vst [vmem:[%s7313_s24 + $0x198] sm:$0xff] %v3405_v39 }
 0x4e1   : > { %3518 = vst [vmem:[%s7313_s24 + $0x190] sm:$0xff] %v3400_v53 }
 0x4ee   : > { %v3811_v15 = vpop.f32.mrb[20].mxu0 }
 0x4ef   : > { %v3255_v14 = vadd.f32 %v3811_v15, %v7290_v20  ;;  %v3249_v33 = vpop.f32.mrb[21].mxu0 }
 0x4f0   : > { %v3250_v55 = vadd.f32 %v7290_v20, %v3249_v33 }
 0x4f1   : > { %3489 = vst [vmem:[%s7313_s24 + $0xa8] sm:$0xff] %v3255_v14  ;;  %v3859_v3 = vpop.f32.mrb[20].mxu1 }
 0x4f2   : > { %3488 = vst [vmem:[%s7313_s24 + $0xa0] sm:$0xff] %v3250_v55  ;;  %v3415_v40 = vadd.f32 %v3859_v3, %v7290_v20  ;;  %v3409_v36 = vpop.f32.mrb[21].mxu1 }
 0x4f3   : > { %v3410_v0 = vadd.f32 %v7290_v20, %v3409_v36 }
 0x4f4   : > { %3521 = vst [vmem:[%s7313_s24 + $0x1a8] sm:$0xff] %v3415_v40 }
 0x4f5   : > { %3520 = vst [vmem:[%s7313_s24 + $0x1a0] sm:$0xff] %v3410_v0 }
 0x505   : > { %v3814_v42 = vpop.f32.mrb[22].mxu0 }
 0x506   : > { %v3265_v51 = vadd.f32 %v3814_v42, %v7290_v20  ;;  %v3862_v27 = vpop.f32.mrb[22].mxu1  ;;  %v3259_v49 = vpop.f32.mrb[23].mxu0 }
 0x507   : > { %v3425_v63 = vadd.f32 %v3862_v27, %v7290_v20  ;;  %v3260_v59 = vadd.f32 %v7290_v20, %v3259_v49  ;;  %v3419_v16 = vpop.f32.mrb[23].mxu1 }
 0x508   : > { %3491 = vst [vmem:[%s7313_s24 + $0xb8] sm:$0xff] %v3265_v51  ;;  %v3420_v19 = vadd.f32 %v7290_v20, %v3419_v16 }
 0x509   : > { %3523 = vst [vmem:[%s7313_s24 + $0x1b8] sm:$0xff] %v3425_v63  ;;  %3490 = vst [vmem:[%s7313_s24 + $0xb0] sm:$0xff] %v3260_v59 }
 0x50a   : > { %3522 = vst [vmem:[%s7313_s24 + $0x1b0] sm:$0xff] %v3420_v19 }
 0x51d   : > { %v3817_v25 = vpop.f32.mrb[24].mxu0 }
 0x51e   : > { %v3275_v29 = vadd.f32 %v3817_v25, %v7290_v20  ;;  %v3865_v2 = vpop.f32.mrb[24].mxu1  ;;  %v3269_v48 = vpop.f32.mrb[25].mxu0 }
 0x51f   : > { %v3435_v24 = vadd.f32 %v3865_v2, %v7290_v20  ;;  %v3270_v26 = vadd.f32 %v7290_v20, %v3269_v48  ;;  %v3429_v9 = vpop.f32.mrb[25].mxu1 }
 0x520   : > { %3493 = vst [vmem:[%s7313_s24 + $0xc8] sm:$0xff] %v3275_v29  ;;  %v3430_v35 = vadd.f32 %v7290_v20, %v3429_v9 }
 0x521   : > { %3525 = vst [vmem:[%s7313_s24 + $0x1c8] sm:$0xff] %v3435_v24  ;;  %3492 = vst [vmem:[%s7313_s24 + $0xc0] sm:$0xff] %v3270_v26 }
 0x522   : > { %3524 = vst [vmem:[%s7313_s24 + $0x1c0] sm:$0xff] %v3430_v35 }
 0x535   : > { %v3820_v44 = vpop.f32.mrb[26].mxu0 }
 0x536   : > { %v3285_v7 = vadd.f32 %v3820_v44, %v7290_v20  ;;  %v3868_v56 = vpop.f32.mrb[26].mxu1  ;;  %v3279_v45 = vpop.f32.mrb[27].mxu0 }
 0x537   : > { %v3445_v22 = vadd.f32 %v3868_v56, %v7290_v20  ;;  %v3280_v38 = vadd.f32 %v7290_v20, %v3279_v45  ;;  %v3439_v47 = vpop.f32.mrb[27].mxu1 }
 0x538   : > { %3495 = vst [vmem:[%s7313_s24 + $0xd8] sm:$0xff] %v3285_v7  ;;  %v3440_v6 = vadd.f32 %v7290_v20, %v3439_v47 }
 0x539   : > { %3527 = vst [vmem:[%s7313_s24 + $0x1d8] sm:$0xff] %v3445_v22  ;;  %3494 = vst [vmem:[%s7313_s24 + $0xd0] sm:$0xff] %v3280_v38 }
 0x53a   : > { %3526 = vst [vmem:[%s7313_s24 + $0x1d0] sm:$0xff] %v3440_v6 }
 0x54d   : > { %v3823_v37 = vpop.f32.mrb[28].mxu0 }
 0x54e   : > { %v3295_v54 = vadd.f32 %v3823_v37, %v7290_v20  ;;  %v3871_v34 = vpop.f32.mrb[28].mxu1  ;;  %v3289_v4 = vpop.f32.mrb[29].mxu0 }
 0x54f   : > { %v3455_v18 = vadd.f32 %v3871_v34, %v7290_v20  ;;  %v3290_v58 = vadd.f32 %v7290_v20, %v3289_v4  ;;  %v3449_v41 = vpop.f32.mrb[29].mxu1 }
 0x550   : > { %3497 = vst [vmem:[%s7313_s24 + $0xe8] sm:$0xff] %v3295_v54  ;;  %v3450_v61 = vadd.f32 %v7290_v20, %v3449_v41 }
 0x551   : > { %3529 = vst [vmem:[%s7313_s24 + $0x1e8] sm:$0xff] %v3455_v18  ;;  %3496 = vst [vmem:[%s7313_s24 + $0xe0] sm:$0xff] %v3290_v58 }
 0x552   : > { %3528 = vst [vmem:[%s7313_s24 + $0x1e0] sm:$0xff] %v3450_v61 }
 0x565   : > { %v3826_v43 = vpop.f32.mrb[30].mxu0 }
 0x566   : > { %v3305_v1 = vadd.f32 %v3826_v43, %v7290_v20  ;;  %v3874_v46 = vpop.f32.mrb[30].mxu1  ;;  %v3299_v13 = vpop.f32.mrb[31].mxu0 }
 0x567   : > { %v3465_v57 = vadd.f32 %v3874_v46, %v7290_v20  ;;  %v3300_v10 = vadd.f32 %v7290_v20, %v3299_v13  ;;  %v3459_v31 = vpop.f32.mrb[31].mxu1 }
 0x568   : > { %3499 = vst [vmem:[%s7313_s24 + $0xf8] sm:$0xff] %v3305_v1  ;;  %v3460_v28 = vadd.f32 %v7290_v20, %v3459_v31 }
 0x569   : > { %3531 = vst [vmem:[%s7313_s24 + $0x1f8] sm:$0xff] %v3465_v57  ;;  %3498 = vst [vmem:[%s7313_s24 + $0xf0] sm:$0xff] %v3300_v10 }
 0x56a   : > { %3530 = vst [vmem:[%s7313_s24 + $0x1f0] sm:$0xff] %v3460_v28 }
 0x56b   : > { %3962 = shalt.err (!%p3959_p3)
}
 0x56c   : > { %s3963_s9 = scalar_lea.hbm %s7723_s30, 8192  ;;  %s3967_s7 = scalar_lea.hbm %s7779_s3, 16384 }
 0x56d   : > { %p3964_p4 = scmp.ne.s32.totalorder %s7723_s30, %s3963_s9  ;;  %p3968_p9 = scmp.lt.u32.totalorder %s7723_s30, %s7779_s3 }
 0x56e   : > { %p3969_p10 = scmp.lt.u32.totalorder %s3967_s7, %s3963_s9  ;;  %p3971_p12 = scmp.lt.u32.totalorder %s3963_s9, %s7723_s30 }
 0x56f   : > { %p3965_p7 = pnand %p3964_p4, %p4081_p5 }
 0x570   : > { %p3970_p11 = por %p3969_p10, %p3968_p9 }
 0x571   : > { %p3966_p8 = pneg %p3965_p7 }
 0x572   : > { %p3972_p13 = por %p3971_p12, %p3970_p11 }
 0x574   : > { %p3973_p0 = pnand %p3972_p13, %p3966_p8 }
 0x576   : > { %3976 = shalt.err (!%p3973_p0)
}
 0x577   : > { %s4022_s20 = smov 128  }
 0x578   : > { %3901 = dma.vmem_to_hbm [thread:$0]  (%p4081_p5), %s7727_s26, 8192, %s7723_s30, %s7734_s16, %s4022_s20, %s4022_s20, %s4013_s29  }
 0x579 PF: > { %p3907_p1 = scmp.ge.s32.totalorder %s4011_s15, 2  ;;  %s3561_s24 = sand.u32 1, %s3999_s12  }
 0x57a   : > { %s3562_s25 = scalar_lea.sflag [#allocation3], %s3561_s24 }
 0x57b   : > { %p3904_p2 = pnand %p3907_p1, %p4085_p6 }
 0x57d   : > { %3994 = dma.done.wait (!%p3904_p2), %s3562_s25, 8192  }
 0x57e   : > { %3996 = vsyncadd (!%p3904_p2), %s3562_s25, 4294959104  ;;  %p13_p3 = scmp.ge.s32.totalorder %s4068_s18, 4   ;;  %s9258_s12 = smov %s4003_s13 }
 0x57f   : > { %s9259_s13 = smov %s4007_s14  ;;  %s9260_s14 = smov %s4079_s21 }
 0x580   : > { %s9261_s15 = smov %s4068_s18  ;;  %15 = sbr.rel (!%p13_p3) target bundleno = 3 (0x3), region = 67 }
 0x587   :  { %3567 = vsyncpa [#allocation3], 1 }
 0x588   :  { %3569 = vsyncpa [#allocation3 + $0x1], 1 }

// kernel: tpu_custom_call.1
= control target key start
LH: loop header
LB: loop body
LE: loop exit
PB: predicated region body
PF: predicated region fallthrough
CT: control target
= control target key end

     0   :  { %8 = vsyncpa [#allocation3], 0  ;;  %s10617_s0 = inlined_call_operand.vmem [shape: f32[4,18,18,8], index: 0, kind: input, shape index: {}]   ;;  %s10618_s1 = inlined_call_operand.vmem [shape: f32[9,8,128], index: 1, kind: input, shape index: {}]   ;;  %s10619_s2 = inlined_call_operand.vmem [shape: f32[1,128], index: 2, kind: input, shape index: {}]   ;;  %s10620_s3 = inlined_call_operand.hbm [shape: f32[1024,128], index: 3, kind: output, shape index: {}]  }
   0x1   :  { %10 = vsyncpa [#allocation3 + $0x1], 0  ;;  %s8104_s12 = smov 0   ;;  %s8106_s13 = smov 0  }
   0x2   :  { %s8108_s14 = smov 0   ;;  %s8110_s15 = smov 0  }
   0x3 LB: > { %s8125_s16 = sadd.s32 4294967295, %s8079_s15   ;;  %s5327_s17 = sadd.s32 4294967294, %s8079_s15   ;;  %s8079_s15 = sphi %s8110_s15, %s11255_s15   ;;  %s8075_s14 = sphi %s8108_s14, %s11254_s14   ;;  %s8071_s13 = sphi %s8106_s13, %s11253_s13   ;;  %s8067_s12 = sphi %s8104_s12, %s11252_s12  }
   0x4   : > { %s8129_s18 = sadd.s32 1, %s8079_s15   ;;  %s91_s19 = sadd.s32 1, %s8075_s14 }
   0x5   : > { %s88_s20 = ssub.s32 %s8079_s15, %s8129_s18  ;;  %p101_p0 = scmp.ne.s32.totalorder %s8075_s14, %s8071_s13 }
   0x6   : > { %p89_p1 = scmp.eq.s32.totalorder %s88_s20, 0  ;;  %p102_p2 = scmp.eq.s32.totalorder %s8125_s16, 1 }
   0x7   : > { %p107_p3 = scmp.ne.s32.totalorder %s8071_s13, %s8067_s12  ;;  %p108_p4 = scmp.eq.s32.totalorder %s5327_s17, 1 }
   0x8   : > { %s8140_s21 = scalar_select %p89_p1, %s8075_s14, %s91_s19  }
   0x9   : > { %p8142_p5 = por %p102_p2, %p101_p0  ;;  %p8146_p6 = por %p108_p4, %p107_p3 }
   0xa   : > { %p5330_p7 = scmp.ge.s32.totalorder %s8079_s15, 1  ;;  %p142_p8 = scmp.lt.s32.totalorder %s8079_s15, 3 }
   0xc   : > { %p143_p9 = pnand %p5330_p7, %p142_p8 }
   0xe   : > { %146 = sbr.rel (%p143_p9) target bundleno = 838 (0x346), region = 32 }
  0x15   : > { %v5334_v0 = vld [vmem:[%s10618_s1 + $0x8] sm:$0xff]  ;;  %v5593_v1 = vld [vmem:[%s10618_s1 + $0x20] sm:$0xff]  ;;  %s5332_s28 = sshll.u32 %s8125_s16, 1  ;;  %vm380_vm0 = vcmask 1046528   ;;  %vm543_vm1 = vcmask 64512   ;;  %v8230_v33 = vld [vmem:[%s10618_s1 + $0x30] sm:$0xff] }
  0x16   : > { %v283_v2 = vld [vmem:[%s10618_s1] sm:$0xff]  ;;  %6510 = vmatprep.subr.mxu1 %v5334_v0  ;;  %6902 = vmatprep.subr.mxu0 %v5593_v1  ;;  %p168_p10 = scmp.lt.s32.totalorder %s5332_s28, 3  ;;  %v5658_v3 = vld [vmem:[%s10618_s1 + $0x28] sm:$0xff]  ;;  %vm1570_vm2 = vcmask 1045504   ;;  %s164_s4 = sand.u32 1, %s8071_s13  }
  0x17   : > { %6511 = vmatpush3.msra.mxu1 %v5334_v0  ;;  %6903 = vmatpush3.msra.mxu0 %v5593_v1  ;;  %s5331_s5 = sshll.u32 %s164_s4, 9  ;;  %s8081_s24 = smov [#allocation2]  }
  0x18   : > { %s11257_s28 = smov (!%p168_p10, %s5332_s28), 3  ;;  %6608 = vmatprep.subr.mxu1 %v283_v2  ;;  %7000 = vmatprep.subr.mxu0 %v5658_v3  ;;  %s10415_s8 = scalar_lea.vmem [#allocation2], %s5331_s5 }
  0x19   : > { %s7906_s6 = smul.u32 432, %s11257_s28  ;;  %s5265_s10 = sshll.u32 %s10415_s8, 4  ;;  %s10569_s10 = int_to_ptr.vmem [resolvable:$true] %s5265_s10 }
  0x1a   : > { %s8017_s20 = scalar_lea.vmem %s10569_s10, 8192  ;;  %s8021_s25 = sshll.u32 %s8081_s24, 4  ;;  %s8022_s25 = int_to_ptr.vmem [resolvable:$false] %s8021_s25 }
  0x1b   : > { %s8168_s9 = scalar_lea.vmem %s10617_s0, %s7906_s6  ;;  %p8018_p11 = scmp.ne.s32.totalorder %s10569_s10, %s8017_s20 }
  0x1c   : > { %v8171_v4 = vld [vmem:[%s8168_s9] sm:$0xff]  ;;  %v8174_v5 = vld [vmem:[%s8168_s9 + $0x8] sm:$0xff]  ;;  %v8177_v6 = vld [vmem:[%s8168_s9 + $0x18] sm:$0xff]  ;;  %s8023_s26 = scalar_lea.vmem %s8022_s25, 16384  ;;  %p8024_p0 = scmp.lt.s32.totalorder %s10569_s10, %s8022_s25 }
  0x1d   : > { %10867 = vst [vmem:[#allocation5_spill] sm:$0xff] %v8171_v4  ;;  %10868 = vst [vmem:[#allocation6_spill] sm:$0xff] %v8174_v5  ;;  %v381_v7 = vrot.slane %v8171_v4, 1  ;;  %v382_v8 = vrot.slane %v8174_v5, 1  ;;  %v8182_v9 = vld [vmem:[%s8168_s9 + $0x20] sm:$0xff]  ;;  %v386_v10 = vrot.slane %v8177_v6, 1  ;;  %p8019_p12 = pnand %p8018_p11, %p8142_p5  ;;  %p8025_p1 = scmp.lt.s32.totalorder %s8023_s26, %s8017_s20 }
  0x1e   : > { %10869 = vst [vmem:[#allocation7_spill] sm:$0xff] %v8182_v9  ;;  %v177_v11 = vld [vmem:[%s8168_s9 + $0x10] sm:$0x3]  ;;  %v387_v12 = vrot.slane %v8182_v9, 1  ;;  %v8188_v14 = vld [vmem:[%s8168_s9 + $0x28] sm:$0x3] }
  0x1f   : > { %v384_v13 = vrot.slane %v177_v11, 1  ;;  %v8191_v15 = vld [vmem:[%s8168_s9 + $0x30] sm:$0xff]  ;;  %v383_v16 = vsel %vm380_vm0, %v381_v7, %v382_v8  ;;  %v389_v17 = vrot.slane %v8188_v14, 1  ;;  %v8196_v18 = vld [vmem:[%s8168_s9 + $0x38] sm:$0xff]  ;;  %v8200_v20 = vld [vmem:[%s8168_s9 + $0x40] sm:$0x3]  ;;  %p8020_p13 = pneg %p8019_p12  ;;  %p8026_p2 = por %p8025_p1, %p8024_p0 }
  0x20   : > { %10870 = vst [vmem:[#allocation8_spill] sm:$0xff] %v8191_v15  ;;  %10871 = vst [vmem:[#allocation9_spill] sm:$0xff] %v8196_v18  ;;  %v391_v19 = vrot.slane %v8191_v15, 1  ;;  %6512 = vmatprep.mubr.msk.f32.mxu1 %vm543_vm1, %v383_v16  ;;  %v388_v21 = vsel %vm380_vm0, %v386_v10, %v387_v12  ;;  %v392_v23 = vrot.slane %v8196_v18, 1  ;;  %v394_v24 = vrot.slane %v8200_v20, 1  ;;  %v8208_v25 = vld [vmem:[%s8168_s9 + $0x48] sm:$0xff] }
  0x21   : > { %v385_v22 = vsel %vm380_vm0, %v382_v8, %v384_v13  ;;  %v8211_v26 = vld [vmem:[%s8168_s9 + $0x50] sm:$0xff]  ;;  %v8214_v27 = vld [vmem:[%s8168_s9 + $0x58] sm:$0x3]  ;;  %6904 = vmatprep.mubr.msk.f32.mxu0 %vm543_vm1, %v388_v21  ;;  %v390_v28 = vsel %vm380_vm0, %v387_v12, %v389_v17  ;;  %v396_v29 = vrot.slane %v8208_v25, 1  ;;  %v8222_v31 = vld [vmem:[%s8168_s9 + $0x60] sm:$0xff]  ;;  %p8027_p3 = pnand %p8026_p2, %p8020_p13 }
  0x22   : > { %10872 = vst [vmem:[#allocation10_spill] sm:$0xff] %v8211_v26  ;;  %6513 = vmatmul.mubr.msk.f32.vlgmr.msra.gmra.mrb[0].mxu1 %vm543_vm1, %v385_v22  ;;  %v397_v30 = vrot.slane %v8211_v26, 1  ;;  %10873 = vst [vmem:[#allocation11_spill] sm:$0xff] %v8222_v31  ;;  %v8225_v32 = vld [vmem:[%s8168_s9 + $0x68] sm:$0xff]  ;;  %6905 = vmatmul.mubr.msk.f32.vlgmr.msra.gmra.mrb[0].mxu0 %vm543_vm1, %v390_v28  ;;  %v8234_v34 = vsel %vm380_vm0, %v391_v19, %v392_v23  ;;  %v8238_v35 = vsel %vm380_vm0, %v392_v23, %v394_v24  ;;  %v8249_v40 = vld [vmem:[%s8168_s9 + $0x70] sm:$0x3] }
  0x23   : > { %10874 = vst [vmem:[#allocation12_spill] sm:$0xff] %v8225_v32  ;;  %6609 = vmatpush3.msra.mxu1 %v283_v2  ;;  %10875 = vst [vmem:[#allocation13_spill] sm:$0xff] %v8234_v34  ;;  %7001 = vmatpush3.msra.mxu0 %v5658_v3  ;;  %v399_v36 = vrot.slane %v8214_v27, 1  ;;  %v401_v38 = vrot.slane %v8222_v31, 1  ;;  %v402_v39 = vrot.slane %v8225_v32, 1  ;;  %v8254_v41 = vld [vmem:[%s8168_s9 + $0x78] sm:$0xff] }
  0x24   : > { %6515 = vmatprep.mubr.msk.f32.mxu1 %vm543_vm1, %v388_v21  ;;  %10876 = vst [vmem:[#allocation14_spill] sm:$0xff] %v8238_v35  ;;  %6907 = vmatprep.mubr.msk.f32.mxu0 %vm543_vm1, %v8234_v34  ;;  %v8244_v37 = vsel %vm380_vm0, %v396_v29, %v397_v30  ;;  %10878 = vst [vmem:[#allocation16_spill] sm:$0xff] %v8254_v41  ;;  %v8257_v42 = vld [vmem:[%s8168_s9 + $0x80] sm:$0xff]  ;;  %v404_v44 = vrot.slane %v8249_v40, 1  ;;  %v406_v46 = vrot.slane %v8254_v41, 1  ;;  %v8280_v49 = vld [vmem:[%s8168_s9 + $0x90] sm:$0xff] }
  0x25   : > { %10877 = vst [vmem:[#allocation15_spill] sm:$0xff] %v8244_v37  ;;  %7098 = vmatprep.subr.mxu0 %v8230_v33  ;;  %10879 = vst [vmem:[#allocation17_spill] sm:$0xff] %v8257_v42  ;;  %v8266_v43 = vsel %vm380_vm0, %v397_v30, %v399_v36  ;;  %v8270_v45 = vsel %vm380_vm0, %v401_v38, %v402_v39  ;;  %v407_v47 = vrot.slane %v8257_v42, 1  ;;  %v8275_v48 = vld [vmem:[%s8168_s9 + $0x88] sm:$0x3]  ;;  %v8283_v50 = vld [vmem:[%s8168_s9 + $0x98] sm:$0xff] }
  0x26   : > { %6516 = vmatmul.mubr.msk.f32.gmra.mrb[2].mxu1 %vm543_vm1, %v390_v28  ;;  %6908 = vmatmul.mubr.msk.f32.gmra.mrb[2].mxu0 %vm543_vm1, %v8238_v35  ;;  %10880 = vst [vmem:[#allocation18_spill] sm:$0xff] %v8266_v43  ;;  %10881 = vst [vmem:[#allocation19_spill] sm:$0xff] %v8270_v45  ;;  %v8292_v51 = vsel %vm380_vm0, %v402_v39, %v404_v44  ;;  %v409_v52 = vrot.slane %v8275_v48, 1  ;;  %v411_v54 = vrot.slane %v8280_v49, 1  ;;  %v412_v55 = vrot.slane %v8283_v50, 1  ;;  %v8306_v57 = vld [vmem:[%s8168_s9 + $0xa8] sm:$0xff] }
  0x27   : > { %6518 = vmatprep.mubr.msk.f32.mxu1 %vm543_vm1, %v8234_v34  ;;  %6910 = vmatprep.mubr.msk.f32.mxu0 %vm543_vm1, %v8244_v37  ;;  %10882 = vst [vmem:[#allocation20_spill] sm:$0xff] %v8280_v49  ;;  %10883 = vst [vmem:[#allocation21_spill] sm:$0xff] %v8283_v50  ;;  %v8296_v53 = vsel %vm380_vm0, %v406_v46, %v407_v47  ;;  %v8301_v56 = vld [vmem:[%s8168_s9 + $0xa0] sm:$0x3]  ;;  %v8309_v58 = vld [vmem:[%s8168_s9 + $0xb0] sm:$0xff]  ;;  %v416_v62 = vrot.slane %v8306_v57, 1 }
  0x28   : > { %10884 = vst [vmem:[#allocation22_spill] sm:$0xff] %v8292_v51  ;;  %10885 = vst [vmem:[#allocation23_spill] sm:$0xff] %v8296_v53  ;;  %v8318_v59 = vsel %vm380_vm0, %v407_v47, %v409_v52  ;;  %v414_v60 = vrot.slane %v8301_v56, 1  ;;  %v8322_v61 = vsel %vm380_vm0, %v411_v54, %v412_v55  ;;  %v417_v63 = vrot.slane %v8309_v58, 1  ;;  %v8327_v0 = vld [vmem:[%s8168_s9 + $0xb8] sm:$0x3] }
  0x29   : > { %10886 = vst [vmem:[#allocation24_spill] sm:$0xff] %v8306_v57  ;;  %10887 = vst [vmem:[#allocation25_spill] sm:$0xff] %v8309_v58  ;;  %v8332_v1 = vld [vmem:[%s8168_s9 + $0xc0] sm:$0xff]  ;;  %v8335_v2 = vld [vmem:[%s8168_s9 + $0xc8] sm:$0xff]  ;;  %v419_v7 = vrot.slane %v8327_v0, 1 }
  0x2a   : > { %6519 = vmatmul.mubr.msk.f32.gmra.mrb[4].mxu1 %vm543_vm1, %v8238_v35  ;;  %6911 = vmatmul.mubr.msk.f32.gmra.mrb[4].mxu0 %vm543_vm1, %v8266_v43  ;;  %10888 = vst [vmem:[#allocation26_spill] sm:$0xff] %v8318_v59  ;;  %10889 = vst [vmem:[#allocation27_spill] sm:$0xff] %v8322_v61  ;;  %v8344_v3 = vsel %vm380_vm0, %v412_v55, %v414_v60  ;;  %v8348_v8 = vsel %vm380_vm0, %v416_v62, %v417_v63  ;;  %v421_v10 = vrot.slane %v8332_v1, 1  ;;  %v8353_v12 = vld [vmem:[%s8168_s9 + $0xd0] sm:$0x3]  ;;  %v8358_v13 = vld [vmem:[%s8168_s9 + $0xd8] sm:$0xff] }
  0x2b   : > { %6521 = vmatprep.mubr.msk.f32.mxu1 %vm543_vm1, %v8244_v37  ;;  %6913 = vmatprep.mubr.msk.f32.mxu0 %vm543_vm1, %v8270_v45  ;;  %10890 = vst [vmem:[#allocation28_spill] sm:$0xff] %v8332_v1  ;;  %10891 = vst [vmem:[#allocation29_spill] sm:$0xff] %v8335_v2  ;;  %v422_v11 = vrot.slane %v8335_v2, 1  ;;  %v8361_v16 = vld [vmem:[%s8168_s9 + $0xe0] sm:$0xff]  ;;  %v8370_v17 = vsel %vm380_vm0, %v417_v63, %v419_v7  ;;  %v424_v19 = vrot.slane %v8353_v12, 1  ;;  %v426_v22 = vrot.slane %v8358_v13, 1 }
  0x2c   : > { %10892 = vst [vmem:[#allocation30_spill] sm:$0xff] %v8344_v3  ;;  %10893 = vst [vmem:[#allocation31_spill] sm:$0xff] %v8348_v8  ;;  %v427_v23 = vrot.slane %v8361_v16, 1  ;;  %v8379_v24 = vld [vmem:[%s8168_s9 + $0xe8] sm:$0x3]  ;;  %v8384_v28 = vld [vmem:[%s8168_s9 + $0xf0] sm:$0xff] }
  0x2d   : > { %10894 = vst [vmem:[#allocation32_spill] sm:$0xff] %v8358_v13  ;;  %10895 = vst [vmem:[#allocation33_spill] sm:$0xff] %v8361_v16  ;;  %v8374_v21 = vsel %vm380_vm0, %v421_v10, %v422_v11  ;;  %v8387_v29 = vld [vmem:[%s8168_s9 + $0xf8] sm:$0xff]  ;;  %v8396_v30 = vsel %vm380_vm0, %v422_v11, %v424_v19  ;;  %v429_v36 = vrot.slane %v8379_v24, 1  ;;  %v431_v39 = vrot.slane %v8384_v28, 1  ;;  %v8410_v47 = vld [vmem:[%s8168_s9 + $0x108] sm:$0xff] }
  0x2e   : > { %6522 = vmatmul.mubr.msk.f32.gmra.mrb[6].mxu1 %vm543_vm1, %v8266_v43  ;;  %6914 = vmatmul.mubr.msk.f32.gmra.mrb[6].mxu0 %vm543_vm1, %v8292_v51  ;;  %10896 = vst [vmem:[#allocation34_spill] sm:$0xff] %v8370_v17  ;;  %10897 = vst [vmem:[#allocation35_spill] sm:$0xff] %v8374_v21  ;;  %v8400_v38 = vsel %vm380_vm0, %v426_v22, %v427_v23  ;;  %v432_v44 = vrot.slane %v8387_v29, 1  ;;  %v8405_v46 = vld [vmem:[%s8168_s9 + $0x100] sm:$0x3]  ;;  %v8413_v52 = vld [vmem:[%s8168_s9 + $0x110] sm:$0xff] }
  0x2f   : > { %6524 = vmatprep.mubr.msk.f32.mxu1 %vm543_vm1, %v8270_v45  ;;  %6916 = vmatprep.mubr.msk.f32.mxu0 %vm543_vm1, %v8296_v53  ;;  %10898 = vst [vmem:[#allocation36_spill] sm:$0xff] %v8384_v28  ;;  %10899 = vst [vmem:[#allocation37_spill] sm:$0xff] %v8387_v29  ;;  %v8422_v54 = vsel %vm380_vm0, %v427_v23, %v429_v36  ;;  %v434_v55 = vrot.slane %v8405_v46, 1  ;;  %v436_v62 = vrot.slane %v8410_v47, 1  ;;  %v437_v63 = vrot.slane %v8413_v52, 1  ;;  %v8436_v10 = vld [vmem:[%s8168_s9 + $0x120] sm:$0xff] }
  0x30   : > { %10900 = vst [vmem:[#allocation38_spill] sm:$0xff] %v8396_v30  ;;  %10901 = vst [vmem:[#allocation39_spill] sm:$0xff] %v8400_v38  ;;  %v8426_v60 = vsel %vm380_vm0, %v431_v39, %v432_v44  ;;  %v8431_v7 = vld [vmem:[%s8168_s9 + $0x118] sm:$0x3]  ;;  %v8439_v11 = vld [vmem:[%s8168_s9 + $0x128] sm:$0xff]  ;;  %v441_v39 = vrot.slane %v8436_v10, 1 }
  0x31   : > { %10902 = vst [vmem:[#allocation40_spill] sm:$0xff] %v8410_v47  ;;  %10903 = vst [vmem:[#allocation41_spill] sm:$0xff] %v8413_v52  ;;  %v8444_v19 = vld [vmem:[%s10618_s1 + $0x10] sm:$0xff]  ;;  %v8453_v22 = vsel %vm380_vm0, %v432_v44, %v434_v55  ;;  %v439_v23 = vrot.slane %v8431_v7, 1  ;;  %v8458_v36 = vsel %vm380_vm0, %v436_v62, %v437_v63  ;;  %v8468_v44 = vld [vmem:[%s8168_s9 + $0x138] sm:$0xff] }
  0x32   : > { %6525 = vmatmul.mubr.msk.f32.gmra.mrb[8].mxu1 %vm543_vm1, %v8292_v51  ;;  %6917 = vmatmul.mubr.msk.f32.gmra.mrb[8].mxu0 %vm543_vm1, %v8318_v59  ;;  %10904 = vst [vmem:[#allocation42_spill] sm:$0xff] %v8422_v54  ;;  %10905 = vst [vmem:[#allocation43_spill] sm:$0xff] %v8426_v60  ;;  %v8471_v55 = vld [vmem:[%s8168_s9 + $0x140] sm:$0xff]  ;;  %v8541_v43 = vld [vmem:[%s8168_s9 + $0x178] sm:$0x3] }
  0x33   : > { %6527 = vmatprep.mubr.msk.f32.mxu1 %vm543_vm1, %v8296_v53  ;;  %6919 = vmatprep.mubr.msk.f32.mxu0 %vm543_vm1, %v8322_v61  ;;  %10906 = vst [vmem:[#allocation44_spill] sm:$0xff] %v8436_v10  ;;  %10907 = vst [vmem:[#allocation45_spill] sm:$0xff] %v8439_v11  ;;  %v8480_v62 = vsel %vm380_vm0, %v437_v63, %v439_v23  ;;  %v8497_v63 = vld [vmem:[%s8168_s9 + $0x158] sm:$0xff]  ;;  %v8515_v53 = vld [vmem:[%s8168_s9 + $0x160] sm:$0x3] }
  0x34   : > { %10908 = vst [vmem:[#allocation46_spill] sm:$0xff] %v8444_v19  ;;  %10909 = vst [vmem:[#allocation47_spill] sm:$0xff] %v8453_v22  ;;  %6706 = vmatprep.subr.mxu1 %v8444_v19  ;;  %v8567_v34 = vld [vmem:[%s8168_s9 + $0x190] sm:$0x3]  ;;  %v8573_v19 = vld [vmem:[%s8168_s9 + $0x1b8] sm:$0xff] }
  0x35   : > { %10910 = vst [vmem:[#allocation48_spill] sm:$0xff] %v8458_v36  ;;  %10911 = vst [vmem:[#allocation49_spill] sm:$0xff] %v8468_v44  ;;  %v462_v5 = vrot.slane %v8573_v19, 1  ;;  %v231_v4 = vld [vmem:[%s8168_s9 + $0x1c0] sm:$0x3] }
  0x36   : > { %6528 = vmatmul.mubr.msk.f32.gmra.mrb[10].mxu1 %vm543_vm1, %v8318_v59  ;;  %6920 = vmatmul.mubr.msk.f32.gmra.mrb[10].mxu0 %vm543_vm1, %v8344_v3  ;;  %10912 = vst [vmem:[#allocation50_spill] sm:$0xff] %v8471_v55  ;;  %10913 = vst [vmem:[#allocation51_spill] sm:$0xff] %v8480_v62  ;;  %v452_v59 = vrot.slane %v8497_v63, 1 }
  0x37   : > { %6530 = vmatprep.mubr.msk.f32.mxu1 %vm543_vm1, %v8322_v61  ;;  %6922 = vmatprep.mubr.msk.f32.mxu0 %vm543_vm1, %v8348_v8  ;;  %10916 = vst [vmem:[#allocation54_spill] sm:$0xff] %v8497_v63  ;;  %10923 = vst [vmem:[#allocation61_spill] sm:$0xff] %v8541_v43 }
  0x38   : > { %10929 = vst [vmem:[#allocation67_spill] sm:$0xff] %v8573_v19 }
  0x3a   : > { %6531 = vmatmul.mubr.msk.f32.gmra.mrb[12].mxu1 %vm543_vm1, %v8344_v3  ;;  %6923 = vmatmul.mubr.msk.f32.gmra.mrb[12].mxu0 %vm543_vm1, %v8370_v17  ;;  %v8489_v3 = vld [vmem:[%s8168_s9 + $0x148] sm:$0x3] }
  0x3b   : > { %6533 = vmatprep.mubr.msk.f32.mxu1 %vm543_vm1, %v8348_v8  ;;  %6925 = vmatprep.mubr.msk.f32.mxu0 %vm543_vm1, %v8374_v21  ;;  %v447_v8 = vrot.slane %v8471_v55, 1 }
  0x3e   : > { %6534 = vmatmul.mubr.msk.f32.gmra.mrb[14].mxu1 %vm543_vm1, %v8370_v17  ;;  %6926 = vmatmul.mubr.msk.f32.gmra.mrb[14].mxu0 %vm543_vm1, %v8396_v30  ;;  %v446_v17 = vrot.slane %v8468_v44, 1 }
  0x3f   : > { %6536 = vmatprep.mubr.msk.f32.mxu1 %vm543_vm1, %v8374_v21  ;;  %6928 = vmatprep.mubr.msk.f32.mxu0 %vm543_vm1, %v8400_v38 }
  0x42   : > { %6537 = vmatmul.mubr.msk.f32.gmra.mrb[16].mxu1 %vm543_vm1, %v8396_v30  ;;  %6929 = vmatmul.mubr.msk.f32.gmra.mrb[16].mxu0 %vm543_vm1, %v8422_v54  ;;  %v442_v30 = vrot.slane %v8439_v11, 1 }
  0x43   : > { %6539 = vmatprep.mubr.msk.f32.mxu1 %vm543_vm1, %v8400_v38  ;;  %6931 = vmatprep.mubr.msk.f32.mxu0 %vm543_vm1, %v8426_v60  ;;  %v8463_v38 = vld [vmem:[%s8168_s9 + $0x130] sm:$0x3] }
  0x44   : > { %v444_v21 = vrot.slane %v8463_v38, 1 }
  0x46   : > { %6540 = vmatmul.mubr.msk.f32.gmra.mrb[18].mxu1 %vm543_vm1, %v8422_v54  ;;  %6932 = vmatmul.mubr.msk.f32.gmra.mrb[18].mxu0 %vm543_vm1, %v8453_v22  ;;  %v8484_v54 = vsel %vm380_vm0, %v441_v39, %v442_v30  ;;  %v8506_v23 = vsel %vm380_vm0, %v442_v30, %v444_v21  ;;  %v449_v39 = vrot.slane %v8489_v3, 1  ;;  %v8523_v21 = vld [vmem:[%s8168_s9 + $0x170] sm:$0xff]  ;;  %v454_v30 = vrot.slane %v8515_v53, 1 }
  0x47   : > { %6542 = vmatprep.mubr.msk.f32.mxu1 %vm543_vm1, %v8426_v60  ;;  %6934 = vmatprep.mubr.msk.f32.mxu0 %vm543_vm1, %v8458_v36  ;;  %10914 = vst [vmem:[#allocation52_spill] sm:$0xff] %v8484_v54  ;;  %v8494_v60 = vld [vmem:[%s8168_s9 + $0x150] sm:$0xff]  ;;  %10917 = vst [vmem:[#allocation55_spill] sm:$0xff] %v8506_v23  ;;  %v457_v45 = vrot.slane %v8523_v21, 1 }
  0x48   : > { %10915 = vst [vmem:[#allocation53_spill] sm:$0xff] %v8494_v60  ;;  %v451_v61 = vrot.slane %v8494_v60, 1  ;;  %10920 = vst [vmem:[#allocation58_spill] sm:$0xff] %v8523_v21 }
  0x4a   : > { %6543 = vmatmul.mubr.msk.f32.gmra.mrb[20].mxu1 %vm543_vm1, %v8453_v22  ;;  %6935 = vmatmul.mubr.msk.f32.gmra.mrb[20].mxu0 %vm543_vm1, %v8480_v62  ;;  %v8510_v22 = vsel %vm380_vm0, %v446_v17, %v447_v8  ;;  %v8532_v17 = vsel %vm380_vm0, %v447_v8, %v449_v39  ;;  %v8549_v8 = vld [vmem:[%s8168_s9 + $0x188] sm:$0xff]  ;;  %v459_v39 = vrot.slane %v8541_v43, 1  ;;  %v8599_v43 = vld [vmem:[%s8168_s9 + $0x1d0] sm:$0xff] }
  0x4b   : > { %6545 = vmatprep.mubr.msk.f32.mxu1 %vm543_vm1, %v8458_v36  ;;  %6937 = vmatprep.mubr.msk.f32.mxu0 %vm543_vm1, %v8484_v54  ;;  %10918 = vst [vmem:[#allocation56_spill] sm:$0xff] %v8510_v22  ;;  %v8520_v36 = vld [vmem:[%s8168_s9 + $0x168] sm:$0xff]  ;;  %10921 = vst [vmem:[#allocation59_spill] sm:$0xff] %v8532_v17  ;;  %v2776_v35 = vrot.slane %v8549_v8, 1 }
  0x4c   : > { %10919 = vst [vmem:[#allocation57_spill] sm:$0xff] %v8520_v36  ;;  %v456_v51 = vrot.slane %v8520_v36, 1  ;;  %10925 = vst [vmem:[#allocation63_spill] sm:$0xff] %v8549_v8  ;;  %v1576_v8 = vrot.slane %v8177_v6, 2 }
  0x4e   : > { %6546 = vmatmul.mubr.msk.f32.gmra.mrb[22].mxu1 %vm543_vm1, %v8480_v62  ;;  %6938 = vmatmul.mubr.msk.f32.gmra.mrb[22].mxu0 %vm543_vm1, %v8506_v23  ;;  %v8536_v62 = vsel %vm380_vm0, %v451_v61, %v452_v59  ;;  %v8558_v61 = vsel %vm380_vm0, %v452_v59, %v454_v30  ;;  %v2778_v59 = vrot.slane %v8567_v34, 1 }
  0x4f   : > { %6548 = vmatprep.mubr.msk.f32.mxu1 %vm543_vm1, %v8484_v54  ;;  %6940 = vmatprep.mubr.msk.f32.mxu0 %vm543_vm1, %v8510_v22  ;;  %10922 = vst [vmem:[#allocation60_spill] sm:$0xff] %v8536_v62  ;;  %v8546_v54 = vld [vmem:[%s8168_s9 + $0x180] sm:$0xff]  ;;  %10926 = vst [vmem:[#allocation64_spill] sm:$0xff] %v8558_v61 }
  0x50   : > { %10924 = vst [vmem:[#allocation62_spill] sm:$0xff] %v8546_v54  ;;  %v2775_v37 = vrot.slane %v8546_v54, 1  ;;  %v8596_v54 = vld [vmem:[%s8168_s9 + $0x1c8] sm:$0xff] }
  0x52   : > { %6549 = vmatmul.mubr.msk.f32.gmra.mrb[24].mxu1 %vm543_vm1, %v8506_v23  ;;  %6941 = vmatmul.mubr.msk.f32.gmra.mrb[24].mxu0 %vm543_vm1, %v8532_v17  ;;  %v8562_v23 = vsel %vm380_vm0, %v456_v51, %v457_v45  ;;  %v8584_v51 = vsel %vm380_vm0, %v457_v45, %v459_v39  ;;  %v1579_v45 = vrot.slane %v8188_v14, 2  ;;  %v8611_v39 = vsel %vm380_vm0, %v2776_v35, %v2778_v59  ;;  %v8617_v14 = vld [vmem:[%s8168_s9 + $0x1d8] sm:$0x3] }
  0x53   : > { %6551 = vmatprep.mubr.msk.f32.mxu1 %vm543_vm1, %v8510_v22  ;;  %6943 = vmatprep.mubr.msk.f32.mxu0 %vm543_vm1, %v8536_v62  ;;  %10927 = vst [vmem:[#allocation65_spill] sm:$0xff] %v8562_v23  ;;  %v8570_v22 = vld [vmem:[%s8168_s9 + $0x1b0] sm:$0xff]  ;;  %10930 = vst [vmem:[#allocation68_spill] sm:$0xff] %v8584_v51  ;;  %v469_v59 = vrot.slane %v8617_v14, 1 }
  0x54   : > { %10928 = vst [vmem:[#allocation66_spill] sm:$0xff] %v8570_v22  ;;  %v461_v30 = vrot.slane %v8570_v22, 1  ;;  %10932 = vst [vmem:[#allocation70_spill] sm:$0xff] %v8611_v39  ;;  %v467_v22 = vrot.slane %v8599_v43, 1 }
  0x56   : > { %6552 = vmatmul.mubr.msk.f32.gmra.mrb[26].mxu1 %vm543_vm1, %v8532_v17  ;;  %6944 = vmatmul.mubr.msk.f32.gmra.mrb[26].mxu0 %vm543_vm1, %v8558_v61  ;;  %v8591_v17 = vsel %vm380_vm0, %v2775_v37, %v2776_v35  ;;  %v464_v37 = vrot.slane %v231_v4, 1  ;;  %v463_v19 = vsel %vm380_vm0, %v461_v30, %v462_v5  ;;  %v1581_v4 = vrot.slane %v8191_v15, 2  ;;  %v8628_v35 = vld [vmem:[%s8168_s9 + $0x1e8] sm:$0xff] }
  0x57   : > { %6554 = vmatprep.mubr.msk.f32.mxu1 %vm543_vm1, %v8536_v62  ;;  %6946 = vmatprep.mubr.msk.f32.mxu0 %vm543_vm1, %v8562_v23  ;;  %10931 = vst [vmem:[#allocation69_spill] sm:$0xff] %v8591_v17  ;;  %v1577_v62 = vrot.slane %v8182_v9, 2  ;;  %v1584_v30 = vrot.slane %v8200_v20, 2  ;;  %v1586_v20 = vrot.slane %v8208_v25, 2 }
  0x59   : > { %v8620_v9 = vsel %vm1570_vm2, %v1576_v8, %v1577_v62  ;;  %v465_v8 = vsel %vm380_vm0, %v462_v5, %v464_v37  ;;  %v1587_v37 = vrot.slane %v8211_v26, 2 }
  0x5a   : > { %6555 = vmatmul.mubr.msk.f32.gmra.mrb[28].mxu1 %vm543_vm1, %v8558_v61  ;;  %6947 = vmatmul.mubr.msk.f32.gmra.mrb[28].mxu0 %vm543_vm1, %v8584_v51  ;;  %v466_v61 = vrot.slane %v8596_v54, 1  ;;  %10933 = vst [vmem:[#allocation71_spill] sm:$0xff] %v8620_v9 }
  0x5b   : > { %6557 = vmatprep.mubr.msk.f32.mxu1 %vm543_vm1, %v8562_v23  ;;  %6949 = vmatprep.mubr.msk.f32.mxu0 %vm543_vm1, %v8591_v17  ;;  %v1582_v23 = vrot.slane %v8196_v18, 2  ;;  %v8625_v17 = vld [vmem:[%s8168_s9 + $0x1e0] sm:$0xff]  ;;  %v8641_v18 = vsel %vm1570_vm2, %v1577_v62, %v1579_v45  ;;  %v8673_v45 = vsel %vm380_vm0, %v467_v22, %v469_v59  ;;  %v8689_v59 = vld [vmem:[%s8168_s9 + $0x208] sm:$0x3] }
  0x5c   : > { %10934 = vst [vmem:[#allocation72_spill] sm:$0xff] %v8641_v18  ;;  %v471_v15 = vrot.slane %v8625_v17, 1  ;;  %v8660_v62 = vld [vmem:[%s8168_s9 + $0x200] sm:$0xff]  ;;  %10938 = vst [vmem:[#allocation76_spill] sm:$0xff] %v8673_v45 }
  0x5d   : > { %v8652_v5 = vsel %vm1570_vm2, %v1581_v4, %v1582_v23  ;;  %v8676_v4 = vsel %vm1570_vm2, %v1582_v23, %v1584_v30  ;;  %v8692_v23 = vsel %vm1570_vm2, %v1586_v20, %v1587_v37  ;;  %v1591_v30 = vrot.slane %v8222_v31, 2  ;;  %v8725_v31 = vld [vmem:[%s8168_s9 + $0x220] sm:$0x3] }
  0x5e   : > { %6558 = vmatmul.mubr.msk.f32.gmra.mrb[30].mxu1 %vm543_vm1, %v8584_v51  ;;  %6950 = vmatmul.mubr.msk.f32.gmra.mrb[30].mxu0 %vm543_vm1, %v8611_v39  ;;  %v8644_v51 = vsel %vm380_vm0, %v466_v61, %v467_v22  ;;  %v472_v39 = vrot.slane %v8628_v35, 1  ;;  %10936 = vst [vmem:[#allocation74_spill] sm:$0xff] %v8652_v5  ;;  %v8666_v61 = vld [vmem:[%s10618_s1 + $0x38] sm:$0xff]  ;;  %10939 = vst [vmem:[#allocation77_spill] sm:$0xff] %v8676_v4  ;;  %v477_v22 = vrot.slane %v8660_v62, 1  ;;  %v479_v20 = vrot.slane %v8689_v59, 1 }
  0x5f   : > { %6560 = vmatprep.mubr.msk.f32.mxu1 %vm543_vm1, %v463_v19  ;;  %7002 = vmatprep.mubr.msk.f32.mxu0 %vm543_vm1, %v8620_v9  ;;  %10935 = vst [vmem:[#allocation73_spill] sm:$0xff] %v8644_v51  ;;  %v8649_v19 = vld [vmem:[%s8168_s9 + $0x1f0] sm:$0x3]  ;;  %v8657_v9 = vld [vmem:[%s8168_s9 + $0x1f8] sm:$0xff]  ;;  %10937 = vst [vmem:[#allocation75_spill] sm:$0xff] %v8666_v61 }
  0x60   : > { %v8683_v26 = vsel %vm380_vm0, %v471_v15, %v472_v39  ;;  %10941 = vst [vmem:[#allocation79_spill] sm:$0xff] %v8692_v23  ;;  %v8700_v15 = vld [vmem:[%s8168_s9 + $0x218] sm:$0xff] }
  0x61   : > { %10940 = vst [vmem:[#allocation78_spill] sm:$0xff] %v8683_v26 }
  0x62   : > { %6561 = vmatmul.mubr.msk.f32.gmra.mrb[32].mxu1 %vm543_vm1, %v465_v8  ;;  %7003 = vmatmul.mubr.msk.f32.vlgmr.msra.gmra.mrb[0].mxu0 %vm543_vm1, %v8641_v18  ;;  %v474_v8 = vrot.slane %v8649_v19, 1  ;;  %v1589_v18 = vrot.slane %v8214_v27, 2 }
  0x63   : > { %6563 = vmatprep.mubr.msk.f32.mxu1 %vm543_vm1, %v8644_v51  ;;  %7099 = vmatpush3.msra.mxu0 %v8230_v33  ;;  %v476_v51 = vrot.slane %v8657_v9, 1  ;;  %v1592_v33 = vrot.slane %v8225_v32, 2  ;;  %v1594_v32 = vrot.slane %v8249_v40, 2  ;;  %v1596_v40 = vrot.slane %v8254_v41, 2  ;;  %v8760_v41 = vld [vmem:[%s8168_s9 + $0x238] sm:$0x3] }
  0x64   : > { %7005 = vmatprep.mubr.msk.f32.mxu0 %vm543_vm1, %v8652_v5  ;;  %v8697_v5 = vld [vmem:[%s8168_s9 + $0x210] sm:$0xff]  ;;  %7196 = vmatprep.subr.mxu0 %v8666_v61  ;;  %v8710_v27 = vsel %vm380_vm0, %v472_v39, %v474_v8  ;;  %v8717_v61 = vsel %vm1570_vm2, %v1587_v37, %v1589_v18  ;;  %v1597_v8 = vrot.slane %v8257_v42, 2  ;;  %v1599_v42 = vrot.slane %v8275_v48, 2 }
  0x65   : > { %10942 = vst [vmem:[#allocation80_spill] sm:$0xff] %v8710_v27  ;;  %10943 = vst [vmem:[#allocation81_spill] sm:$0xff] %v8717_v61  ;;  %v8728_v39 = vsel %vm1570_vm2, %v1591_v30, %v1592_v33  ;;  %v8736_v18 = vld [vmem:[%s8168_s9 + $0x230] sm:$0xff]  ;;  %v8748_v37 = vsel %vm1570_vm2, %v1592_v33, %v1594_v32  ;;  %v484_v30 = vrot.slane %v8725_v31, 1  ;;  %v1601_v32 = vrot.slane %v8280_v49, 2 }
  0x66   : > { %6564 = vmatmul.mubr.msk.f32.gmra.mrb[34].mxu1 %vm543_vm1, %v8673_v45  ;;  %7006 = vmatmul.mubr.msk.f32.gmra.mrb[2].mxu0 %vm543_vm1, %v8676_v4  ;;  %v8720_v45 = vsel %vm380_vm0, %v476_v51, %v477_v22  ;;  %v481_v4 = vrot.slane %v8697_v5, 1  ;;  %10945 = vst [vmem:[#allocation83_spill] sm:$0xff] %v8728_v39  ;;  %v8745_v51 = vsel %vm380_vm0, %v477_v22, %v479_v20  ;;  %10947 = vst [vmem:[#allocation85_spill] sm:$0xff] %v8748_v37  ;;  %v8768_v20 = vld [vmem:[%s8168_s9 + $0x240] sm:$0xff]  ;;  %v8795_v49 = vld [vmem:[%s8168_s9 + $0x250] sm:$0x3] }
  0x67   : > { %6566 = vmatprep.mubr.msk.f32.mxu1 %vm543_vm1, %v8683_v26  ;;  %7008 = vmatprep.mubr.msk.f32.mxu0 %vm543_vm1, %v8692_v23  ;;  %10944 = vst [vmem:[#allocation82_spill] sm:$0xff] %v8720_v45  ;;  %v482_v26 = vrot.slane %v8700_v15, 1  ;;  %v8733_v23 = vld [vmem:[%s8168_s9 + $0x228] sm:$0xff]  ;;  %10946 = vst [vmem:[#allocation84_spill] sm:$0xff] %v8745_v51  ;;  %v8763_v22 = vsel %vm1570_vm2, %v1596_v40, %v1597_v8  ;;  %v1602_v33 = vrot.slane %v8283_v50, 2  ;;  %v489_v40 = vrot.slane %v8760_v41, 1 }
  0x68   : > { %10949 = vst [vmem:[#allocation87_spill] sm:$0xff] %v8763_v22  ;;  %v8787_v50 = vsel %vm1570_vm2, %v1597_v8, %v1599_v42  ;;  %v8806_v42 = vld [vmem:[%s8168_s9 + $0x260] sm:$0xff] }
  0x69   : > { %v8780_v48 = vsel %vm380_vm0, %v482_v26, %v484_v30  ;;  %10951 = vst [vmem:[#allocation89_spill] sm:$0xff] %v8787_v50  ;;  %v1607_v30 = vrot.slane %v8309_v58, 2  ;;  %v1609_v58 = vrot.slane %v8327_v0, 2 }
  0x6a   : > { %6567 = vmatmul.mubr.msk.f32.gmra.mrb[36].mxu1 %vm543_vm1, %v8710_v27  ;;  %7009 = vmatmul.mubr.msk.f32.gmra.mrb[4].mxu0 %vm543_vm1, %v8717_v61  ;;  %v8754_v27 = vsel %vm380_vm0, %v481_v4, %v482_v26  ;;  %v486_v61 = vrot.slane %v8733_v23, 1  ;;  %v8771_v4 = vld [vmem:[%s8168_s9 + $0x248] sm:$0xff]  ;;  %10950 = vst [vmem:[#allocation88_spill] sm:$0xff] %v8780_v48  ;;  %v8798_v26 = vsel %vm1570_vm2, %v1601_v32, %v1602_v33  ;;  %v494_v32 = vrot.slane %v8795_v49, 1 }
  0x6b   : > { %6569 = vmatprep.mubr.msk.f32.mxu1 %vm543_vm1, %v8720_v45  ;;  %7011 = vmatprep.mubr.msk.f32.mxu0 %vm543_vm1, %v8728_v39  ;;  %10948 = vst [vmem:[#allocation86_spill] sm:$0xff] %v8754_v27  ;;  %v487_v45 = vrot.slane %v8736_v18, 1  ;;  %v1604_v39 = vrot.slane %v8301_v56, 2  ;;  %10953 = vst [vmem:[#allocation91_spill] sm:$0xff] %v8798_v26  ;;  %v1606_v56 = vrot.slane %v8306_v57, 2 }
  0x6c   : > { %v8830_v57 = vld [vmem:[%s8168_s9 + $0x268] sm:$0x3] }
  0x6d   : > { %v8818_v8 = vsel %vm1570_vm2, %v1602_v33, %v1604_v39  ;;  %v1611_v39 = vrot.slane %v8332_v1, 2  ;;  %v1612_v33 = vrot.slane %v8335_v2, 2  ;;  %v8857_v2 = vsel %vm1570_vm2, %v1607_v30, %v1609_v58  ;;  %v8865_v1 = vld [vmem:[%s8168_s9 + $0x280] sm:$0x3]  ;;  %v8876_v58 = vld [vmem:[%s8168_s9 + $0x290] sm:$0xff] }
  0x6e   : > { %6570 = vmatmul.mubr.msk.f32.gmra.mrb[38].mxu1 %vm543_vm1, %v8745_v51  ;;  %7012 = vmatmul.mubr.msk.f32.gmra.mrb[6].mxu0 %vm543_vm1, %v8748_v37  ;;  %v8790_v51 = vsel %vm380_vm0, %v486_v61, %v487_v45  ;;  %v491_v37 = vrot.slane %v8768_v20, 1  ;;  %v8815_v61 = vsel %vm380_vm0, %v487_v45, %v489_v40  ;;  %10955 = vst [vmem:[#allocation93_spill] sm:$0xff] %v8818_v8  ;;  %v8838_v40 = vld [vmem:[%s8168_s9 + $0x270] sm:$0xff]  ;;  %10959 = vst [vmem:[#allocation97_spill] sm:$0xff] %v8857_v2 }
  0x6f   : > { %6572 = vmatprep.mubr.msk.f32.mxu1 %vm543_vm1, %v8754_v27  ;;  %7014 = vmatprep.mubr.msk.f32.mxu0 %vm543_vm1, %v8763_v22  ;;  %10952 = vst [vmem:[#allocation90_spill] sm:$0xff] %v8790_v51  ;;  %v492_v27 = vrot.slane %v8771_v4, 1  ;;  %v8803_v22 = vld [vmem:[%s8168_s9 + $0x258] sm:$0xff]  ;;  %10954 = vst [vmem:[#allocation92_spill] sm:$0xff] %v8815_v61  ;;  %v8833_v45 = vsel %vm1570_vm2, %v1606_v56, %v1607_v30  ;;  %v499_v56 = vrot.slane %v8830_v57, 1 }
  0x70   : > { %10957 = vst [vmem:[#allocation95_spill] sm:$0xff] %v8833_v45 }
  0x71   : > { %v8850_v0 = vsel %vm380_vm0, %v492_v27, %v494_v32  ;;  %v1617_v32 = vrot.slane %v8361_v16, 2  ;;  %v1619_v16 = vrot.slane %v8379_v24, 2 }
  0x72   : > { %6573 = vmatmul.mubr.msk.f32.gmra.mrb[40].mxu1 %vm543_vm1, %v8780_v48  ;;  %7015 = vmatmul.mubr.msk.f32.gmra.mrb[8].mxu0 %vm543_vm1, %v8787_v50  ;;  %v8824_v48 = vsel %vm380_vm0, %v491_v37, %v492_v27  ;;  %v496_v50 = vrot.slane %v8803_v22, 1  ;;  %v8841_v37 = vld [vmem:[%s8168_s9 + $0x278] sm:$0xff]  ;;  %10958 = vst [vmem:[#allocation96_spill] sm:$0xff] %v8850_v0  ;;  %v8868_v27 = vsel %vm1570_vm2, %v1611_v39, %v1612_v33  ;;  %v504_v39 = vrot.slane %v8865_v1, 1 }
  0x73   : > { %6575 = vmatprep.mubr.msk.f32.mxu1 %vm543_vm1, %v8790_v51  ;;  %7017 = vmatprep.mubr.msk.f32.mxu0 %vm543_vm1, %v8798_v26  ;;  %10956 = vst [vmem:[#allocation94_spill] sm:$0xff] %v8824_v48  ;;  %v497_v51 = vrot.slane %v8806_v42, 1  ;;  %v1614_v26 = vrot.slane %v8353_v12, 2  ;;  %10961 = vst [vmem:[#allocation99_spill] sm:$0xff] %v8868_v27  ;;  %v1616_v12 = vrot.slane %v8358_v13, 2 }
  0x74   : > { %v8900_v13 = vld [vmem:[%s8168_s9 + $0x298] sm:$0x3] }
  0x75   : > { %v8888_v30 = vsel %vm1570_vm2, %v1612_v33, %v1614_v26  ;;  %v1621_v26 = vrot.slane %v8384_v28, 2  ;;  %v1622_v33 = vrot.slane %v8387_v29, 2  ;;  %v8927_v29 = vsel %vm1570_vm2, %v1617_v32, %v1619_v16  ;;  %v8935_v28 = vld [vmem:[%s8168_s9 + $0x2b0] sm:$0x3]  ;;  %v8946_v16 = vld [vmem:[%s8168_s9 + $0x2c0] sm:$0xff] }
  0x76   : > { %6576 = vmatmul.mubr.msk.f32.gmra.mrb[42].mxu1 %vm543_vm1, %v8815_v61  ;;  %7018 = vmatmul.mubr.msk.f32.gmra.mrb[10].mxu0 %vm543_vm1, %v8818_v8  ;;  %v8860_v61 = vsel %vm380_vm0, %v496_v50, %v497_v51  ;;  %v501_v8 = vrot.slane %v8838_v40, 1  ;;  %v8885_v50 = vsel %vm380_vm0, %v497_v51, %v499_v56  ;;  %10963 = vst [vmem:[#allocation101_spill] sm:$0xff] %v8888_v30  ;;  %v8908_v56 = vld [vmem:[%s8168_s9 + $0x2a0] sm:$0xff]  ;;  %10967 = vst [vmem:[#allocation105_spill] sm:$0xff] %v8927_v29 }
  0x77   : > { %6578 = vmatprep.mubr.msk.f32.mxu1 %vm543_vm1, %v8824_v48  ;;  %7020 = vmatprep.mubr.msk.f32.mxu0 %vm543_vm1, %v8833_v45  ;;  %10960 = vst [vmem:[#allocation98_spill] sm:$0xff] %v8860_v61  ;;  %v502_v48 = vrot.slane %v8841_v37, 1  ;;  %v8873_v45 = vld [vmem:[%s8168_s9 + $0x288] sm:$0xff]  ;;  %10962 = vst [vmem:[#allocation100_spill] sm:$0xff] %v8885_v50  ;;  %v8903_v51 = vsel %vm1570_vm2, %v1616_v12, %v1617_v32  ;;  %v509_v12 = vrot.slane %v8900_v13, 1 }
  0x78   : > { %10965 = vst [vmem:[#allocation103_spill] sm:$0xff] %v8903_v51 }
  0x79   : > { %v8920_v24 = vsel %vm380_vm0, %v502_v48, %v504_v39  ;;  %v1627_v39 = vrot.slane %v8413_v52, 2  ;;  %v1629_v52 = vrot.slane %v8431_v7, 2 }
  0x7a   : > { %6579 = vmatmul.mubr.msk.f32.gmra.mrb[44].mxu1 %vm543_vm1, %v8850_v0  ;;  %7021 = vmatmul.mubr.msk.f32.gmra.mrb[12].mxu0 %vm543_vm1, %v8857_v2  ;;  %v8894_v0 = vsel %vm380_vm0, %v501_v8, %v502_v48  ;;  %v506_v2 = vrot.slane %v8873_v45, 1  ;;  %v8911_v8 = vld [vmem:[%s8168_s9 + $0x2a8] sm:$0xff]  ;;  %10966 = vst [vmem:[#allocation104_spill] sm:$0xff] %v8920_v24  ;;  %v8938_v48 = vsel %vm1570_vm2, %v1621_v26, %v1622_v33  ;;  %v514_v26 = vrot.slane %v8935_v28, 1 }
  0x7b   : > { %6581 = vmatprep.mubr.msk.f32.mxu1 %vm543_vm1, %v8860_v61  ;;  %7023 = vmatprep.mubr.msk.f32.mxu0 %vm543_vm1, %v8868_v27  ;;  %10964 = vst [vmem:[#allocation102_spill] sm:$0xff] %v8894_v0  ;;  %v507_v61 = vrot.slane %v8876_v58, 1  ;;  %v1624_v27 = vrot.slane %v8405_v46, 2  ;;  %10969 = vst [vmem:[#allocation107_spill] sm:$0xff] %v8938_v48  ;;  %v1626_v46 = vrot.slane %v8410_v47, 2 }
  0x7c   : > { %v8970_v47 = vld [vmem:[%s8168_s9 + $0x2c8] sm:$0x3] }
  0x7d   : > { %v8958_v32 = vsel %vm1570_vm2, %v1622_v33, %v1624_v27  ;;  %v1631_v27 = vrot.slane %v8436_v10, 2  ;;  %v1632_v33 = vrot.slane %v8439_v11, 2  ;;  %v8997_v11 = vsel %vm1570_vm2, %v1627_v39, %v1629_v52  ;;  %v9005_v10 = vld [vmem:[%s8168_s9 + $0x2e0] sm:$0x3]  ;;  %v9016_v52 = vld [vmem:[%s8168_s9 + $0x2f0] sm:$0xff] }
  0x7e   : > { %6582 = vmatmul.mubr.msk.f32.gmra.mrb[46].mxu1 %vm543_vm1, %v8885_v50  ;;  %7024 = vmatmul.mubr.msk.f32.gmra.mrb[14].mxu0 %vm543_vm1, %v8888_v30  ;;  %v8930_v50 = vsel %vm380_vm0, %v506_v2, %v507_v61  ;;  %v511_v30 = vrot.slane %v8908_v56, 1  ;;  %v8955_v2 = vsel %vm380_vm0, %v507_v61, %v509_v12  ;;  %10971 = vst [vmem:[#allocation109_spill] sm:$0xff] %v8958_v32  ;;  %v8978_v12 = vld [vmem:[%s8168_s9 + $0x2d0] sm:$0xff]  ;;  %10975 = vst [vmem:[#allocation113_spill] sm:$0xff] %v8997_v11 }
  0x7f   : > { %6584 = vmatprep.mubr.msk.f32.mxu1 %vm543_vm1, %v8894_v0  ;;  %7026 = vmatprep.mubr.msk.f32.mxu0 %vm543_vm1, %v8903_v51  ;;  %10968 = vst [vmem:[#allocation106_spill] sm:$0xff] %v8930_v50  ;;  %v512_v0 = vrot.slane %v8911_v8, 1  ;;  %v8943_v51 = vld [vmem:[%s8168_s9 + $0x2b8] sm:$0xff]  ;;  %10970 = vst [vmem:[#allocation108_spill] sm:$0xff] %v8955_v2  ;;  %v8973_v61 = vsel %vm1570_vm2, %v1626_v46, %v1627_v39  ;;  %v519_v46 = vrot.slane %v8970_v47, 1 }
  0x80   : > { %10973 = vst [vmem:[#allocation111_spill] sm:$0xff] %v8973_v61 }
  0x81   : > { %v8990_v7 = vsel %vm380_vm0, %v512_v0, %v514_v26  ;;  %v1637_v26 = vrot.slane %v8471_v55, 2  ;;  %v1639_v55 = vrot.slane %v8489_v3, 2 }
  0x82   : > { %6585 = vmatmul.mubr.msk.f32.gmra.mrb[48].mxu1 %vm543_vm1, %v8920_v24  ;;  %7027 = vmatmul.mubr.msk.f32.gmra.mrb[16].mxu0 %vm543_vm1, %v8927_v29  ;;  %v8964_v24 = vsel %vm380_vm0, %v511_v30, %v512_v0  ;;  %v516_v29 = vrot.slane %v8943_v51, 1  ;;  %v8981_v30 = vld [vmem:[%s8168_s9 + $0x2d8] sm:$0xff]  ;;  %10974 = vst [vmem:[#allocation112_spill] sm:$0xff] %v8990_v7  ;;  %v9008_v0 = vsel %vm1570_vm2, %v1631_v27, %v1632_v33  ;;  %v524_v27 = vrot.slane %v9005_v10, 1 }
  0x83   : > { %6587 = vmatprep.mubr.msk.f32.mxu1 %vm543_vm1, %v8930_v50  ;;  %7029 = vmatprep.mubr.msk.f32.mxu0 %vm543_vm1, %v8938_v48  ;;  %10972 = vst [vmem:[#allocation110_spill] sm:$0xff] %v8964_v24  ;;  %v517_v50 = vrot.slane %v8946_v16, 1  ;;  %v1634_v48 = vrot.slane %v8463_v38, 2  ;;  %10977 = vst [vmem:[#allocation115_spill] sm:$0xff] %v9008_v0  ;;  %v1636_v38 = vrot.slane %v8468_v44, 2 }
  0x84   : > { %v9040_v44 = vld [vmem:[%s8168_s9 + $0x2f8] sm:$0x3] }
  0x85   : > { %v9028_v39 = vsel %vm1570_vm2, %v1632_v33, %v1634_v48  ;;  %v1641_v48 = vrot.slane %v8494_v60, 2  ;;  %v1642_v33 = vrot.slane %v8497_v63, 2  ;;  %v9067_v63 = vsel %vm1570_vm2, %v1637_v26, %v1639_v55  ;;  %v9075_v60 = vld [vmem:[%s8168_s9 + $0x310] sm:$0x3]  ;;  %v9086_v55 = vld [vmem:[%s8168_s9 + $0x320] sm:$0xff] }
  0x86   : > { %6588 = vmatmul.mubr.msk.f32.gmra.mrb[50].mxu1 %vm543_vm1, %v8955_v2  ;;  %7030 = vmatmul.mubr.msk.f32.gmra.mrb[18].mxu0 %vm543_vm1, %v8958_v32  ;;  %v9000_v2 = vsel %vm380_vm0, %v516_v29, %v517_v50  ;;  %v521_v32 = vrot.slane %v8978_v12, 1  ;;  %v9025_v29 = vsel %vm380_vm0, %v517_v50, %v519_v46  ;;  %10979 = vst [vmem:[#allocation117_spill] sm:$0xff] %v9028_v39  ;;  %v9048_v46 = vld [vmem:[%s8168_s9 + $0x300] sm:$0xff]  ;;  %10984 = vst [vmem:[#allocation122_spill] sm:$0xff] %v9067_v63 }
  0x87   : > { %6590 = vmatprep.mubr.msk.f32.mxu1 %vm543_vm1, %v8964_v24  ;;  %7032 = vmatprep.mubr.msk.f32.mxu0 %vm543_vm1, %v8973_v61  ;;  %10976 = vst [vmem:[#allocation114_spill] sm:$0xff] %v9000_v2  ;;  %v522_v24 = vrot.slane %v8981_v30, 1  ;;  %v9013_v61 = vld [vmem:[%s8168_s9 + $0x2e8] sm:$0xff]  ;;  %10978 = vst [vmem:[#allocation116_spill] sm:$0xff] %v9025_v29  ;;  %v9043_v50 = vsel %vm1570_vm2, %v1636_v38, %v1637_v26  ;;  %v529_v38 = vrot.slane %v9040_v44, 1 }
  0x88   : > { %10981 = vst [vmem:[#allocation119_spill] sm:$0xff] %v9043_v50  ;;  %10986 = vst [vmem:[#allocation124_spill] sm:$0xff] %v9075_v60 }
  0x89   : > { %v9060_v3 = vsel %vm380_vm0, %v522_v24, %v524_v27  ;;  %v1647_v27 = vrot.slane %v8523_v21, 2 }
  0x8a   : > { %6591 = vmatmul.mubr.msk.f32.gmra.mrb[52].mxu1 %vm543_vm1, %v8990_v7  ;;  %7033 = vmatmul.mubr.msk.f32.gmra.mrb[20].mxu0 %vm543_vm1, %v8997_v11  ;;  %v9034_v7 = vsel %vm380_vm0, %v521_v32, %v522_v24  ;;  %v526_v11 = vrot.slane %v9013_v61, 1  ;;  %v9051_v32 = vld [vmem:[%s8168_s9 + $0x308] sm:$0xff]  ;;  %10983 = vst [vmem:[#allocation121_spill] sm:$0xff] %v9060_v3  ;;  %v9078_v24 = vsel %vm1570_vm2, %v1641_v48, %v1642_v33  ;;  %v534_v48 = vrot.slane %v9075_v60, 1 }
  0x8b   : > { %6593 = vmatprep.mubr.msk.f32.mxu1 %vm543_vm1, %v9000_v2  ;;  %7035 = vmatprep.mubr.msk.f32.mxu0 %vm543_vm1, %v9008_v0  ;;  %10980 = vst [vmem:[#allocation118_spill] sm:$0xff] %v9034_v7  ;;  %v527_v2 = vrot.slane %v9016_v52, 1  ;;  %10982 = vst [vmem:[#allocation120_spill] sm:$0xff] %v9051_v32  ;;  %v1644_v0 = vrot.slane %v8515_v53, 2  ;;  %v1646_v53 = vrot.slane %v8520_v36, 2 }
  0x8d   : > { %v9098_v26 = vsel %vm1570_vm2, %v1642_v33, %v1644_v0  ;;  %v10991_v0 = vld [vmem:[#allocation62_spill] sm:$0xff] }
  0x8e   : > { %6594 = vmatmul.mubr.msk.f32.gmra.mrb[54].mxu1 %vm543_vm1, %v9025_v29  ;;  %7036 = vmatmul.mubr.msk.f32.gmra.mrb[22].mxu0 %vm543_vm1, %v9028_v39  ;;  %v9070_v29 = vsel %vm380_vm0, %v526_v11, %v527_v2  ;;  %v531_v39 = vrot.slane %v9048_v46, 1  ;;  %v9095_v11 = vsel %vm380_vm0, %v527_v2, %v529_v38  ;;  %10988 = vst [vmem:[#allocation126_spill] sm:$0xff] %v9098_v26  ;;  %v3244_v33 = vrot.slane %v10991_v0, 2  ;;  %v10992_v38 = vld [vmem:[#allocation63_spill] sm:$0xff] }
  0x8f   : > { %6596 = vmatprep.mubr.msk.f32.mxu1 %vm543_vm1, %v9034_v7  ;;  %7038 = vmatprep.mubr.msk.f32.mxu0 %vm543_vm1, %v9043_v50  ;;  %10985 = vst [vmem:[#allocation123_spill] sm:$0xff] %v9070_v29  ;;  %v532_v7 = vrot.slane %v9051_v32, 1  ;;  %v9083_v50 = vld [vmem:[%s8168_s9 + $0x318] sm:$0xff]  ;;  %10987 = vst [vmem:[#allocation125_spill] sm:$0xff] %v9095_v11  ;;  %v9110_v32 = vld [vmem:[%s8168_s9 + $0x328] sm:$0x3]  ;;  %v9113_v2 = vsel %vm1570_vm2, %v1646_v53, %v1647_v27 }
  0x90   : > { %v3245_v60 = vrot.slane %v10992_v38, 2 }
  0x91   : > { %v9104_v21 = vsel %vm380_vm0, %v531_v39, %v532_v7  ;;  %v9124_v39 = vsel %vm380_vm0, %v532_v7, %v534_v48  ;;  %v1657_v7 = vrot.slane %v8599_v43, 2  ;;  %v1661_v48 = vrot.slane %v8625_v17, 2 }
  0x92   : > { %6597 = vmatmul.mubr.msk.f32.gmra.mrb[56].mxu1 %vm543_vm1, %v9060_v3  ;;  %7039 = vmatmul.mubr.msk.f32.gmra.mrb[24].mxu0 %vm543_vm1, %v9067_v63  ;;  %10989 = vst [vmem:[#allocation127_spill] sm:$0xff] %v9104_v21  ;;  %v10990_v3 = vld [vmem:[#allocation61_spill] sm:$0xff]  ;;  %v536_v63 = vrot.slane %v9083_v50, 1 }
  0x93   : > { %6599 = vmatprep.mubr.msk.f32.mxu1 %vm543_vm1, %v9070_v29  ;;  %7041 = vmatprep.mubr.msk.f32.mxu0 %vm543_vm1, %v9078_v24  ;;  %v1649_v36 = vrot.slane %v10990_v3, 2  ;;  %v537_v29 = vrot.slane %v9086_v55, 1  ;;  %10993 = vst [vmem:[#allocation61_spill] sm:$0xff] %v9124_v39  ;;  %v539_v3 = vrot.slane %v9110_v32, 1 }
  0x95   : > { %v9130_v53 = vsel %vm1570_vm2, %v1647_v27, %v1649_v36  ;;  %v9133_v38 = vsel %vm380_vm0, %v536_v63, %v537_v29  ;;  %v9148_v36 = vsel %vm380_vm0, %v537_v29, %v539_v3  ;;  %v1659_v63 = vrot.slane %v8617_v14, 2  ;;  %v10998_v29 = vld [vmem:[#allocation5_spill] sm:$0xff] }
  0x96   : > { %6600 = vmatmul.mubr.msk.f32.gmra.mrb[58].mxu1 %vm543_vm1, %v9095_v11  ;;  %7042 = vmatmul.mubr.msk.f32.gmra.mrb[26].mxu0 %vm543_vm1, %v9098_v26  ;;  %10994 = vst [vmem:[#allocation62_spill] sm:$0xff] %v9133_v38  ;;  %v3247_v11 = vrot.slane %v8567_v34, 2  ;;  %v9137_v26 = vsel %vm1570_vm2, %v3244_v33, %v3245_v60  ;;  %10996 = vst [vmem:[#allocation128_spill] sm:$0xff] %v9148_v36  ;;  %v1662_v33 = vrot.slane %v8628_v35, 2  ;;  %v1667_v3 = vrot.slane %v8660_v62, 2 }
  0x97   : > { %6602 = vmatprep.mubr.msk.f32.mxu1 %vm543_vm1, %v9104_v21  ;;  %7044 = vmatprep.mubr.msk.f32.mxu0 %vm543_vm1, %v9113_v2  ;;  %10995 = vst [vmem:[#allocation63_spill] sm:$0xff] %v9137_v26  ;;  %v1656_v21 = vrot.slane %v8596_v54, 2 }
  0x98   : > { %v9153_v34 = vsel %vm1570_vm2, %v3245_v60, %v3247_v11  ;;  %v9170_v60 = vsel %vm1570_vm2, %v1657_v7, %v1659_v63  ;;  %v9174_v14 = vsel %vm1570_vm2, %v1661_v48, %v1662_v33  ;;  %v1666_v11 = vrot.slane %v8657_v9, 2  ;;  %v11001_v48 = vld [vmem:[#allocation7_spill] sm:$0xff] }
  0x99   : > { %10997 = vst [vmem:[#allocation129_spill] sm:$0xff] %v9153_v34  ;;  %v9157_v27 = vsel %vm1570_vm2, %v1656_v21, %v1657_v7  ;;  %v1664_v21 = vrot.slane %v8649_v19, 2  ;;  %v1671_v63 = vrot.slane %v8697_v5, 2 }
  0x9a   : > { %6603 = vmatmul.mubr.msk.f32.gmra.mrb[60].mxu1 %vm543_vm1, %v9124_v39  ;;  %7045 = vmatmul.mubr.msk.f32.gmra.mrb[28].mxu0 %vm543_vm1, %v9130_v53  ;;  %v9197_v7 = vsel %vm1570_vm2, %v1666_v11, %v1667_v3  ;;  %v1676_v11 = vrot.slane %v8733_v23, 2  ;;  %v11011_v39 = vld [vmem:[#allocation17_spill] sm:$0xff] }
  0x9b   : > { %6605 = vmatprep.mubr.msk.f32.mxu1 %vm543_vm1, %v9133_v38  ;;  %7047 = vmatprep.mubr.msk.f32.mxu0 %vm543_vm1, %v9137_v26  ;;  %v10999_v26 = vld [vmem:[#allocation6_spill] sm:$0xff]  ;;  %v9193_v19 = vsel %vm1570_vm2, %v1662_v33, %v1664_v21  ;;  %v1674_v33 = vrot.slane %v8725_v31, 2  ;;  %v11007_v38 = vld [vmem:[#allocation12_spill] sm:$0xff] }
  0x9e   : > { %6606 = vmatmul.mubr.msk.f32.gmra.mrb[62].mxu1 %vm543_vm1, %v9148_v36  ;;  %7048 = vmatmul.mubr.msk.f32.gmra.mrb[30].mxu0 %vm543_vm1, %v9153_v34  ;;  %v11000_v34 = vld [vmem:[#allocation46_spill] sm:$0xff]  ;;  %v11003_v36 = vld [vmem:[#allocation9_spill] sm:$0xff] }
  0x9f   : > { %6610 = vmatprep.mubr.msk.f32.mxu1 %vm543_vm1, %v10998_v29  ;;  %7050 = vmatprep.mubr.msk.f32.mxu0 %vm543_vm1, %v9157_v27  ;;  %v9183_v29 = vld [vmem:[%s10618_s1 + $0x18] sm:$0xff] }
  0xa2   : > { %6611 = vmatmul.mubr.msk.f32.vlgmr.msra.gmra.mrb[0].mxu1 %vm543_vm1, %v10999_v26  ;;  %7051 = vmatmul.mubr.msk.f32.gmra.mrb[32].mxu0 %vm543_vm1, %v9170_v60  ;;  %v1669_v26 = vrot.slane %v8689_v59, 2 }
  0xa3   : > { %6707 = vmatpush3.msra.mxu1 %v11000_v34  ;;  %6613 = vmatprep.mubr.msk.f32.mxu1 %vm543_vm1, %v8177_v6  ;;  %v1672_v34 = vrot.slane %v8700_v15, 2  ;;  %v11002_v6 = vld [vmem:[#allocation8_spill] sm:$0xff] }
  0xa4   : > { %7053 = vmatprep.mubr.msk.f32.mxu0 %vm543_vm1, %v9174_v14  ;;  %6804 = vmatprep.subr.mxu1 %v9183_v29  ;;  %v9211_v59 = vsel %vm1570_vm2, %v1667_v3, %v1669_v26  ;;  %v1679_v3 = vrot.slane %v8760_v41, 2 }
  0xa5   : > { %v9215_v21 = vsel %vm1570_vm2, %v1671_v63, %v1672_v34  ;;  %v9228_v31 = vsel %vm1570_vm2, %v1672_v34, %v1674_v33  ;;  %v1681_v63 = vrot.slane %v8768_v20, 2  ;;  %v1684_v34 = vrot.slane %v8795_v49, 2 }
  0xa6   : > { %6614 = vmatmul.mubr.msk.f32.gmra.mrb[2].mxu1 %vm543_vm1, %v11001_v48  ;;  %7054 = vmatmul.mubr.msk.f32.gmra.mrb[34].mxu0 %vm543_vm1, %v9193_v19  ;;  %v1677_v48 = vrot.slane %v8736_v18, 2 }
  0xa7   : > { %6616 = vmatprep.mubr.msk.f32.mxu1 %vm543_vm1, %v11002_v6  ;;  %7056 = vmatprep.mubr.msk.f32.mxu0 %vm543_vm1, %v9197_v7  ;;  %v11004_v6 = vld [vmem:[#allocation10_spill] sm:$0xff] }
  0xa8   : > { %v9232_v26 = vsel %vm1570_vm2, %v1676_v11, %v1677_v48  ;;  %v9245_v41 = vsel %vm1570_vm2, %v1677_v48, %v1679_v3  ;;  %v1686_v11 = vrot.slane %v8803_v22, 2  ;;  %v1689_v48 = vrot.slane %v8830_v57, 2 }
  0xaa   : > { %6617 = vmatmul.mubr.msk.f32.gmra.mrb[4].mxu1 %vm543_vm1, %v11003_v36  ;;  %7057 = vmatmul.mubr.msk.f32.gmra.mrb[36].mxu0 %vm543_vm1, %v9211_v59  ;;  %v1682_v36 = vrot.slane %v8771_v4, 2 }
  0xab   : > { %6619 = vmatprep.mubr.msk.f32.mxu1 %vm543_vm1, %v8208_v25  ;;  %7059 = vmatprep.mubr.msk.f32.mxu0 %vm543_vm1, %v9215_v21  ;;  %v11005_v25 = vld [vmem:[#allocation11_spill] sm:$0xff] }
  0xac   : > { %v9249_v33 = vsel %vm1570_vm2, %v1681_v63, %v1682_v36  ;;  %v9262_v49 = vsel %vm1570_vm2, %v1682_v36, %v1684_v34  ;;  %v1691_v63 = vrot.slane %v8838_v40, 2  ;;  %v1694_v36 = vrot.slane %v8865_v1, 2 }
  0xad   : > { %11006 = vst [vmem:[#allocation5_spill] sm:$0xff] %v9249_v33  ;;  %11009 = vst [vmem:[#allocation6_spill] sm:$0xff] %v9262_v49 }
  0xae   : > { %6620 = vmatmul.mubr.msk.f32.gmra.mrb[6].mxu1 %vm543_vm1, %v11004_v6  ;;  %7060 = vmatmul.mubr.msk.f32.gmra.mrb[38].mxu0 %vm543_vm1, %v9228_v31  ;;  %v1687_v6 = vrot.slane %v8806_v42, 2 }
  0xaf   : > { %6622 = vmatprep.mubr.msk.f32.mxu1 %vm543_vm1, %v11005_v25  ;;  %7062 = vmatprep.mubr.msk.f32.mxu0 %vm543_vm1, %v9232_v26  ;;  %v11008_v25 = vld [vmem:[#allocation16_spill] sm:$0xff] }
  0xb0   : > { %v9266_v3 = vsel %vm1570_vm2, %v1686_v11, %v1687_v6  ;;  %v9279_v57 = vsel %vm1570_vm2, %v1687_v6, %v1689_v48  ;;  %v1696_v11 = vrot.slane %v8873_v45, 2  ;;  %v1699_v6 = vrot.slane %v8900_v13, 2 }
  0xb1   : > { %11010 = vst [vmem:[#allocation46_spill] sm:$0xff] %v9266_v3  ;;  %11013 = vst [vmem:[#allocation7_spill] sm:$0xff] %v9279_v57 }
  0xb2   : > { %6623 = vmatmul.mubr.msk.f32.gmra.mrb[8].mxu1 %vm543_vm1, %v11007_v38  ;;  %7063 = vmatmul.mubr.msk.f32.gmra.mrb[40].mxu0 %vm543_vm1, %v9245_v41  ;;  %v1692_v38 = vrot.slane %v8841_v37, 2 }
  0xb3   : > { %6625 = vmatprep.mubr.msk.f32.mxu1 %vm543_vm1, %v11008_v25  ;;  %7065 = vmatprep.mubr.msk.f32.mxu0 %vm543_vm1, %v9249_v33  ;;  %v11012_v25 = vld [vmem:[#allocation20_spill] sm:$0xff]  ;;  %v11015_v33 = vld [vmem:[#allocation21_spill] sm:$0xff] }
  0xb4   : > { %v9283_v34 = vsel %vm1570_vm2, %v1691_v63, %v1692_v38  ;;  %v9296_v1 = vsel %vm1570_vm2, %v1692_v38, %v1694_v36  ;;  %v1701_v63 = vrot.slane %v8908_v56, 2  ;;  %v1704_v38 = vrot.slane %v8935_v28, 2 }
  0xb5   : > { %11014 = vst [vmem:[#allocation8_spill] sm:$0xff] %v9283_v34  ;;  %11017 = vst [vmem:[#allocation9_spill] sm:$0xff] %v9296_v1 }
  0xb6   : > { %6626 = vmatmul.mubr.msk.f32.gmra.mrb[10].mxu1 %vm543_vm1, %v11011_v39  ;;  %7066 = vmatmul.mubr.msk.f32.gmra.mrb[42].mxu0 %vm543_vm1, %v9262_v49  ;;  %v1697_v39 = vrot.slane %v8876_v58, 2 }
  0xb7   : > { %6628 = vmatprep.mubr.msk.f32.mxu1 %vm543_vm1, %v11012_v25  ;;  %7068 = vmatprep.mubr.msk.f32.mxu0 %vm543_vm1, %v9266_v3  ;;  %v11016_v25 = vld [vmem:[#allocation24_spill] sm:$0xff]  ;;  %v11019_v3 = vld [vmem:[#allocation25_spill] sm:$0xff] }
  0xb8   : > { %v9300_v48 = vsel %vm1570_vm2, %v1696_v11, %v1697_v39  ;;  %v9313_v13 = vsel %vm1570_vm2, %v1697_v39, %v1699_v6  ;;  %v1706_v11 = vrot.slane %v8943_v51, 2  ;;  %v1709_v39 = vrot.slane %v8970_v47, 2 }
  0xb9   : > { %11018 = vst [vmem:[#allocation10_spill] sm:$0xff] %v9300_v48  ;;  %11021 = vst [vmem:[#allocation11_spill] sm:$0xff] %v9313_v13 }
  0xba   : > { %6629 = vmatmul.mubr.msk.f32.gmra.mrb[12].mxu1 %vm543_vm1, %v11015_v33  ;;  %7069 = vmatmul.mubr.msk.f32.gmra.mrb[44].mxu0 %vm543_vm1, %v9279_v57  ;;  %v1702_v33 = vrot.slane %v8911_v8, 2 }
  0xbb   : > { %6631 = vmatprep.mubr.msk.f32.mxu1 %vm543_vm1, %v11016_v25  ;;  %7071 = vmatprep.mubr.msk.f32.mxu0 %vm543_vm1, %v9283_v34  ;;  %v11020_v25 = vld [vmem:[#allocation28_spill] sm:$0xff]  ;;  %v11023_v34 = vld [vmem:[#allocation29_spill] sm:$0xff] }
  0xbc   : > { %v9317_v36 = vsel %vm1570_vm2, %v1701_v63, %v1702_v33  ;;  %v9330_v28 = vsel %vm1570_vm2, %v1702_v33, %v1704_v38  ;;  %v1711_v63 = vrot.slane %v8978_v12, 2  ;;  %v1714_v33 = vrot.slane %v9005_v10, 2 }
  0xbd   : > { %11022 = vst [vmem:[#allocation12_spill] sm:$0xff] %v9317_v36  ;;  %11025 = vst [vmem:[#allocation16_spill] sm:$0xff] %v9330_v28 }
  0xbe   : > { %6632 = vmatmul.mubr.msk.f32.gmra.mrb[14].mxu1 %vm543_vm1, %v11019_v3  ;;  %7072 = vmatmul.mubr.msk.f32.gmra.mrb[46].mxu0 %vm543_vm1, %v9296_v1  ;;  %v1707_v3 = vrot.slane %v8946_v16, 2 }
  0xbf   : > { %6634 = vmatprep.mubr.msk.f32.mxu1 %vm543_vm1, %v11020_v25  ;;  %7074 = vmatprep.mubr.msk.f32.mxu0 %vm543_vm1, %v9300_v48  ;;  %v11024_v25 = vld [vmem:[#allocation32_spill] sm:$0xff]  ;;  %v11027_v48 = vld [vmem:[#allocation33_spill] sm:$0xff] }
  0xc0   : > { %v9334_v6 = vsel %vm1570_vm2, %v1706_v11, %v1707_v3  ;;  %v9347_v47 = vsel %vm1570_vm2, %v1707_v3, %v1709_v39  ;;  %v1716_v11 = vrot.slane %v9013_v61, 2  ;;  %v1719_v3 = vrot.slane %v9040_v44, 2 }
  0xc1   : > { %11026 = vst [vmem:[#allocation17_spill] sm:$0xff] %v9334_v6  ;;  %11029 = vst [vmem:[#allocation20_spill] sm:$0xff] %v9347_v47 }
  0xc2   : > { %6635 = vmatmul.mubr.msk.f32.gmra.mrb[16].mxu1 %vm543_vm1, %v11023_v34  ;;  %7075 = vmatmul.mubr.msk.f32.gmra.mrb[48].mxu0 %vm543_vm1, %v9313_v13  ;;  %v1712_v34 = vrot.slane %v8981_v30, 2  ;;  %v9413_v13 = vld [vmem:[%s8168_s9 + $0x340] sm:$0x3] }
  0xc3   : > { %6637 = vmatprep.mubr.msk.f32.mxu1 %vm543_vm1, %v11024_v25  ;;  %7077 = vmatprep.mubr.msk.f32.mxu0 %vm543_vm1, %v9317_v36  ;;  %v11028_v25 = vld [vmem:[#allocation36_spill] sm:$0xff]  ;;  %v11031_v36 = vld [vmem:[#allocation37_spill] sm:$0xff] }
  0xc4   : > { %v9351_v38 = vsel %vm1570_vm2, %v1711_v63, %v1712_v34  ;;  %v9364_v10 = vsel %vm1570_vm2, %v1712_v34, %v1714_v33  ;;  %v11035_v63 = vld [vmem:[#allocation120_spill] sm:$0xff]  ;;  %11045 = vst [vmem:[#allocation36_spill] sm:$0xff] %v9413_v13 }
  0xc5   : > { %11030 = vst [vmem:[#allocation21_spill] sm:$0xff] %v9351_v38  ;;  %11033 = vst [vmem:[#allocation24_spill] sm:$0xff] %v9364_v10  ;;  %v11039_v34 = vld [vmem:[#allocation124_spill] sm:$0xff] }
  0xc6   : > { %6638 = vmatmul.mubr.msk.f32.gmra.mrb[18].mxu1 %vm543_vm1, %v11027_v48  ;;  %7078 = vmatmul.mubr.msk.f32.gmra.mrb[50].mxu0 %vm543_vm1, %v9330_v28  ;;  %v1717_v48 = vrot.slane %v9016_v52, 2  ;;  %v1724_v33 = vrot.slane %v11039_v34, 2  ;;  %v9395_v28 = vld [vmem:[%s8168_s9 + $0x338] sm:$0xff] }
  0xc7   : > { %6640 = vmatprep.mubr.msk.f32.mxu1 %vm543_vm1, %v11028_v25  ;;  %7080 = vmatprep.mubr.msk.f32.mxu0 %vm543_vm1, %v9334_v6  ;;  %v11032_v25 = vld [vmem:[#allocation40_spill] sm:$0xff]  ;;  %v11036_v6 = vld [vmem:[#allocation41_spill] sm:$0xff] }
  0xc8   : > { %v9368_v39 = vsel %vm1570_vm2, %v1716_v11, %v1717_v48  ;;  %v9381_v44 = vsel %vm1570_vm2, %v1717_v48, %v1719_v3  ;;  %v11042_v48 = vld [vmem:[#allocation49_spill] sm:$0xff] }
  0xc9   : > { %11034 = vst [vmem:[#allocation25_spill] sm:$0xff] %v9368_v39  ;;  %11038 = vst [vmem:[#allocation28_spill] sm:$0xff] %v9381_v44 }
  0xca   : > { %6641 = vmatmul.mubr.msk.f32.gmra.mrb[20].mxu1 %vm543_vm1, %v11031_v36  ;;  %7081 = vmatmul.mubr.msk.f32.gmra.mrb[52].mxu0 %vm543_vm1, %v9347_v47  ;;  %v1721_v36 = vrot.slane %v9048_v46, 2  ;;  %v1722_v47 = vrot.slane %v11035_v63, 2 }
  0xcb   : > { %6643 = vmatprep.mubr.msk.f32.mxu1 %vm543_vm1, %v11032_v25  ;;  %7083 = vmatprep.mubr.msk.f32.mxu0 %vm543_vm1, %v9351_v38  ;;  %v11037_v25 = vld [vmem:[#allocation44_spill] sm:$0xff]  ;;  %v1727_v38 = vrot.slane %v9086_v55, 2 }
  0xcc   : > { %v9385_v11 = vsel %vm1570_vm2, %v1721_v36, %v1722_v47  ;;  %v9404_v3 = vsel %vm1570_vm2, %v1722_v47, %v1724_v33  ;;  %v1729_v36 = vrot.slane %v9110_v32, 2  ;;  %v11047_v47 = vld [vmem:[#allocation53_spill] sm:$0xff]  ;;  %v3252_v33 = vrot.slane %v9413_v13, 2  ;;  %v9525_v13 = vld [vmem:[%s8168_s9 + $0xa8] sm:$0xff] }
  0xcd   : > { %11040 = vst [vmem:[#allocation29_spill] sm:$0xff] %v9385_v11  ;;  %11043 = vst [vmem:[#allocation32_spill] sm:$0xff] %v9404_v3 }
  0xce   : > { %6644 = vmatmul.mubr.msk.f32.gmra.mrb[22].mxu1 %vm543_vm1, %v11036_v6  ;;  %7084 = vmatmul.mubr.msk.f32.gmra.mrb[54].mxu0 %vm543_vm1, %v9364_v10  ;;  %v1726_v6 = vrot.slane %v9083_v50, 2  ;;  %v11041_v10 = vld [vmem:[#allocation45_spill] sm:$0xff]  ;;  %v9424_v32 = vsel %vm1570_vm2, %v1727_v38, %v1729_v36  ;;  %v11053_v36 = vld [vmem:[#allocation58_spill] sm:$0xff] }
  0xcf   : > { %6646 = vmatprep.mubr.msk.f32.mxu1 %vm543_vm1, %v11037_v25  ;;  %7086 = vmatprep.mubr.msk.f32.mxu0 %vm543_vm1, %v9368_v39  ;;  %v9392_v25 = vld [vmem:[%s8168_s9 + $0x330] sm:$0xff]  ;;  %v3250_v39 = vrot.slane %v9395_v28, 2  ;;  %11048 = vst [vmem:[#allocation37_spill] sm:$0xff] %v9424_v32 }
  0xd0   : > { %v3249_v34 = vrot.slane %v9392_v25, 2 }
  0xd2   : > { %6647 = vmatmul.mubr.msk.f32.gmra.mrb[24].mxu1 %vm543_vm1, %v11041_v10  ;;  %7087 = vmatmul.mubr.msk.f32.gmra.mrb[56].mxu0 %vm543_vm1, %v9381_v44  ;;  %v9408_v10 = vsel %vm1570_vm2, %v1726_v6, %v1727_v38  ;;  %v11046_v44 = vld [vmem:[#allocation50_spill] sm:$0xff]  ;;  %v9428_v6 = vsel %vm1570_vm2, %v3249_v34, %v3250_v39  ;;  %v9439_v38 = vsel %vm1570_vm2, %v3250_v39, %v3252_v33  ;;  %v9457_v39 = vld [vmem:[%s10618_s1 + $0x40] sm:$0xff]  ;;  %v9460_v33 = vld [vmem:[%s8168_s9 + $0x38] sm:$0xff] }
  0xd3   : > { %6649 = vmatprep.mubr.msk.f32.mxu1 %vm543_vm1, %v11042_v48  ;;  %7089 = vmatprep.mubr.msk.f32.mxu0 %vm543_vm1, %v9385_v11  ;;  %11044 = vst [vmem:[#allocation33_spill] sm:$0xff] %v9408_v10  ;;  %11049 = vst [vmem:[#allocation40_spill] sm:$0xff] %v9428_v6  ;;  %v11050_v48 = vld [vmem:[#allocation54_spill] sm:$0xff] }
  0xd4   : > { %11052 = vst [vmem:[#allocation120_spill] sm:$0xff] %v9439_v38  ;;  %v11054_v34 = vld [vmem:[#allocation66_spill] sm:$0xff] }
  0xd6   : > { %6650 = vmatmul.mubr.msk.f32.gmra.mrb[26].mxu1 %vm543_vm1, %v11046_v44  ;;  %7090 = vmatmul.mubr.msk.f32.gmra.mrb[58].mxu0 %vm543_vm1, %v9404_v3  ;;  %v11051_v44 = vld [vmem:[#allocation57_spill] sm:$0xff] }
  0xd7   : > { %6652 = vmatprep.mubr.msk.f32.mxu1 %vm543_vm1, %v11047_v47  ;;  %7092 = vmatprep.mubr.msk.f32.mxu0 %vm543_vm1, %v9408_v10  ;;  %v9448_v47 = vld [vmem:[%s8168_s9 + $0x30] sm:$0xff]  ;;  %11065 = vst [vmem:[#allocation57_spill] sm:$0xff] %v9525_v13 }
  0xda   : > { %6653 = vmatmul.mubr.msk.f32.gmra.mrb[28].mxu1 %vm543_vm1, %v11050_v48  ;;  %7093 = vmatmul.mubr.msk.f32.gmra.mrb[60].mxu0 %vm543_vm1, %v9424_v32  ;;  %v11055_v48 = vld [vmem:[#allocation67_spill] sm:$0xff] }
  0xdb   : > { %6655 = vmatprep.mubr.msk.f32.mxu1 %vm543_vm1, %v11051_v44  ;;  %7095 = vmatprep.mubr.msk.f32.mxu0 %vm543_vm1, %v9428_v6  ;;  %v11056_v44 = vld [vmem:[#allocation75_spill] sm:$0xff]  ;;  %v9518_v6 = vld [vmem:[%s8168_s9 + $0x98] sm:$0xff] }
  0xdc   : > { %11064 = vst [vmem:[#allocation54_spill] sm:$0xff] %v9518_v6 }
  0xde   : > { %6656 = vmatmul.mubr.msk.f32.gmra.mrb[30].mxu1 %vm543_vm1, %v11053_v36  ;;  %7096 = vmatmul.mubr.msk.f32.gmra.mrb[62].mxu0 %vm543_vm1, %v9439_v38  ;;  %v9468_v36 = vld [vmem:[%s8168_s9 + $0x48] sm:$0xff]  ;;  %v9511_v38 = vld [vmem:[%s8168_s9 + $0x90] sm:$0xff] }
  0xdf   : > { %6658 = vmatprep.mubr.msk.f32.mxu1 %vm543_vm1, %v11054_v34  ;;  %7100 = vmatprep.mubr.msk.f32.mxu0 %vm543_vm1, %v9448_v47  ;;  %11057 = vst [vmem:[#allocation41_spill] sm:$0xff] %v9468_v36  ;;  %v9476_v34 = vld [vmem:[%s8168_s9 + $0x50] sm:$0xff]  ;;  %11063 = vst [vmem:[#allocation53_spill] sm:$0xff] %v9511_v38 }
  0xe0   : > { %11058 = vst [vmem:[#allocation44_spill] sm:$0xff] %v9476_v34 }
  0xe2   : > { %6659 = vmatmul.mubr.msk.f32.gmra.mrb[32].mxu1 %vm543_vm1, %v11055_v48  ;;  %7101 = vmatmul.mubr.msk.f32.vlgmr.msra.gmra.mrb[0].mxu0 %vm543_vm1, %v9460_v33  ;;  %v9497_v48 = vld [vmem:[%s8168_s9 + $0x78] sm:$0xff] }
  0xe3   : > { %6661 = vmatprep.mubr.msk.f32.mxu1 %vm543_vm1, %v8596_v54  ;;  %7197 = vmatpush3.msra.mxu0 %v11056_v44  ;;  %v9483_v54 = vld [vmem:[%s8168_s9 + $0x60] sm:$0xff]  ;;  %11061 = vst [vmem:[#allocation49_spill] sm:$0xff] %v9497_v48 }
  0xe4   : > { %7103 = vmatprep.mubr.msk.f32.mxu0 %vm543_vm1, %v9468_v36  ;;  %7294 = vmatprep.subr.mxu0 %v9457_v39  ;;  %11059 = vst [vmem:[#allocation124_spill] sm:$0xff] %v9483_v54  ;;  %v9504_v44 = vld [vmem:[%s8168_s9 + $0x80] sm:$0xff]  ;;  %v9661_v36 = vld [vmem:[%s8168_s9 + $0x188] sm:$0xff] }
  0xe5   : > { %11062 = vst [vmem:[#allocation50_spill] sm:$0xff] %v9504_v44 }
  0xe6   : > { %6662 = vmatmul.mubr.msk.f32.gmra.mrb[34].mxu1 %vm543_vm1, %v8599_v43  ;;  %7104 = vmatmul.mubr.msk.f32.gmra.mrb[2].mxu0 %vm543_vm1, %v9476_v34  ;;  %v9490_v43 = vld [vmem:[%s8168_s9 + $0x68] sm:$0xff] }
  0xe7   : > { %6664 = vmatprep.mubr.msk.f32.mxu1 %vm543_vm1, %v8625_v17  ;;  %7106 = vmatprep.mubr.msk.f32.mxu0 %vm543_vm1, %v9483_v54  ;;  %11060 = vst [vmem:[#allocation45_spill] sm:$0xff] %v9490_v43  ;;  %v7978_v54 = vld [vmem:[%s8168_s9 + $0x10] sm:$0x3] }
  0xe8   : > { %v1574_v34 = vrot.slane %v7978_v54, 2 }
  0xea   : > { %6665 = vmatmul.mubr.msk.f32.gmra.mrb[36].mxu1 %vm543_vm1, %v8628_v35  ;;  %7107 = vmatmul.mubr.msk.f32.gmra.mrb[4].mxu0 %vm543_vm1, %v9490_v43 }
  0xeb   : > { %6667 = vmatprep.mubr.msk.f32.mxu1 %vm543_vm1, %v8657_v9  ;;  %7109 = vmatprep.mubr.msk.f32.mxu0 %vm543_vm1, %v9497_v48  ;;  %v7977_v48 = vld [vmem:[%s8168_s9 + $0x8] sm:$0xff] }
  0xec   : > { %v1572_v43 = vrot.slane %v7977_v48, 2  ;;  %v11082_v48 = vld [vmem:[#allocation71_spill] sm:$0xff] }
  0xee   : > { %6668 = vmatmul.mubr.msk.f32.gmra.mrb[38].mxu1 %vm543_vm1, %v8660_v62  ;;  %7110 = vmatmul.mubr.msk.f32.gmra.mrb[6].mxu0 %vm543_vm1, %v9504_v44  ;;  %v1575_v54 = vsel %vm1570_vm2, %v1572_v43, %v1574_v34  ;;  %v9692_v34 = vld [vmem:[%s10618_s1 + $0x20] sm:$0xff] }
  0xef   : > { %6670 = vmatprep.mubr.msk.f32.mxu1 %vm543_vm1, %v8697_v5  ;;  %7112 = vmatprep.mubr.msk.f32.mxu0 %vm543_vm1, %v9511_v38  ;;  %v9532_v38 = vld [vmem:[%s8168_s9 + $0xb0] sm:$0xff] }
  0xf0   : > { %11066 = vst [vmem:[#allocation58_spill] sm:$0xff] %v9532_v38 }
  0xf2   : > { %6671 = vmatmul.mubr.msk.f32.gmra.mrb[40].mxu1 %vm543_vm1, %v8700_v15  ;;  %7113 = vmatmul.mubr.msk.f32.gmra.mrb[8].mxu0 %vm543_vm1, %v9518_v6  ;;  %v9539_v6 = vld [vmem:[%s8168_s9 + $0xc0] sm:$0xff] }
  0xf3   : > { %6673 = vmatprep.mubr.msk.f32.mxu1 %vm543_vm1, %v8733_v23  ;;  %7115 = vmatprep.mubr.msk.f32.mxu0 %vm543_vm1, %v9525_v13  ;;  %11067 = vst [vmem:[#allocation66_spill] sm:$0xff] %v9539_v6  ;;  %v9546_v13 = vld [vmem:[%s8168_s9 + $0xc8] sm:$0xff] }
  0xf4   : > { %11068 = vst [vmem:[#allocation67_spill] sm:$0xff] %v9546_v13 }
  0xf6   : > { %6674 = vmatmul.mubr.msk.f32.gmra.mrb[42].mxu1 %vm543_vm1, %v8736_v18  ;;  %7116 = vmatmul.mubr.msk.f32.gmra.mrb[10].mxu0 %vm543_vm1, %v9532_v38  ;;  %v9553_v38 = vld [vmem:[%s8168_s9 + $0xd8] sm:$0xff] }
  0xf7   : > { %6676 = vmatprep.mubr.msk.f32.mxu1 %vm543_vm1, %v8768_v20  ;;  %7118 = vmatprep.mubr.msk.f32.mxu0 %vm543_vm1, %v9539_v6  ;;  %11069 = vst [vmem:[#allocation75_spill] sm:$0xff] %v9553_v38  ;;  %v9560_v6 = vld [vmem:[%s8168_s9 + $0xe0] sm:$0xff] }
  0xf8   : > { %11070 = vst [vmem:[#allocation130_spill] sm:$0xff] %v9560_v6 }
  0xfa   : > { %6677 = vmatmul.mubr.msk.f32.gmra.mrb[44].mxu1 %vm543_vm1, %v8771_v4  ;;  %7119 = vmatmul.mubr.msk.f32.gmra.mrb[12].mxu0 %vm543_vm1, %v9546_v13  ;;  %v9567_v13 = vld [vmem:[%s8168_s9 + $0xf0] sm:$0xff] }
  0xfb   : > { %6679 = vmatprep.mubr.msk.f32.mxu1 %vm543_vm1, %v8803_v22  ;;  %7121 = vmatprep.mubr.msk.f32.mxu0 %vm543_vm1, %v9553_v38  ;;  %11071 = vst [vmem:[#allocation131_spill] sm:$0xff] %v9567_v13  ;;  %v9574_v38 = vld [vmem:[%s8168_s9 + $0xf8] sm:$0xff] }
  0xfc   : > { %11072 = vst [vmem:[#allocation132_spill] sm:$0xff] %v9574_v38 }
  0xfe   : > { %6680 = vmatmul.mubr.msk.f32.gmra.mrb[46].mxu1 %vm543_vm1, %v8806_v42  ;;  %7122 = vmatmul.mubr.msk.f32.gmra.mrb[14].mxu0 %vm543_vm1, %v9560_v6  ;;  %v9581_v6 = vld [vmem:[%s8168_s9 + $0x108] sm:$0xff] }
  0xff   : > { %6682 = vmatprep.mubr.msk.f32.mxu1 %vm543_vm1, %v8838_v40  ;;  %7124 = vmatprep.mubr.msk.f32.mxu0 %vm543_vm1, %v9567_v13  ;;  %11073 = vst [vmem:[#allocation133_spill] sm:$0xff] %v9581_v6  ;;  %v9588_v13 = vld [vmem:[%s8168_s9 + $0x110] sm:$0xff] }
 0x100   : > { %11074 = vst [vmem:[#allocation134_spill] sm:$0xff] %v9588_v13 }
 0x102   : > { %6683 = vmatmul.mubr.msk.f32.gmra.mrb[48].mxu1 %vm543_vm1, %v8841_v37  ;;  %7125 = vmatmul.mubr.msk.f32.gmra.mrb[16].mxu0 %vm543_vm1, %v9574_v38  ;;  %v9595_v38 = vld [vmem:[%s8168_s9 + $0x120] sm:$0xff] }
 0x103   : > { %6685 = vmatprep.mubr.msk.f32.mxu1 %vm543_vm1, %v8873_v45  ;;  %7127 = vmatprep.mubr.msk.f32.mxu0 %vm543_vm1, %v9581_v6  ;;  %11075 = vst [vmem:[#allocation135_spill] sm:$0xff] %v9595_v38  ;;  %v9602_v6 = vld [vmem:[%s8168_s9 + $0x128] sm:$0xff] }
 0x104   : > { %11076 = vst [vmem:[#allocation136_spill] sm:$0xff] %v9602_v6 }
 0x106   : > { %6686 = vmatmul.mubr.msk.f32.gmra.mrb[50].mxu1 %vm543_vm1, %v8876_v58  ;;  %7128 = vmatmul.mubr.msk.f32.gmra.mrb[18].mxu0 %vm543_vm1, %v9588_v13  ;;  %v9609_v13 = vld [vmem:[%s8168_s9 + $0x138] sm:$0xff] }
 0x107   : > { %6688 = vmatprep.mubr.msk.f32.mxu1 %vm543_vm1, %v8908_v56  ;;  %7130 = vmatprep.mubr.msk.f32.mxu0 %vm543_vm1, %v9595_v38  ;;  %11077 = vst [vmem:[#allocation137_spill] sm:$0xff] %v9609_v13  ;;  %v9616_v38 = vld [vmem:[%s8168_s9 + $0x140] sm:$0xff] }
 0x108   : > { %11078 = vst [vmem:[#allocation138_spill] sm:$0xff] %v9616_v38 }
 0x10a   : > { %6689 = vmatmul.mubr.msk.f32.gmra.mrb[52].mxu1 %vm543_vm1, %v8911_v8  ;;  %7131 = vmatmul.mubr.msk.f32.gmra.mrb[20].mxu0 %vm543_vm1, %v9602_v6  ;;  %v9623_v6 = vld [vmem:[%s8168_s9 + $0x150] sm:$0xff] }
 0x10b   : > { %6691 = vmatprep.mubr.msk.f32.mxu1 %vm543_vm1, %v8943_v51  ;;  %7133 = vmatprep.mubr.msk.f32.mxu0 %vm543_vm1, %v9609_v13  ;;  %11079 = vst [vmem:[#allocation139_spill] sm:$0xff] %v9623_v6  ;;  %v9630_v13 = vld [vmem:[%s8168_s9 + $0x158] sm:$0xff] }
 0x10c   : > { %11080 = vst [vmem:[#allocation140_spill] sm:$0xff] %v9630_v13 }
 0x10e   : > { %6692 = vmatmul.mubr.msk.f32.gmra.mrb[54].mxu1 %vm543_vm1, %v8946_v16  ;;  %7134 = vmatmul.mubr.msk.f32.gmra.mrb[22].mxu0 %vm543_vm1, %v9616_v38  ;;  %v9637_v38 = vld [vmem:[%s8168_s9 + $0x168] sm:$0xff] }
 0x10f   : > { %6694 = vmatprep.mubr.msk.f32.mxu1 %vm543_vm1, %v8978_v12  ;;  %7136 = vmatprep.mubr.msk.f32.mxu0 %vm543_vm1, %v9623_v6  ;;  %11081 = vst [vmem:[#allocation141_spill] sm:$0xff] %v9637_v38  ;;  %v9644_v6 = vld [vmem:[%s8168_s9 + $0x170] sm:$0xff] }
 0x112   : > { %6695 = vmatmul.mubr.msk.f32.gmra.mrb[56].mxu1 %vm543_vm1, %v8981_v30  ;;  %7137 = vmatmul.mubr.msk.f32.gmra.mrb[24].mxu0 %vm543_vm1, %v9630_v13  ;;  %v7976_v13 = vld [vmem:[%s8168_s9] sm:$0xff] }
 0x113   : > { %6697 = vmatprep.mubr.msk.f32.mxu1 %vm543_vm1, %v9013_v61  ;;  %7139 = vmatprep.mubr.msk.f32.mxu0 %vm543_vm1, %v9637_v38  ;;  %v1571_v44 = vrot.slane %v7976_v13, 2  ;;  %v9655_v38 = vld [vmem:[%s8168_s9 + $0x198] sm:$0xff] }
 0x115   : > { %v1573_v13 = vsel %vm1570_vm2, %v1571_v44, %v1572_v43  ;;  %v11087_v43 = vld [vmem:[#allocation81_spill] sm:$0xff] }
 0x116   : > { %6698 = vmatmul.mubr.msk.f32.gmra.mrb[58].mxu1 %vm543_vm1, %v9016_v52  ;;  %7140 = vmatmul.mubr.msk.f32.gmra.mrb[26].mxu0 %vm543_vm1, %v9644_v6 }
 0x117   : > { %6700 = vmatprep.mubr.msk.f32.mxu1 %vm543_vm1, %v9048_v46  ;;  %7142 = vmatprep.mubr.msk.f32.mxu0 %vm543_vm1, %v10991_v0  ;;  %v9670_v0 = vld [vmem:[%s8168_s9 + $0x1a0] sm:$0xff] }
 0x11a   : > { %6701 = vmatmul.mubr.msk.f32.gmra.mrb[60].mxu1 %vm543_vm1, %v11035_v63  ;;  %7143 = vmatmul.mubr.msk.f32.gmra.mrb[28].mxu0 %vm543_vm1, %v9661_v36 }
 0x11b   : > { %6703 = vmatprep.mubr.msk.f32.mxu1 %vm543_vm1, %v9083_v50  ;;  %7145 = vmatprep.mubr.msk.f32.mxu0 %vm543_vm1, %v9655_v38 }
 0x11e   : > { %6704 = vmatmul.mubr.msk.f32.gmra.mrb[62].mxu1 %vm543_vm1, %v9086_v55  ;;  %7146 = vmatmul.mubr.msk.f32.gmra.mrb[30].mxu0 %vm543_vm1, %v9670_v0 }
 0x11f   : > { %6708 = vmatprep.mubr.msk.f32.mxu1 %vm543_vm1, %v1573_v13  ;;  %7148 = vmatprep.mubr.msk.f32.mxu0 %vm543_vm1, %v8625_v17  ;;  %v11083_v17 = vld [vmem:[#allocation72_spill] sm:$0xff]  ;;  %v9802_v13 = vld [vmem:[%s8168_s9 + $0x348] sm:$0xff] }
 0x122   : > { %6709 = vmatmul.mubr.msk.f32.vlgmr.msra.gmra.mrb[0].mxu1 %vm543_vm1, %v1575_v54  ;;  %7149 = vmatmul.mubr.msk.f32.gmra.mrb[32].mxu0 %vm543_vm1, %v8628_v35  ;;  %v11084_v35 = vld [vmem:[#allocation74_spill] sm:$0xff] }
 0x123   : > { %6805 = vmatpush3.msra.mxu1 %v9183_v29  ;;  %6711 = vmatprep.mubr.msk.f32.mxu1 %vm543_vm1, %v11082_v48  ;;  %v11086_v29 = vld [vmem:[#allocation79_spill] sm:$0xff] }
 0x124   : > { %7151 = vmatprep.mubr.msk.f32.mxu0 %vm543_vm1, %v8657_v9  ;;  %7392 = vmatprep.subr.mxu1 %v9692_v34  ;;  %v11085_v9 = vld [vmem:[#allocation77_spill] sm:$0xff]  ;;  %v9814_v48 = vld [vmem:[%s8168_s9 + $0x350] sm:$0xff] }
 0x126   : > { %6712 = vmatmul.mubr.msk.f32.gmra.mrb[2].mxu1 %vm543_vm1, %v11083_v17  ;;  %7152 = vmatmul.mubr.msk.f32.gmra.mrb[34].mxu0 %vm543_vm1, %v8660_v62  ;;  %v11088_v62 = vld [vmem:[#allocation83_spill] sm:$0xff] }
 0x127   : > { %6714 = vmatprep.mubr.msk.f32.mxu1 %vm543_vm1, %v11084_v35  ;;  %7154 = vmatprep.mubr.msk.f32.mxu0 %vm543_vm1, %v8697_v5  ;;  %v11089_v5 = vld [vmem:[#allocation85_spill] sm:$0xff] }
 0x12a   : > { %6715 = vmatmul.mubr.msk.f32.gmra.mrb[4].mxu1 %vm543_vm1, %v11085_v9  ;;  %7155 = vmatmul.mubr.msk.f32.gmra.mrb[36].mxu0 %vm543_vm1, %v8700_v15  ;;  %v11090_v15 = vld [vmem:[#allocation87_spill] sm:$0xff] }
 0x12b   : > { %6717 = vmatprep.mubr.msk.f32.mxu1 %vm543_vm1, %v11086_v29  ;;  %7157 = vmatprep.mubr.msk.f32.mxu0 %vm543_vm1, %v8733_v23  ;;  %v11091_v23 = vld [vmem:[#allocation89_spill] sm:$0xff] }
 0x12e   : > { %6718 = vmatmul.mubr.msk.f32.gmra.mrb[6].mxu1 %vm543_vm1, %v11087_v43  ;;  %7158 = vmatmul.mubr.msk.f32.gmra.mrb[38].mxu0 %vm543_vm1, %v8736_v18  ;;  %v11092_v18 = vld [vmem:[#allocation91_spill] sm:$0xff] }
 0x12f   : > { %6720 = vmatprep.mubr.msk.f32.mxu1 %vm543_vm1, %v11088_v62  ;;  %7160 = vmatprep.mubr.msk.f32.mxu0 %vm543_vm1, %v8768_v20  ;;  %v11093_v20 = vld [vmem:[#allocation93_spill] sm:$0xff] }
 0x132   : > { %6721 = vmatmul.mubr.msk.f32.gmra.mrb[8].mxu1 %vm543_vm1, %v11089_v5  ;;  %7161 = vmatmul.mubr.msk.f32.gmra.mrb[40].mxu0 %vm543_vm1, %v8771_v4  ;;  %v11094_v4 = vld [vmem:[#allocation95_spill] sm:$0xff] }
 0x133   : > { %6723 = vmatprep.mubr.msk.f32.mxu1 %vm543_vm1, %v11090_v15  ;;  %7163 = vmatprep.mubr.msk.f32.mxu0 %vm543_vm1, %v8803_v22  ;;  %v11095_v22 = vld [vmem:[#allocation97_spill] sm:$0xff] }
 0x136   : > { %6724 = vmatmul.mubr.msk.f32.gmra.mrb[10].mxu1 %vm543_vm1, %v11091_v23  ;;  %7164 = vmatmul.mubr.msk.f32.gmra.mrb[42].mxu0 %vm543_vm1, %v8806_v42  ;;  %v11096_v42 = vld [vmem:[#allocation99_spill] sm:$0xff] }
 0x137   : > { %6726 = vmatprep.mubr.msk.f32.mxu1 %vm543_vm1, %v11092_v18  ;;  %7166 = vmatprep.mubr.msk.f32.mxu0 %vm543_vm1, %v8838_v40  ;;  %v11097_v40 = vld [vmem:[#allocation101_spill] sm:$0xff] }
 0x13a   : > { %6727 = vmatmul.mubr.msk.f32.gmra.mrb[12].mxu1 %vm543_vm1, %v11093_v20  ;;  %7167 = vmatmul.mubr.msk.f32.gmra.mrb[44].mxu0 %vm543_vm1, %v8841_v37  ;;  %v11098_v37 = vld [vmem:[#allocation103_spill] sm:$0xff] }
 0x13b   : > { %6729 = vmatprep.mubr.msk.f32.mxu1 %vm543_vm1, %v11094_v4  ;;  %7169 = vmatprep.mubr.msk.f32.mxu0 %vm543_vm1, %v8873_v45  ;;  %v11099_v45 = vld [vmem:[#allocation105_spill] sm:$0xff] }
 0x13e   : > { %6730 = vmatmul.mubr.msk.f32.gmra.mrb[14].mxu1 %vm543_vm1, %v11095_v22  ;;  %7170 = vmatmul.mubr.msk.f32.gmra.mrb[46].mxu0 %vm543_vm1, %v8876_v58  ;;  %v11100_v58 = vld [vmem:[#allocation107_spill] sm:$0xff] }
 0x13f   : > { %6732 = vmatprep.mubr.msk.f32.mxu1 %vm543_vm1, %v11096_v42  ;;  %7172 = vmatprep.mubr.msk.f32.mxu0 %vm543_vm1, %v8908_v56  ;;  %v11101_v56 = vld [vmem:[#allocation109_spill] sm:$0xff] }
 0x142   : > { %6733 = vmatmul.mubr.msk.f32.gmra.mrb[16].mxu1 %vm543_vm1, %v11097_v40  ;;  %7173 = vmatmul.mubr.msk.f32.gmra.mrb[48].mxu0 %vm543_vm1, %v8911_v8  ;;  %v11103_v8 = vld [vmem:[#allocation113_spill] sm:$0xff] }
 0x143   : > { %6735 = vmatprep.mubr.msk.f32.mxu1 %vm543_vm1, %v11098_v37  ;;  %7175 = vmatprep.mubr.msk.f32.mxu0 %vm543_vm1, %v8943_v51  ;;  %v11102_v51 = vld [vmem:[#allocation111_spill] sm:$0xff] }
 0x146   : > { %6736 = vmatmul.mubr.msk.f32.gmra.mrb[18].mxu1 %vm543_vm1, %v11099_v45  ;;  %7176 = vmatmul.mubr.msk.f32.gmra.mrb[50].mxu0 %vm543_vm1, %v8946_v16  ;;  %v11104_v16 = vld [vmem:[#allocation115_spill] sm:$0xff] }
 0x147   : > { %6738 = vmatprep.mubr.msk.f32.mxu1 %vm543_vm1, %v11100_v58  ;;  %7178 = vmatprep.mubr.msk.f32.mxu0 %vm543_vm1, %v8978_v12  ;;  %v11105_v12 = vld [vmem:[#allocation117_spill] sm:$0xff] }
 0x14a   : > { %6739 = vmatmul.mubr.msk.f32.gmra.mrb[20].mxu1 %vm543_vm1, %v11101_v56  ;;  %7179 = vmatmul.mubr.msk.f32.gmra.mrb[52].mxu0 %vm543_vm1, %v8981_v30  ;;  %v11107_v30 = vld [vmem:[#allocation122_spill] sm:$0xff] }
 0x14b   : > { %6741 = vmatprep.mubr.msk.f32.mxu1 %vm543_vm1, %v11102_v51  ;;  %7181 = vmatprep.mubr.msk.f32.mxu0 %vm543_vm1, %v9013_v61  ;;  %v11106_v61 = vld [vmem:[#allocation119_spill] sm:$0xff] }
 0x14e   : > { %6742 = vmatmul.mubr.msk.f32.gmra.mrb[22].mxu1 %vm543_vm1, %v11103_v8  ;;  %7182 = vmatmul.mubr.msk.f32.gmra.mrb[54].mxu0 %vm543_vm1, %v9016_v52  ;;  %v7981_v52 = vld [vmem:[%s8168_s9 + $0x1b0] sm:$0xff] }
 0x14f   : > { %6744 = vmatprep.mubr.msk.f32.mxu1 %vm543_vm1, %v11104_v16  ;;  %7184 = vmatprep.mubr.msk.f32.mxu0 %vm543_vm1, %v9048_v46  ;;  %v1651_v46 = vrot.slane %v7981_v52, 2 }
 0x152   : > { %6745 = vmatmul.mubr.msk.f32.gmra.mrb[24].mxu1 %vm543_vm1, %v11105_v12  ;;  %7185 = vmatmul.mubr.msk.f32.gmra.mrb[56].mxu0 %vm543_vm1, %v11035_v63  ;;  %v7982_v63 = vld [vmem:[%s8168_s9 + $0x1b8] sm:$0xff] }
 0x153   : > { %6747 = vmatprep.mubr.msk.f32.mxu1 %vm543_vm1, %v11106_v61  ;;  %7187 = vmatprep.mubr.msk.f32.mxu0 %vm543_vm1, %v9083_v50  ;;  %v1652_v44 = vrot.slane %v7982_v63, 2  ;;  %v11108_v50 = vld [vmem:[#allocation126_spill] sm:$0xff]  ;;  %v11109_v63 = vld [vmem:[#allocation13_spill] sm:$0xff] }
 0x155   : > { %v1653_v17 = vsel %vm1570_vm2, %v1651_v46, %v1652_v44  ;;  %v11111_v46 = vld [vmem:[#allocation15_spill] sm:$0xff] }
 0x156   : > { %6748 = vmatmul.mubr.msk.f32.gmra.mrb[26].mxu1 %vm543_vm1, %v11107_v30  ;;  %7188 = vmatmul.mubr.msk.f32.gmra.mrb[58].mxu0 %vm543_vm1, %v9086_v55  ;;  %v7983_v55 = vld [vmem:[%s8168_s9 + $0x1c0] sm:$0x3] }
 0x157   : > { %6750 = vmatprep.mubr.msk.f32.mxu1 %vm543_vm1, %v9078_v24  ;;  %7190 = vmatprep.mubr.msk.f32.mxu0 %vm543_vm1, %v9392_v25  ;;  %v1654_v54 = vrot.slane %v7983_v55, 2  ;;  %v11110_v55 = vld [vmem:[#allocation14_spill] sm:$0xff] }
 0x159   : > { %v1655_v52 = vsel %vm1570_vm2, %v1652_v44, %v1654_v54  ;;  %v11112_v44 = vld [vmem:[#allocation18_spill] sm:$0xff]  ;;  %v11113_v54 = vld [vmem:[#allocation19_spill] sm:$0xff] }
 0x15a   : > { %6751 = vmatmul.mubr.msk.f32.gmra.mrb[28].mxu1 %vm543_vm1, %v11108_v50  ;;  %7191 = vmatmul.mubr.msk.f32.gmra.mrb[60].mxu0 %vm543_vm1, %v9395_v28 }
 0x15b   : > { %6753 = vmatprep.mubr.msk.f32.mxu1 %vm543_vm1, %v9113_v2  ;;  %7193 = vmatprep.mubr.msk.f32.mxu0 %vm543_vm1, %v9802_v13 }
 0x15e   : > { %6754 = vmatmul.mubr.msk.f32.gmra.mrb[30].mxu1 %vm543_vm1, %v9130_v53  ;;  %7194 = vmatmul.mubr.msk.f32.gmra.mrb[62].mxu0 %vm543_vm1, %v9814_v48 }
 0x15f   : > { %6756 = vmatprep.mubr.msk.f32.mxu1 %vm543_vm1, %v1653_v17  ;;  %7198 = vmatprep.mubr.msk.f32.mxu0 %vm543_vm1, %v11109_v63  ;;  %v11117_v17 = vld [vmem:[#allocation27_spill] sm:$0xff] }
 0x160   : > { %v11119_v63 = vld [vmem:[#allocation31_spill] sm:$0xff] }
 0x162   : > { %6757 = vmatmul.mubr.msk.f32.gmra.mrb[32].mxu1 %vm543_vm1, %v1655_v52  ;;  %7199 = vmatmul.mubr.msk.f32.vlgmr.msra.gmra.mrb[0].mxu0 %vm543_vm1, %v11110_v55  ;;  %v11118_v52 = vld [vmem:[#allocation30_spill] sm:$0xff] }
 0x163   : > { %6759 = vmatprep.mubr.msk.f32.mxu1 %vm543_vm1, %v9157_v27  ;;  %7295 = vmatpush3.msra.mxu0 %v9457_v39  ;;  %v11114_v27 = vld [vmem:[#allocation22_spill] sm:$0xff]  ;;  %v11115_v39 = vld [vmem:[#allocation23_spill] sm:$0xff] }
 0x164   : > { %7201 = vmatprep.mubr.msk.f32.mxu0 %vm543_vm1, %v11111_v46  ;;  %v11120_v55 = vld [vmem:[#allocation34_spill] sm:$0xff]  ;;  %v11121_v46 = vld [vmem:[#allocation5_spill] sm:$0xff] }
 0x166   : > { %6760 = vmatmul.mubr.msk.f32.gmra.mrb[34].mxu1 %vm543_vm1, %v9170_v60  ;;  %7202 = vmatmul.mubr.msk.f32.gmra.mrb[2].mxu0 %vm543_vm1, %v11112_v44  ;;  %v11116_v60 = vld [vmem:[#allocation26_spill] sm:$0xff]  ;;  %v11122_v44 = vld [vmem:[#allocation35_spill] sm:$0xff] }
 0x167   : > { %6762 = vmatprep.mubr.msk.f32.mxu1 %vm543_vm1, %v9174_v14  ;;  %7204 = vmatprep.mubr.msk.f32.mxu0 %vm543_vm1, %v11113_v54  ;;  %v11123_v54 = vld [vmem:[#allocation38_spill] sm:$0xff] }
 0x16a   : > { %6763 = vmatmul.mubr.msk.f32.gmra.mrb[36].mxu1 %vm543_vm1, %v9193_v19  ;;  %7205 = vmatmul.mubr.msk.f32.gmra.mrb[4].mxu0 %vm543_vm1, %v11114_v27  ;;  %v11124_v27 = vld [vmem:[#allocation46_spill] sm:$0xff] }
 0x16b   : > { %6765 = vmatprep.mubr.msk.f32.mxu1 %vm543_vm1, %v9197_v7  ;;  %7207 = vmatprep.mubr.msk.f32.mxu0 %vm543_vm1, %v11115_v39  ;;  %v11125_v39 = vld [vmem:[#allocation39_spill] sm:$0xff] }
 0x16e   : > { %6766 = vmatmul.mubr.msk.f32.gmra.mrb[38].mxu1 %vm543_vm1, %v9211_v59  ;;  %7208 = vmatmul.mubr.msk.f32.gmra.mrb[6].mxu0 %vm543_vm1, %v11116_v60  ;;  %v11126_v60 = vld [vmem:[#allocation42_spill] sm:$0xff] }
 0x16f   : > { %6768 = vmatprep.mubr.msk.f32.mxu1 %vm543_vm1, %v9215_v21  ;;  %7210 = vmatprep.mubr.msk.f32.mxu0 %vm543_vm1, %v11117_v17  ;;  %v11127_v17 = vld [vmem:[#allocation8_spill] sm:$0xff] }
 0x172   : > { %6769 = vmatmul.mubr.msk.f32.gmra.mrb[40].mxu1 %vm543_vm1, %v9228_v31  ;;  %7211 = vmatmul.mubr.msk.f32.gmra.mrb[8].mxu0 %vm543_vm1, %v11118_v52  ;;  %v11128_v52 = vld [vmem:[#allocation43_spill] sm:$0xff] }
 0x173   : > { %6771 = vmatprep.mubr.msk.f32.mxu1 %vm543_vm1, %v9232_v26  ;;  %7213 = vmatprep.mubr.msk.f32.mxu0 %vm543_vm1, %v11119_v63  ;;  %v11129_v63 = vld [vmem:[#allocation47_spill] sm:$0xff] }
 0x176   : > { %6772 = vmatmul.mubr.msk.f32.gmra.mrb[42].mxu1 %vm543_vm1, %v9245_v41  ;;  %7214 = vmatmul.mubr.msk.f32.gmra.mrb[10].mxu0 %vm543_vm1, %v11120_v55  ;;  %v11130_v55 = vld [vmem:[#allocation10_spill] sm:$0xff] }
 0x177   : > { %6774 = vmatprep.mubr.msk.f32.mxu1 %vm543_vm1, %v11121_v46  ;;  %7216 = vmatprep.mubr.msk.f32.mxu0 %vm543_vm1, %v11122_v44  ;;  %v11131_v44 = vld [vmem:[#allocation48_spill] sm:$0xff] }
 0x178   : > { %v11203_v46 = vld [vmem:[#allocation140_spill] sm:$0xff] }
 0x17a   : > { %6775 = vmatmul.mubr.msk.f32.gmra.mrb[44].mxu1 %vm543_vm1, %v9262_v49  ;;  %7217 = vmatmul.mubr.msk.f32.gmra.mrb[12].mxu0 %vm543_vm1, %v11123_v54  ;;  %v11132_v54 = vld [vmem:[#allocation11_spill] sm:$0xff]  ;;  %v4184_v49 = vrot.slane %v9814_v48, 1 }
 0x17b   : > { %6777 = vmatprep.mubr.msk.f32.mxu1 %vm543_vm1, %v11124_v27  ;;  %7219 = vmatprep.mubr.msk.f32.mxu0 %vm543_vm1, %v11125_v39  ;;  %v11133_v39 = vld [vmem:[#allocation51_spill] sm:$0xff]  ;;  %v11173_v27 = vld [vmem:[#allocation102_spill] sm:$0xff] }
 0x17e   : > { %6778 = vmatmul.mubr.msk.f32.gmra.mrb[46].mxu1 %vm543_vm1, %v9279_v57  ;;  %7220 = vmatmul.mubr.msk.f32.gmra.mrb[14].mxu0 %vm543_vm1, %v11126_v60  ;;  %v11134_v60 = vld [vmem:[#allocation12_spill] sm:$0xff] }
 0x17f   : > { %6780 = vmatprep.mubr.msk.f32.mxu1 %vm543_vm1, %v11127_v17  ;;  %7222 = vmatprep.mubr.msk.f32.mxu0 %vm543_vm1, %v11128_v52  ;;  %v11135_v52 = vld [vmem:[#allocation52_spill] sm:$0xff]  ;;  %v11151_v17 = vld [vmem:[#allocation70_spill] sm:$0xff] }
 0x180   : > { %v11171_v57 = vld [vmem:[#allocation100_spill] sm:$0xff] }
 0x182   : > { %6781 = vmatmul.mubr.msk.f32.gmra.mrb[48].mxu1 %vm543_vm1, %v9296_v1  ;;  %7223 = vmatmul.mubr.msk.f32.gmra.mrb[16].mxu0 %vm543_vm1, %v11129_v63  ;;  %v11136_v63 = vld [vmem:[#allocation16_spill] sm:$0xff]  ;;  %v11142_v1 = vld [vmem:[#allocation21_spill] sm:$0xff] }
 0x183   : > { %6783 = vmatprep.mubr.msk.f32.mxu1 %vm543_vm1, %v11130_v55  ;;  %7225 = vmatprep.mubr.msk.f32.mxu0 %vm543_vm1, %v11131_v44  ;;  %v11137_v55 = vld [vmem:[#allocation55_spill] sm:$0xff]  ;;  %v11138_v44 = vld [vmem:[#allocation17_spill] sm:$0xff] }
 0x186   : > { %6784 = vmatmul.mubr.msk.f32.gmra.mrb[50].mxu1 %vm543_vm1, %v11132_v54  ;;  %7226 = vmatmul.mubr.msk.f32.gmra.mrb[18].mxu0 %vm543_vm1, %v11133_v39  ;;  %v11139_v54 = vld [vmem:[#allocation56_spill] sm:$0xff] }
 0x187   : > { %6786 = vmatprep.mubr.msk.f32.mxu1 %vm543_vm1, %v11134_v60  ;;  %7228 = vmatprep.mubr.msk.f32.mxu0 %vm543_vm1, %v11135_v52  ;;  %v11140_v39 = vld [vmem:[#allocation20_spill] sm:$0xff]  ;;  %v11141_v60 = vld [vmem:[#allocation59_spill] sm:$0xff] }
 0x188   : > { %v11143_v52 = vld [vmem:[#allocation60_spill] sm:$0xff] }
 0x18a   : > { %6787 = vmatmul.mubr.msk.f32.gmra.mrb[52].mxu1 %vm543_vm1, %v11136_v63  ;;  %7229 = vmatmul.mubr.msk.f32.gmra.mrb[20].mxu0 %vm543_vm1, %v11137_v55  ;;  %v11144_v63 = vld [vmem:[#allocation24_spill] sm:$0xff] }
 0x18b   : > { %6789 = vmatprep.mubr.msk.f32.mxu1 %vm543_vm1, %v11138_v44  ;;  %7231 = vmatprep.mubr.msk.f32.mxu0 %vm543_vm1, %v11139_v54  ;;  %v11145_v55 = vld [vmem:[#allocation64_spill] sm:$0xff]  ;;  %v11146_v44 = vld [vmem:[#allocation25_spill] sm:$0xff] }
 0x18c   : > { %v11147_v54 = vld [vmem:[#allocation65_spill] sm:$0xff] }
 0x18e   : > { %6790 = vmatmul.mubr.msk.f32.gmra.mrb[54].mxu1 %vm543_vm1, %v11140_v39  ;;  %7232 = vmatmul.mubr.msk.f32.gmra.mrb[22].mxu0 %vm543_vm1, %v11141_v60  ;;  %v4178_v60 = vrot.slane %v9655_v38, 1  ;;  %v9932_v39 = vld [vmem:[%s8168_s9 + $0x1a8] sm:$0x3] }
 0x18f   : > { %6792 = vmatprep.mubr.msk.f32.mxu1 %vm543_vm1, %v11142_v1  ;;  %7234 = vmatprep.mubr.msk.f32.mxu0 %vm543_vm1, %v11143_v52  ;;  %v4179_v1 = vrot.slane %v9670_v0, 1  ;;  %v11148_v52 = vld [vmem:[#allocation28_spill] sm:$0xff] }
 0x192   : > { %6793 = vmatmul.mubr.msk.f32.gmra.mrb[56].mxu1 %vm543_vm1, %v11144_v63  ;;  %7235 = vmatmul.mubr.msk.f32.gmra.mrb[24].mxu0 %vm543_vm1, %v11145_v55  ;;  %v11149_v63 = vld [vmem:[#allocation68_spill] sm:$0xff]  ;;  %v11150_v55 = vld [vmem:[#allocation69_spill] sm:$0xff] }
 0x193   : > { %6795 = vmatprep.mubr.msk.f32.mxu1 %vm543_vm1, %v11146_v44  ;;  %7237 = vmatprep.mubr.msk.f32.mxu0 %vm543_vm1, %v11147_v54  ;;  %v4181_v54 = vrot.slane %v9932_v39, 1  ;;  %v4180_v44 = vsel %vm380_vm0, %v4178_v60, %v4179_v1  ;;  %v11152_v60 = vld [vmem:[#allocation78_spill] sm:$0xff] }
 0x196   : > { %6796 = vmatmul.mubr.msk.f32.gmra.mrb[58].mxu1 %vm543_vm1, %v11148_v52  ;;  %7238 = vmatmul.mubr.msk.f32.gmra.mrb[26].mxu0 %vm543_vm1, %v11149_v63  ;;  %v4182_v63 = vsel %vm380_vm0, %v4179_v1, %v4181_v54  ;;  %v11154_v1 = vld [vmem:[#allocation82_spill] sm:$0xff]  ;;  %v11156_v54 = vld [vmem:[#allocation41_spill] sm:$0xff] }
 0x197   : > { %6798 = vmatprep.mubr.msk.f32.mxu1 %vm543_vm1, %v9385_v11  ;;  %7240 = vmatprep.mubr.msk.f32.mxu0 %vm543_vm1, %v11150_v55  ;;  %v7984_v55 = vld [vmem:[%s8168_s9 + $0x18] sm:$0xff]  ;;  %v11169_v52 = vld [vmem:[#allocation98_spill] sm:$0xff] }
 0x198   : > { %v11167_v11 = vld [vmem:[#allocation96_spill] sm:$0xff] }
 0x19a   : > { %6799 = vmatmul.mubr.msk.f32.gmra.mrb[60].mxu1 %vm543_vm1, %v9404_v3  ;;  %7241 = vmatmul.mubr.msk.f32.gmra.mrb[28].mxu0 %vm543_vm1, %v11151_v17  ;;  %v7985_v3 = vld [vmem:[%s8168_s9 + $0x20] sm:$0xff]  ;;  %v11153_v17 = vld [vmem:[#allocation80_spill] sm:$0xff] }
 0x19b   : > { %6801 = vmatprep.mubr.msk.f32.mxu1 %vm543_vm1, %v9408_v10  ;;  %7243 = vmatprep.mubr.msk.f32.mxu0 %vm543_vm1, %v4180_v44  ;;  %v11155_v44 = vld [vmem:[#allocation84_spill] sm:$0xff]  ;;  %v11165_v10 = vld [vmem:[#allocation94_spill] sm:$0xff] }
 0x19e   : > { %6802 = vmatmul.mubr.msk.f32.gmra.mrb[62].mxu1 %vm543_vm1, %v9424_v32  ;;  %7244 = vmatmul.mubr.msk.f32.gmra.mrb[30].mxu0 %vm543_vm1, %v4182_v63  ;;  %v11159_v63 = vld [vmem:[#allocation88_spill] sm:$0xff] }
 0x19f   : > { %6806 = vmatprep.mubr.msk.f32.mxu1 %vm543_vm1, %v7984_v55  ;;  %7246 = vmatprep.mubr.msk.f32.mxu0 %vm543_vm1, %v11152_v60  ;;  %v11161_v55 = vld [vmem:[#allocation90_spill] sm:$0xff]  ;;  %v11163_v32 = vld [vmem:[#allocation92_spill] sm:$0xff] }
 0x1a2   : > { %6807 = vmatmul.mubr.msk.f32.vlgmr.msra.gmra.mrb[0].mxu1 %vm543_vm1, %v7985_v3  ;;  %7247 = vmatmul.mubr.msk.f32.gmra.mrb[32].mxu0 %vm543_vm1, %v11153_v17  ;;  %v11157_v3 = vld [vmem:[#allocation86_spill] sm:$0xff] }
 0x1a3   : > { %7393 = vmatpush3.msra.mxu1 %v9692_v34  ;;  %6809 = vmatprep.mubr.msk.f32.mxu1 %vm543_vm1, %v9448_v47  ;;  %v11158_v34 = vld [vmem:[#allocation44_spill] sm:$0xff] }
 0x1a4   : > { %7249 = vmatprep.mubr.msk.f32.mxu0 %vm543_vm1, %v11154_v1  ;;  %v11160_v47 = vld [vmem:[#allocation124_spill] sm:$0xff] }
 0x1a6   : > { %6810 = vmatmul.mubr.msk.f32.gmra.mrb[2].mxu1 %vm543_vm1, %v9460_v33  ;;  %7250 = vmatmul.mubr.msk.f32.gmra.mrb[34].mxu0 %vm543_vm1, %v11155_v44  ;;  %v11162_v33 = vld [vmem:[#allocation45_spill] sm:$0xff] }
 0x1a7   : > { %6812 = vmatprep.mubr.msk.f32.mxu1 %vm543_vm1, %v11156_v54  ;;  %7252 = vmatprep.mubr.msk.f32.mxu0 %vm543_vm1, %v11157_v3  ;;  %v11164_v54 = vld [vmem:[#allocation49_spill] sm:$0xff] }
 0x1aa   : > { %6813 = vmatmul.mubr.msk.f32.gmra.mrb[4].mxu1 %vm543_vm1, %v11158_v34  ;;  %7253 = vmatmul.mubr.msk.f32.gmra.mrb[36].mxu0 %vm543_vm1, %v11159_v63  ;;  %v11166_v34 = vld [vmem:[#allocation50_spill] sm:$0xff] }
 0x1ab   : > { %6815 = vmatprep.mubr.msk.f32.mxu1 %vm543_vm1, %v11160_v47  ;;  %7255 = vmatprep.mubr.msk.f32.mxu0 %vm543_vm1, %v11161_v55  ;;  %v11168_v47 = vld [vmem:[#allocation53_spill] sm:$0xff] }
 0x1ae   : > { %6816 = vmatmul.mubr.msk.f32.gmra.mrb[6].mxu1 %vm543_vm1, %v11162_v33  ;;  %7256 = vmatmul.mubr.msk.f32.gmra.mrb[38].mxu0 %vm543_vm1, %v11163_v32  ;;  %v11170_v33 = vld [vmem:[#allocation54_spill] sm:$0xff] }
 0x1af   : > { %6818 = vmatprep.mubr.msk.f32.mxu1 %vm543_vm1, %v11164_v54  ;;  %7258 = vmatprep.mubr.msk.f32.mxu0 %vm543_vm1, %v11165_v10  ;;  %v11172_v54 = vld [vmem:[#allocation57_spill] sm:$0xff] }
 0x1b2   : > { %6819 = vmatmul.mubr.msk.f32.gmra.mrb[8].mxu1 %vm543_vm1, %v11166_v34  ;;  %7259 = vmatmul.mubr.msk.f32.gmra.mrb[40].mxu0 %vm543_vm1, %v11167_v11  ;;  %v11174_v34 = vld [vmem:[#allocation58_spill] sm:$0xff]  ;;  %v11175_v11 = vld [vmem:[#allocation104_spill] sm:$0xff] }
 0x1b3   : > { %6821 = vmatprep.mubr.msk.f32.mxu1 %vm543_vm1, %v11168_v47  ;;  %7261 = vmatprep.mubr.msk.f32.mxu0 %vm543_vm1, %v11169_v52  ;;  %v11176_v47 = vld [vmem:[#allocation66_spill] sm:$0xff] }
 0x1b4   : > { %v11177_v52 = vld [vmem:[#allocation106_spill] sm:$0xff] }
 0x1b6   : > { %6822 = vmatmul.mubr.msk.f32.gmra.mrb[10].mxu1 %vm543_vm1, %v11170_v33  ;;  %7262 = vmatmul.mubr.msk.f32.gmra.mrb[42].mxu0 %vm543_vm1, %v11171_v57  ;;  %v11178_v33 = vld [vmem:[#allocation67_spill] sm:$0xff]  ;;  %v11179_v57 = vld [vmem:[#allocation108_spill] sm:$0xff] }
 0x1b7   : > { %6824 = vmatprep.mubr.msk.f32.mxu1 %vm543_vm1, %v11172_v54  ;;  %7264 = vmatprep.mubr.msk.f32.mxu0 %vm543_vm1, %v11173_v27  ;;  %v11180_v54 = vld [vmem:[#allocation75_spill] sm:$0xff]  ;;  %v11181_v27 = vld [vmem:[#allocation110_spill] sm:$0xff] }
 0x1ba   : > { %6825 = vmatmul.mubr.msk.f32.gmra.mrb[12].mxu1 %vm543_vm1, %v11174_v34  ;;  %7265 = vmatmul.mubr.msk.f32.gmra.mrb[44].mxu0 %vm543_vm1, %v11175_v11  ;;  %v11182_v34 = vld [vmem:[#allocation130_spill] sm:$0xff]  ;;  %v11183_v11 = vld [vmem:[#allocation112_spill] sm:$0xff] }
 0x1bb   : > { %6827 = vmatprep.mubr.msk.f32.mxu1 %vm543_vm1, %v11176_v47  ;;  %7267 = vmatprep.mubr.msk.f32.mxu0 %vm543_vm1, %v11177_v52  ;;  %v11184_v47 = vld [vmem:[#allocation131_spill] sm:$0xff]  ;;  %v11185_v52 = vld [vmem:[#allocation114_spill] sm:$0xff] }
 0x1be   : > { %6828 = vmatmul.mubr.msk.f32.gmra.mrb[14].mxu1 %vm543_vm1, %v11178_v33  ;;  %7268 = vmatmul.mubr.msk.f32.gmra.mrb[46].mxu0 %vm543_vm1, %v11179_v57  ;;  %v11186_v33 = vld [vmem:[#allocation132_spill] sm:$0xff] }
 0x1bf   : > { %6830 = vmatprep.mubr.msk.f32.mxu1 %vm543_vm1, %v11180_v54  ;;  %7270 = vmatprep.mubr.msk.f32.mxu0 %vm543_vm1, %v11181_v27  ;;  %v11187_v57 = vld [vmem:[#allocation116_spill] sm:$0xff]  ;;  %v11188_v54 = vld [vmem:[#allocation133_spill] sm:$0xff]  ;;  %v11189_v27 = vld [vmem:[#allocation118_spill] sm:$0xff] }
 0x1c2   : > { %6831 = vmatmul.mubr.msk.f32.gmra.mrb[16].mxu1 %vm543_vm1, %v11182_v34  ;;  %7271 = vmatmul.mubr.msk.f32.gmra.mrb[48].mxu0 %vm543_vm1, %v11183_v11  ;;  %v11190_v34 = vld [vmem:[#allocation134_spill] sm:$0xff]  ;;  %v11191_v11 = vld [vmem:[#allocation121_spill] sm:$0xff] }
 0x1c3   : > { %6833 = vmatprep.mubr.msk.f32.mxu1 %vm543_vm1, %v11184_v47  ;;  %7273 = vmatprep.mubr.msk.f32.mxu0 %vm543_vm1, %v11185_v52  ;;  %v11192_v47 = vld [vmem:[#allocation135_spill] sm:$0xff] }
 0x1c4   : > { %v11193_v52 = vld [vmem:[#allocation123_spill] sm:$0xff] }
 0x1c6   : > { %6834 = vmatmul.mubr.msk.f32.gmra.mrb[18].mxu1 %vm543_vm1, %v11186_v33  ;;  %7274 = vmatmul.mubr.msk.f32.gmra.mrb[50].mxu0 %vm543_vm1, %v11187_v57  ;;  %v11194_v33 = vld [vmem:[#allocation136_spill] sm:$0xff]  ;;  %v11198_v57 = vld [vmem:[#allocation138_spill] sm:$0xff] }
 0x1c7   : > { %6836 = vmatprep.mubr.msk.f32.mxu1 %vm543_vm1, %v11188_v54  ;;  %7276 = vmatprep.mubr.msk.f32.mxu0 %vm543_vm1, %v11189_v27  ;;  %v11195_v54 = vld [vmem:[#allocation125_spill] sm:$0xff] }
 0x1c8   : > { %v11196_v27 = vld [vmem:[#allocation137_spill] sm:$0xff] }
 0x1ca   : > { %6837 = vmatmul.mubr.msk.f32.gmra.mrb[20].mxu1 %vm543_vm1, %v11190_v34  ;;  %7277 = vmatmul.mubr.msk.f32.gmra.mrb[52].mxu0 %vm543_vm1, %v11191_v11  ;;  %v11197_v34 = vld [vmem:[#allocation127_spill] sm:$0xff]  ;;  %v2780_v11 = vrot.slane %v9392_v25, 1 }
 0x1cb   : > { %6839 = vmatprep.mubr.msk.f32.mxu1 %vm543_vm1, %v11192_v47  ;;  %7279 = vmatprep.mubr.msk.f32.mxu0 %vm543_vm1, %v11193_v52  ;;  %v2781_v47 = vrot.slane %v9395_v28, 1  ;;  %v11199_v52 = vld [vmem:[#allocation61_spill] sm:$0xff] }
 0x1cd   : > { %v10070_v32 = vsel %vm380_vm0, %v2780_v11, %v2781_v47 }
 0x1ce   : > { %6840 = vmatmul.mubr.msk.f32.gmra.mrb[22].mxu1 %vm543_vm1, %v11194_v33  ;;  %7280 = vmatmul.mubr.msk.f32.gmra.mrb[54].mxu0 %vm543_vm1, %v11195_v54  ;;  %v11200_v33 = vld [vmem:[#allocation139_spill] sm:$0xff]  ;;  %v11201_v54 = vld [vmem:[#allocation62_spill] sm:$0xff] }
 0x1cf   : > { %6842 = vmatprep.mubr.msk.f32.mxu1 %vm543_vm1, %v11196_v27  ;;  %7282 = vmatprep.mubr.msk.f32.mxu0 %vm543_vm1, %v11197_v34  ;;  %v11202_v27 = vld [vmem:[#allocation36_spill] sm:$0xff]  ;;  %v4183_v34 = vrot.slane %v9802_v13, 1 }
 0x1d0   : > { %v2783_v10 = vrot.slane %v11202_v27, 1 }
 0x1d2   : > { %6843 = vmatmul.mubr.msk.f32.gmra.mrb[24].mxu1 %vm543_vm1, %v11198_v57  ;;  %7283 = vmatmul.mubr.msk.f32.gmra.mrb[56].mxu0 %vm543_vm1, %v11199_v52  ;;  %v10073_v57 = vld [vmem:[%s8168_s9 + $0x358] sm:$0x3]  ;;  %v11205_v52 = vld [vmem:[#allocation141_spill] sm:$0xff]  ;;  %v10084_v27 = vsel %vm380_vm0, %v2781_v47, %v2783_v10  ;;  %v4650_v47 = vrot.slane %v9932_v39, 2 }
 0x1d3   : > { %6845 = vmatprep.mubr.msk.f32.mxu1 %vm543_vm1, %v11200_v33  ;;  %7285 = vmatprep.mubr.msk.f32.mxu0 %vm543_vm1, %v11201_v54  ;;  %v11204_v33 = vld [vmem:[#allocation128_spill] sm:$0xff]  ;;  %v4186_v11 = vrot.slane %v10073_v57, 1  ;;  %v4185_v54 = vsel %vm380_vm0, %v4183_v34, %v4184_v49  ;;  %v8014_v34 = vld [vmem:[%s8168_s9 + $0x308] sm:$0xff] }
 0x1d4   : > { %v11209_v39 = vld [vmem:[#allocation76_spill] sm:$0xff] }
 0x1d5   : > { %v4187_v10 = vsel %vm380_vm0, %v4184_v49, %v4186_v11  ;;  %v7989_v49 = vld [vmem:[%s8168_s9 + $0x1e0] sm:$0xff] }
 0x1d6   : > { %6846 = vmatmul.mubr.msk.f32.gmra.mrb[26].mxu1 %vm543_vm1, %v11203_v46  ;;  %7286 = vmatmul.mubr.msk.f32.gmra.mrb[58].mxu0 %vm543_vm1, %v11204_v33  ;;  %v7986_v46 = vld [vmem:[%s8168_s9 + $0x180] sm:$0xff] }
 0x1d7   : > { %6848 = vmatprep.mubr.msk.f32.mxu1 %vm543_vm1, %v11205_v52  ;;  %7288 = vmatprep.mubr.msk.f32.mxu0 %vm543_vm1, %v10070_v32  ;;  %v7987_v52 = vld [vmem:[%s8168_s9 + $0x1c8] sm:$0xff]  ;;  %v8016_v11 = vld [vmem:[%s8168_s9 + $0x320] sm:$0xff] }
 0x1da   : > { %6849 = vmatmul.mubr.msk.f32.gmra.mrb[28].mxu1 %vm543_vm1, %v9644_v6  ;;  %7289 = vmatmul.mubr.msk.f32.gmra.mrb[60].mxu0 %vm543_vm1, %v10084_v27  ;;  %v7988_v6 = vld [vmem:[%s8168_s9 + $0x1d0] sm:$0xff] }
 0x1db   : > { %6851 = vmatprep.mubr.msk.f32.mxu1 %vm543_vm1, %v7986_v46  ;;  %7291 = vmatprep.mubr.msk.f32.mxu0 %vm543_vm1, %v4185_v54  ;;  %v4648_v54 = vrot.slane %v9670_v0, 2  ;;  %v11208_v0 = vld [vmem:[#allocation73_spill] sm:$0xff]  ;;  %v11227_v46 = vld [vmem:[#allocation108_spill] sm:$0xff] }
 0x1de   : > { %6852 = vmatmul.mubr.msk.f32.gmra.mrb[30].mxu1 %vm543_vm1, %v9661_v36  ;;  %7292 = vmatmul.mubr.msk.f32.gmra.mrb[62].mxu0 %vm543_vm1, %v4187_v10  ;;  %v7990_v36 = vld [vmem:[%s8168_s9 + $0x1e8] sm:$0xff]  ;;  %v11228_v10 = vld [vmem:[#allocation16_spill] sm:$0xff] }
 0x1df   : > { %6854 = vmatprep.mubr.msk.f32.mxu1 %vm543_vm1, %v7987_v52  ;;  %7296 = vmatprep.mubr.msk.f32.mxu0 %vm543_vm1, %v11084_v35  ;;  %v7991_v35 = vld [vmem:[%s8168_s9 + $0x1f8] sm:$0xff]  ;;  %v11229_v52 = vld [vmem:[#allocation110_spill] sm:$0xff] }
 0x1e2   : > { %6855 = vmatmul.mubr.msk.f32.gmra.mrb[32].mxu1 %vm543_vm1, %v7988_v6  ;;  %7297 = vmatmul.mubr.msk.f32.vlgmr.msra.gmra.mrb[0].mxu0 %vm543_vm1, %v11085_v9  ;;  %v7992_v9 = vld [vmem:[%s8168_s9 + $0x200] sm:$0xff] }
 0x1e3   : > { %6857 = vmatprep.mubr.msk.f32.mxu1 %vm543_vm1, %v7989_v49  ;;  %7299 = vmatprep.mubr.msk.f32.mxu0 %vm543_vm1, %v11086_v29  ;;  %v7993_v29 = vld [vmem:[%s8168_s9 + $0x210] sm:$0xff]  ;;  %v11230_v6 = vld [vmem:[#allocation17_spill] sm:$0xff]  ;;  %v11231_v49 = vld [vmem:[#allocation112_spill] sm:$0xff] }
 0x1e6   : > { %6858 = vmatmul.mubr.msk.f32.gmra.mrb[34].mxu1 %vm543_vm1, %v7990_v36  ;;  %7300 = vmatmul.mubr.msk.f32.gmra.mrb[2].mxu0 %vm543_vm1, %v11087_v43  ;;  %v7994_v43 = vld [vmem:[%s8168_s9 + $0x218] sm:$0xff] }
 0x1e7   : > { %6860 = vmatprep.mubr.msk.f32.mxu1 %vm543_vm1, %v7991_v35  ;;  %7302 = vmatprep.mubr.msk.f32.mxu0 %vm543_vm1, %v11088_v62  ;;  %v7995_v62 = vld [vmem:[%s8168_s9 + $0x228] sm:$0xff]  ;;  %v11232_v36 = vld [vmem:[#allocation20_spill] sm:$0xff] }
 0x1e8   : > { %v11233_v35 = vld [vmem:[#allocation114_spill] sm:$0xff] }
 0x1ea   : > { %6861 = vmatmul.mubr.msk.f32.gmra.mrb[36].mxu1 %vm543_vm1, %v7992_v9  ;;  %7303 = vmatmul.mubr.msk.f32.gmra.mrb[4].mxu0 %vm543_vm1, %v11089_v5  ;;  %v7996_v5 = vld [vmem:[%s8168_s9 + $0x230] sm:$0xff]  ;;  %v11234_v9 = vld [vmem:[#allocation21_spill] sm:$0xff] }
 0x1eb   : > { %6863 = vmatprep.mubr.msk.f32.mxu1 %vm543_vm1, %v7993_v29  ;;  %7305 = vmatprep.mubr.msk.f32.mxu0 %vm543_vm1, %v11090_v15  ;;  %v7997_v15 = vld [vmem:[%s8168_s9 + $0x240] sm:$0xff]  ;;  %v11235_v29 = vld [vmem:[#allocation116_spill] sm:$0xff] }
 0x1ee   : > { %6864 = vmatmul.mubr.msk.f32.gmra.mrb[38].mxu1 %vm543_vm1, %v7994_v43  ;;  %7306 = vmatmul.mubr.msk.f32.gmra.mrb[6].mxu0 %vm543_vm1, %v11091_v23  ;;  %v7998_v23 = vld [vmem:[%s8168_s9 + $0x248] sm:$0xff]  ;;  %v11236_v43 = vld [vmem:[#allocation24_spill] sm:$0xff] }
 0x1ef   : > { %6866 = vmatprep.mubr.msk.f32.mxu1 %vm543_vm1, %v7995_v62  ;;  %7308 = vmatprep.mubr.msk.f32.mxu0 %vm543_vm1, %v11092_v18  ;;  %v7999_v18 = vld [vmem:[%s8168_s9 + $0x258] sm:$0xff]  ;;  %v11237_v62 = vld [vmem:[#allocation118_spill] sm:$0xff] }
 0x1f2   : > { %6867 = vmatmul.mubr.msk.f32.gmra.mrb[40].mxu1 %vm543_vm1, %v7996_v5  ;;  %7309 = vmatmul.mubr.msk.f32.gmra.mrb[8].mxu0 %vm543_vm1, %v11093_v20  ;;  %v8000_v20 = vld [vmem:[%s8168_s9 + $0x260] sm:$0xff] }
 0x1f3   : > { %6869 = vmatprep.mubr.msk.f32.mxu1 %vm543_vm1, %v7997_v15  ;;  %7311 = vmatprep.mubr.msk.f32.mxu0 %vm543_vm1, %v11094_v4  ;;  %v8001_v4 = vld [vmem:[%s8168_s9 + $0x270] sm:$0xff]  ;;  %v11238_v5 = vld [vmem:[#allocation25_spill] sm:$0xff] }
 0x1f4   : > { %v11239_v15 = vld [vmem:[#allocation121_spill] sm:$0xff] }
 0x1f6   : > { %6870 = vmatmul.mubr.msk.f32.gmra.mrb[42].mxu1 %vm543_vm1, %v7998_v23  ;;  %7312 = vmatmul.mubr.msk.f32.gmra.mrb[10].mxu0 %vm543_vm1, %v11095_v22  ;;  %v8002_v22 = vld [vmem:[%s8168_s9 + $0x278] sm:$0xff] }
 0x1f7   : > { %6872 = vmatprep.mubr.msk.f32.mxu1 %vm543_vm1, %v7999_v18  ;;  %7314 = vmatprep.mubr.msk.f32.mxu0 %vm543_vm1, %v11096_v42  ;;  %v8003_v42 = vld [vmem:[%s8168_s9 + $0x288] sm:$0xff]  ;;  %v11240_v23 = vld [vmem:[#allocation28_spill] sm:$0xff]  ;;  %v11241_v18 = vld [vmem:[#allocation123_spill] sm:$0xff] }
 0x1fa   : > { %6873 = vmatmul.mubr.msk.f32.gmra.mrb[44].mxu1 %vm543_vm1, %v8000_v20  ;;  %7315 = vmatmul.mubr.msk.f32.gmra.mrb[12].mxu0 %vm543_vm1, %v11097_v40  ;;  %v8004_v40 = vld [vmem:[%s8168_s9 + $0x290] sm:$0xff]  ;;  %v11242_v20 = vld [vmem:[#allocation29_spill] sm:$0xff] }
 0x1fb   : > { %6875 = vmatprep.mubr.msk.f32.mxu1 %vm543_vm1, %v8001_v4  ;;  %7317 = vmatprep.mubr.msk.f32.mxu0 %vm543_vm1, %v11098_v37  ;;  %v8005_v37 = vld [vmem:[%s8168_s9 + $0x2a0] sm:$0xff] }
 0x1fc   : > { %v11243_v4 = vld [vmem:[#allocation125_spill] sm:$0xff] }
 0x1fe   : > { %6876 = vmatmul.mubr.msk.f32.gmra.mrb[46].mxu1 %vm543_vm1, %v8002_v22  ;;  %7318 = vmatmul.mubr.msk.f32.gmra.mrb[14].mxu0 %vm543_vm1, %v11099_v45  ;;  %v8006_v45 = vld [vmem:[%s8168_s9 + $0x2a8] sm:$0xff]  ;;  %v11244_v22 = vld [vmem:[#allocation32_spill] sm:$0xff] }
 0x1ff   : > { %6878 = vmatprep.mubr.msk.f32.mxu1 %vm543_vm1, %v8003_v42  ;;  %7320 = vmatprep.mubr.msk.f32.mxu0 %vm543_vm1, %v11100_v58  ;;  %v8007_v58 = vld [vmem:[%s8168_s9 + $0x2b8] sm:$0xff]  ;;  %v11245_v42 = vld [vmem:[#allocation127_spill] sm:$0xff] }
 0x202   : > { %6879 = vmatmul.mubr.msk.f32.gmra.mrb[48].mxu1 %vm543_vm1, %v8004_v40  ;;  %7321 = vmatmul.mubr.msk.f32.gmra.mrb[16].mxu0 %vm543_vm1, %v11101_v56  ;;  %v8008_v56 = vld [vmem:[%s8168_s9 + $0x2c0] sm:$0xff] }
 0x203   : > { %6881 = vmatprep.mubr.msk.f32.mxu1 %vm543_vm1, %v8005_v37  ;;  %7323 = vmatprep.mubr.msk.f32.mxu0 %vm543_vm1, %v11102_v51  ;;  %v8009_v51 = vld [vmem:[%s8168_s9 + $0x2d0] sm:$0xff]  ;;  %v11246_v40 = vld [vmem:[#allocation33_spill] sm:$0xff]  ;;  %v4652_v37 = vrot.slane %v9802_v13, 2  ;;  %v11251_v13 = vld [vmem:[#allocation120_spill] sm:$0xff] }
 0x206   : > { %6882 = vmatmul.mubr.msk.f32.gmra.mrb[50].mxu1 %vm543_vm1, %v8006_v45  ;;  %7324 = vmatmul.mubr.msk.f32.gmra.mrb[18].mxu0 %vm543_vm1, %v11103_v8  ;;  %v8010_v8 = vld [vmem:[%s8168_s9 + $0x2d8] sm:$0xff]  ;;  %v4653_v45 = vrot.slane %v9814_v48, 2 }
 0x207   : > { %6884 = vmatprep.mubr.msk.f32.mxu1 %vm543_vm1, %v8007_v58  ;;  %7326 = vmatprep.mubr.msk.f32.mxu0 %vm543_vm1, %v11104_v16  ;;  %v8011_v16 = vld [vmem:[%s8168_s9 + $0x2e8] sm:$0xff]  ;;  %v11247_v58 = vld [vmem:[#allocation61_spill] sm:$0xff] }
 0x20a   : > { %6885 = vmatmul.mubr.msk.f32.gmra.mrb[52].mxu1 %vm543_vm1, %v8008_v56  ;;  %7327 = vmatmul.mubr.msk.f32.gmra.mrb[20].mxu0 %vm543_vm1, %v11105_v12  ;;  %v8012_v12 = vld [vmem:[%s8168_s9 + $0x2f0] sm:$0xff]  ;;  %v11248_v56 = vld [vmem:[#allocation37_spill] sm:$0xff] }
 0x20b   : > { %6887 = vmatprep.mubr.msk.f32.mxu1 %vm543_vm1, %v8009_v51  ;;  %7329 = vmatprep.mubr.msk.f32.mxu0 %vm543_vm1, %v11106_v61  ;;  %v8013_v61 = vld [vmem:[%s8168_s9 + $0x300] sm:$0xff]  ;;  %v11249_v51 = vld [vmem:[#allocation62_spill] sm:$0xff] }
 0x20e   : > { %6888 = vmatmul.mubr.msk.f32.gmra.mrb[54].mxu1 %vm543_vm1, %v8010_v8  ;;  %7330 = vmatmul.mubr.msk.f32.gmra.mrb[22].mxu0 %vm543_vm1, %v11107_v30  ;;  %v4647_v30 = vrot.slane %v9655_v38, 2  ;;  %v11207_v38 = vld [vmem:[#allocation129_spill] sm:$0xff]  ;;  %v11250_v8 = vld [vmem:[#allocation40_spill] sm:$0xff] }
 0x20f   : > { %6890 = vmatprep.mubr.msk.f32.mxu1 %vm543_vm1, %v8011_v16  ;;  %7332 = vmatprep.mubr.msk.f32.mxu0 %vm543_vm1, %v9078_v24  ;;  %v8015_v24 = vld [vmem:[%s8168_s9 + $0x318] sm:$0xff]  ;;  %v4655_v16 = vrot.slane %v10073_v57, 2  ;;  %s5924_s9 = sshll.u32 %s8125_s16, 13  ;;  %s10576_s16 = scalar_lea.sflag [#allocation3], %s164_s4 }
 0x210   : > { %s10567_s19 = scalar_lea.hbm %s10620_s3, %s5924_s9 }
 0x211   : > { %v4656_v48 = vsel %vm1570_vm2, %v4653_v45, %v4655_v16 }
 0x212   : > { %6891 = vmatmul.mubr.msk.f32.gmra.mrb[56].mxu1 %vm543_vm1, %v8012_v12  ;;  %7333 = vmatmul.mubr.msk.f32.gmra.mrb[24].mxu0 %vm543_vm1, %v11108_v50  ;;  %v11206_v50 = vld [vmem:[#allocation63_spill] sm:$0xff]  ;;  %v4654_v12 = vsel %vm1570_vm2, %v4652_v37, %v4653_v45 }
 0x213   : > { %6893 = vmatprep.mubr.msk.f32.mxu1 %vm543_vm1, %v8013_v61  ;;  %7335 = vmatprep.mubr.msk.f32.mxu0 %vm543_vm1, %v9113_v2  ;;  %v4649_v2 = vsel %vm1570_vm2, %v4647_v30, %v4648_v54 }
 0x216   : > { %6894 = vmatmul.mubr.msk.f32.gmra.mrb[58].mxu1 %vm543_vm1, %v8014_v34  ;;  %7336 = vmatmul.mubr.msk.f32.gmra.mrb[26].mxu0 %vm543_vm1, %v9130_v53  ;;  %v4651_v53 = vsel %vm1570_vm2, %v4648_v54, %v4650_v47 }
 0x217   : > { %6896 = vmatprep.mubr.msk.f32.mxu1 %vm543_vm1, %v8015_v24  ;;  %7338 = vmatprep.mubr.msk.f32.mxu0 %vm543_vm1, %v11206_v50 }
 0x21a   : > { %6897 = vmatmul.mubr.msk.f32.gmra.mrb[60].mxu1 %vm543_vm1, %v8016_v11  ;;  %7339 = vmatmul.mubr.msk.f32.gmra.mrb[28].mxu0 %vm543_vm1, %v11207_v38 }
 0x21b   : > { %6899 = vmatprep.mubr.msk.f32.mxu1 %vm543_vm1, %v9392_v25  ;;  %7341 = vmatprep.mubr.msk.f32.mxu0 %vm543_vm1, %v4649_v2  ;;  %v11219_v25 = vld [vmem:[#allocation100_spill] sm:$0xff] }
 0x21e   : > { %6900 = vmatmul.mubr.msk.f32.gmra.mrb[62].mxu1 %vm543_vm1, %v9395_v28  ;;  %7342 = vmatmul.mubr.msk.f32.gmra.mrb[30].mxu0 %vm543_vm1, %v4651_v53  ;;  %v11218_v28 = vld [vmem:[#allocation8_spill] sm:$0xff] }
 0x21f   : > { %6952 = vmatprep.mubr.msk.f32.mxu1 %vm543_vm1, %v11208_v0  ;;  %7344 = vmatprep.mubr.msk.f32.mxu0 %vm543_vm1, %v9174_v14  ;;  %v11210_v14 = vld [vmem:[#allocation5_spill] sm:$0xff] }
 0x222   : > { %6953 = vmatmul.mubr.msk.f32.vlgmr.msra.gmra.mrb[32].mxu1 %vm543_vm1, %v11209_v39  ;;  %7345 = vmatmul.mubr.msk.f32.gmra.mrb[32].mxu0 %vm543_vm1, %v9193_v19  ;;  %v11211_v19 = vld [vmem:[#allocation92_spill] sm:$0xff] }
 0x223   : > { %6955 = vmatprep.mubr.msk.f32.mxu1 %vm543_vm1, %v11152_v60  ;;  %7347 = vmatprep.mubr.msk.f32.mxu0 %vm543_vm1, %v9197_v7  ;;  %v11212_v7 = vld [vmem:[#allocation6_spill] sm:$0xff]  ;;  %v11220_v60 = vld [vmem:[#allocation9_spill] sm:$0xff] }
 0x226   : > { %6956 = vmatmul.mubr.msk.f32.gmra.mrb[34].mxu1 %vm543_vm1, %v11153_v17  ;;  %7348 = vmatmul.mubr.msk.f32.gmra.mrb[34].mxu0 %vm543_vm1, %v9211_v59  ;;  %v11213_v59 = vld [vmem:[#allocation94_spill] sm:$0xff] }
 0x227   : > { %6958 = vmatprep.mubr.msk.f32.mxu1 %vm543_vm1, %v11154_v1  ;;  %7350 = vmatprep.mubr.msk.f32.mxu0 %vm543_vm1, %v9215_v21  ;;  %v11214_v21 = vld [vmem:[#allocation46_spill] sm:$0xff] }
 0x228   : > { %v11221_v17 = vld [vmem:[#allocation102_spill] sm:$0xff] }
 0x229   : > { %v11222_v1 = vld [vmem:[#allocation10_spill] sm:$0xff] }
 0x22a   : > { %6959 = vmatmul.mubr.msk.f32.gmra.mrb[36].mxu1 %vm543_vm1, %v11155_v44  ;;  %7351 = vmatmul.mubr.msk.f32.gmra.mrb[36].mxu0 %vm543_vm1, %v9228_v31  ;;  %v11215_v31 = vld [vmem:[#allocation96_spill] sm:$0xff] }
 0x22b   : > { %6961 = vmatprep.mubr.msk.f32.mxu1 %vm543_vm1, %v11157_v3  ;;  %7353 = vmatprep.mubr.msk.f32.mxu0 %vm543_vm1, %v9232_v26  ;;  %v11216_v26 = vld [vmem:[#allocation7_spill] sm:$0xff]  ;;  %v11223_v44 = vld [vmem:[#allocation104_spill] sm:$0xff] }
 0x22c   : > { %v11224_v3 = vld [vmem:[#allocation11_spill] sm:$0xff] }
 0x22e   : > { %6962 = vmatmul.mubr.msk.f32.gmra.mrb[38].mxu1 %vm543_vm1, %v11159_v63  ;;  %7354 = vmatmul.mubr.msk.f32.gmra.mrb[38].mxu0 %vm543_vm1, %v9245_v41  ;;  %v11217_v41 = vld [vmem:[#allocation98_spill] sm:$0xff] }
 0x22f   : > { %6964 = vmatprep.mubr.msk.f32.mxu1 %vm543_vm1, %v11161_v55  ;;  %7356 = vmatprep.mubr.msk.f32.mxu0 %vm543_vm1, %v11210_v14  ;;  %v11225_v63 = vld [vmem:[#allocation106_spill] sm:$0xff]  ;;  %v11226_v55 = vld [vmem:[#allocation12_spill] sm:$0xff] }
 0x232   : > { %6965 = vmatmul.mubr.msk.f32.gmra.mrb[40].mxu1 %vm543_vm1, %v11211_v19  ;;  %7357 = vmatmul.mubr.msk.f32.gmra.mrb[40].mxu0 %vm543_vm1, %v11212_v7 }
 0x233   : > { %6967 = vmatprep.mubr.msk.f32.mxu1 %vm543_vm1, %v11213_v59  ;;  %7359 = vmatprep.mubr.msk.f32.mxu0 %vm543_vm1, %v11214_v21 }
 0x236   : > { %6968 = vmatmul.mubr.msk.f32.gmra.mrb[42].mxu1 %vm543_vm1, %v11215_v31  ;;  %7360 = vmatmul.mubr.msk.f32.gmra.mrb[42].mxu0 %vm543_vm1, %v11216_v26 }
 0x237   : > { %6970 = vmatprep.mubr.msk.f32.mxu1 %vm543_vm1, %v11217_v41  ;;  %7362 = vmatprep.mubr.msk.f32.mxu0 %vm543_vm1, %v11218_v28 }
 0x23a   : > { %6971 = vmatmul.mubr.msk.f32.gmra.mrb[44].mxu1 %vm543_vm1, %v11219_v25  ;;  %7363 = vmatmul.mubr.msk.f32.gmra.mrb[44].mxu0 %vm543_vm1, %v11220_v60 }
 0x23b   : > { %6973 = vmatprep.mubr.msk.f32.mxu1 %vm543_vm1, %v11221_v17  ;;  %7365 = vmatprep.mubr.msk.f32.mxu0 %vm543_vm1, %v11222_v1 }
 0x23e   : > { %6974 = vmatmul.mubr.msk.f32.gmra.mrb[46].mxu1 %vm543_vm1, %v11223_v44  ;;  %7366 = vmatmul.mubr.msk.f32.gmra.mrb[46].mxu0 %vm543_vm1, %v11224_v3 }
 0x23f   : > { %6976 = vmatprep.mubr.msk.f32.mxu1 %vm543_vm1, %v11225_v63  ;;  %7368 = vmatprep.mubr.msk.f32.mxu0 %vm543_vm1, %v11226_v55  ;;  %v10411_v55 = vld [vmem:[%s10619_s2] ss:$0 sm:$0xff] }
 0x242   : > { %6977 = vmatmul.mubr.msk.f32.gmra.mrb[48].mxu1 %vm543_vm1, %v11227_v46  ;;  %7369 = vmatmul.mubr.msk.f32.gmra.mrb[48].mxu0 %vm543_vm1, %v11228_v10 }
 0x243   : > { %6979 = vmatprep.mubr.msk.f32.mxu1 %vm543_vm1, %v11229_v52  ;;  %7371 = vmatprep.mubr.msk.f32.mxu0 %vm543_vm1, %v11230_v6 }
 0x246   : > { %6980 = vmatmul.mubr.msk.f32.gmra.mrb[50].mxu1 %vm543_vm1, %v11231_v49  ;;  %7372 = vmatmul.mubr.msk.f32.gmra.mrb[50].mxu0 %vm543_vm1, %v11232_v36 }
 0x247   : > { %6982 = vmatprep.mubr.msk.f32.mxu1 %vm543_vm1, %v11233_v35  ;;  %7374 = vmatprep.mubr.msk.f32.mxu0 %vm543_vm1, %v11234_v9 }
 0x24a   : > { %6983 = vmatmul.mubr.msk.f32.gmra.mrb[52].mxu1 %vm543_vm1, %v11235_v29  ;;  %7375 = vmatmul.mubr.msk.f32.gmra.mrb[52].mxu0 %vm543_vm1, %v11236_v43 }
 0x24b   : > { %6985 = vmatprep.mubr.msk.f32.mxu1 %vm543_vm1, %v11237_v62  ;;  %7377 = vmatprep.mubr.msk.f32.mxu0 %vm543_vm1, %v11238_v5 }
 0x24e   : > { %6986 = vmatmul.mubr.msk.f32.gmra.mrb[54].mxu1 %vm543_vm1, %v11239_v15  ;;  %7378 = vmatmul.mubr.msk.f32.gmra.mrb[54].mxu0 %vm543_vm1, %v11240_v23 }
 0x24f   : > { %6988 = vmatprep.mubr.msk.f32.mxu1 %vm543_vm1, %v11241_v18  ;;  %7380 = vmatprep.mubr.msk.f32.mxu0 %vm543_vm1, %v11242_v20 }
 0x252   : > { %6989 = vmatmul.mubr.msk.f32.gmra.mrb[56].mxu1 %vm543_vm1, %v11243_v4  ;;  %7381 = vmatmul.mubr.msk.f32.gmra.mrb[56].mxu0 %vm543_vm1, %v11244_v22 }
 0x253   : > { %6991 = vmatprep.mubr.msk.f32.mxu1 %vm543_vm1, %v11245_v42  ;;  %7383 = vmatprep.mubr.msk.f32.mxu0 %vm543_vm1, %v11246_v40 }
 0x256   : > { %6992 = vmatmul.mubr.msk.f32.gmra.mrb[58].mxu1 %vm543_vm1, %v11247_v58  ;;  %7384 = vmatmul.mubr.msk.f32.gmra.mrb[58].mxu0 %vm543_vm1, %v11248_v56 }
 0x257   : > { %6994 = vmatprep.mubr.msk.f32.mxu1 %vm543_vm1, %v11249_v51  ;;  %7386 = vmatprep.mubr.msk.f32.mxu0 %vm543_vm1, %v11250_v8 }
 0x25a   : > { %6995 = vmatmul.mubr.msk.f32.gmra.mrb[60].mxu1 %vm543_vm1, %v11204_v33  ;;  %7387 = vmatmul.mubr.msk.f32.gmra.mrb[60].mxu0 %vm543_vm1, %v11251_v13 }
 0x25b   : > { %6997 = vmatprep.mubr.msk.f32.mxu1 %vm543_vm1, %v10070_v32  ;;  %7389 = vmatprep.mubr.msk.f32.mxu0 %vm543_vm1, %v4654_v12 }
 0x25e   : > { %6998 = vmatmul.mubr.msk.f32.gmra.mrb[62].mxu1 %vm543_vm1, %v10084_v27  ;;  %7390 = vmatmul.mubr.msk.f32.gmra.mrb[62].mxu0 %vm543_vm1, %v4656_v48 }
 0x275   : > { %v6808_v57 = vpop.f32.mrb[0].mxu1 }
 0x276   : > { %v2390_v61 = vpop.f32.mrb[1].mxu1 }
 0x279   : > { %v6811_v30 = vpop.f32.mrb[2].mxu1 }
 0x27a   : > { %v2400_v54 = vpop.f32.mrb[3].mxu1 }
 0x27d   : > { %v6814_v33 = vpop.f32.mrb[4].mxu1 }
 0x27e   : > { %v2410_v34 = vpop.f32.mrb[5].mxu1 }
 0x281   : > { %v6817_v24 = vpop.f32.mrb[6].mxu1 }
 0x282   : > { %v2420_v50 = vpop.f32.mrb[7].mxu1 }
 0x285   : > { %v6820_v47 = vpop.f32.mrb[8].mxu1 }
 0x286   : > { %v2430_v2 = vpop.f32.mrb[9].mxu1 }
 0x289   : > { %v10361_v32 = vpop.f32.mrb[10].mxu1 }
 0x28a   : > { %v10363_v11 = vpop.f32.mrb[11].mxu1 }
 0x28d   : > { %v10365_v38 = vpop.f32.mrb[12].mxu1 }
 0x28e   : > { %v10367_v53 = vpop.f32.mrb[13].mxu1 }
 0x291   : > { %v10369_v27 = vpop.f32.mrb[14].mxu1 }
 0x292   : > { %v10371_v0 = vpop.f32.mrb[15].mxu1 }
 0x295   : > { %v10373_v39 = vpop.f32.mrb[16].mxu1 }
 0x296   : > { %v10375_v14 = vpop.f32.mrb[17].mxu1 }
 0x299   : > { %v10377_v19 = vpop.f32.mrb[18].mxu1 }
 0x29a   : > { %v10379_v7 = vpop.f32.mrb[19].mxu1 }
 0x29d   : > { %v10381_v59 = vpop.f32.mrb[20].mxu1 }
 0x29e   : > { %v10383_v21 = vpop.f32.mrb[21].mxu1 }
 0x2a1   : > { %v10385_v31 = vpop.f32.mrb[22].mxu1 }
 0x2a2   : > { %v10387_v26 = vpop.f32.mrb[23].mxu1 }
 0x2a5   : > { %v10389_v41 = vpop.f32.mrb[24].mxu1 }
 0x2a6   : > { %v10391_v28 = vpop.f32.mrb[25].mxu1 }
 0x2a9   : > { %v10393_v25 = vpop.f32.mrb[26].mxu1 }
 0x2aa   : > { %v10395_v60 = vpop.f32.mrb[27].mxu1 }
 0x2ad   : > { %v10397_v17 = vpop.f32.mrb[28].mxu1 }
 0x2ae   : > { %v10399_v1 = vpop.f32.mrb[29].mxu1 }
 0x2b1   : > { %v10401_v44 = vpop.f32.mrb[30].mxu1 }
 0x2b2   : > { %v10403_v3 = vpop.f32.mrb[31].mxu1 }
 0x2b5   : > { %v7298_v63 = vpop.f32.mrb[0].mxu0 }
 0x2b6   : > { %v7394_v46 = vadd.f32 %v7298_v63, %v6808_v57  ;;  %v4733_v10 = vpop.f32.mrb[1].mxu0 }
 0x2b7   : > { %v7395_v52 = vadd.f32 %v4733_v10, %v2390_v61 }
 0x2b8   : > { %v5124_v6 = vadd.f32 %v7394_v46, %v10411_v55 }
 0x2b9   : > { %v5123_v49 = vadd.f32 %v7395_v52, %v10411_v55  ;;  %v7301_v36 = vpop.f32.mrb[2].mxu0 }
 0x2ba   : > { %5188 = vst [vmem:[%s10415_s8 + $0x8] sm:$0xff] %v5124_v6  ;;  %v7396_v35 = vadd.f32 %v7301_v36, %v6811_v30  ;;  %v4743_v9 = vpop.f32.mrb[3].mxu0 }
 0x2bb   : > { %5187 = vst [vmem:[%s10415_s8] sm:$0xff] %v5123_v49  ;;  %v7397_v29 = vadd.f32 %v4743_v9, %v2400_v54 }
 0x2bc   : > { %v5126_v43 = vadd.f32 %v7396_v35, %v10411_v55 }
 0x2bd   : > { %v5125_v62 = vadd.f32 %v7397_v29, %v10411_v55  ;;  %v7304_v5 = vpop.f32.mrb[4].mxu0 }
 0x2be   : > { %5190 = vst [vmem:[%s10415_s8 + $0x18] sm:$0xff] %v5126_v43  ;;  %v7398_v15 = vadd.f32 %v7304_v5, %v6814_v33  ;;  %v4753_v23 = vpop.f32.mrb[5].mxu0 }
 0x2bf   : > { %5189 = vst [vmem:[%s10415_s8 + $0x10] sm:$0xff] %v5125_v62  ;;  %v7399_v18 = vadd.f32 %v4753_v23, %v2410_v34 }
 0x2c0   : > { %v5128_v20 = vadd.f32 %v7398_v15, %v10411_v55 }
 0x2c1   : > { %v5127_v4 = vadd.f32 %v7399_v18, %v10411_v55  ;;  %v7307_v22 = vpop.f32.mrb[6].mxu0 }
 0x2c2   : > { %5192 = vst [vmem:[%s10415_s8 + $0x28] sm:$0xff] %v5128_v20  ;;  %v7400_v42 = vadd.f32 %v7307_v22, %v6817_v24  ;;  %v4763_v40 = vpop.f32.mrb[7].mxu0 }
 0x2c3   : > { %5191 = vst [vmem:[%s10415_s8 + $0x20] sm:$0xff] %v5127_v4  ;;  %v7401_v37 = vadd.f32 %v4763_v40, %v2420_v50 }
 0x2c4   : > { %v5130_v45 = vadd.f32 %v7400_v42, %v10411_v55 }
 0x2c5   : > { %v5129_v58 = vadd.f32 %v7401_v37, %v10411_v55  ;;  %v7310_v56 = vpop.f32.mrb[8].mxu0 }
 0x2c6   : > { %5194 = vst [vmem:[%s10415_s8 + $0x38] sm:$0xff] %v5130_v45  ;;  %v7402_v51 = vadd.f32 %v7310_v56, %v6820_v47  ;;  %v4773_v8 = vpop.f32.mrb[9].mxu0 }
 0x2c7   : > { %5193 = vst [vmem:[%s10415_s8 + $0x30] sm:$0xff] %v5129_v58  ;;  %v7403_v16 = vadd.f32 %v4773_v8, %v2430_v2 }
 0x2c8   : > { %v5132_v12 = vadd.f32 %v7402_v51, %v10411_v55 }
 0x2c9   : > { %v5131_v13 = vadd.f32 %v7403_v16, %v10411_v55  ;;  %v7313_v48 = vpop.f32.mrb[10].mxu0 }
 0x2ca   : > { %5196 = vst [vmem:[%s10415_s8 + $0x48] sm:$0xff] %v5132_v12  ;;  %v7404_v57 = vadd.f32 %v7313_v48, %v10361_v32  ;;  %v4783_v61 = vpop.f32.mrb[11].mxu0 }
 0x2cb   : > { %5195 = vst [vmem:[%s10415_s8 + $0x40] sm:$0xff] %v5131_v13  ;;  %v7405_v30 = vadd.f32 %v4783_v61, %v10363_v11 }
 0x2cc   : > { %v5134_v54 = vadd.f32 %v7404_v57, %v10411_v55 }
 0x2cd   : > { %v5133_v33 = vadd.f32 %v7405_v30, %v10411_v55  ;;  %v7316_v34 = vpop.f32.mrb[12].mxu0 }
 0x2ce   : > { %5198 = vst [vmem:[%s10415_s8 + $0x58] sm:$0xff] %v5134_v54  ;;  %v7406_v24 = vadd.f32 %v7316_v34, %v10365_v38  ;;  %v4793_v50 = vpop.f32.mrb[13].mxu0 }
 0x2cf   : > { %5197 = vst [vmem:[%s10415_s8 + $0x50] sm:$0xff] %v5133_v33  ;;  %v7407_v47 = vadd.f32 %v4793_v50, %v10367_v53 }
 0x2d0   : > { %v5136_v2 = vadd.f32 %v7406_v24, %v10411_v55 }
 0x2d1   : > { %v5135_v32 = vadd.f32 %v7407_v47, %v10411_v55  ;;  %v7319_v63 = vpop.f32.mrb[14].mxu0 }
 0x2d2   : > { %5200 = vst [vmem:[%s10415_s8 + $0x68] sm:$0xff] %v5136_v2  ;;  %v7408_v11 = vadd.f32 %v7319_v63, %v10369_v27  ;;  %v4803_v46 = vpop.f32.mrb[15].mxu0 }
 0x2d3   : > { %5199 = vst [vmem:[%s10415_s8 + $0x60] sm:$0xff] %v5135_v32  ;;  %v7409_v10 = vadd.f32 %v4803_v46, %v10371_v0 }
 0x2d4   : > { %v5138_v38 = vadd.f32 %v7408_v11, %v10411_v55 }
 0x2d5   : > { %v5137_v52 = vadd.f32 %v7409_v10, %v10411_v55  ;;  %v7322_v6 = vpop.f32.mrb[16].mxu0 }
 0x2d6   : > { %5202 = vst [vmem:[%s10415_s8 + $0x78] sm:$0xff] %v5138_v38  ;;  %v7410_v53 = vadd.f32 %v7322_v6, %v10373_v39  ;;  %v4813_v49 = vpop.f32.mrb[17].mxu0 }
 0x2d7   : > { %5201 = vst [vmem:[%s10415_s8 + $0x70] sm:$0xff] %v5137_v52  ;;  %v7411_v36 = vadd.f32 %v4813_v49, %v10375_v14 }
 0x2d8   : > { %v5140_v27 = vadd.f32 %v7410_v53, %v10411_v55 }
 0x2d9   : > { %v5139_v35 = vadd.f32 %v7411_v36, %v10411_v55  ;;  %v7325_v9 = vpop.f32.mrb[18].mxu0 }
 0x2da   : > { %5204 = vst [vmem:[%s10415_s8 + $0x88] sm:$0xff] %v5140_v27  ;;  %v7412_v0 = vadd.f32 %v7325_v9, %v10377_v19  ;;  %v4823_v29 = vpop.f32.mrb[19].mxu0 }
 0x2db   : > { %5203 = vst [vmem:[%s10415_s8 + $0x80] sm:$0xff] %v5139_v35  ;;  %v7413_v43 = vadd.f32 %v4823_v29, %v10379_v7 }
 0x2dc   : > { %v5142_v39 = vadd.f32 %v7412_v0, %v10411_v55 }
 0x2dd   : > { %v5141_v62 = vadd.f32 %v7413_v43, %v10411_v55  ;;  %v7328_v5 = vpop.f32.mrb[20].mxu0 }
 0x2de   : > { %5206 = vst [vmem:[%s10415_s8 + $0x98] sm:$0xff] %v5142_v39  ;;  %v7414_v14 = vadd.f32 %v7328_v5, %v10381_v59  ;;  %v4833_v15 = vpop.f32.mrb[21].mxu0 }
 0x2df   : > { %5205 = vst [vmem:[%s10415_s8 + $0x90] sm:$0xff] %v5141_v62  ;;  %v7415_v23 = vadd.f32 %v4833_v15, %v10383_v21 }
 0x2e0   : > { %v5144_v19 = vadd.f32 %v7414_v14, %v10411_v55 }
 0x2e1   : > { %v5143_v18 = vadd.f32 %v7415_v23, %v10411_v55  ;;  %v7331_v20 = vpop.f32.mrb[22].mxu0 }
 0x2e2   : > { %5208 = vst [vmem:[%s10415_s8 + $0xa8] sm:$0xff] %v5144_v19  ;;  %v7416_v7 = vadd.f32 %v7331_v20, %v10385_v31  ;;  %v4843_v4 = vpop.f32.mrb[23].mxu0 }
 0x2e3   : > { %5207 = vst [vmem:[%s10415_s8 + $0xa0] sm:$0xff] %v5143_v18  ;;  %v7417_v22 = vadd.f32 %v4843_v4, %v10387_v26 }
 0x2e4   : > { %v5146_v59 = vadd.f32 %v7416_v7, %v10411_v55 }
 0x2e5   : > { %v5145_v42 = vadd.f32 %v7417_v22, %v10411_v55  ;;  %v7334_v40 = vpop.f32.mrb[24].mxu0 }
 0x2e6   : > { %5210 = vst [vmem:[%s10415_s8 + $0xb8] sm:$0xff] %v5146_v59  ;;  %v7418_v21 = vadd.f32 %v7334_v40, %v10389_v41  ;;  %v4853_v37 = vpop.f32.mrb[25].mxu0 }
 0x2e7   : > { %5209 = vst [vmem:[%s10415_s8 + $0xb0] sm:$0xff] %v5145_v42  ;;  %v7419_v45 = vadd.f32 %v4853_v37, %v10391_v28 }
 0x2e8   : > { %v5148_v31 = vadd.f32 %v7418_v21, %v10411_v55 }
 0x2e9   : > { %v5147_v58 = vadd.f32 %v7419_v45, %v10411_v55  ;;  %v7337_v56 = vpop.f32.mrb[26].mxu0 }
 0x2ea   : > { %5212 = vst [vmem:[%s10415_s8 + $0xc8] sm:$0xff] %v5148_v31  ;;  %v7420_v26 = vadd.f32 %v7337_v56, %v10393_v25  ;;  %v4863_v51 = vpop.f32.mrb[27].mxu0 }
 0x2eb   : > { %5211 = vst [vmem:[%s10415_s8 + $0xc0] sm:$0xff] %v5147_v58  ;;  %v7421_v8 = vadd.f32 %v4863_v51, %v10395_v60 }
 0x2ec   : > { %v5150_v41 = vadd.f32 %v7420_v26, %v10411_v55 }
 0x2ed   : > { %v5149_v16 = vadd.f32 %v7421_v8, %v10411_v55  ;;  %v7340_v12 = vpop.f32.mrb[28].mxu0 }
 0x2ee   : > { %5214 = vst [vmem:[%s10415_s8 + $0xd8] sm:$0xff] %v5150_v41  ;;  %v7422_v28 = vadd.f32 %v7340_v12, %v10397_v17  ;;  %v4873_v13 = vpop.f32.mrb[29].mxu0 }
 0x2ef   : > { %5213 = vst [vmem:[%s10415_s8 + $0xd0] sm:$0xff] %v5149_v16  ;;  %v7423_v48 = vadd.f32 %v4873_v13, %v10399_v1 }
 0x2f0   : > { %v5152_v25 = vadd.f32 %v7422_v28, %v10411_v55 }
 0x2f1   : > { %v5151_v57 = vadd.f32 %v7423_v48, %v10411_v55  ;;  %v7343_v61 = vpop.f32.mrb[30].mxu0 }
 0x2f2   : > { %5216 = vst [vmem:[%s10415_s8 + $0xe8] sm:$0xff] %v5152_v25  ;;  %v7424_v60 = vadd.f32 %v7343_v61, %v10401_v44  ;;  %v4883_v30 = vpop.f32.mrb[31].mxu0 }
 0x2f3   : > { %5215 = vst [vmem:[%s10415_s8 + $0xe0] sm:$0xff] %v5151_v57  ;;  %v7425_v54 = vadd.f32 %v4883_v30, %v10403_v3 }
 0x2f4   : > { %v5154_v17 = vadd.f32 %v7424_v60, %v10411_v55 }
 0x2f5   : > { %v6954_v33 = vpop.f32.mrb[32].mxu1  ;;  %v5153_v34 = vadd.f32 %v7425_v54, %v10411_v55  ;;  %v7346_v1 = vpop.f32.mrb[32].mxu0 }
 0x2f6   : > { %v3021_v24 = vpop.f32.mrb[33].mxu1  ;;  %5218 = vst [vmem:[%s10415_s8 + $0xf8] sm:$0xff] %v5154_v17  ;;  %v7426_v50 = vadd.f32 %v7346_v1, %v6954_v33  ;;  %v4893_v47 = vpop.f32.mrb[33].mxu0 }
 0x2f7   : > { %5217 = vst [vmem:[%s10415_s8 + $0xf0] sm:$0xff] %v5153_v34  ;;  %v7427_v2 = vadd.f32 %v4893_v47, %v3021_v24 }
 0x2f8   : > { %v5156_v44 = vadd.f32 %v7426_v50, %v10411_v55 }
 0x2f9   : > { %v6957_v32 = vpop.f32.mrb[34].mxu1  ;;  %v5155_v3 = vadd.f32 %v7427_v2, %v10411_v55  ;;  %v7349_v63 = vpop.f32.mrb[34].mxu0 }
 0x2fa   : > { %v3031_v11 = vpop.f32.mrb[35].mxu1  ;;  %5220 = vst [vmem:[%s10415_s8 + $0x108] sm:$0xff] %v5156_v44  ;;  %v7428_v46 = vadd.f32 %v7349_v63, %v6957_v32  ;;  %v4903_v10 = vpop.f32.mrb[35].mxu0 }
 0x2fb   : > { %5219 = vst [vmem:[%s10415_s8 + $0x100] sm:$0xff] %v5155_v3  ;;  %v7429_v38 = vadd.f32 %v4903_v10, %v3031_v11 }
 0x2fc   : > { %v5158_v52 = vadd.f32 %v7428_v46, %v10411_v55 }
 0x2fd   : > { %v6960_v6 = vpop.f32.mrb[36].mxu1  ;;  %v5157_v53 = vadd.f32 %v7429_v38, %v10411_v55  ;;  %v7352_v49 = vpop.f32.mrb[36].mxu0 }
 0x2fe   : > { %v3041_v36 = vpop.f32.mrb[37].mxu1  ;;  %5222 = vst [vmem:[%s10415_s8 + $0x118] sm:$0xff] %v5158_v52  ;;  %v7430_v27 = vadd.f32 %v7352_v49, %v6960_v6  ;;  %v4913_v35 = vpop.f32.mrb[37].mxu0 }
 0x2ff   : > { %5221 = vst [vmem:[%s10415_s8 + $0x110] sm:$0xff] %v5157_v53  ;;  %v7431_v9 = vadd.f32 %v4913_v35, %v3041_v36 }
 0x300   : > { %v5160_v0 = vadd.f32 %v7430_v27, %v10411_v55 }
 0x301   : > { %v6963_v29 = vpop.f32.mrb[38].mxu1  ;;  %v5159_v43 = vadd.f32 %v7431_v9, %v10411_v55  ;;  %v7355_v39 = vpop.f32.mrb[38].mxu0 }
 0x302   : > { %v3051_v62 = vpop.f32.mrb[39].mxu1  ;;  %5224 = vst [vmem:[%s10415_s8 + $0x128] sm:$0xff] %v5160_v0  ;;  %v7432_v5 = vadd.f32 %v7355_v39, %v6963_v29  ;;  %v4923_v14 = vpop.f32.mrb[39].mxu0 }
 0x303   : > { %5223 = vst [vmem:[%s10415_s8 + $0x120] sm:$0xff] %v5159_v43  ;;  %v7433_v15 = vadd.f32 %v4923_v14, %v3051_v62 }
 0x304   : > { %v5162_v23 = vadd.f32 %v7432_v5, %v10411_v55 }
 0x305   : > { %v6966_v19 = vpop.f32.mrb[40].mxu1  ;;  %v5161_v18 = vadd.f32 %v7433_v15, %v10411_v55  ;;  %v7358_v20 = vpop.f32.mrb[40].mxu0 }
 0x306   : > { %v3061_v7 = vpop.f32.mrb[41].mxu1  ;;  %5226 = vst [vmem:[%s10415_s8 + $0x138] sm:$0xff] %v5162_v23  ;;  %v7434_v4 = vadd.f32 %v7358_v20, %v6966_v19  ;;  %v4933_v22 = vpop.f32.mrb[41].mxu0 }
 0x307   : > { %5225 = vst [vmem:[%s10415_s8 + $0x130] sm:$0xff] %v5161_v18  ;;  %v7435_v59 = vadd.f32 %v4933_v22, %v3061_v7 }
 0x308   : > { %v5164_v42 = vadd.f32 %v7434_v4, %v10411_v55 }
 0x309   : > { %v6969_v40 = vpop.f32.mrb[42].mxu1  ;;  %v5163_v21 = vadd.f32 %v7435_v59, %v10411_v55  ;;  %v7361_v37 = vpop.f32.mrb[42].mxu0 }
 0x30a   : > { %v3071_v45 = vpop.f32.mrb[43].mxu1  ;;  %5228 = vst [vmem:[%s10415_s8 + $0x148] sm:$0xff] %v5164_v42  ;;  %v7436_v31 = vadd.f32 %v7361_v37, %v6969_v40  ;;  %v4943_v58 = vpop.f32.mrb[43].mxu0 }
 0x30b   : > { %5227 = vst [vmem:[%s10415_s8 + $0x140] sm:$0xff] %v5163_v21  ;;  %v7437_v56 = vadd.f32 %v4943_v58, %v3071_v45 }
 0x30c   : > { %v5166_v26 = vadd.f32 %v7436_v31, %v10411_v55 }
 0x30d   : > { %v6972_v51 = vpop.f32.mrb[44].mxu1  ;;  %v5165_v8 = vadd.f32 %v7437_v56, %v10411_v55  ;;  %v7364_v41 = vpop.f32.mrb[44].mxu0 }
 0x30e   : > { %v3081_v16 = vpop.f32.mrb[45].mxu1  ;;  %5230 = vst [vmem:[%s10415_s8 + $0x158] sm:$0xff] %v5166_v26  ;;  %v7438_v12 = vadd.f32 %v7364_v41, %v6972_v51  ;;  %v4953_v28 = vpop.f32.mrb[45].mxu0 }
 0x30f   : > { %5229 = vst [vmem:[%s10415_s8 + $0x150] sm:$0xff] %v5165_v8  ;;  %v7439_v13 = vadd.f32 %v4953_v28, %v3081_v16 }
 0x310   : > { %v5168_v48 = vadd.f32 %v7438_v12, %v10411_v55 }
 0x311   : > { %v6975_v25 = vpop.f32.mrb[46].mxu1  ;;  %v5167_v57 = vadd.f32 %v7439_v13, %v10411_v55  ;;  %v7367_v61 = vpop.f32.mrb[46].mxu0 }
 0x312   : > { %v3091_v60 = vpop.f32.mrb[47].mxu1  ;;  %5232 = vst [vmem:[%s10415_s8 + $0x168] sm:$0xff] %v5168_v48  ;;  %v7440_v30 = vadd.f32 %v7367_v61, %v6975_v25  ;;  %v4963_v54 = vpop.f32.mrb[47].mxu0 }
 0x313   : > { %5231 = vst [vmem:[%s10415_s8 + $0x160] sm:$0xff] %v5167_v57  ;;  %v7441_v17 = vadd.f32 %v4963_v54, %v3091_v60 }
 0x314   : > { %v5170_v33 = vadd.f32 %v7440_v30, %v10411_v55 }
 0x315   : > { %v6978_v34 = vpop.f32.mrb[48].mxu1  ;;  %v5169_v1 = vadd.f32 %v7441_v17, %v10411_v55  ;;  %v7370_v24 = vpop.f32.mrb[48].mxu0 }
 0x316   : > { %v3101_v50 = vpop.f32.mrb[49].mxu1  ;;  %5234 = vst [vmem:[%s10415_s8 + $0x178] sm:$0xff] %v5170_v33  ;;  %v7442_v47 = vadd.f32 %v7370_v24, %v6978_v34  ;;  %v4973_v2 = vpop.f32.mrb[49].mxu0 }
 0x317   : > { %5233 = vst [vmem:[%s10415_s8 + $0x170] sm:$0xff] %v5169_v1  ;;  %v7443_v44 = vadd.f32 %v4973_v2, %v3101_v50 }
 0x318   : > { %v5172_v32 = vadd.f32 %v7442_v47, %v10411_v55 }
 0x319   : > { %v6981_v3 = vpop.f32.mrb[50].mxu1  ;;  %v5171_v63 = vadd.f32 %v7443_v44, %v10411_v55  ;;  %v7373_v11 = vpop.f32.mrb[50].mxu0 }
 0x31a   : > { %v3111_v46 = vpop.f32.mrb[51].mxu1  ;;  %5236 = vst [vmem:[%s10415_s8 + $0x188] sm:$0xff] %v5172_v32  ;;  %v7444_v10 = vadd.f32 %v7373_v11, %v6981_v3  ;;  %v4983_v38 = vpop.f32.mrb[51].mxu0 }
 0x31b   : > { %5235 = vst [vmem:[%s10415_s8 + $0x180] sm:$0xff] %v5171_v63  ;;  %v7445_v52 = vadd.f32 %v4983_v38, %v3111_v46 }
 0x31c   : > { %v5174_v6 = vadd.f32 %v7444_v10, %v10411_v55 }
 0x31d   : > { %v6984_v53 = vpop.f32.mrb[52].mxu1  ;;  %v5173_v49 = vadd.f32 %v7445_v52, %v10411_v55  ;;  %v7376_v36 = vpop.f32.mrb[52].mxu0 }
 0x31e   : > { %v3121_v27 = vpop.f32.mrb[53].mxu1  ;;  %5238 = vst [vmem:[%s10415_s8 + $0x198] sm:$0xff] %v5174_v6  ;;  %v7446_v35 = vadd.f32 %v7376_v36, %v6984_v53  ;;  %v4993_v9 = vpop.f32.mrb[53].mxu0 }
 0x31f   : > { %5237 = vst [vmem:[%s10415_s8 + $0x190] sm:$0xff] %v5173_v49  ;;  %v7447_v0 = vadd.f32 %v4993_v9, %v3121_v27 }
 0x320   : > { %v5176_v29 = vadd.f32 %v7446_v35, %v10411_v55 }
 0x321   : > { %v6987_v43 = vpop.f32.mrb[54].mxu1  ;;  %v5175_v39 = vadd.f32 %v7447_v0, %v10411_v55  ;;  %v7379_v62 = vpop.f32.mrb[54].mxu0 }
 0x322   : > { %v3131_v5 = vpop.f32.mrb[55].mxu1  ;;  %5240 = vst [vmem:[%s10415_s8 + $0x1a8] sm:$0xff] %v5176_v29  ;;  %v7448_v14 = vadd.f32 %v7379_v62, %v6987_v43  ;;  %v5003_v15 = vpop.f32.mrb[55].mxu0 }
 0x323   : > { %5239 = vst [vmem:[%s10415_s8 + $0x1a0] sm:$0xff] %v5175_v39  ;;  %v7449_v23 = vadd.f32 %v5003_v15, %v3131_v5 }
 0x324   : > { %v5178_v19 = vadd.f32 %v7448_v14, %v10411_v55 }
 0x325   : > { %v6990_v18 = vpop.f32.mrb[56].mxu1  ;;  %v5177_v20 = vadd.f32 %v7449_v23, %v10411_v55  ;;  %v7382_v7 = vpop.f32.mrb[56].mxu0 }
 0x326   : > { %v3141_v4 = vpop.f32.mrb[57].mxu1  ;;  %5242 = vst [vmem:[%s10415_s8 + $0x1b8] sm:$0xff] %v5178_v19  ;;  %v7450_v22 = vadd.f32 %v7382_v7, %v6990_v18  ;;  %v5013_v59 = vpop.f32.mrb[57].mxu0 }
 0x327   : > { %5241 = vst [vmem:[%s10415_s8 + $0x1b0] sm:$0xff] %v5177_v20  ;;  %v7451_v42 = vadd.f32 %v5013_v59, %v3141_v4 }
 0x328   : > { %v5180_v40 = vadd.f32 %v7450_v22, %v10411_v55 }
 0x329   : > { %v6993_v21 = vpop.f32.mrb[58].mxu1  ;;  %v5179_v37 = vadd.f32 %v7451_v42, %v10411_v55  ;;  %v7385_v45 = vpop.f32.mrb[58].mxu0 }
 0x32a   : > { %v3151_v31 = vpop.f32.mrb[59].mxu1  ;;  %5244 = vst [vmem:[%s10415_s8 + $0x1c8] sm:$0xff] %v5180_v40  ;;  %v7452_v58 = vadd.f32 %v7385_v45, %v6993_v21  ;;  %v5023_v56 = vpop.f32.mrb[59].mxu0 }
 0x32b   : > { %5243 = vst [vmem:[%s10415_s8 + $0x1c0] sm:$0xff] %v5179_v37  ;;  %v7453_v26 = vadd.f32 %v5023_v56, %v3151_v31 }
 0x32c   : > { %v5182_v51 = vadd.f32 %v7452_v58, %v10411_v55 }
 0x32d   : > { %v6996_v8 = vpop.f32.mrb[60].mxu1  ;;  %v5181_v41 = vadd.f32 %v7453_v26, %v10411_v55  ;;  %v7388_v16 = vpop.f32.mrb[60].mxu0 }
 0x32e   : > { %v3161_v12 = vpop.f32.mrb[61].mxu1  ;;  %5246 = vst [vmem:[%s10415_s8 + $0x1d8] sm:$0xff] %v5182_v51  ;;  %v7454_v28 = vadd.f32 %v7388_v16, %v6996_v8  ;;  %v5033_v13 = vpop.f32.mrb[61].mxu0 }
 0x32f   : > { %5245 = vst [vmem:[%s10415_s8 + $0x1d0] sm:$0xff] %v5181_v41  ;;  %v7455_v48 = vadd.f32 %v5033_v13, %v3161_v12 }
 0x330   : > { %v5184_v25 = vadd.f32 %v7454_v28, %v10411_v55 }
 0x331   : > { %v6999_v57 = vpop.f32.mrb[62].mxu1  ;;  %v5183_v61 = vadd.f32 %v7455_v48, %v10411_v55  ;;  %v7391_v60 = vpop.f32.mrb[62].mxu0 }
 0x332   : > { %v3171_v30 = vpop.f32.mrb[63].mxu1  ;;  %5248 = vst [vmem:[%s10415_s8 + $0x1e8] sm:$0xff] %v5184_v25  ;;  %v7456_v54 = vadd.f32 %v7391_v60, %v6999_v57  ;;  %v5043_v17 = vpop.f32.mrb[63].mxu0 }
 0x333   : > { %5247 = vst [vmem:[%s10415_s8 + $0x1e0] sm:$0xff] %v5183_v61  ;;  %v7457_v33 = vadd.f32 %v5043_v17, %v3171_v30 }
 0x334   : > { %v5186_v34 = vadd.f32 %v7456_v54, %v10411_v55 }
 0x335   : > { %v5185_v1 = vadd.f32 %v7457_v33, %v10411_v55 }
 0x336   : > { %5250 = vst [vmem:[%s10415_s8 + $0x1f8] sm:$0xff] %v5186_v34 }
 0x337   : > { %5249 = vst [vmem:[%s10415_s8 + $0x1f0] sm:$0xff] %v5185_v1 }
 0x338   : > { %8030 = shalt.err (!%p8027_p3)
}
 0x339   : > { %s8031_s27 = scalar_lea.hbm %s10567_s19, 8192  ;;  %s8035_s30 = scalar_lea.hbm %s10620_s3, 16384 }
 0x33a   : > { %p8032_p4 = scmp.ne.s32.totalorder %s10567_s19, %s8031_s27  ;;  %p8036_p9 = scmp.lt.u32.totalorder %s10567_s19, %s10620_s3 }
 0x33b   : > { %p8037_p10 = scmp.lt.u32.totalorder %s8035_s30, %s8031_s27  ;;  %p8039_p12 = scmp.lt.u32.totalorder %s8031_s27, %s10567_s19 }
 0x33c   : > { %p8033_p7 = pnand %p8032_p4, %p8142_p5 }
 0x33d   : > { %p8038_p11 = por %p8037_p10, %p8036_p9 }
 0x33e   : > { %p8034_p8 = pneg %p8033_p7 }
 0x33f   : > { %p8040_p13 = por %p8039_p12, %p8038_p11 }
 0x341   : > { %p8041_p0 = pnand %p8040_p13, %p8034_p8 }
 0x343   : > { %8044 = shalt.err (!%p8041_p0)
}
 0x344   : > { %s8082_s6 = smov 128   ;;  %s8083_s7 = smov 8  }
 0x345   : > { %7907 = dma.vmem_to_hbm [thread:$0]  (%p8142_p5), %s10569_s10, 8192, %s10567_s19, %s10576_s16, %s8082_s6, %s8082_s6, %s8083_s7  }
 0x346 PF: > { %p7913_p1 = scmp.ge.s32.totalorder %s8079_s15, 2  ;;  %s5280_s8 = sand.u32 1, %s8067_s12  }
 0x347   : > { %s5281_s9 = scalar_lea.sflag [#allocation3], %s5280_s8 }
 0x348   : > { %p7910_p2 = pnand %p7913_p1, %p8146_p6 }
 0x34a   : > { %8062 = dma.done.wait (!%p7910_p2), %s5281_s9, 8192  }
 0x34b   : > { %8064 = vsyncadd (!%p7910_p2), %s5281_s9, 4294959104  ;;  %p13_p3 = scmp.ge.s32.totalorder %s8129_s18, 4   ;;  %s11252_s12 = smov %s8071_s13 }
 0x34c   : > { %s11253_s13 = smov %s8075_s14  ;;  %s11254_s14 = smov %s8140_s21 }
 0x34d   : > { %s11255_s15 = smov %s8129_s18  ;;  %15 = sbr.rel (!%p13_p3) target bundleno = 3 (0x3), region = 75 }
 0x354   :  { %5286 = vsyncpa [#allocation3], 1 }
 0x355   :  { %5288 = vsyncpa [#allocation3 + $0x1], 1 }

</bundles_post_ra>
